<compile_context>
chip_gen: v7x
topology: tpu7x:2x2x1
jax: 0.10.0
libtpu: 0.0.40
codegen_flags: <defaults>
</compile_context>

<pallas_src>
import jax
import jax.numpy as jnp
from jax.experimental import pallas as pl
from jax.experimental.pallas import tpu as pltpu

BF16 = jnp.bfloat16
F32 = jnp.float32

_ATTN_KEYS = ("wkx", "bkx", "wqs", "bqs", "mask", "wproj", "bproj")
_FFN_KEYS = ("w1", "b1", "w2", "b2")


# ----------------------------- in-kernel building blocks --------------------

def _attention_body(keys_bf, qrys_bf, w):
    """Attention(score_function='mlp'), all heads fused, one batch element.

    keys_bf: (Lk, D) bf16 (keys double as values), qrys_bf: (Lq, D) bf16.
    Returns (Lq, out_dim) float32.
    """
    H = w["wqs"].shape[1]
    Hhd = w["wkx"].shape[1] - H

    # Key projection + folded per-head key-score in ONE wide MXU matmul.
    kall = jnp.dot(keys_bf, w["wkx"][...],
                   preferred_element_type=jnp.float32) + w["bkx"][...]   # (Lk, Hhd+H)
    kx = kall[:, :Hhd]                                                   # (Lk, Hhd)
    sk = kall[:, Hhd:]                                                   # (Lk, H)

    # Query side only needs its folded score column (qx itself is unused).
    sq = jnp.dot(qrys_bf, w["wqs"][...],
                 preferred_element_type=jnp.float32) + w["bqs"][...]     # (Lq, H)

    # 'mlp' score: logits[h, i, j] = tanh(qx[h,i].w_q + kx[h,j].w_k)
    logits = jnp.tanh(sq.T[:, :, None] + sk.T[:, None, :])               # (H, Lq, Lk)

    # Softmax over keys (f32, EUP approx reciprocal for the denominator).
    m = jnp.max(logits, axis=-1, keepdims=True)
    e = jnp.exp(logits - m)
    p = (e * pl.reciprocal(jnp.sum(e, axis=-1, keepdims=True),
                           approx=True)).astype(BF16)                    # (H, Lq, Lk)

    # Value mix: head h must only mix its own hd-wide slice of kx.  The
    # host-precomputed block mask keeps kx in its natural (Lk, H*hd) lane
    # layout (no in-kernel reshape/transpose); the head-sum collapses the
    # disjoint per-head lane blocks back into a flat (Lq, H*hd) activation.
    kx_bd = kx.astype(BF16)[None, :, :] * w["mask"][...]                 # (H, Lk, Hhd)
    ov = jnp.einsum("hqk,hkc->hqc", p, kx_bd,
                    preferred_element_type=jnp.float32)                  # (H, Lq, Hhd)
    ov_flat = jnp.sum(ov, axis=0)                                        # (Lq, Hhd)

    # Single full-width output projection with the original (H*hd, out) weight.
    return jnp.dot(ov_flat.astype(BF16), w["wproj"][...],
                   preferred_element_type=jnp.float32) + w["bproj"][...]


def _ffn_body(x, w):
    """PositionwiseFeedForward (1x1 convs == per-position linears), fused."""
    h1 = jnp.dot(x.astype(BF16), w["w1"][...],
                 preferred_element_type=jnp.float32) + w["b1"][...]
    h1 = jnp.maximum(h1, 0.0)
    return jnp.dot(h1.astype(BF16), w["w2"][...],
                   preferred_element_type=jnp.float32) + w["b2"][...]


# ----------------------------- fused network kernel --------------------------

def fused_network(kp, context, target, knowledge):
    """Five attentions + three FFNs + pooling sums in ONE Pallas kernel.

    context/target/knowledge: (B, L, D) bf16.
    Returns (B, 4, hidden) f32 with rows = [sum(hc), sum(s1), sum(ht), sum(s2)]
    over the query axis; division by the true lengths happens in the wrapper.
    """
    B, Lc, D = context.shape
    Lt = target.shape[1]
    Lkn = knowledge.shape[1]
    hidden = kp["attn_k"]["wproj"].shape[1]

    groups = [("attn_k", _ATTN_KEYS), ("ffn_c", _FFN_KEYS),
              ("attn_q", _ATTN_KEYS), ("ffn_t", _FFN_KEYS),
              ("attn_q2", _ATTN_KEYS), ("ffn_k", _FFN_KEYS),
              ("attn_s1", _ATTN_KEYS), ("attn_s2", _ATTN_KEYS)]
    weights = [kp[g][k] for g, ks in groups for k in ks]

    def kernel(*refs):
        ctx_ref, tgt_ref, kn_ref = refs[:3]
        o_ref = refs[-1]
        it = iter(refs[3:-1])
        take = lambda ks: {k: next(it) for k in ks}
        a_k = take(_ATTN_KEYS); f_c = take(_FFN_KEYS)
        a_q = take(_ATTN_KEYS); f_t = take(_FFN_KEYS)
        a_q2 = take(_ATTN_KEYS); f_k = take(_FFN_KEYS)
        a_s1 = take(_ATTN_KEYS); a_s2 = take(_ATTN_KEYS)

        c = ctx_ref[...]       # (Lc, D) bf16 -- DMA'd once, shared by 3 attentions
        t = tgt_ref[...]       # (Lt, D) bf16
        kn = kn_ref[...]       # (Lkn, D) bf16

        hc = _ffn_body(_attention_body(c, c, a_k), f_c)        # (Lc, hidden) f32
        ht = _ffn_body(_attention_body(c, t, a_q), f_t)        # (Lt, hidden) f32
        hk = _ffn_body(_attention_body(c, kn, a_q2), f_k)      # (Lkn, hidden) f32

        hc_bf = hc.astype(BF16)                                # stays in VMEM
        s1 = _attention_body(hc_bf, ht.astype(BF16), a_s1)     # (Lt, hidden) f32
        s2 = _attention_body(hc_bf, hk.astype(BF16), a_s2)     # (Lkn, hidden) f32

        # Query-axis sums (means are finished in the wrapper); rows are
        # ordered [hc, s1, ht, s2] to match the reference concat order.
        o_ref[0:1, :] = jnp.sum(hc, axis=0, keepdims=True)
        o_ref[1:2, :] = jnp.sum(s1, axis=0, keepdims=True)
        o_ref[2:3, :] = jnp.sum(ht, axis=0, keepdims=True)
        o_ref[3:4, :] = jnp.sum(s2, axis=0, keepdims=True)

    def act_spec(L):
        return pl.BlockSpec((None, L, D), lambda b: (b, 0, 0))

    def w_spec(w):
        idx = (0,) * w.ndim
        return pl.BlockSpec(w.shape, lambda b, _idx=idx: _idx)

    return pl.pallas_call(
        kernel,
        out_shape=jax.ShapeDtypeStruct((B, 4, hidden), F32),
        grid=(B,),
        in_specs=[act_spec(Lc), act_spec(Lt), act_spec(Lkn)]
                 + [w_spec(w) for w in weights],
        out_specs=pl.BlockSpec((None, 4, hidden), lambda b: (b, 0, 0)),
        compiler_params=pltpu.CompilerParams(
            dimension_semantics=("parallel",),
            vmem_limit_bytes=64 * 1024 * 1024),
    )(context, target, knowledge, *weights)


# ----------------------------- params & host-side weight prep ----------------

def init_params(key, vocab_size, bert_dim, hidden_dim, polarities_dim, n_head=8):
    keys = iter(jax.random.split(key, 64))
    s = 0.1

    def lin(din, dout):
        w = jax.random.normal(next(keys), (din, dout), F32) * s
        b = jax.random.normal(next(keys), (1, dout), F32) * s
        return w, b

    def attn(embed_dim, out_dim):
        hd = embed_dim // n_head
        wk, bk = lin(embed_dim, n_head * hd)
        wq, bq = lin(embed_dim, n_head * hd)
        wproj, bproj = lin(n_head * hd, out_dim)
        w_mlp = jax.random.normal(next(keys), (1, 2 * hd), F32) * s
        return dict(wk=wk, bk=bk, wq=wq, bq=bq,
                    wproj=wproj, bproj=bproj, w_mlp=w_mlp)

    def ffn(d):
        w1, b1 = lin(d, d)
        w2, b2 = lin(d, d)
        return dict(w1=w1, b1=b1, w2=w2, b2=b2)

    params = dict(
        # TODO(synk): the external pretrained BERT encoder has no clean Pallas
        # equivalent here; replaced by a deterministic embedding lookup.
        emb=jax.random.normal(next(keys), (vocab_size, bert_dim), F32) * s,
        attn_k=attn(bert_dim, hidden_dim),
        attn_q=attn(bert_dim, hidden_dim),
        attn_q2=attn(bert_dim, hidden_dim),
        ffn_c=ffn(hidden_dim), ffn_t=ffn(hidden_dim), ffn_k=ffn(hidden_dim),
        attn_s1=attn(hidden_dim, hidden_dim),
        attn_s2=attn(hidden_dim, hidden_dim),
    )
    params["dense_w"], params["dense_b"] = lin(hidden_dim * 4, polarities_dim)
    return params


def _prep_attention(p, n_head):
    """Fold the 'mlp' score vector into the projections; pack for the kernel."""
    wk, bk, wq, bq = p["wk"], p["bk"], p["wq"], p["bq"]
    D, Hhd = wk.shape
    H = n_head
    hd = Hhd // H
    wm = p["w_mlp"].reshape(-1)
    wmk, wmq = wm[:hd], wm[hd:]

    # score_k[j, h] = kx[j, h-block] . wmk  ->  extra output column per head of
    # the key projection; likewise the query side reduces to a (D, H) matmul.
    wk_s = jnp.einsum("dhf,f->dh", wk.reshape(D, H, hd), wmk)          # (D, H)
    bk_s = jnp.einsum("hf,f->h", bk.reshape(H, hd), wmk)[None, :]      # (1, H)
    wq_s = jnp.einsum("dhf,f->dh", wq.reshape(D, H, hd), wmq)          # (D, H)
    bq_s = jnp.einsum("hf,f->h", bq.reshape(H, hd), wmq)[None, :]      # (1, H)

    # Per-head block mask for the value mix (head h keeps lanes [h*hd, (h+1)*hd)).
    mask = (jnp.arange(Hhd)[None, :] // hd == jnp.arange(H)[:, None]).astype(BF16)

    return dict(
        wkx=jnp.concatenate([wk, wk_s], axis=1).astype(BF16),   # (D, Hhd+H) bf16
        bkx=jnp.concatenate([bk, bk_s], axis=1),                # (1, Hhd+H) f32
        wqs=wq_s.astype(BF16),                                  # (D, H) bf16
        bqs=bq_s,                                               # (1, H) f32
        mask=mask[:, None, :],                                  # (H, 1, Hhd) bf16
        wproj=p["wproj"].astype(BF16),                          # (Hhd, out) bf16
        bproj=p["bproj"],                                       # (1, out) f32
    )


def _prep_ffn(p):
    return dict(w1=p["w1"].astype(BF16), b1=p["b1"],
                w2=p["w2"].astype(BF16), b2=p["b2"])


def prepare_kernel_params(params, n_head=8):
    """One-time, eager (outside jit) repack of torch-layout params."""
    return dict(
        emb=params["emb"].astype(BF16),
        attn_k=_prep_attention(params["attn_k"], n_head),
        attn_q=_prep_attention(params["attn_q"], n_head),
        attn_q2=_prep_attention(params["attn_q2"], n_head),
        ffn_c=_prep_ffn(params["ffn_c"]),
        ffn_t=_prep_ffn(params["ffn_t"]),
        ffn_k=_prep_ffn(params["ffn_k"]),
        attn_s1=_prep_attention(params["attn_s1"], n_head),
        attn_s2=_prep_attention(params["attn_s2"], n_head),
        dense_w=params["dense_w"], dense_b=params["dense_b"],
    )


# ----------------------------- forward ---------------------------------------

def squeeze_embedding(ids):
    """SqueezeEmbedding: truncate padded ids to the batch max length.

    Host-side preprocessing (outside jit), so the jitted forward never syncs.
    """
    lengths = jnp.sum(ids != 0, axis=-1)
    max_len = int(jnp.max(lengths))
    return ids[:, :max_len], lengths


@jax.jit
def nkeaen_bert_apply(kp, ctx_ids, tgt_ids, kn_ids, ctx_len, tgt_len):
    # "BERT" hidden states (deterministic embedding-lookup stand-in); dropout
    # is identity in eval mode.  Activations are bf16 in HBM to halve DMA.
    context = kp["emb"][ctx_ids]        # (B, Lc, D) bf16
    target = kp["emb"][tgt_ids]         # (B, Lt, D) bf16
    knowledge = kp["emb"][kn_ids]       # (B, Lkn, D) bf16

    pooled = fused_network(kp, context, target, knowledge)   # (B, 4, hidden) sums
    B, _, hidden = pooled.shape

    # Rows are [sum(hc), sum(s1), sum(ht), sum(s2)].  Matching the reference,
    # the s1/s2 means divide by the *context* length.
    ctx_f = ctx_len.astype(F32)
    tgt_f = tgt_len.astype(F32)
    denom = jnp.stack([ctx_f, ctx_f, tgt_f, ctx_f], axis=1)[:, :, None]   # (B,4,1)
    x = (pooled / denom).reshape(B, 4 * hidden)

    # Tiny final dense in plain JAX (one MXU tile; a kernel launch costs more).
    return jnp.dot(x, kp["dense_w"]) + kp["dense_b"]


# ----------------------------- demo -------------------------------------------

if __name__ == "__main__":
    B, Lc, Lt, Lkn = 2, 16, 8, 8
    vocab, bert_dim, hidden_dim, polarities = 32, 64, 32, 3

    key = jax.random.PRNGKey(0)
    pkey, ck, tk, kk = jax.random.split(key, 4)
    params = init_params(pkey, vocab, bert_dim, hidden_dim, polarities)
    kparams = prepare_kernel_params(params, n_head=8)   # once, outside jit

    def make_ids(k, L, lens):
        ids = jax.random.randint(k, (B, L), 1, vocab, dtype=jnp.int32)
        pos = jnp.arange(L)[None, :]
        return jnp.where(pos < jnp.asarray(lens)[:, None], ids, 0)

    context = make_ids(ck, Lc, [16, 12])
    target = make_ids(tk, Lt, [8, 5])
    knowledge = make_ids(kk, Lkn, [8, 6])

    # SqueezeEmbedding: host-side truncation before the jitted forward.
    ctx_ids, ctx_len = squeeze_embedding(context)
    tgt_ids, tgt_len = squeeze_embedding(target)
    kn_ids, _kn_len = squeeze_embedding(knowledge)

    out = nkeaen_bert_apply(kparams, ctx_ids, tgt_ids, kn_ids, ctx_len, tgt_len)
    out = jax.block_until_ready(out)
    assert out.shape == (B, polarities)
    assert bool(jnp.all(jnp.isfinite(out)))
    print("KERNEL_OK")
</pallas_src>

<mosaic_0001>
module attributes {stable_mosaic.version = 11 : i64} {
  func.func @kernel(%arg0: i32, %arg1: memref<1x16x64xbf16, #tpu.memory_space<vmem>>, %arg2: memref<1x8x64xbf16, #tpu.memory_space<vmem>>, %arg3: memref<1x8x64xbf16, #tpu.memory_space<vmem>>, %arg4: memref<64x72xbf16, #tpu.memory_space<vmem>>, %arg5: memref<1x72xf32, #tpu.memory_space<vmem>>, %arg6: memref<64x8xbf16, #tpu.memory_space<vmem>>, %arg7: memref<1x8xf32, #tpu.memory_space<vmem>>, %arg8: memref<8x1x64xbf16, #tpu.memory_space<vmem>>, %arg9: memref<64x32xbf16, #tpu.memory_space<vmem>>, %arg10: memref<1x32xf32, #tpu.memory_space<vmem>>, %arg11: memref<32x32xbf16, #tpu.memory_space<vmem>>, %arg12: memref<1x32xf32, #tpu.memory_space<vmem>>, %arg13: memref<32x32xbf16, #tpu.memory_space<vmem>>, %arg14: memref<1x32xf32, #tpu.memory_space<vmem>>, %arg15: memref<64x72xbf16, #tpu.memory_space<vmem>>, %arg16: memref<1x72xf32, #tpu.memory_space<vmem>>, %arg17: memref<64x8xbf16, #tpu.memory_space<vmem>>, %arg18: memref<1x8xf32, #tpu.memory_space<vmem>>, %arg19: memref<8x1x64xbf16, #tpu.memory_space<vmem>>, %arg20: memref<64x32xbf16, #tpu.memory_space<vmem>>, %arg21: memref<1x32xf32, #tpu.memory_space<vmem>>, %arg22: memref<32x32xbf16, #tpu.memory_space<vmem>>, %arg23: memref<1x32xf32, #tpu.memory_space<vmem>>, %arg24: memref<32x32xbf16, #tpu.memory_space<vmem>>, %arg25: memref<1x32xf32, #tpu.memory_space<vmem>>, %arg26: memref<64x72xbf16, #tpu.memory_space<vmem>>, %arg27: memref<1x72xf32, #tpu.memory_space<vmem>>, %arg28: memref<64x8xbf16, #tpu.memory_space<vmem>>, %arg29: memref<1x8xf32, #tpu.memory_space<vmem>>, %arg30: memref<8x1x64xbf16, #tpu.memory_space<vmem>>, %arg31: memref<64x32xbf16, #tpu.memory_space<vmem>>, %arg32: memref<1x32xf32, #tpu.memory_space<vmem>>, %arg33: memref<32x32xbf16, #tpu.memory_space<vmem>>, %arg34: memref<1x32xf32, #tpu.memory_space<vmem>>, %arg35: memref<32x32xbf16, #tpu.memory_space<vmem>>, %arg36: memref<1x32xf32, #tpu.memory_space<vmem>>, %arg37: memref<32x40xbf16, #tpu.memory_space<vmem>>, %arg38: memref<1x40xf32, #tpu.memory_space<vmem>>, %arg39: memref<32x8xbf16, #tpu.memory_space<vmem>>, %arg40: memref<1x8xf32, #tpu.memory_space<vmem>>, %arg41: memref<8x1x32xbf16, #tpu.memory_space<vmem>>, %arg42: memref<32x32xbf16, #tpu.memory_space<vmem>>, %arg43: memref<1x32xf32, #tpu.memory_space<vmem>>, %arg44: memref<32x40xbf16, #tpu.memory_space<vmem>>, %arg45: memref<1x40xf32, #tpu.memory_space<vmem>>, %arg46: memref<32x8xbf16, #tpu.memory_space<vmem>>, %arg47: memref<1x8xf32, #tpu.memory_space<vmem>>, %arg48: memref<8x1x32xbf16, #tpu.memory_space<vmem>>, %arg49: memref<32x32xbf16, #tpu.memory_space<vmem>>, %arg50: memref<1x32xf32, #tpu.memory_space<vmem>>, %arg51: memref<1x4x32xf32, #tpu.memory_space<vmem>>) attributes {dimension_semantics = [#tpu.dimension_semantics<parallel>], iteration_bounds = array<i64: 2>, scalar_prefetch = 0 : i64, scratch_operands = 0 : i64, tpu.core_type = #tpu.core_type<tc>, window_params = [{transform_indices = @transform_0, window_bounds = array<i64: 1, 16, 64>}, {transform_indices = @transform_1, window_bounds = array<i64: 1, 8, 64>}, {transform_indices = @transform_2, window_bounds = array<i64: 1, 8, 64>}, {pipeline_mode = #tpu.pipeline_mode<synchronous>, transform_indices = @transform_3, window_bounds = array<i64: 64, 72>}, {pipeline_mode = #tpu.pipeline_mode<synchronous>, transform_indices = @transform_4, window_bounds = array<i64: 1, 72>}, {pipeline_mode = #tpu.pipeline_mode<synchronous>, transform_indices = @transform_5, window_bounds = array<i64: 64, 8>}, {pipeline_mode = #tpu.pipeline_mode<synchronous>, transform_indices = @transform_6, window_bounds = array<i64: 1, 8>}, {pipeline_mode = #tpu.pipeline_mode<synchronous>, transform_indices = @transform_7, window_bounds = array<i64: 8, 1, 64>}, {pipeline_mode = #tpu.pipeline_mode<synchronous>, transform_indices = @transform_8, window_bounds = array<i64: 64, 32>}, {pipeline_mode = #tpu.pipeline_mode<synchronous>, transform_indices = @transform_9, window_bounds = array<i64: 1, 32>}, {pipeline_mode = #tpu.pipeline_mode<synchronous>, transform_indices = @transform_10, window_bounds = array<i64: 32, 32>}, {pipeline_mode = #tpu.pipeline_mode<synchronous>, transform_indices = @transform_11, window_bounds = array<i64: 1, 32>}, {pipeline_mode = #tpu.pipeline_mode<synchronous>, transform_indices = @transform_12, window_bounds = array<i64: 32, 32>}, {pipeline_mode = #tpu.pipeline_mode<synchronous>, transform_indices = @transform_13, window_bounds = array<i64: 1, 32>}, {pipeline_mode = #tpu.pipeline_mode<synchronous>, transform_indices = @transform_14, window_bounds = array<i64: 64, 72>}, {pipeline_mode = #tpu.pipeline_mode<synchronous>, transform_indices = @transform_15, window_bounds = array<i64: 1, 72>}, {pipeline_mode = #tpu.pipeline_mode<synchronous>, transform_indices = @transform_16, window_bounds = array<i64: 64, 8>}, {pipeline_mode = #tpu.pipeline_mode<synchronous>, transform_indices = @transform_17, window_bounds = array<i64: 1, 8>}, {pipeline_mode = #tpu.pipeline_mode<synchronous>, transform_indices = @transform_18, window_bounds = array<i64: 8, 1, 64>}, {pipeline_mode = #tpu.pipeline_mode<synchronous>, transform_indices = @transform_19, window_bounds = array<i64: 64, 32>}, {pipeline_mode = #tpu.pipeline_mode<synchronous>, transform_indices = @transform_20, window_bounds = array<i64: 1, 32>}, {pipeline_mode = #tpu.pipeline_mode<synchronous>, transform_indices = @transform_21, window_bounds = array<i64: 32, 32>}, {pipeline_mode = #tpu.pipeline_mode<synchronous>, transform_indices = @transform_22, window_bounds = array<i64: 1, 32>}, {pipeline_mode = #tpu.pipeline_mode<synchronous>, transform_indices = @transform_23, window_bounds = array<i64: 32, 32>}, {pipeline_mode = #tpu.pipeline_mode<synchronous>, transform_indices = @transform_24, window_bounds = array<i64: 1, 32>}, {pipeline_mode = #tpu.pipeline_mode<synchronous>, transform_indices = @transform_25, window_bounds = array<i64: 64, 72>}, {pipeline_mode = #tpu.pipeline_mode<synchronous>, transform_indices = @transform_26, window_bounds = array<i64: 1, 72>}, {pipeline_mode = #tpu.pipeline_mode<synchronous>, transform_indices = @transform_27, window_bounds = array<i64: 64, 8>}, {pipeline_mode = #tpu.pipeline_mode<synchronous>, transform_indices = @transform_28, window_bounds = array<i64: 1, 8>}, {pipeline_mode = #tpu.pipeline_mode<synchronous>, transform_indices = @transform_29, window_bounds = array<i64: 8, 1, 64>}, {pipeline_mode = #tpu.pipeline_mode<synchronous>, transform_indices = @transform_30, window_bounds = array<i64: 64, 32>}, {pipeline_mode = #tpu.pipeline_mode<synchronous>, transform_indices = @transform_31, window_bounds = array<i64: 1, 32>}, {pipeline_mode = #tpu.pipeline_mode<synchronous>, transform_indices = @transform_32, window_bounds = array<i64: 32, 32>}, {pipeline_mode = #tpu.pipeline_mode<synchronous>, transform_indices = @transform_33, window_bounds = array<i64: 1, 32>}, {pipeline_mode = #tpu.pipeline_mode<synchronous>, transform_indices = @transform_34, window_bounds = array<i64: 32, 32>}, {pipeline_mode = #tpu.pipeline_mode<synchronous>, transform_indices = @transform_35, window_bounds = array<i64: 1, 32>}, {pipeline_mode = #tpu.pipeline_mode<synchronous>, transform_indices = @transform_36, window_bounds = array<i64: 32, 40>}, {pipeline_mode = #tpu.pipeline_mode<synchronous>, transform_indices = @transform_37, window_bounds = array<i64: 1, 40>}, {pipeline_mode = #tpu.pipeline_mode<synchronous>, transform_indices = @transform_38, window_bounds = array<i64: 32, 8>}, {pipeline_mode = #tpu.pipeline_mode<synchronous>, transform_indices = @transform_39, window_bounds = array<i64: 1, 8>}, {pipeline_mode = #tpu.pipeline_mode<synchronous>, transform_indices = @transform_40, window_bounds = array<i64: 8, 1, 32>}, {pipeline_mode = #tpu.pipeline_mode<synchronous>, transform_indices = @transform_41, window_bounds = array<i64: 32, 32>}, {pipeline_mode = #tpu.pipeline_mode<synchronous>, transform_indices = @transform_42, window_bounds = array<i64: 1, 32>}, {pipeline_mode = #tpu.pipeline_mode<synchronous>, transform_indices = @transform_43, window_bounds = array<i64: 32, 40>}, {pipeline_mode = #tpu.pipeline_mode<synchronous>, transform_indices = @transform_44, window_bounds = array<i64: 1, 40>}, {pipeline_mode = #tpu.pipeline_mode<synchronous>, transform_indices = @transform_45, window_bounds = array<i64: 32, 8>}, {pipeline_mode = #tpu.pipeline_mode<synchronous>, transform_indices = @transform_46, window_bounds = array<i64: 1, 8>}, {pipeline_mode = #tpu.pipeline_mode<synchronous>, transform_indices = @transform_47, window_bounds = array<i64: 8, 1, 32>}, {pipeline_mode = #tpu.pipeline_mode<synchronous>, transform_indices = @transform_48, window_bounds = array<i64: 32, 32>}, {pipeline_mode = #tpu.pipeline_mode<synchronous>, transform_indices = @transform_49, window_bounds = array<i64: 1, 32>}, {transform_indices = @transform_50, window_bounds = array<i64: 1, 4, 32>}]} {
    %c0 = arith.constant 0 : index
    %c0_0 = arith.constant 0 : index
    %c0_1 = arith.constant 0 : index
    %0 = vector.load %arg1[%c0, %c0_0, %c0_1] : memref<1x16x64xbf16, #tpu.memory_space<vmem>>, vector<1x16x64xbf16>
    %1 = vector.shape_cast %0 : vector<1x16x64xbf16> to vector<16x64xbf16>
    %c0_2 = arith.constant 0 : index
    %c0_3 = arith.constant 0 : index
    %c0_4 = arith.constant 0 : index
    %2 = vector.load %arg2[%c0_2, %c0_3, %c0_4] : memref<1x8x64xbf16, #tpu.memory_space<vmem>>, vector<1x8x64xbf16>
    %3 = vector.shape_cast %2 : vector<1x8x64xbf16> to vector<8x64xbf16>
    %c0_5 = arith.constant 0 : index
    %c0_6 = arith.constant 0 : index
    %c0_7 = arith.constant 0 : index
    %4 = vector.load %arg3[%c0_5, %c0_6, %c0_7] : memref<1x8x64xbf16, #tpu.memory_space<vmem>>, vector<1x8x64xbf16>
    %5 = vector.shape_cast %4 : vector<1x8x64xbf16> to vector<8x64xbf16>
    %c0_8 = arith.constant 0 : index
    %c0_9 = arith.constant 0 : index
    %6 = vector.load %arg4[%c0_8, %c0_9] : memref<64x72xbf16, #tpu.memory_space<vmem>>, vector<64x72xbf16>
    %cst = arith.constant dense<0.000000e+00> : vector<16x72xf32>
    %7 = tpu.matmul %1, %6, %cst {dimension_numbers = #tpu.dot_dimension_numbers<[1], [0], [0], [1], [0, 0, 1, 1], [], []>} : vector<16x64xbf16>, vector<64x72xbf16>, vector<16x72xf32> -> vector<16x72xf32>
    %c0_10 = arith.constant 0 : index
    %c0_11 = arith.constant 0 : index
    %8 = vector.load %arg5[%c0_10, %c0_11] : memref<1x72xf32, #tpu.memory_space<vmem>>, vector<1x72xf32>
    %9 = vector.broadcast %8 : vector<1x72xf32> to vector<16x72xf32>
    %10 = arith.addf %7, %9 : vector<16x72xf32>
    %11 = vector.extract_strided_slice %10 {offsets = [0, 0], sizes = [16, 64], strides = [1, 1]} : vector<16x72xf32> to vector<16x64xf32>
    %12 = vector.extract_strided_slice %10 {offsets = [0, 64], sizes = [16, 8], strides = [1, 1]} : vector<16x72xf32> to vector<16x8xf32>
    %c0_12 = arith.constant 0 : index
    %c0_13 = arith.constant 0 : index
    %13 = vector.load %arg6[%c0_12, %c0_13] : memref<64x8xbf16, #tpu.memory_space<vmem>>, vector<64x8xbf16>
    %cst_14 = arith.constant dense<0.000000e+00> : vector<16x8xf32>
    %14 = tpu.matmul %1, %13, %cst_14 {dimension_numbers = #tpu.dot_dimension_numbers<[1], [0], [0], [1], [0, 0, 1, 1], [], []>} : vector<16x64xbf16>, vector<64x8xbf16>, vector<16x8xf32> -> vector<16x8xf32>
    %c0_15 = arith.constant 0 : index
    %c0_16 = arith.constant 0 : index
    %15 = vector.load %arg7[%c0_15, %c0_16] : memref<1x8xf32, #tpu.memory_space<vmem>>, vector<1x8xf32>
    %16 = vector.broadcast %15 : vector<1x8xf32> to vector<16x8xf32>
    %17 = arith.addf %14, %16 : vector<16x8xf32>
    %18 = tpu.transpose %17, [1, 0] : vector<16x8xf32> -> vector<8x16xf32>
    %19 = vector.shape_cast %18 : vector<8x16xf32> to vector<8x16x1xf32>
    %20 = tpu.transpose %12, [1, 0] : vector<16x8xf32> -> vector<8x16xf32>
    %21 = vector.shape_cast %20 : vector<8x16xf32> to vector<8x1x16xf32>
    %22 = vector.broadcast %19 : vector<8x16x1xf32> to vector<8x16x16xf32>
    %23 = vector.broadcast %21 : vector<8x1x16xf32> to vector<8x16x16xf32>
    %24 = arith.addf %22, %23 : vector<8x16x16xf32>
    %25 = math.tanh %24 : vector<8x16x16xf32>
    %cst_17 = arith.constant dense<0xFF800000> : vector<8x16xf32>
    %26 = vector.multi_reduction <maximumf>, %25, %cst_17 [2] : vector<8x16x16xf32> to vector<8x16xf32>
    %27 = vector.shape_cast %26 : vector<8x16xf32> to vector<8x16x1xf32>
    %28 = vector.broadcast %27 : vector<8x16x1xf32> to vector<8x16x16xf32>
    %29 = arith.subf %25, %28 : vector<8x16x16xf32>
    %30 = math.exp %29 : vector<8x16x16xf32>
    %cst_18 = arith.constant dense<0.000000e+00> : vector<8x16xf32>
    %31 = vector.multi_reduction <add>, %30, %cst_18 [2] : vector<8x16x16xf32> to vector<8x16xf32>
    %32 = vector.shape_cast %31 : vector<8x16xf32> to vector<8x16x1xf32>
    %33 = tpu.reciprocal %32 {approx = true} : vector<8x16x1xf32> -> vector<8x16x1xf32>
    %34 = vector.broadcast %33 : vector<8x16x1xf32> to vector<8x16x16xf32>
    %35 = arith.mulf %30, %34 : vector<8x16x16xf32>
    %36 = arith.truncf %35 : vector<8x16x16xf32> to vector<8x16x16xbf16>
    %37 = arith.truncf %11 : vector<16x64xf32> to vector<16x64xbf16>
    %38 = vector.shape_cast %37 : vector<16x64xbf16> to vector<1x16x64xbf16>
    %c0_19 = arith.constant 0 : index
    %c0_20 = arith.constant 0 : index
    %c0_21 = arith.constant 0 : index
    %39 = vector.load %arg8[%c0_19, %c0_20, %c0_21] : memref<8x1x64xbf16, #tpu.memory_space<vmem>>, vector<8x1x64xbf16>
    %40 = vector.broadcast %38 : vector<1x16x64xbf16> to vector<8x16x64xbf16>
    %41 = vector.broadcast %39 : vector<8x1x64xbf16> to vector<8x16x64xbf16>
    %42 = arith.mulf %40, %41 : vector<8x16x64xbf16>
    "tpu.trace_start"() <{level = 10 : i32, message = "hqk,hkc->hqc"}> : () -> ()
    %cst_22 = arith.constant dense<0.000000e+00> : vector<8x16x64xf32>
    %43 = tpu.matmul %36, %42, %cst_22 {dimension_numbers = #tpu.dot_dimension_numbers<[2], [1], [1], [2], [0, 0, 0, 1, 1, 2], [0], [0]>} : vector<8x16x16xbf16>, vector<8x16x64xbf16>, vector<8x16x64xf32> -> vector<8x16x64xf32>
    "tpu.trace_stop"() : () -> ()
    %cst_23 = arith.constant dense<0.000000e+00> : vector<16x64xf32>
    %44 = vector.multi_reduction <add>, %43, %cst_23 [0] : vector<8x16x64xf32> to vector<16x64xf32>
    %45 = arith.truncf %44 : vector<16x64xf32> to vector<16x64xbf16>
    %c0_24 = arith.constant 0 : index
    %c0_25 = arith.constant 0 : index
    %46 = vector.load %arg9[%c0_24, %c0_25] : memref<64x32xbf16, #tpu.memory_space<vmem>>, vector<64x32xbf16>
    %cst_26 = arith.constant dense<0.000000e+00> : vector<16x32xf32>
    %47 = tpu.matmul %45, %46, %cst_26 {dimension_numbers = #tpu.dot_dimension_numbers<[1], [0], [0], [1], [0, 0, 1, 1], [], []>} : vector<16x64xbf16>, vector<64x32xbf16>, vector<16x32xf32> -> vector<16x32xf32>
    %c0_27 = arith.constant 0 : index
    %c0_28 = arith.constant 0 : index
    %48 = vector.load %arg10[%c0_27, %c0_28] : memref<1x32xf32, #tpu.memory_space<vmem>>, vector<1x32xf32>
    %49 = vector.broadcast %48 : vector<1x32xf32> to vector<16x32xf32>
    %50 = arith.addf %47, %49 : vector<16x32xf32>
    %51 = arith.truncf %50 : vector<16x32xf32> to vector<16x32xbf16>
    %c0_29 = arith.constant 0 : index
    %c0_30 = arith.constant 0 : index
    %52 = vector.load %arg11[%c0_29, %c0_30] : memref<32x32xbf16, #tpu.memory_space<vmem>>, vector<32x32xbf16>
    %cst_31 = arith.constant dense<0.000000e+00> : vector<16x32xf32>
    %53 = tpu.matmul %51, %52, %cst_31 {dimension_numbers = #tpu.dot_dimension_numbers<[1], [0], [0], [1], [0, 0, 1, 1], [], []>} : vector<16x32xbf16>, vector<32x32xbf16>, vector<16x32xf32> -> vector<16x32xf32>
    %c0_32 = arith.constant 0 : index
    %c0_33 = arith.constant 0 : index
    %54 = vector.load %arg12[%c0_32, %c0_33] : memref<1x32xf32, #tpu.memory_space<vmem>>, vector<1x32xf32>
    %55 = vector.broadcast %54 : vector<1x32xf32> to vector<16x32xf32>
    %56 = arith.addf %53, %55 : vector<16x32xf32>
    %cst_34 = arith.constant 0.000000e+00 : f32
    %57 = vector.broadcast %cst_34 : f32 to vector<16x32xf32>
    %58 = arith.maximumf %56, %57 : vector<16x32xf32>
    %59 = arith.truncf %58 : vector<16x32xf32> to vector<16x32xbf16>
    %c0_35 = arith.constant 0 : index
    %c0_36 = arith.constant 0 : index
    %60 = vector.load %arg13[%c0_35, %c0_36] : memref<32x32xbf16, #tpu.memory_space<vmem>>, vector<32x32xbf16>
    %cst_37 = arith.constant dense<0.000000e+00> : vector<16x32xf32>
    %61 = tpu.matmul %59, %60, %cst_37 {dimension_numbers = #tpu.dot_dimension_numbers<[1], [0], [0], [1], [0, 0, 1, 1], [], []>} : vector<16x32xbf16>, vector<32x32xbf16>, vector<16x32xf32> -> vector<16x32xf32>
    %c0_38 = arith.constant 0 : index
    %c0_39 = arith.constant 0 : index
    %62 = vector.load %arg14[%c0_38, %c0_39] : memref<1x32xf32, #tpu.memory_space<vmem>>, vector<1x32xf32>
    %63 = vector.broadcast %62 : vector<1x32xf32> to vector<16x32xf32>
    %64 = arith.addf %61, %63 : vector<16x32xf32>
    %c0_40 = arith.constant 0 : index
    %c0_41 = arith.constant 0 : index
    %65 = vector.load %arg15[%c0_40, %c0_41] : memref<64x72xbf16, #tpu.memory_space<vmem>>, vector<64x72xbf16>
    %cst_42 = arith.constant dense<0.000000e+00> : vector<16x72xf32>
    %66 = tpu.matmul %1, %65, %cst_42 {dimension_numbers = #tpu.dot_dimension_numbers<[1], [0], [0], [1], [0, 0, 1, 1], [], []>} : vector<16x64xbf16>, vector<64x72xbf16>, vector<16x72xf32> -> vector<16x72xf32>
    %c0_43 = arith.constant 0 : index
    %c0_44 = arith.constant 0 : index
    %67 = vector.load %arg16[%c0_43, %c0_44] : memref<1x72xf32, #tpu.memory_space<vmem>>, vector<1x72xf32>
    %68 = vector.broadcast %67 : vector<1x72xf32> to vector<16x72xf32>
    %69 = arith.addf %66, %68 : vector<16x72xf32>
    %70 = vector.extract_strided_slice %69 {offsets = [0, 0], sizes = [16, 64], strides = [1, 1]} : vector<16x72xf32> to vector<16x64xf32>
    %71 = vector.extract_strided_slice %69 {offsets = [0, 64], sizes = [16, 8], strides = [1, 1]} : vector<16x72xf32> to vector<16x8xf32>
    %c0_45 = arith.constant 0 : index
    %c0_46 = arith.constant 0 : index
    %72 = vector.load %arg17[%c0_45, %c0_46] : memref<64x8xbf16, #tpu.memory_space<vmem>>, vector<64x8xbf16>
    %cst_47 = arith.constant dense<0.000000e+00> : vector<8x8xf32>
    %73 = tpu.matmul %3, %72, %cst_47 {dimension_numbers = #tpu.dot_dimension_numbers<[1], [0], [0], [1], [0, 0, 1, 1], [], []>} : vector<8x64xbf16>, vector<64x8xbf16>, vector<8x8xf32> -> vector<8x8xf32>
    %c0_48 = arith.constant 0 : index
    %c0_49 = arith.constant 0 : index
    %74 = vector.load %arg18[%c0_48, %c0_49] : memref<1x8xf32, #tpu.memory_space<vmem>>, vector<1x8xf32>
    %75 = vector.broadcast %74 : vector<1x8xf32> to vector<8x8xf32>
    %76 = arith.addf %73, %75 : vector<8x8xf32>
    %77 = tpu.transpose %76, [1, 0] : vector<8x8xf32> -> vector<8x8xf32>
    %78 = vector.shape_cast %77 : vector<8x8xf32> to vector<8x8x1xf32>
    %79 = tpu.transpose %71, [1, 0] : vector<16x8xf32> -> vector<8x16xf32>
    %80 = vector.shape_cast %79 : vector<8x16xf32> to vector<8x1x16xf32>
    %81 = vector.broadcast %78 : vector<8x8x1xf32> to vector<8x8x16xf32>
    %82 = vector.broadcast %80 : vector<8x1x16xf32> to vector<8x8x16xf32>
    %83 = arith.addf %81, %82 : vector<8x8x16xf32>
    %84 = math.tanh %83 : vector<8x8x16xf32>
    %cst_50 = arith.constant dense<0xFF800000> : vector<8x8xf32>
    %85 = vector.multi_reduction <maximumf>, %84, %cst_50 [2] : vector<8x8x16xf32> to vector<8x8xf32>
    %86 = vector.shape_cast %85 : vector<8x8xf32> to vector<8x8x1xf32>
    %87 = vector.broadcast %86 : vector<8x8x1xf32> to vector<8x8x16xf32>
    %88 = arith.subf %84, %87 : vector<8x8x16xf32>
    %89 = math.exp %88 : vector<8x8x16xf32>
    %cst_51 = arith.constant dense<0.000000e+00> : vector<8x8xf32>
    %90 = vector.multi_reduction <add>, %89, %cst_51 [2] : vector<8x8x16xf32> to vector<8x8xf32>
    %91 = vector.shape_cast %90 : vector<8x8xf32> to vector<8x8x1xf32>
    %92 = tpu.reciprocal %91 {approx = true} : vector<8x8x1xf32> -> vector<8x8x1xf32>
    %93 = vector.broadcast %92 : vector<8x8x1xf32> to vector<8x8x16xf32>
    %94 = arith.mulf %89, %93 : vector<8x8x16xf32>
    %95 = arith.truncf %94 : vector<8x8x16xf32> to vector<8x8x16xbf16>
    %96 = arith.truncf %70 : vector<16x64xf32> to vector<16x64xbf16>
    %97 = vector.shape_cast %96 : vector<16x64xbf16> to vector<1x16x64xbf16>
    %c0_52 = arith.constant 0 : index
    %c0_53 = arith.constant 0 : index
    %c0_54 = arith.constant 0 : index
    %98 = vector.load %arg19[%c0_52, %c0_53, %c0_54] : memref<8x1x64xbf16, #tpu.memory_space<vmem>>, vector<8x1x64xbf16>
    %99 = vector.broadcast %97 : vector<1x16x64xbf16> to vector<8x16x64xbf16>
    %100 = vector.broadcast %98 : vector<8x1x64xbf16> to vector<8x16x64xbf16>
    %101 = arith.mulf %99, %100 : vector<8x16x64xbf16>
    "tpu.trace_start"() <{level = 10 : i32, message = "hqk,hkc->hqc"}> : () -> ()
    %cst_55 = arith.constant dense<0.000000e+00> : vector<8x8x64xf32>
    %102 = tpu.matmul %95, %101, %cst_55 {dimension_numbers = #tpu.dot_dimension_numbers<[2], [1], [1], [2], [0, 0, 0, 1, 1, 2], [0], [0]>} : vector<8x8x16xbf16>, vector<8x16x64xbf16>, vector<8x8x64xf32> -> vector<8x8x64xf32>
    "tpu.trace_stop"() : () -> ()
    %cst_56 = arith.constant dense<0.000000e+00> : vector<8x64xf32>
    %103 = vector.multi_reduction <add>, %102, %cst_56 [0] : vector<8x8x64xf32> to vector<8x64xf32>
    %104 = arith.truncf %103 : vector<8x64xf32> to vector<8x64xbf16>
    %c0_57 = arith.constant 0 : index
    %c0_58 = arith.constant 0 : index
    %105 = vector.load %arg20[%c0_57, %c0_58] : memref<64x32xbf16, #tpu.memory_space<vmem>>, vector<64x32xbf16>
    %cst_59 = arith.constant dense<0.000000e+00> : vector<8x32xf32>
    %106 = tpu.matmul %104, %105, %cst_59 {dimension_numbers = #tpu.dot_dimension_numbers<[1], [0], [0], [1], [0, 0, 1, 1], [], []>} : vector<8x64xbf16>, vector<64x32xbf16>, vector<8x32xf32> -> vector<8x32xf32>
    %c0_60 = arith.constant 0 : index
    %c0_61 = arith.constant 0 : index
    %107 = vector.load %arg21[%c0_60, %c0_61] : memref<1x32xf32, #tpu.memory_space<vmem>>, vector<1x32xf32>
    %108 = vector.broadcast %107 : vector<1x32xf32> to vector<8x32xf32>
    %109 = arith.addf %106, %108 : vector<8x32xf32>
    %110 = arith.truncf %109 : vector<8x32xf32> to vector<8x32xbf16>
    %c0_62 = arith.constant 0 : index
    %c0_63 = arith.constant 0 : index
    %111 = vector.load %arg22[%c0_62, %c0_63] : memref<32x32xbf16, #tpu.memory_space<vmem>>, vector<32x32xbf16>
    %cst_64 = arith.constant dense<0.000000e+00> : vector<8x32xf32>
    %112 = tpu.matmul %110, %111, %cst_64 {dimension_numbers = #tpu.dot_dimension_numbers<[1], [0], [0], [1], [0, 0, 1, 1], [], []>} : vector<8x32xbf16>, vector<32x32xbf16>, vector<8x32xf32> -> vector<8x32xf32>
    %c0_65 = arith.constant 0 : index
    %c0_66 = arith.constant 0 : index
    %113 = vector.load %arg23[%c0_65, %c0_66] : memref<1x32xf32, #tpu.memory_space<vmem>>, vector<1x32xf32>
    %114 = vector.broadcast %113 : vector<1x32xf32> to vector<8x32xf32>
    %115 = arith.addf %112, %114 : vector<8x32xf32>
    %cst_67 = arith.constant 0.000000e+00 : f32
    %116 = vector.broadcast %cst_67 : f32 to vector<8x32xf32>
    %117 = arith.maximumf %115, %116 : vector<8x32xf32>
    %118 = arith.truncf %117 : vector<8x32xf32> to vector<8x32xbf16>
    %c0_68 = arith.constant 0 : index
    %c0_69 = arith.constant 0 : index
    %119 = vector.load %arg24[%c0_68, %c0_69] : memref<32x32xbf16, #tpu.memory_space<vmem>>, vector<32x32xbf16>
    %cst_70 = arith.constant dense<0.000000e+00> : vector<8x32xf32>
    %120 = tpu.matmul %118, %119, %cst_70 {dimension_numbers = #tpu.dot_dimension_numbers<[1], [0], [0], [1], [0, 0, 1, 1], [], []>} : vector<8x32xbf16>, vector<32x32xbf16>, vector<8x32xf32> -> vector<8x32xf32>
    %c0_71 = arith.constant 0 : index
    %c0_72 = arith.constant 0 : index
    %121 = vector.load %arg25[%c0_71, %c0_72] : memref<1x32xf32, #tpu.memory_space<vmem>>, vector<1x32xf32>
    %122 = vector.broadcast %121 : vector<1x32xf32> to vector<8x32xf32>
    %123 = arith.addf %120, %122 : vector<8x32xf32>
    %c0_73 = arith.constant 0 : index
    %c0_74 = arith.constant 0 : index
    %124 = vector.load %arg26[%c0_73, %c0_74] : memref<64x72xbf16, #tpu.memory_space<vmem>>, vector<64x72xbf16>
    %cst_75 = arith.constant dense<0.000000e+00> : vector<16x72xf32>
    %125 = tpu.matmul %1, %124, %cst_75 {dimension_numbers = #tpu.dot_dimension_numbers<[1], [0], [0], [1], [0, 0, 1, 1], [], []>} : vector<16x64xbf16>, vector<64x72xbf16>, vector<16x72xf32> -> vector<16x72xf32>
    %c0_76 = arith.constant 0 : index
    %c0_77 = arith.constant 0 : index
    %126 = vector.load %arg27[%c0_76, %c0_77] : memref<1x72xf32, #tpu.memory_space<vmem>>, vector<1x72xf32>
    %127 = vector.broadcast %126 : vector<1x72xf32> to vector<16x72xf32>
    %128 = arith.addf %125, %127 : vector<16x72xf32>
    %129 = vector.extract_strided_slice %128 {offsets = [0, 0], sizes = [16, 64], strides = [1, 1]} : vector<16x72xf32> to vector<16x64xf32>
    %130 = vector.extract_strided_slice %128 {offsets = [0, 64], sizes = [16, 8], strides = [1, 1]} : vector<16x72xf32> to vector<16x8xf32>
    %c0_78 = arith.constant 0 : index
    %c0_79 = arith.constant 0 : index
    %131 = vector.load %arg28[%c0_78, %c0_79] : memref<64x8xbf16, #tpu.memory_space<vmem>>, vector<64x8xbf16>
    %cst_80 = arith.constant dense<0.000000e+00> : vector<8x8xf32>
    %132 = tpu.matmul %5, %131, %cst_80 {dimension_numbers = #tpu.dot_dimension_numbers<[1], [0], [0], [1], [0, 0, 1, 1], [], []>} : vector<8x64xbf16>, vector<64x8xbf16>, vector<8x8xf32> -> vector<8x8xf32>
    %c0_81 = arith.constant 0 : index
    %c0_82 = arith.constant 0 : index
    %133 = vector.load %arg29[%c0_81, %c0_82] : memref<1x8xf32, #tpu.memory_space<vmem>>, vector<1x8xf32>
    %134 = vector.broadcast %133 : vector<1x8xf32> to vector<8x8xf32>
    %135 = arith.addf %132, %134 : vector<8x8xf32>
    %136 = tpu.transpose %135, [1, 0] : vector<8x8xf32> -> vector<8x8xf32>
    %137 = vector.shape_cast %136 : vector<8x8xf32> to vector<8x8x1xf32>
    %138 = tpu.transpose %130, [1, 0] : vector<16x8xf32> -> vector<8x16xf32>
    %139 = vector.shape_cast %138 : vector<8x16xf32> to vector<8x1x16xf32>
    %140 = vector.broadcast %137 : vector<8x8x1xf32> to vector<8x8x16xf32>
    %141 = vector.broadcast %139 : vector<8x1x16xf32> to vector<8x8x16xf32>
    %142 = arith.addf %140, %141 : vector<8x8x16xf32>
    %143 = math.tanh %142 : vector<8x8x16xf32>
    %cst_83 = arith.constant dense<0xFF800000> : vector<8x8xf32>
    %144 = vector.multi_reduction <maximumf>, %143, %cst_83 [2] : vector<8x8x16xf32> to vector<8x8xf32>
    %145 = vector.shape_cast %144 : vector<8x8xf32> to vector<8x8x1xf32>
    %146 = vector.broadcast %145 : vector<8x8x1xf32> to vector<8x8x16xf32>
    %147 = arith.subf %143, %146 : vector<8x8x16xf32>
    %148 = math.exp %147 : vector<8x8x16xf32>
    %cst_84 = arith.constant dense<0.000000e+00> : vector<8x8xf32>
    %149 = vector.multi_reduction <add>, %148, %cst_84 [2] : vector<8x8x16xf32> to vector<8x8xf32>
    %150 = vector.shape_cast %149 : vector<8x8xf32> to vector<8x8x1xf32>
    %151 = tpu.reciprocal %150 {approx = true} : vector<8x8x1xf32> -> vector<8x8x1xf32>
    %152 = vector.broadcast %151 : vector<8x8x1xf32> to vector<8x8x16xf32>
    %153 = arith.mulf %148, %152 : vector<8x8x16xf32>
    %154 = arith.truncf %153 : vector<8x8x16xf32> to vector<8x8x16xbf16>
    %155 = arith.truncf %129 : vector<16x64xf32> to vector<16x64xbf16>
    %156 = vector.shape_cast %155 : vector<16x64xbf16> to vector<1x16x64xbf16>
    %c0_85 = arith.constant 0 : index
    %c0_86 = arith.constant 0 : index
    %c0_87 = arith.constant 0 : index
    %157 = vector.load %arg30[%c0_85, %c0_86, %c0_87] : memref<8x1x64xbf16, #tpu.memory_space<vmem>>, vector<8x1x64xbf16>
    %158 = vector.broadcast %156 : vector<1x16x64xbf16> to vector<8x16x64xbf16>
    %159 = vector.broadcast %157 : vector<8x1x64xbf16> to vector<8x16x64xbf16>
    %160 = arith.mulf %158, %159 : vector<8x16x64xbf16>
    "tpu.trace_start"() <{level = 10 : i32, message = "hqk,hkc->hqc"}> : () -> ()
    %cst_88 = arith.constant dense<0.000000e+00> : vector<8x8x64xf32>
    %161 = tpu.matmul %154, %160, %cst_88 {dimension_numbers = #tpu.dot_dimension_numbers<[2], [1], [1], [2], [0, 0, 0, 1, 1, 2], [0], [0]>} : vector<8x8x16xbf16>, vector<8x16x64xbf16>, vector<8x8x64xf32> -> vector<8x8x64xf32>
    "tpu.trace_stop"() : () -> ()
    %cst_89 = arith.constant dense<0.000000e+00> : vector<8x64xf32>
    %162 = vector.multi_reduction <add>, %161, %cst_89 [0] : vector<8x8x64xf32> to vector<8x64xf32>
    %163 = arith.truncf %162 : vector<8x64xf32> to vector<8x64xbf16>
    %c0_90 = arith.constant 0 : index
    %c0_91 = arith.constant 0 : index
    %164 = vector.load %arg31[%c0_90, %c0_91] : memref<64x32xbf16, #tpu.memory_space<vmem>>, vector<64x32xbf16>
    %cst_92 = arith.constant dense<0.000000e+00> : vector<8x32xf32>
    %165 = tpu.matmul %163, %164, %cst_92 {dimension_numbers = #tpu.dot_dimension_numbers<[1], [0], [0], [1], [0, 0, 1, 1], [], []>} : vector<8x64xbf16>, vector<64x32xbf16>, vector<8x32xf32> -> vector<8x32xf32>
    %c0_93 = arith.constant 0 : index
    %c0_94 = arith.constant 0 : index
    %166 = vector.load %arg32[%c0_93, %c0_94] : memref<1x32xf32, #tpu.memory_space<vmem>>, vector<1x32xf32>
    %167 = vector.broadcast %166 : vector<1x32xf32> to vector<8x32xf32>
    %168 = arith.addf %165, %167 : vector<8x32xf32>
    %169 = arith.truncf %168 : vector<8x32xf32> to vector<8x32xbf16>
    %c0_95 = arith.constant 0 : index
    %c0_96 = arith.constant 0 : index
    %170 = vector.load %arg33[%c0_95, %c0_96] : memref<32x32xbf16, #tpu.memory_space<vmem>>, vector<32x32xbf16>
    %cst_97 = arith.constant dense<0.000000e+00> : vector<8x32xf32>
    %171 = tpu.matmul %169, %170, %cst_97 {dimension_numbers = #tpu.dot_dimension_numbers<[1], [0], [0], [1], [0, 0, 1, 1], [], []>} : vector<8x32xbf16>, vector<32x32xbf16>, vector<8x32xf32> -> vector<8x32xf32>
    %c0_98 = arith.constant 0 : index
    %c0_99 = arith.constant 0 : index
    %172 = vector.load %arg34[%c0_98, %c0_99] : memref<1x32xf32, #tpu.memory_space<vmem>>, vector<1x32xf32>
    %173 = vector.broadcast %172 : vector<1x32xf32> to vector<8x32xf32>
    %174 = arith.addf %171, %173 : vector<8x32xf32>
    %cst_100 = arith.constant 0.000000e+00 : f32
    %175 = vector.broadcast %cst_100 : f32 to vector<8x32xf32>
    %176 = arith.maximumf %174, %175 : vector<8x32xf32>
    %177 = arith.truncf %176 : vector<8x32xf32> to vector<8x32xbf16>
    %c0_101 = arith.constant 0 : index
    %c0_102 = arith.constant 0 : index
    %178 = vector.load %arg35[%c0_101, %c0_102] : memref<32x32xbf16, #tpu.memory_space<vmem>>, vector<32x32xbf16>
    %cst_103 = arith.constant dense<0.000000e+00> : vector<8x32xf32>
    %179 = tpu.matmul %177, %178, %cst_103 {dimension_numbers = #tpu.dot_dimension_numbers<[1], [0], [0], [1], [0, 0, 1, 1], [], []>} : vector<8x32xbf16>, vector<32x32xbf16>, vector<8x32xf32> -> vector<8x32xf32>
    %c0_104 = arith.constant 0 : index
    %c0_105 = arith.constant 0 : index
    %180 = vector.load %arg36[%c0_104, %c0_105] : memref<1x32xf32, #tpu.memory_space<vmem>>, vector<1x32xf32>
    %181 = vector.broadcast %180 : vector<1x32xf32> to vector<8x32xf32>
    %182 = arith.addf %179, %181 : vector<8x32xf32>
    %183 = arith.truncf %64 : vector<16x32xf32> to vector<16x32xbf16>
    %184 = arith.truncf %123 : vector<8x32xf32> to vector<8x32xbf16>
    %c0_106 = arith.constant 0 : index
    %c0_107 = arith.constant 0 : index
    %185 = vector.load %arg37[%c0_106, %c0_107] : memref<32x40xbf16, #tpu.memory_space<vmem>>, vector<32x40xbf16>
    %cst_108 = arith.constant dense<0.000000e+00> : vector<16x40xf32>
    %186 = tpu.matmul %183, %185, %cst_108 {dimension_numbers = #tpu.dot_dimension_numbers<[1], [0], [0], [1], [0, 0, 1, 1], [], []>} : vector<16x32xbf16>, vector<32x40xbf16>, vector<16x40xf32> -> vector<16x40xf32>
    %c0_109 = arith.constant 0 : index
    %c0_110 = arith.constant 0 : index
    %187 = vector.load %arg38[%c0_109, %c0_110] : memref<1x40xf32, #tpu.memory_space<vmem>>, vector<1x40xf32>
    %188 = vector.broadcast %187 : vector<1x40xf32> to vector<16x40xf32>
    %189 = arith.addf %186, %188 : vector<16x40xf32>
    %190 = vector.extract_strided_slice %189 {offsets = [0, 0], sizes = [16, 32], strides = [1, 1]} : vector<16x40xf32> to vector<16x32xf32>
    %191 = vector.extract_strided_slice %189 {offsets = [0, 32], sizes = [16, 8], strides = [1, 1]} : vector<16x40xf32> to vector<16x8xf32>
    %c0_111 = arith.constant 0 : index
    %c0_112 = arith.constant 0 : index
    %192 = vector.load %arg39[%c0_111, %c0_112] : memref<32x8xbf16, #tpu.memory_space<vmem>>, vector<32x8xbf16>
    %cst_113 = arith.constant dense<0.000000e+00> : vector<8x8xf32>
    %193 = tpu.matmul %184, %192, %cst_113 {dimension_numbers = #tpu.dot_dimension_numbers<[1], [0], [0], [1], [0, 0, 1, 1], [], []>} : vector<8x32xbf16>, vector<32x8xbf16>, vector<8x8xf32> -> vector<8x8xf32>
    %c0_114 = arith.constant 0 : index
    %c0_115 = arith.constant 0 : index
    %194 = vector.load %arg40[%c0_114, %c0_115] : memref<1x8xf32, #tpu.memory_space<vmem>>, vector<1x8xf32>
    %195 = vector.broadcast %194 : vector<1x8xf32> to vector<8x8xf32>
    %196 = arith.addf %193, %195 : vector<8x8xf32>
    %197 = tpu.transpose %196, [1, 0] : vector<8x8xf32> -> vector<8x8xf32>
    %198 = vector.shape_cast %197 : vector<8x8xf32> to vector<8x8x1xf32>
    %199 = tpu.transpose %191, [1, 0] : vector<16x8xf32> -> vector<8x16xf32>
    %200 = vector.shape_cast %199 : vector<8x16xf32> to vector<8x1x16xf32>
    %201 = vector.broadcast %198 : vector<8x8x1xf32> to vector<8x8x16xf32>
    %202 = vector.broadcast %200 : vector<8x1x16xf32> to vector<8x8x16xf32>
    %203 = arith.addf %201, %202 : vector<8x8x16xf32>
    %204 = math.tanh %203 : vector<8x8x16xf32>
    %cst_116 = arith.constant dense<0xFF800000> : vector<8x8xf32>
    %205 = vector.multi_reduction <maximumf>, %204, %cst_116 [2] : vector<8x8x16xf32> to vector<8x8xf32>
    %206 = vector.shape_cast %205 : vector<8x8xf32> to vector<8x8x1xf32>
    %207 = vector.broadcast %206 : vector<8x8x1xf32> to vector<8x8x16xf32>
    %208 = arith.subf %204, %207 : vector<8x8x16xf32>
    %209 = math.exp %208 : vector<8x8x16xf32>
    %cst_117 = arith.constant dense<0.000000e+00> : vector<8x8xf32>
    %210 = vector.multi_reduction <add>, %209, %cst_117 [2] : vector<8x8x16xf32> to vector<8x8xf32>
    %211 = vector.shape_cast %210 : vector<8x8xf32> to vector<8x8x1xf32>
    %212 = tpu.reciprocal %211 {approx = true} : vector<8x8x1xf32> -> vector<8x8x1xf32>
    %213 = vector.broadcast %212 : vector<8x8x1xf32> to vector<8x8x16xf32>
    %214 = arith.mulf %209, %213 : vector<8x8x16xf32>
    %215 = arith.truncf %214 : vector<8x8x16xf32> to vector<8x8x16xbf16>
    %216 = arith.truncf %190 : vector<16x32xf32> to vector<16x32xbf16>
    %217 = vector.shape_cast %216 : vector<16x32xbf16> to vector<1x16x32xbf16>
    %c0_118 = arith.constant 0 : index
    %c0_119 = arith.constant 0 : index
    %c0_120 = arith.constant 0 : index
    %218 = vector.load %arg41[%c0_118, %c0_119, %c0_120] : memref<8x1x32xbf16, #tpu.memory_space<vmem>>, vector<8x1x32xbf16>
    %219 = vector.broadcast %217 : vector<1x16x32xbf16> to vector<8x16x32xbf16>
    %220 = vector.broadcast %218 : vector<8x1x32xbf16> to vector<8x16x32xbf16>
    %221 = arith.mulf %219, %220 : vector<8x16x32xbf16>
    "tpu.trace_start"() <{level = 10 : i32, message = "hqk,hkc->hqc"}> : () -> ()
    %cst_121 = arith.constant dense<0.000000e+00> : vector<8x8x32xf32>
    %222 = tpu.matmul %215, %221, %cst_121 {dimension_numbers = #tpu.dot_dimension_numbers<[2], [1], [1], [2], [0, 0, 0, 1, 1, 2], [0], [0]>} : vector<8x8x16xbf16>, vector<8x16x32xbf16>, vector<8x8x32xf32> -> vector<8x8x32xf32>
    "tpu.trace_stop"() : () -> ()
    %cst_122 = arith.constant dense<0.000000e+00> : vector<8x32xf32>
    %223 = vector.multi_reduction <add>, %222, %cst_122 [0] : vector<8x8x32xf32> to vector<8x32xf32>
    %224 = arith.truncf %223 : vector<8x32xf32> to vector<8x32xbf16>
    %c0_123 = arith.constant 0 : index
    %c0_124 = arith.constant 0 : index
    %225 = vector.load %arg42[%c0_123, %c0_124] : memref<32x32xbf16, #tpu.memory_space<vmem>>, vector<32x32xbf16>
    %cst_125 = arith.constant dense<0.000000e+00> : vector<8x32xf32>
    %226 = tpu.matmul %224, %225, %cst_125 {dimension_numbers = #tpu.dot_dimension_numbers<[1], [0], [0], [1], [0, 0, 1, 1], [], []>} : vector<8x32xbf16>, vector<32x32xbf16>, vector<8x32xf32> -> vector<8x32xf32>
    %c0_126 = arith.constant 0 : index
    %c0_127 = arith.constant 0 : index
    %227 = vector.load %arg43[%c0_126, %c0_127] : memref<1x32xf32, #tpu.memory_space<vmem>>, vector<1x32xf32>
    %228 = vector.broadcast %227 : vector<1x32xf32> to vector<8x32xf32>
    %229 = arith.addf %226, %228 : vector<8x32xf32>
    %230 = arith.truncf %182 : vector<8x32xf32> to vector<8x32xbf16>
    %c0_128 = arith.constant 0 : index
    %c0_129 = arith.constant 0 : index
    %231 = vector.load %arg44[%c0_128, %c0_129] : memref<32x40xbf16, #tpu.memory_space<vmem>>, vector<32x40xbf16>
    %cst_130 = arith.constant dense<0.000000e+00> : vector<16x40xf32>
    %232 = tpu.matmul %183, %231, %cst_130 {dimension_numbers = #tpu.dot_dimension_numbers<[1], [0], [0], [1], [0, 0, 1, 1], [], []>} : vector<16x32xbf16>, vector<32x40xbf16>, vector<16x40xf32> -> vector<16x40xf32>
    %c0_131 = arith.constant 0 : index
    %c0_132 = arith.constant 0 : index
    %233 = vector.load %arg45[%c0_131, %c0_132] : memref<1x40xf32, #tpu.memory_space<vmem>>, vector<1x40xf32>
    %234 = vector.broadcast %233 : vector<1x40xf32> to vector<16x40xf32>
    %235 = arith.addf %232, %234 : vector<16x40xf32>
    %236 = vector.extract_strided_slice %235 {offsets = [0, 0], sizes = [16, 32], strides = [1, 1]} : vector<16x40xf32> to vector<16x32xf32>
    %237 = vector.extract_strided_slice %235 {offsets = [0, 32], sizes = [16, 8], strides = [1, 1]} : vector<16x40xf32> to vector<16x8xf32>
    %c0_133 = arith.constant 0 : index
    %c0_134 = arith.constant 0 : index
    %238 = vector.load %arg46[%c0_133, %c0_134] : memref<32x8xbf16, #tpu.memory_space<vmem>>, vector<32x8xbf16>
    %cst_135 = arith.constant dense<0.000000e+00> : vector<8x8xf32>
    %239 = tpu.matmul %230, %238, %cst_135 {dimension_numbers = #tpu.dot_dimension_numbers<[1], [0], [0], [1], [0, 0, 1, 1], [], []>} : vector<8x32xbf16>, vector<32x8xbf16>, vector<8x8xf32> -> vector<8x8xf32>
    %c0_136 = arith.constant 0 : index
    %c0_137 = arith.constant 0 : index
    %240 = vector.load %arg47[%c0_136, %c0_137] : memref<1x8xf32, #tpu.memory_space<vmem>>, vector<1x8xf32>
    %241 = vector.broadcast %240 : vector<1x8xf32> to vector<8x8xf32>
    %242 = arith.addf %239, %241 : vector<8x8xf32>
    %243 = tpu.transpose %242, [1, 0] : vector<8x8xf32> -> vector<8x8xf32>
    %244 = vector.shape_cast %243 : vector<8x8xf32> to vector<8x8x1xf32>
    %245 = tpu.transpose %237, [1, 0] : vector<16x8xf32> -> vector<8x16xf32>
    %246 = vector.shape_cast %245 : vector<8x16xf32> to vector<8x1x16xf32>
    %247 = vector.broadcast %244 : vector<8x8x1xf32> to vector<8x8x16xf32>
    %248 = vector.broadcast %246 : vector<8x1x16xf32> to vector<8x8x16xf32>
    %249 = arith.addf %247, %248 : vector<8x8x16xf32>
    %250 = math.tanh %249 : vector<8x8x16xf32>
    %cst_138 = arith.constant dense<0xFF800000> : vector<8x8xf32>
    %251 = vector.multi_reduction <maximumf>, %250, %cst_138 [2] : vector<8x8x16xf32> to vector<8x8xf32>
    %252 = vector.shape_cast %251 : vector<8x8xf32> to vector<8x8x1xf32>
    %253 = vector.broadcast %252 : vector<8x8x1xf32> to vector<8x8x16xf32>
    %254 = arith.subf %250, %253 : vector<8x8x16xf32>
    %255 = math.exp %254 : vector<8x8x16xf32>
    %cst_139 = arith.constant dense<0.000000e+00> : vector<8x8xf32>
    %256 = vector.multi_reduction <add>, %255, %cst_139 [2] : vector<8x8x16xf32> to vector<8x8xf32>
    %257 = vector.shape_cast %256 : vector<8x8xf32> to vector<8x8x1xf32>
    %258 = tpu.reciprocal %257 {approx = true} : vector<8x8x1xf32> -> vector<8x8x1xf32>
    %259 = vector.broadcast %258 : vector<8x8x1xf32> to vector<8x8x16xf32>
    %260 = arith.mulf %255, %259 : vector<8x8x16xf32>
    %261 = arith.truncf %260 : vector<8x8x16xf32> to vector<8x8x16xbf16>
    %262 = arith.truncf %236 : vector<16x32xf32> to vector<16x32xbf16>
    %263 = vector.shape_cast %262 : vector<16x32xbf16> to vector<1x16x32xbf16>
    %c0_140 = arith.constant 0 : index
    %c0_141 = arith.constant 0 : index
    %c0_142 = arith.constant 0 : index
    %264 = vector.load %arg48[%c0_140, %c0_141, %c0_142] : memref<8x1x32xbf16, #tpu.memory_space<vmem>>, vector<8x1x32xbf16>
    %265 = vector.broadcast %263 : vector<1x16x32xbf16> to vector<8x16x32xbf16>
    %266 = vector.broadcast %264 : vector<8x1x32xbf16> to vector<8x16x32xbf16>
    %267 = arith.mulf %265, %266 : vector<8x16x32xbf16>
    "tpu.trace_start"() <{level = 10 : i32, message = "hqk,hkc->hqc"}> : () -> ()
    %cst_143 = arith.constant dense<0.000000e+00> : vector<8x8x32xf32>
    %268 = tpu.matmul %261, %267, %cst_143 {dimension_numbers = #tpu.dot_dimension_numbers<[2], [1], [1], [2], [0, 0, 0, 1, 1, 2], [0], [0]>} : vector<8x8x16xbf16>, vector<8x16x32xbf16>, vector<8x8x32xf32> -> vector<8x8x32xf32>
    "tpu.trace_stop"() : () -> ()
    %cst_144 = arith.constant dense<0.000000e+00> : vector<8x32xf32>
    %269 = vector.multi_reduction <add>, %268, %cst_144 [0] : vector<8x8x32xf32> to vector<8x32xf32>
    %270 = arith.truncf %269 : vector<8x32xf32> to vector<8x32xbf16>
    %c0_145 = arith.constant 0 : index
    %c0_146 = arith.constant 0 : index
    %271 = vector.load %arg49[%c0_145, %c0_146] : memref<32x32xbf16, #tpu.memory_space<vmem>>, vector<32x32xbf16>
    %cst_147 = arith.constant dense<0.000000e+00> : vector<8x32xf32>
    %272 = tpu.matmul %270, %271, %cst_147 {dimension_numbers = #tpu.dot_dimension_numbers<[1], [0], [0], [1], [0, 0, 1, 1], [], []>} : vector<8x32xbf16>, vector<32x32xbf16>, vector<8x32xf32> -> vector<8x32xf32>
    %c0_148 = arith.constant 0 : index
    %c0_149 = arith.constant 0 : index
    %273 = vector.load %arg50[%c0_148, %c0_149] : memref<1x32xf32, #tpu.memory_space<vmem>>, vector<1x32xf32>
    %274 = vector.broadcast %273 : vector<1x32xf32> to vector<8x32xf32>
    %275 = arith.addf %272, %274 : vector<8x32xf32>
    %cst_150 = arith.constant dense<0.000000e+00> : vector<32xf32>
    %276 = vector.multi_reduction <add>, %64, %cst_150 [0] : vector<16x32xf32> to vector<32xf32>
    %277 = vector.shape_cast %276 : vector<32xf32> to vector<1x32xf32>
    %c0_151 = arith.constant 0 : index
    %c0_152 = arith.constant 0 : index
    %c0_153 = arith.constant 0 : index
    %278 = vector.load %arg51[%c0_151, %c0_152, %c0_153] : memref<1x4x32xf32, #tpu.memory_space<vmem>>, vector<1x1x32xf32>
    %279 = vector.shape_cast %278 : vector<1x1x32xf32> to vector<1x32xf32>
    %280 = vector.shape_cast %277 : vector<1x32xf32> to vector<1x1x32xf32>
    tpu.vector_store %arg51[%c0_151, %c0_152, %c0_153], %280 {strides = array<i32>} : memref<1x4x32xf32, #tpu.memory_space<vmem>>, vector<1x1x32xf32>,
    %cst_154 = arith.constant dense<0.000000e+00> : vector<32xf32>
    %281 = vector.multi_reduction <add>, %229, %cst_154 [0] : vector<8x32xf32> to vector<32xf32>
    %282 = vector.shape_cast %281 : vector<32xf32> to vector<1x32xf32>
    %c0_155 = arith.constant 0 : index
    %c1 = arith.constant 1 : index
    %c0_156 = arith.constant 0 : index
    %283 = vector.load %arg51[%c0_155, %c1, %c0_156] : memref<1x4x32xf32, #tpu.memory_space<vmem>>, vector<1x1x32xf32>
    %284 = vector.shape_cast %283 : vector<1x1x32xf32> to vector<1x32xf32>
    %285 = vector.shape_cast %282 : vector<1x32xf32> to vector<1x1x32xf32>
    tpu.vector_store %arg51[%c0_155, %c1, %c0_156], %285 {strides = array<i32>} : memref<1x4x32xf32, #tpu.memory_space<vmem>>, vector<1x1x32xf32>,
    %cst_157 = arith.constant dense<0.000000e+00> : vector<32xf32>
    %286 = vector.multi_reduction <add>, %123, %cst_157 [0] : vector<8x32xf32> to vector<32xf32>
    %287 = vector.shape_cast %286 : vector<32xf32> to vector<1x32xf32>
    %c0_158 = arith.constant 0 : index
    %c2 = arith.constant 2 : index
    %c0_159 = arith.constant 0 : index
    %288 = vector.load %arg51[%c0_158, %c2, %c0_159] : memref<1x4x32xf32, #tpu.memory_space<vmem>>, vector<1x1x32xf32>
    %289 = vector.shape_cast %288 : vector<1x1x32xf32> to vector<1x32xf32>
    %290 = vector.shape_cast %287 : vector<1x32xf32> to vector<1x1x32xf32>
    tpu.vector_store %arg51[%c0_158, %c2, %c0_159], %290 {strides = array<i32>} : memref<1x4x32xf32, #tpu.memory_space<vmem>>, vector<1x1x32xf32>,
    %cst_160 = arith.constant dense<0.000000e+00> : vector<32xf32>
    %291 = vector.multi_reduction <add>, %275, %cst_160 [0] : vector<8x32xf32> to vector<32xf32>
    %292 = vector.shape_cast %291 : vector<32xf32> to vector<1x32xf32>
    %c0_161 = arith.constant 0 : index
    %c3 = arith.constant 3 : index
    %c0_162 = arith.constant 0 : index
    %293 = vector.load %arg51[%c0_161, %c3, %c0_162] : memref<1x4x32xf32, #tpu.memory_space<vmem>>, vector<1x1x32xf32>
    %294 = vector.shape_cast %293 : vector<1x1x32xf32> to vector<1x32xf32>
    %295 = vector.shape_cast %292 : vector<1x32xf32> to vector<1x1x32xf32>
    tpu.vector_store %arg51[%c0_161, %c3, %c0_162], %295 {strides = array<i32>} : memref<1x4x32xf32, #tpu.memory_space<vmem>>, vector<1x1x32xf32>,
    return
  }
  func.func @transform_0(%arg0: i32) -> (i32, i32, i32) {
    %c0_i32 = arith.constant 0 : i32
    %c0_i32_0 = arith.constant 0 : i32
    %c0_i32_1 = arith.constant 0 : i32
    return %arg0, %c0_i32, %c0_i32_0 : i32, i32, i32
  }
  func.func @transform_1(%arg0: i32) -> (i32, i32, i32) {
    %c0_i32 = arith.constant 0 : i32
    %c0_i32_0 = arith.constant 0 : i32
    %c0_i32_1 = arith.constant 0 : i32
    return %arg0, %c0_i32, %c0_i32_0 : i32, i32, i32
  }
  func.func @transform_2(%arg0: i32) -> (i32, i32, i32) {
    %c0_i32 = arith.constant 0 : i32
    %c0_i32_0 = arith.constant 0 : i32
    %c0_i32_1 = arith.constant 0 : i32
    return %arg0, %c0_i32, %c0_i32_0 : i32, i32, i32
  }
  func.func @transform_3(%arg0: i32) -> (i32, i32) {
    %c0_i32 = arith.constant 0 : i32
    %c0_i32_0 = arith.constant 0 : i32
    %c0_i32_1 = arith.constant 0 : i32
    return %c0_i32, %c0_i32_0 : i32, i32
  }
  func.func @transform_4(%arg0: i32) -> (i32, i32) {
    %c0_i32 = arith.constant 0 : i32
    %c0_i32_0 = arith.constant 0 : i32
    %c0_i32_1 = arith.constant 0 : i32
    return %c0_i32, %c0_i32_0 : i32, i32
  }
  func.func @transform_5(%arg0: i32) -> (i32, i32) {
    %c0_i32 = arith.constant 0 : i32
    %c0_i32_0 = arith.constant 0 : i32
    %c0_i32_1 = arith.constant 0 : i32
    return %c0_i32, %c0_i32_0 : i32, i32
  }
  func.func @transform_6(%arg0: i32) -> (i32, i32) {
    %c0_i32 = arith.constant 0 : i32
    %c0_i32_0 = arith.constant 0 : i32
    %c0_i32_1 = arith.constant 0 : i32
    return %c0_i32, %c0_i32_0 : i32, i32
  }
  func.func @transform_7(%arg0: i32) -> (i32, i32, i32) {
    %c0_i32 = arith.constant 0 : i32
    %c0_i32_0 = arith.constant 0 : i32
    %c0_i32_1 = arith.constant 0 : i32
    %c0_i32_2 = arith.constant 0 : i32
    return %c0_i32, %c0_i32_0, %c0_i32_1 : i32, i32, i32
  }
  func.func @transform_8(%arg0: i32) -> (i32, i32) {
    %c0_i32 = arith.constant 0 : i32
    %c0_i32_0 = arith.constant 0 : i32
    %c0_i32_1 = arith.constant 0 : i32
    return %c0_i32, %c0_i32_0 : i32, i32
  }
  func.func @transform_9(%arg0: i32) -> (i32, i32) {
    %c0_i32 = arith.constant 0 : i32
    %c0_i32_0 = arith.constant 0 : i32
    %c0_i32_1 = arith.constant 0 : i32
    return %c0_i32, %c0_i32_0 : i32, i32
  }
  func.func @transform_10(%arg0: i32) -> (i32, i32) {
    %c0_i32 = arith.constant 0 : i32
    %c0_i32_0 = arith.constant 0 : i32
    %c0_i32_1 = arith.constant 0 : i32
    return %c0_i32, %c0_i32_0 : i32, i32
  }
  func.func @transform_11(%arg0: i32) -> (i32, i32) {
    %c0_i32 = arith.constant 0 : i32
    %c0_i32_0 = arith.constant 0 : i32
    %c0_i32_1 = arith.constant 0 : i32
    return %c0_i32, %c0_i32_0 : i32, i32
  }
  func.func @transform_12(%arg0: i32) -> (i32, i32) {
    %c0_i32 = arith.constant 0 : i32
    %c0_i32_0 = arith.constant 0 : i32
    %c0_i32_1 = arith.constant 0 : i32
    return %c0_i32, %c0_i32_0 : i32, i32
  }
  func.func @transform_13(%arg0: i32) -> (i32, i32) {
    %c0_i32 = arith.constant 0 : i32
    %c0_i32_0 = arith.constant 0 : i32
    %c0_i32_1 = arith.constant 0 : i32
    return %c0_i32, %c0_i32_0 : i32, i32
  }
  func.func @transform_14(%arg0: i32) -> (i32, i32) {
    %c0_i32 = arith.constant 0 : i32
    %c0_i32_0 = arith.constant 0 : i32
    %c0_i32_1 = arith.constant 0 : i32
    return %c0_i32, %c0_i32_0 : i32, i32
  }
  func.func @transform_15(%arg0: i32) -> (i32, i32) {
    %c0_i32 = arith.constant 0 : i32
    %c0_i32_0 = arith.constant 0 : i32
    %c0_i32_1 = arith.constant 0 : i32
    return %c0_i32, %c0_i32_0 : i32, i32
  }
  func.func @transform_16(%arg0: i32) -> (i32, i32) {
    %c0_i32 = arith.constant 0 : i32
    %c0_i32_0 = arith.constant 0 : i32
    %c0_i32_1 = arith.constant 0 : i32
    return %c0_i32, %c0_i32_0 : i32, i32
  }
  func.func @transform_17(%arg0: i32) -> (i32, i32) {
    %c0_i32 = arith.constant 0 : i32
    %c0_i32_0 = arith.constant 0 : i32
    %c0_i32_1 = arith.constant 0 : i32
    return %c0_i32, %c0_i32_0 : i32, i32
  }
  func.func @transform_18(%arg0: i32) -> (i32, i32, i32) {
    %c0_i32 = arith.constant 0 : i32
    %c0_i32_0 = arith.constant 0 : i32
    %c0_i32_1 = arith.constant 0 : i32
    %c0_i32_2 = arith.constant 0 : i32
    return %c0_i32, %c0_i32_0, %c0_i32_1 : i32, i32, i32
  }
  func.func @transform_19(%arg0: i32) -> (i32, i32) {
    %c0_i32 = arith.constant 0 : i32
    %c0_i32_0 = arith.constant 0 : i32
    %c0_i32_1 = arith.constant 0 : i32
    return %c0_i32, %c0_i32_0 : i32, i32
  }
  func.func @transform_20(%arg0: i32) -> (i32, i32) {
    %c0_i32 = arith.constant 0 : i32
    %c0_i32_0 = arith.constant 0 : i32
    %c0_i32_1 = arith.constant 0 : i32
    return %c0_i32, %c0_i32_0 : i32, i32
  }
  func.func @transform_21(%arg0: i32) -> (i32, i32) {
    %c0_i32 = arith.constant 0 : i32
    %c0_i32_0 = arith.constant 0 : i32
    %c0_i32_1 = arith.constant 0 : i32
    return %c0_i32, %c0_i32_0 : i32, i32
  }
  func.func @transform_22(%arg0: i32) -> (i32, i32) {
    %c0_i32 = arith.constant 0 : i32
    %c0_i32_0 = arith.constant 0 : i32
    %c0_i32_1 = arith.constant 0 : i32
    return %c0_i32, %c0_i32_0 : i32, i32
  }
  func.func @transform_23(%arg0: i32) -> (i32, i32) {
    %c0_i32 = arith.constant 0 : i32
    %c0_i32_0 = arith.constant 0 : i32
    %c0_i32_1 = arith.constant 0 : i32
    return %c0_i32, %c0_i32_0 : i32, i32
  }
  func.func @transform_24(%arg0: i32) -> (i32, i32) {
    %c0_i32 = arith.constant 0 : i32
    %c0_i32_0 = arith.constant 0 : i32
    %c0_i32_1 = arith.constant 0 : i32
    return %c0_i32, %c0_i32_0 : i32, i32
  }
  func.func @transform_25(%arg0: i32) -> (i32, i32) {
    %c0_i32 = arith.constant 0 : i32
    %c0_i32_0 = arith.constant 0 : i32
    %c0_i32_1 = arith.constant 0 : i32
    return %c0_i32, %c0_i32_0 : i32, i32
  }
  func.func @transform_26(%arg0: i32) -> (i32, i32) {
    %c0_i32 = arith.constant 0 : i32
    %c0_i32_0 = arith.constant 0 : i32
    %c0_i32_1 = arith.constant 0 : i32
    return %c0_i32, %c0_i32_0 : i32, i32
  }
  func.func @transform_27(%arg0: i32) -> (i32, i32) {
    %c0_i32 = arith.constant 0 : i32
    %c0_i32_0 = arith.constant 0 : i32
    %c0_i32_1 = arith.constant 0 : i32
    return %c0_i32, %c0_i32_0 : i32, i32
  }
  func.func @transform_28(%arg0: i32) -> (i32, i32) {
    %c0_i32 = arith.constant 0 : i32
    %c0_i32_0 = arith.constant 0 : i32
    %c0_i32_1 = arith.constant 0 : i32
    return %c0_i32, %c0_i32_0 : i32, i32
  }
  func.func @transform_29(%arg0: i32) -> (i32, i32, i32) {
    %c0_i32 = arith.constant 0 : i32
    %c0_i32_0 = arith.constant 0 : i32
    %c0_i32_1 = arith.constant 0 : i32
    %c0_i32_2 = arith.constant 0 : i32
    return %c0_i32, %c0_i32_0, %c0_i32_1 : i32, i32, i32
  }
  func.func @transform_30(%arg0: i32) -> (i32, i32) {
    %c0_i32 = arith.constant 0 : i32
    %c0_i32_0 = arith.constant 0 : i32
    %c0_i32_1 = arith.constant 0 : i32
    return %c0_i32, %c0_i32_0 : i32, i32
  }
  func.func @transform_31(%arg0: i32) -> (i32, i32) {
    %c0_i32 = arith.constant 0 : i32
    %c0_i32_0 = arith.constant 0 : i32
    %c0_i32_1 = arith.constant 0 : i32
    return %c0_i32, %c0_i32_0 : i32, i32
  }
  func.func @transform_32(%arg0: i32) -> (i32, i32) {
    %c0_i32 = arith.constant 0 : i32
    %c0_i32_0 = arith.constant 0 : i32
    %c0_i32_1 = arith.constant 0 : i32
    return %c0_i32, %c0_i32_0 : i32, i32
  }
  func.func @transform_33(%arg0: i32) -> (i32, i32) {
    %c0_i32 = arith.constant 0 : i32
    %c0_i32_0 = arith.constant 0 : i32
    %c0_i32_1 = arith.constant 0 : i32
    return %c0_i32, %c0_i32_0 : i32, i32
  }
  func.func @transform_34(%arg0: i32) -> (i32, i32) {
    %c0_i32 = arith.constant 0 : i32
    %c0_i32_0 = arith.constant 0 : i32
    %c0_i32_1 = arith.constant 0 : i32
    return %c0_i32, %c0_i32_0 : i32, i32
  }
  func.func @transform_35(%arg0: i32) -> (i32, i32) {
    %c0_i32 = arith.constant 0 : i32
    %c0_i32_0 = arith.constant 0 : i32
    %c0_i32_1 = arith.constant 0 : i32
    return %c0_i32, %c0_i32_0 : i32, i32
  }
  func.func @transform_36(%arg0: i32) -> (i32, i32) {
    %c0_i32 = arith.constant 0 : i32
    %c0_i32_0 = arith.constant 0 : i32
    %c0_i32_1 = arith.constant 0 : i32
    return %c0_i32, %c0_i32_0 : i32, i32
  }
  func.func @transform_37(%arg0: i32) -> (i32, i32) {
    %c0_i32 = arith.constant 0 : i32
    %c0_i32_0 = arith.constant 0 : i32
    %c0_i32_1 = arith.constant 0 : i32
    return %c0_i32, %c0_i32_0 : i32, i32
  }
  func.func @transform_38(%arg0: i32) -> (i32, i32) {
    %c0_i32 = arith.constant 0 : i32
    %c0_i32_0 = arith.constant 0 : i32
    %c0_i32_1 = arith.constant 0 : i32
    return %c0_i32, %c0_i32_0 : i32, i32
  }
  func.func @transform_39(%arg0: i32) -> (i32, i32) {
    %c0_i32 = arith.constant 0 : i32
    %c0_i32_0 = arith.constant 0 : i32
    %c0_i32_1 = arith.constant 0 : i32
    return %c0_i32, %c0_i32_0 : i32, i32
  }
  func.func @transform_40(%arg0: i32) -> (i32, i32, i32) {
    %c0_i32 = arith.constant 0 : i32
    %c0_i32_0 = arith.constant 0 : i32
    %c0_i32_1 = arith.constant 0 : i32
    %c0_i32_2 = arith.constant 0 : i32
    return %c0_i32, %c0_i32_0, %c0_i32_1 : i32, i32, i32
  }
  func.func @transform_41(%arg0: i32) -> (i32, i32) {
    %c0_i32 = arith.constant 0 : i32
    %c0_i32_0 = arith.constant 0 : i32
    %c0_i32_1 = arith.constant 0 : i32
    return %c0_i32, %c0_i32_0 : i32, i32
  }
  func.func @transform_42(%arg0: i32) -> (i32, i32) {
    %c0_i32 = arith.constant 0 : i32
    %c0_i32_0 = arith.constant 0 : i32
    %c0_i32_1 = arith.constant 0 : i32
    return %c0_i32, %c0_i32_0 : i32, i32
  }
  func.func @transform_43(%arg0: i32) -> (i32, i32) {
    %c0_i32 = arith.constant 0 : i32
    %c0_i32_0 = arith.constant 0 : i32
    %c0_i32_1 = arith.constant 0 : i32
    return %c0_i32, %c0_i32_0 : i32, i32
  }
  func.func @transform_44(%arg0: i32) -> (i32, i32) {
    %c0_i32 = arith.constant 0 : i32
    %c0_i32_0 = arith.constant 0 : i32
    %c0_i32_1 = arith.constant 0 : i32
    return %c0_i32, %c0_i32_0 : i32, i32
  }
  func.func @transform_45(%arg0: i32) -> (i32, i32) {
    %c0_i32 = arith.constant 0 : i32
    %c0_i32_0 = arith.constant 0 : i32
    %c0_i32_1 = arith.constant 0 : i32
    return %c0_i32, %c0_i32_0 : i32, i32
  }
  func.func @transform_46(%arg0: i32) -> (i32, i32) {
    %c0_i32 = arith.constant 0 : i32
    %c0_i32_0 = arith.constant 0 : i32
    %c0_i32_1 = arith.constant 0 : i32
    return %c0_i32, %c0_i32_0 : i32, i32
  }
  func.func @transform_47(%arg0: i32) -> (i32, i32, i32) {
    %c0_i32 = arith.constant 0 : i32
    %c0_i32_0 = arith.constant 0 : i32
    %c0_i32_1 = arith.constant 0 : i32
    %c0_i32_2 = arith.constant 0 : i32
    return %c0_i32, %c0_i32_0, %c0_i32_1 : i32, i32, i32
  }
  func.func @transform_48(%arg0: i32) -> (i32, i32) {
    %c0_i32 = arith.constant 0 : i32
    %c0_i32_0 = arith.constant 0 : i32
    %c0_i32_1 = arith.constant 0 : i32
    return %c0_i32, %c0_i32_0 : i32, i32
  }
  func.func @transform_49(%arg0: i32) -> (i32, i32) {
    %c0_i32 = arith.constant 0 : i32
    %c0_i32_0 = arith.constant 0 : i32
    %c0_i32_1 = arith.constant 0 : i32
    return %c0_i32, %c0_i32_0 : i32, i32
  }
  func.func @transform_50(%arg0: i32) -> (i32, i32, i32) {
    %c0_i32 = arith.constant 0 : i32
    %c0_i32_0 = arith.constant 0 : i32
    %c0_i32_1 = arith.constant 0 : i32
    return %arg0, %c0_i32, %c0_i32_0 : i32, i32, i32
  }
}

</mosaic_0001>

<bundles_post_ra>
// kernel: nkeaen_bert_apply.1
= control target key start
LH: loop header
LB: loop body
LE: loop exit
PB: predicated region body
PF: predicated region fallthrough
CT: control target
= control target key end

     0   :  { %s11544_s6 = smov 1   ;;  %s11545_s10 = smov 2   ;;  %s13869_s0 = inlined_call_operand.smem [shape: u32[51], index: -1, kind: input, shape index: {}] }
   0x1   :  { %s11664_s5 = sld [smem:[%s13869_s0]]   ;;  %s11546_s14 = smov 3  }
   0x2   :  { %s11669_s9 = sld [smem:[%s13869_s0 + %s11544_s6]]   ;;  %s11547_s18 = smov 4  }
   0x3   :  { %s11674_s13 = sld [smem:[%s13869_s0 + %s11545_s10]]   ;;  %s11548_s22 = smov 5  }
   0x4   :  { %s11679_s17 = sld [smem:[%s13869_s0 + %s11546_s14]]   ;;  %s11549_s26 = smov 6  }
   0x5   :  { %s11684_s21 = sld [smem:[%s13869_s0 + %s11547_s18]]   ;;  %s11550_s30 = smov 7  }
   0x6   :  { %s11689_s25 = sld [smem:[%s13869_s0 + %s11548_s22]]   ;;  %s11551_s4 = smov 8  }
   0x7   :  { %13966 = sst [smem:[#allocation107_spill]] %s11664_s5  ;;  %s11552_s10 = smov 9  }
   0x8   :  { %13967 = sst [smem:[#allocation108_spill]] %s11669_s9  ;;  %s11553_s15 = smov 10  }
   0x9   :  { %13968 = sst [smem:[#allocation109_spill]] %s11674_s13  ;;  %s11554_s20 = smov 11  }
   0xa   :  { %13969 = sst [smem:[#allocation110_spill]] %s11679_s17  ;;  %s11556_s1 = smov 13  }
   0xb   :  { %13970 = sst [smem:[#allocation111_spill]] %s11684_s21  ;;  %s11557_s7 = smov 14  }
   0xc   :  { %s11694_s29 = sld [smem:[%s13869_s0 + %s11549_s26]]   ;;  %s11555_s26 = smov 12  }
   0xd   :  { %s11699_s3 = sld [smem:[%s13869_s0 + %s11550_s30]]   ;;  %s11559_s22 = smov 16  }
   0xe   :  { %s11704_s8 = sld [smem:[%s13869_s0 + %s11551_s4]]   ;;  %s11560_s28 = smov 17  }
   0xf   :  { %s11709_s14 = sld [smem:[%s13869_s0 + %s11552_s10]]  }
  0x10   :  { %s11714_s19 = sld [smem:[%s13869_s0 + %s11553_s15]]   ;;  %s11558_s15 = smov 15  }
  0x11   :  { %s11719_s24 = sld [smem:[%s13869_s0 + %s11554_s20]]  }
  0x12   :  { %13971 = sst [smem:[#allocation112_spill]] %s11694_s29 }
  0x13   :  { %13972 = sst [smem:[#allocation113_spill]] %s11699_s3 }
  0x14   :  { %13973 = sst [smem:[#allocation114_spill]] %s11704_s8 }
  0x15   :  { %13974 = sst [smem:[#allocation115_spill]] %s11709_s14 }
  0x16   :  { %13975 = sst [smem:[#allocation116_spill]] %s11714_s19 }
  0x17   :  { %s11724_s30 = sld [smem:[%s13869_s0 + %s11555_s26]]  }
  0x18   :  { %s11729_s6 = sld [smem:[%s13869_s0 + %s11556_s1]]  }
  0x19   :  { %s11734_s12 = sld [smem:[%s13869_s0 + %s11557_s7]]   ;;  %s11561_s7 = smov 18  }
  0x1a   :  { %s11739_s20 = sld [smem:[%s13869_s0 + %s11558_s15]]   ;;  %s11562_s15 = smov 19  }
  0x1b   :  { %s11744_s27 = sld [smem:[%s13869_s0 + %s11559_s22]]   ;;  %s11563_s22 = smov 20  }
  0x1c   :  { %s11749_s4 = sld [smem:[%s13869_s0 + %s11560_s28]]   ;;  %s11564_s28 = smov 21  }
  0x1d   :  { %13976 = sst [smem:[#allocation117_spill]] %s11724_s30 }
  0x1e   :  { %13977 = sst [smem:[#allocation118_spill]] %s11729_s6 }
  0x1f   :  { %13978 = sst [smem:[#allocation119_spill]] %s11734_s12 }
  0x20   :  { %s11754_s5 = sld [smem:[%s13869_s0 + %s11561_s7]]   ;;  %s11565_s7 = smov 22  }
  0x21   :  { %13979 = sst [smem:[#allocation120_spill]] %s11744_s27 }
  0x22   :  { %13980 = sst [smem:[#allocation121_spill]] %s11749_s4 }
  0x23   :  { %s11759_s13 = sld [smem:[%s13869_s0 + %s11562_s15]]   ;;  %s11566_s15 = smov 23  }
  0x24   :  { %s11764_s9 = sld [smem:[%s13869_s0 + %s11563_s22]]   ;;  %s11567_s22 = smov 24  }
  0x25   :  { %s11769_s27 = sld [smem:[%s13869_s0 + %s11564_s28]]   ;;  %s11568_s28 = smov 25  }
  0x26   :  { %13981 = sst [smem:[#allocation122_spill]] %s11754_s5 }
  0x27   :  { %s11774_s5 = sld [smem:[%s13869_s0 + %s11565_s7]]   ;;  %s11569_s7 = smov 26  }
  0x28   :  { %s11779_s12 = sld [smem:[%s13869_s0 + %s11566_s15]]   ;;  %s11570_s15 = smov 27  }
  0x29   :  { %13982 = sst [smem:[#allocation123_spill]] %s11759_s13 }
  0x2a   :  { %13983 = sst [smem:[#allocation124_spill]] %s11764_s9 }
  0x2b   :  { %s11784_s9 = sld [smem:[%s13869_s0 + %s11567_s22]]   ;;  %s11571_s22 = smov 28  }
  0x2c   :  { %s11789_s30 = sld [smem:[%s13869_s0 + %s11568_s28]]   ;;  %s11572_s28 = smov 29  }
  0x2d   :  { %13984 = sst [smem:[#allocation125_spill]] %s11774_s5 }
  0x2e   :  { %13985 = sst [smem:[#allocation126_spill]] %s11779_s12 }
  0x2f   :  { %s11794_s5 = sld [smem:[%s13869_s0 + %s11569_s7]]   ;;  %s11573_s7 = smov 30  }
  0x30   :  { %s11799_s19 = sld [smem:[%s13869_s0 + %s11570_s15]]   ;;  %s11574_s15 = smov 31  }
  0x31   :  { %13986 = sst [smem:[#allocation127_spill]] %s11784_s9 }
  0x32   :  { %s11804_s9 = sld [smem:[%s13869_s0 + %s11571_s22]]   ;;  %s11575_s22 = smov 32  }
  0x33   :  { %s11809_s8 = sld [smem:[%s13869_s0 + %s11572_s28]]   ;;  %s11576_s28 = smov 33  }
  0x34   :  { %s11819_s29 = sld [smem:[%s13869_s0 + %s11574_s15]]   ;;  %s11578_s15 = smov 35  }
  0x35   :  { %13987 = sst [smem:[#allocation128_spill]] %s11794_s5 }
  0x36   :  { %s11814_s5 = sld [smem:[%s13869_s0 + %s11573_s7]]   ;;  %s11577_s7 = smov 34  }
  0x37   :  { %s11829_s21 = sld [smem:[%s13869_s0 + %s11576_s28]]   ;;  %s11580_s28 = smov 37  }
  0x38   :  { %13988 = sst [smem:[#allocation129_spill]] %s11804_s9 }
  0x39   :  { %13989 = sst [smem:[#allocation130_spill]] %s11809_s8 }
  0x3a   :  { %13991 = sst [smem:[#allocation132_spill]] %s11819_s29 }
  0x3b   :  { %s11824_s9 = sld [smem:[%s13869_s0 + %s11575_s22]]   ;;  %s11579_s22 = smov 36  }
  0x3c   :  { %13990 = sst [smem:[#allocation131_spill]] %s11814_s5 }
  0x3d   :  { %13993 = sst [smem:[#allocation134_spill]] %s11829_s21 }
  0x3e   :  { %s11834_s5 = sld [smem:[%s13869_s0 + %s11577_s7]]   ;;  %s11581_s7 = smov 38  }
  0x3f   :  { %s11839_s29 = sld [smem:[%s13869_s0 + %s11578_s15]]   ;;  %s11582_s15 = smov 39  }
  0x40   :  { %s11849_s21 = sld [smem:[%s13869_s0 + %s11580_s28]]   ;;  %s11584_s28 = smov 41  }
  0x41   :  { %13992 = sst [smem:[#allocation133_spill]] %s11824_s9 }
  0x42   :  { %s11844_s9 = sld [smem:[%s13869_s0 + %s11579_s22]]   ;;  %s11583_s22 = smov 40  }
  0x44   :  { %13994 = sst [smem:[#allocation135_spill]] %s11834_s5 }
  0x45   :  { %13995 = sst [smem:[#allocation136_spill]] %s11839_s29 }
  0x46   :  { %13997 = sst [smem:[#allocation138_spill]] %s11849_s21 }
  0x47   :  { %s11854_s5 = sld [smem:[%s13869_s0 + %s11581_s7]]   ;;  %s11585_s7 = smov 42  }
  0x48   :  { %13996 = sst [smem:[#allocation137_spill]] %s11844_s9 }
  0x49   :  { %s11859_s29 = sld [smem:[%s13869_s0 + %s11582_s15]]   ;;  %s11586_s15 = smov 43  }
  0x4a   :  { %s11864_s9 = sld [smem:[%s13869_s0 + %s11583_s22]]   ;;  %s11587_s22 = smov 44  }
  0x4b   :  { %s11869_s21 = sld [smem:[%s13869_s0 + %s11584_s28]]   ;;  %s11588_s28 = smov 45  }
  0x4d   :  { %13998 = sst [smem:[#allocation139_spill]] %s11854_s5 }
  0x4e   :  { %s11874_s5 = sld [smem:[%s13869_s0 + %s11585_s7]]   ;;  %s11589_s7 = smov 46  }
  0x4f   :  { %13999 = sst [smem:[#allocation140_spill]] %s11859_s29 }
  0x50   :  { %14000 = sst [smem:[#allocation141_spill]] %s11864_s9 }
  0x51   :  { %14001 = sst [smem:[#allocation142_spill]] %s11869_s21 }
  0x52   :  { %s11879_s29 = sld [smem:[%s13869_s0 + %s11586_s15]]   ;;  %s11590_s15 = smov 47  }
  0x53   :  { %s11884_s9 = sld [smem:[%s13869_s0 + %s11587_s22]]   ;;  %s11591_s22 = smov 48  }
  0x54   :  { %14002 = sst [smem:[#allocation143_spill]] %s11874_s5 }
  0x55   :  { %s11889_s21 = sld [smem:[%s13869_s0 + %s11588_s28]]   ;;  %s11592_s28 = smov 49  }
  0x56   :  { %s11894_s5 = sld [smem:[%s13869_s0 + %s11589_s7]]   ;;  %s11593_s7 = smov 50  }
  0x58   :  { %14003 = sst [smem:[#allocation144_spill]] %s11879_s29 }
  0x59   :  { %14004 = sst [smem:[#allocation145_spill]] %s11884_s9 }
  0x5a   :  { %s11899_s29 = sld [smem:[%s13869_s0 + %s11590_s15]]  }
  0x5b   :  { %14005 = sst [smem:[#allocation146_spill]] %s11889_s21 }
  0x5c   :  { %14006 = sst [smem:[#allocation147_spill]] %s11894_s5 }
  0x5d   :  { %s11904_s9 = sld [smem:[%s13869_s0 + %s11591_s22]]  }
  0x5e   :  { %s11909_s21 = sld [smem:[%s13869_s0 + %s11592_s28]]  }
  0x5f   :  { %s11914_s5 = sld [smem:[%s13869_s0 + %s11593_s7]]  }
  0x63   :  { %14007 = sst [smem:[#allocation148_spill]] %s11904_s9 }
  0x65   :  { %14008 = sst [smem:[#allocation149_spill]] %s11914_s5 }
  0x66   :  { %106 = vsyncpa [#allocation3], 0 }
  0x67   :  { %108 = vsyncpa [#allocation3 + $0x1], 0 }
  0x68   :  { %109 = vsyncpa [#allocation6], 0 }
  0x69   :  { %111 = vsyncpa [#allocation6 + $0x1], 0 }
  0x6a   :  { %112 = vsyncpa [#allocation9], 0 }
  0x6b   :  { %113 = vsyncpa [#allocation12], 0 }
  0x6c   :  { %114 = vsyncpa [#allocation15], 0 }
  0x6d   :  { %115 = vsyncpa [#allocation18], 0 }
  0x6e   :  { %116 = vsyncpa [#allocation21], 0 }
  0x6f   :  { %117 = vsyncpa [#allocation24], 0 }
  0x70   :  { %118 = vsyncpa [#allocation27], 0 }
  0x71   :  { %119 = vsyncpa [#allocation30], 0 }
  0x72   :  { %120 = vsyncpa [#allocation33], 0 }
  0x73   :  { %121 = vsyncpa [#allocation36], 0 }
  0x74   :  { %122 = vsyncpa [#allocation39], 0 }
  0x75   :  { %123 = vsyncpa [#allocation42], 0 }
  0x76   :  { %124 = vsyncpa [#allocation45], 0 }
  0x77   :  { %125 = vsyncpa [#allocation48], 0 }
  0x78   :  { %126 = vsyncpa [#allocation51], 0 }
  0x79   :  { %127 = vsyncpa [#allocation54], 0 }
  0x7a   :  { %128 = vsyncpa [#allocation57], 0 }
  0x7b   :  { %129 = vsyncpa [#allocation60], 0 }
  0x7c   :  { %130 = vsyncpa [#allocation63], 0 }
  0x7d   :  { %131 = vsyncpa [#allocation66], 0 }
  0x7e   :  { %132 = vsyncpa [#allocation69], 0 }
  0x7f   :  { %133 = vsyncpa [#allocation72], 0 }
  0x80   :  { %134 = vsyncpa [#allocation75], 0 }
  0x81   :  { %135 = vsyncpa [#allocation78], 0 }
  0x82   :  { %136 = vsyncpa [#allocation4], 0 }
  0x83   :  { %138 = vsyncpa [#allocation4 + $0x1], 0  ;;  %s11916_s0 = smov 0   ;;  %s11918_s15 = smov 0  }
  0x84   :  { %s11920_s16 = smov 0   ;;  %s11922_s18 = smov 0  }
  0x85 LB: > { %s14009_s17 = sld [smem:[#allocation110_spill]]  ;;  %s14010_s9 = sld [smem:[#allocation148_spill]]  ;;  %s11530_s0 = sphi %s11916_s0, %s14134_s0   ;;  %s11542_s18 = sphi %s11922_s18, %s14133_s18   ;;  %s11538_s16 = sphi %s11920_s16, %s14137_s16   ;;  %s11534_s15 = sphi %s11918_s15, %s14136_s15  }
  0x86   : > { %s14011_s14 = sld [smem:[#allocation115_spill]]  ;;  %s14013_s12 = sld [smem:[#allocation126_spill]] }
  0x87   : > { %s14012_s13 = sld [smem:[#allocation123_spill]]  ;;  %s14014_s8 = sld [smem:[#allocation130_spill]] }
  0x88   : > { %s14015_s6 = sld [smem:[#allocation118_spill]]  ;;  %s14016_s4 = sld [smem:[#allocation121_spill]] }
  0x89   : > { %s14017_s3 = sld [smem:[#allocation113_spill]]  ;;  %14019 = sst [smem:[#allocation151_spill]] %s11534_s15 }
  0x8a   : > { %14018 = sst [smem:[#allocation150_spill]] %s11530_s0  ;;  %s11937_s22 = sadd.s32 4294967295, %s11542_s18  }
  0x8b   : > { %s8406_s23 = sadd.s32 4294967294, %s11542_s18   ;;  %s11941_s26 = sadd.s32 1, %s11542_s18  }
  0x8c   : > { %14020 = sst [smem:[#allocation152_spill]] %s11941_s26  ;;  %s151_s28 = sadd.s32 1, %s11538_s16 }
  0x8d   : > { %s148_s1 = ssub.s32 %s11542_s18, %s11941_s26  ;;  %p158_p0 = scmp.ne.s32.totalorder %s11538_s16, %s11534_s15 }
  0x8e   : > { %p149_p1 = scmp.eq.s32.totalorder %s148_s1, 0  ;;  %p159_p2 = scmp.eq.s32.totalorder %s11542_s18, 0 }
  0x8f   : > { %p164_p3 = scmp.ne.s32.totalorder %s11534_s15, %s11530_s0  ;;  %p13959_p4 = scmp.eq.s32.totalorder %s11937_s22, 0 }
  0x90   : > { %s11953_s2 = scalar_select %p149_p1, %s11538_s16, %s151_s28  }
  0x91   : > { %p11955_p5 = por %p159_p2, %p158_p0  ;;  %p11961_p6 = por %p13959_p4, %p164_p3 }
  0x92   : > { %14021 = sst [smem:[#allocation153_spill]] %s11953_s2  ;;  %p1227_p7 = scmp.eq.s32.totalorder %s11937_s22, 1 }
  0x93   : > { %s14023_s10 = scalar_select %p11961_p6, 1, 0 }
  0x94   : > { %p1233_p8 = scmp.eq.s32.totalorder %s8406_s23, 1  ;;  %p8407_p9 = scmp.ge.s32.totalorder %s11542_s18, 1 }
  0x95   : > { %14024 = sst [smem:[#allocation154_spill]] %s14023_s10  ;;  %p1240_p10 = scmp.lt.s32.totalorder %s11542_s18, 3 }
  0x96   : > { %p11968_p11 = por %p1227_p7, %p158_p0  ;;  %p11972_p12 = por %p1233_p8, %p164_p3 }
  0x97   : > { %p11976_p13 = pnand %p8407_p9, %p1240_p10 }
  0x98   : > { %s14025_s11 = scalar_select %p11968_p11, 1, 0 }
  0x99   : > { %s14027_s28 = scalar_select %p11972_p12, 1, 0 }
  0x9a   : > { %14026 = sst [smem:[#allocation155_spill]] %s14025_s11  ;;  %1244 = sbr.rel (%p11976_p13) target bundleno = 1314 (0x522), region = 12 }
  0x9b   : > { %14028 = sst [smem:[#allocation156_spill]] %s14027_s28  ;;  %s11594_s2 = smov (!%p11976_p13), [#allocation8]  }
  0x9c   : > { %s14029_s1 = scalar_select %p11976_p13, 1, 0 }
  0x9d   : > { %s1252_s23 = sshll.u32 (!%p11976_p13), %s11594_s2, 4  ;;  %s10064_s26 = scalar_lea.hbm (!%p11976_p13), %s14009_s17, 512  ;;  %s1253_s23 = int_to_ptr.vmem [resolvable:$true] %s1252_s23 }
  0x9e   : > { %p10065_p0 = scmp.ne.s32.totalorder (!%p11976_p13), %s14009_s17, %s10064_s26  ;;  %p10070_p3 = scmp.lt.u32.totalorder (!%p11976_p13), %s10064_s26, %s14009_s17 }
  0xa0   : > { %p10066_p1 = pnand (!%p11976_p13), %p10065_p0, %p13959_p4 }
  0xa2   : > { %p10067_p2 = pneg %p10066_p1 }
  0xa4   : > { %p10072_p7 = pnand %p10070_p3, %p10067_p2 }
  0xa6   : > { %10075 = shalt.err (!%p10072_p7)
}
  0xa7   : > { %s10076_s28 = scalar_lea.vmem %s1253_s23, 512  ;;  %p10083_p12 = scmp.lt.s32.totalorder %s1253_s23, %s1253_s23 }
  0xa8   : > { %p10077_p8 = scmp.ne.s32.totalorder %s1253_s23, %s10076_s28  ;;  %p10084_p11 = scmp.lt.s32.totalorder %s10076_s28, %s10076_s28 }
  0xaa   : > { %p10078_p9 = pnand %p10077_p8, %p13959_p4  ;;  %p10085_p6 = por %p10084_p11, %p10083_p12 }
  0xac   : > { %p10079_p10 = pneg %p10078_p9 }
  0xae   : > { %p10086_p13 = pnand %p10085_p6, %p10079_p10 }
  0xb0   : > { %10089 = shalt.err (!%p10086_p13)
}
  0xb1   : > { %s13916_s2 = smov 64   ;;  %s13918_s26 = smov 4  }
  0xb2   : > { %9269 = dma.hbm_to_vmem [thread:$0]  (%p13959_p4), %s14009_s17, 512, %s1253_s23, [#allocation9], %s13916_s2, %s13916_s2, %s13918_s26  }
  0xb3   : > { %s11597_s0 = smov [#allocation11]   ;;  %s11598_s5 = smov [#allocation14]  }
  0xb4   : > { %s1276_s11 = sshll.u32 %s11597_s0, 4  ;;  %s1300_s28 = sshll.u32 %s11598_s5, 4  ;;  %s1277_s11 = int_to_ptr.vmem [resolvable:$true] %s1276_s11  ;;  %s11995_s28 = int_to_ptr.vmem [resolvable:$true] %s1300_s28 }
  0xb5   : > { %s10090_s10 = scalar_lea.hbm %s11689_s25, 512 }
  0xb6   : > { %p10091_p6 = scmp.ne.s32.totalorder %s11689_s25, %s10090_s10  ;;  %p10096_p13 = scmp.lt.u32.totalorder %s10090_s10, %s11689_s25 }
  0xb8   : > { %p10092_p11 = pnand %p10091_p6, %p13959_p4 }
  0xba   : > { %p10093_p12 = pneg %p10092_p11 }
  0xbc   : > { %p10098_p0 = pnand %p10096_p13, %p10093_p12 }
  0xbe   : > { %10101 = shalt.err (!%p10098_p0)
}
  0xbf   : > { %s10102_s15 = scalar_lea.vmem %s1277_s11, 512  ;;  %p10109_p7 = scmp.lt.s32.totalorder %s1277_s11, %s1277_s11 }
  0xc0   : > { %p10103_p1 = scmp.ne.s32.totalorder %s1277_s11, %s10102_s15  ;;  %p10110_p8 = scmp.lt.s32.totalorder %s10102_s15, %s10102_s15 }
  0xc2   : > { %p10104_p2 = pnand %p10103_p1, %p13959_p4  ;;  %p10111_p9 = por %p10110_p8, %p10109_p7 }
  0xc4   : > { %p10105_p3 = pneg %p10104_p2 }
  0xc6   : > { %p10112_p10 = pnand %p10111_p9, %p10105_p3 }
  0xc8   : > { %10115 = shalt.err (!%p10112_p10)
}
  0xc9   : > { %9273 = dma.hbm_to_vmem [thread:$0]  (%p13959_p4), %s11689_s25, 512, %s1277_s11, [#allocation12], %s13916_s2, %s13916_s2, %s13918_s26  }
  0xca   : > { %s10116_s5 = scalar_lea.hbm %s14017_s3, 128 }
  0xcb   : > { %p10117_p6 = scmp.ne.s32.totalorder %s14017_s3, %s10116_s5  ;;  %p10122_p13 = scmp.lt.u32.totalorder %s10116_s5, %s14017_s3 }
  0xcd   : > { %p10118_p11 = pnand %p10117_p6, %p13959_p4 }
  0xcf   : > { %p10119_p12 = pneg %p10118_p11 }
  0xd1   : > { %p10124_p0 = pnand %p10122_p13, %p10119_p12 }
  0xd3   : > { %10127 = shalt.err (!%p10124_p0)
}
  0xd4   : > { %s10128_s0 = scalar_lea.vmem %s11995_s28, 128  ;;  %p10135_p7 = scmp.lt.s32.totalorder %s11995_s28, %s11995_s28 }
  0xd5   : > { %p10129_p1 = scmp.ne.s32.totalorder %s11995_s28, %s10128_s0  ;;  %p10136_p8 = scmp.lt.s32.totalorder %s10128_s0, %s10128_s0 }
  0xd7   : > { %p10130_p2 = pnand %p10129_p1, %p13959_p4  ;;  %p10137_p9 = por %p10136_p8, %p10135_p7 }
  0xd9   : > { %p10131_p3 = pneg %p10130_p2 }
  0xdb   : > { %p10138_p10 = pnand %p10137_p9, %p10131_p3 }
  0xdd   : > { %10141 = shalt.err (!%p10138_p10)
}
  0xde   : > { %s13920_s15 = smov 16   ;;  %s13922_s10 = smov 1  }
  0xdf   : > { %9277 = dma.hbm_to_vmem [thread:$0]  (%p13959_p4), %s14017_s3, 128, %s11995_s28, [#allocation15], %s13920_s15, %s13920_s15, %s13922_s10  }
  0xe0   : > { %s11601_s11 = smov [#allocation17]   ;;  %s11602_s5 = smov [#allocation20]  }
  0xe1   : > { %s1327_s23 = sshll.u32 %s11601_s11, 4  ;;  %s1351_s0 = sshll.u32 %s11602_s5, 4  ;;  %s1328_s23 = int_to_ptr.vmem [resolvable:$true] %s1327_s23  ;;  %s12028_s0 = int_to_ptr.vmem [resolvable:$true] %s1351_s0 }
  0xe2   : > { %s10142_s2 = scalar_lea.hbm %s14011_s14, 16 }
  0xe3   : > { %p10143_p6 = scmp.ne.s32.totalorder %s14011_s14, %s10142_s2  ;;  %p10148_p13 = scmp.lt.u32.totalorder %s10142_s2, %s14011_s14 }
  0xe5   : > { %p10144_p11 = pnand %p10143_p6, %p13959_p4 }
  0xe7   : > { %p10145_p12 = pneg %p10144_p11 }
  0xe9   : > { %p10150_p0 = pnand %p10148_p13, %p10145_p12 }
  0xeb   : > { %10153 = shalt.err (!%p10150_p0)
}
  0xec   : > { %s10154_s26 = scalar_lea.vmem %s1328_s23, 16  ;;  %s10160_s28 = scalar_lea.vmem %s1328_s23, 32 }
  0xed   : > { %p10155_p1 = scmp.ne.s32.totalorder %s1328_s23, %s10154_s26  ;;  %p10161_p7 = scmp.lt.s32.totalorder %s1328_s23, %s1328_s23 }
  0xee   : > { %p10162_p8 = scmp.lt.s32.totalorder %s10160_s28, %s10154_s26 }
  0xef   : > { %p10156_p2 = pnand %p10155_p1, %p13959_p4 }
  0xf0   : > { %p10163_p9 = por %p10162_p8, %p10161_p7 }
  0xf1   : > { %p10157_p3 = pneg %p10156_p2 }
  0xf3   : > { %p10164_p10 = pnand %p10163_p9, %p10157_p3 }
  0xf5   : > { %10167 = shalt.err (!%p10164_p10)
}
  0xf6   : > { %9281 = dma.hbm_to_vmem [thread:$0]  (%p13959_p4), %s14011_s14, 16, %s1328_s23, [#allocation18]  }
  0xf7   : > { %s10168_s2 = scalar_lea.hbm %s11719_s24, 16 }
  0xf8   : > { %p10169_p6 = scmp.ne.s32.totalorder %s11719_s24, %s10168_s2  ;;  %p10174_p13 = scmp.lt.u32.totalorder %s10168_s2, %s11719_s24 }
  0xfa   : > { %p10170_p11 = pnand %p10169_p6, %p13959_p4 }
  0xfc   : > { %p10171_p12 = pneg %p10170_p11 }
  0xfe   : > { %p10176_p0 = pnand %p10174_p13, %p10171_p12 }
 0x100   : > { %10179 = shalt.err (!%p10176_p0)
}
 0x101   : > { %s10180_s26 = scalar_lea.vmem %s12028_s0, 16  ;;  %s10186_s11 = scalar_lea.vmem %s12028_s0, 32 }
 0x102   : > { %p10181_p1 = scmp.ne.s32.totalorder %s12028_s0, %s10180_s26  ;;  %p10187_p7 = scmp.lt.s32.totalorder %s12028_s0, %s12028_s0 }
 0x103   : > { %p10188_p8 = scmp.lt.s32.totalorder %s10186_s11, %s10180_s26 }
 0x104   : > { %p10182_p2 = pnand %p10181_p1, %p13959_p4 }
 0x105   : > { %p10189_p9 = por %p10188_p8, %p10187_p7 }
 0x106   : > { %p10183_p3 = pneg %p10182_p2 }
 0x108   : > { %p10190_p10 = pnand %p10189_p9, %p10183_p3 }
 0x10a   : > { %10193 = shalt.err (!%p10190_p10)
}
 0x10b   : > { %9285 = dma.hbm_to_vmem [thread:$0]  (%p13959_p4), %s11719_s24, 16, %s12028_s0, [#allocation21]  }
 0x10c   : > { %s11603_s23 = smov [#allocation23]   ;;  %s11604_s28 = smov [#allocation26]  }
 0x10d   : > { %s1375_s5 = sshll.u32 %s11603_s23, 4  ;;  %s1399_s2 = sshll.u32 %s11604_s28, 4  ;;  %s1376_s5 = int_to_ptr.vmem [resolvable:$true] %s1375_s5  ;;  %s12056_s2 = int_to_ptr.vmem [resolvable:$true] %s1399_s2 }
 0x10e   : > { %s10194_s26 = scalar_lea.hbm %s14015_s6, 16 }
 0x10f   : > { %p10195_p6 = scmp.ne.s32.totalorder %s14015_s6, %s10194_s26  ;;  %p10200_p13 = scmp.lt.u32.totalorder %s10194_s26, %s14015_s6 }
 0x111   : > { %p10196_p11 = pnand %p10195_p6, %p13959_p4 }
 0x113   : > { %p10197_p12 = pneg %p10196_p11 }
 0x115   : > { %p10202_p0 = pnand %p10200_p13, %p10197_p12 }
 0x117   : > { %10205 = shalt.err (!%p10202_p0)
}
 0x118   : > { %s10206_s11 = scalar_lea.vmem %s1376_s5, 16  ;;  %s10212_s0 = scalar_lea.vmem %s1376_s5, 32 }
 0x119   : > { %p10207_p1 = scmp.ne.s32.totalorder %s1376_s5, %s10206_s11  ;;  %p10213_p7 = scmp.lt.s32.totalorder %s1376_s5, %s1376_s5 }
 0x11a   : > { %p10214_p8 = scmp.lt.s32.totalorder %s10212_s0, %s10206_s11 }
 0x11b   : > { %p10208_p2 = pnand %p10207_p1, %p13959_p4 }
 0x11c   : > { %p10215_p9 = por %p10214_p8, %p10213_p7 }
 0x11d   : > { %p10209_p3 = pneg %p10208_p2 }
 0x11f   : > { %p10216_p10 = pnand %p10215_p9, %p10209_p3 }
 0x121   : > { %10219 = shalt.err (!%p10216_p10)
}
 0x122   : > { %9289 = dma.hbm_to_vmem [thread:$0]  (%p13959_p4), %s14015_s6, 16, %s1376_s5, [#allocation24]  }
 0x123   : > { %s10220_s23 = scalar_lea.hbm %s11739_s20, 16 }
 0x124   : > { %p10221_p6 = scmp.ne.s32.totalorder %s11739_s20, %s10220_s23  ;;  %p10226_p13 = scmp.lt.u32.totalorder %s10220_s23, %s11739_s20 }
 0x126   : > { %p10222_p11 = pnand %p10221_p6, %p13959_p4 }
 0x128   : > { %p10223_p12 = pneg %p10222_p11 }
 0x12a   : > { %p10228_p0 = pnand %p10226_p13, %p10223_p12 }
 0x12c   : > { %10231 = shalt.err (!%p10228_p0)
}
 0x12d   : > { %s10232_s28 = scalar_lea.vmem %s12056_s2, 16  ;;  %s10238_s26 = scalar_lea.vmem %s12056_s2, 32 }
 0x12e   : > { %p10233_p1 = scmp.ne.s32.totalorder %s12056_s2, %s10232_s28  ;;  %p10239_p7 = scmp.lt.s32.totalorder %s12056_s2, %s12056_s2 }
 0x12f   : > { %p10240_p8 = scmp.lt.s32.totalorder %s10238_s26, %s10232_s28 }
 0x130   : > { %p10234_p2 = pnand %p10233_p1, %p13959_p4 }
 0x131   : > { %p10241_p9 = por %p10240_p8, %p10239_p7 }
 0x132   : > { %p10235_p3 = pneg %p10234_p2 }
 0x134   : > { %p10242_p10 = pnand %p10241_p9, %p10235_p3 }
 0x136   : > { %10245 = shalt.err (!%p10242_p10)
}
 0x137   : > { %9293 = dma.hbm_to_vmem [thread:$0]  (%p13959_p4), %s11739_s20, 16, %s12056_s2, [#allocation27]  }
 0x138   : > { %s11605_s5 = smov [#allocation29]   ;;  %s11606_s0 = smov [#allocation32]  }
 0x139   : > { %s1423_s11 = sshll.u32 %s11605_s5, 4  ;;  %s1446_s23 = sshll.u32 %s11606_s0, 4  ;;  %s1424_s11 = int_to_ptr.vmem [resolvable:$true] %s1423_s11  ;;  %s12084_s23 = int_to_ptr.vmem [resolvable:$true] %s1446_s23 }
 0x13a   : > { %s10246_s28 = scalar_lea.hbm %s14016_s4, 16 }
 0x13b   : > { %p10247_p6 = scmp.ne.s32.totalorder %s14016_s4, %s10246_s28  ;;  %p10252_p13 = scmp.lt.u32.totalorder %s10246_s28, %s14016_s4 }
 0x13d   : > { %p10248_p11 = pnand %p10247_p6, %p13959_p4 }
 0x13f   : > { %p10249_p12 = pneg %p10248_p11 }
 0x141   : > { %p10254_p0 = pnand %p10252_p13, %p10249_p12 }
 0x143   : > { %10257 = shalt.err (!%p10254_p0)
}
 0x144   : > { %s10258_s26 = scalar_lea.vmem %s1424_s11, 16  ;;  %s10264_s2 = scalar_lea.vmem %s1424_s11, 32 }
 0x145   : > { %p10259_p1 = scmp.ne.s32.totalorder %s1424_s11, %s10258_s26  ;;  %p10265_p7 = scmp.lt.s32.totalorder %s1424_s11, %s1424_s11 }
 0x146   : > { %p10266_p8 = scmp.lt.s32.totalorder %s10264_s2, %s10258_s26 }
 0x147   : > { %p10260_p2 = pnand %p10259_p1, %p13959_p4 }
 0x148   : > { %p10267_p9 = por %p10266_p8, %p10265_p7 }
 0x149   : > { %p10261_p3 = pneg %p10260_p2 }
 0x14b   : > { %p10268_p10 = pnand %p10267_p9, %p10261_p3 }
 0x14d   : > { %10271 = shalt.err (!%p10268_p10)
}
 0x14e   : > { %9297 = dma.hbm_to_vmem [thread:$0]  (%p13959_p4), %s14016_s4, 16, %s1424_s11, [#allocation30]  }
 0x14f   : > { %s10272_s5 = scalar_lea.hbm %s14012_s13, 512 }
 0x150   : > { %p10273_p6 = scmp.ne.s32.totalorder %s14012_s13, %s10272_s5  ;;  %p10278_p13 = scmp.lt.u32.totalorder %s10272_s5, %s14012_s13 }
 0x152   : > { %p10274_p11 = pnand %p10273_p6, %p13959_p4 }
 0x154   : > { %p10275_p12 = pneg %p10274_p11 }
 0x156   : > { %p10280_p0 = pnand %p10278_p13, %p10275_p12 }
 0x158   : > { %10283 = shalt.err (!%p10280_p0)
}
 0x159   : > { %s10284_s0 = scalar_lea.vmem %s12084_s23, 512  ;;  %p10291_p7 = scmp.lt.s32.totalorder %s12084_s23, %s12084_s23 }
 0x15a   : > { %p10285_p1 = scmp.ne.s32.totalorder %s12084_s23, %s10284_s0  ;;  %p10292_p8 = scmp.lt.s32.totalorder %s10284_s0, %s10284_s0 }
 0x15c   : > { %p10286_p2 = pnand %p10285_p1, %p13959_p4  ;;  %p10293_p9 = por %p10292_p8, %p10291_p7 }
 0x15e   : > { %p10287_p3 = pneg %p10286_p2 }
 0x160   : > { %p10294_p10 = pnand %p10293_p9, %p10287_p3 }
 0x162   : > { %10297 = shalt.err (!%p10294_p10)
}
 0x163   : > { %s14030_s11 = smov 4   ;;  %s14031_s28 = smov 64  }
 0x164   : > { %9301 = dma.hbm_to_vmem [thread:$0]  (%p13959_p4), %s14012_s13, 512, %s12084_s23, [#allocation33], %s14031_s28, %s14031_s28, %s14030_s11  }
 0x165   : > { %s11607_s26 = smov [#allocation35]   ;;  %s11608_s5 = smov [#allocation38]  }
 0x166   : > { %s1470_s2 = sshll.u32 %s11607_s26, 4  ;;  %s1494_s15 = sshll.u32 %s11608_s5, 4  ;;  %s1471_s2 = int_to_ptr.vmem [resolvable:$true] %s1470_s2  ;;  %s12114_s15 = int_to_ptr.vmem [resolvable:$true] %s1494_s15 }
 0x167   : > { %s10298_s0 = scalar_lea.hbm %s11769_s27, 256 }
 0x168   : > { %p10299_p6 = scmp.ne.s32.totalorder %s11769_s27, %s10298_s0  ;;  %p10304_p13 = scmp.lt.u32.totalorder %s10298_s0, %s11769_s27 }
 0x16a   : > { %p10300_p11 = pnand %p10299_p6, %p13959_p4 }
 0x16c   : > { %p10301_p12 = pneg %p10300_p11 }
 0x16e   : > { %p10306_p0 = pnand %p10304_p13, %p10301_p12 }
 0x170   : > { %10309 = shalt.err (!%p10306_p0)
}
 0x171   : > { %s10310_s10 = scalar_lea.vmem %s1471_s2, 256  ;;  %p10317_p7 = scmp.lt.s32.totalorder %s1471_s2, %s1471_s2 }
 0x172   : > { %p10311_p1 = scmp.ne.s32.totalorder %s1471_s2, %s10310_s10  ;;  %p10318_p8 = scmp.lt.s32.totalorder %s10310_s10, %s10310_s10 }
 0x174   : > { %p10312_p2 = pnand %p10311_p1, %p13959_p4  ;;  %p10319_p9 = por %p10318_p8, %p10317_p7 }
 0x176   : > { %p10313_p3 = pneg %p10312_p2 }
 0x178   : > { %p10320_p10 = pnand %p10319_p9, %p10313_p3 }
 0x17a   : > { %10323 = shalt.err (!%p10320_p10)
}
 0x17b   : > { %9305 = dma.hbm_to_vmem [thread:$0]  (%p13959_p4), %s11769_s27, 256, %s1471_s2, [#allocation36], %s14031_s28, %s14031_s28, %s14030_s11  }
 0x17c   : > { %s10324_s23 = scalar_lea.hbm %s14013_s12, 256 }
 0x17d   : > { %p10325_p6 = scmp.ne.s32.totalorder %s14013_s12, %s10324_s23  ;;  %p10330_p13 = scmp.lt.u32.totalorder %s10324_s23, %s14013_s12 }
 0x17f   : > { %p10326_p11 = pnand %p10325_p6, %p13959_p4 }
 0x181   : > { %p10327_p12 = pneg %p10326_p11 }
 0x183   : > { %p10332_p0 = pnand %p10330_p13, %p10327_p12 }
 0x185   : > { %10335 = shalt.err (!%p10332_p0)
}
 0x186   : > { %s10336_s10 = scalar_lea.vmem %s12114_s15, 256  ;;  %p10343_p7 = scmp.lt.s32.totalorder %s12114_s15, %s12114_s15 }
 0x187   : > { %p10337_p1 = scmp.ne.s32.totalorder %s12114_s15, %s10336_s10  ;;  %p10344_p8 = scmp.lt.s32.totalorder %s10336_s10, %s10336_s10 }
 0x189   : > { %p10338_p2 = pnand %p10337_p1, %p13959_p4  ;;  %p10345_p9 = por %p10344_p8, %p10343_p7 }
 0x18b   : > { %p10339_p3 = pneg %p10338_p2 }
 0x18d   : > { %p10346_p10 = pnand %p10345_p9, %p10339_p3 }
 0x18f   : > { %10349 = shalt.err (!%p10346_p10)
}
 0x190   : > { %9309 = dma.hbm_to_vmem [thread:$0]  (%p13959_p4), %s14013_s12, 256, %s12114_s15, [#allocation39], %s14031_s28, %s14031_s28, %s14030_s11  }
 0x191   : > { %s11609_s26 = smov [#allocation41]   ;;  %s11610_s5 = smov [#allocation44]  }
 0x192   : > { %s1518_s2 = sshll.u32 %s11609_s26, 4  ;;  %s1542_s0 = sshll.u32 %s11610_s5, 4  ;;  %s1519_s2 = int_to_ptr.vmem [resolvable:$true] %s1518_s2  ;;  %s12147_s0 = int_to_ptr.vmem [resolvable:$true] %s1542_s0 }
 0x193   : > { %s10350_s23 = scalar_lea.hbm %s11789_s30, 512 }
 0x194   : > { %p10351_p6 = scmp.ne.s32.totalorder %s11789_s30, %s10350_s23  ;;  %p10356_p13 = scmp.lt.u32.totalorder %s10350_s23, %s11789_s30 }
 0x196   : > { %p10352_p11 = pnand %p10351_p6, %p13959_p4 }
 0x198   : > { %p10353_p12 = pneg %p10352_p11 }
 0x19a   : > { %p10358_p0 = pnand %p10356_p13, %p10353_p12 }
 0x19c   : > { %10361 = shalt.err (!%p10358_p0)
}
 0x19d   : > { %s10362_s10 = scalar_lea.vmem %s1519_s2, 512  ;;  %p10369_p7 = scmp.lt.s32.totalorder %s1519_s2, %s1519_s2 }
 0x19e   : > { %p10363_p1 = scmp.ne.s32.totalorder %s1519_s2, %s10362_s10  ;;  %p10370_p8 = scmp.lt.s32.totalorder %s10362_s10, %s10362_s10 }
 0x1a0   : > { %p10364_p2 = pnand %p10363_p1, %p13959_p4  ;;  %p10371_p9 = por %p10370_p8, %p10369_p7 }
 0x1a2   : > { %p10365_p3 = pneg %p10364_p2 }
 0x1a4   : > { %p10372_p10 = pnand %p10371_p9, %p10365_p3 }
 0x1a6   : > { %10375 = shalt.err (!%p10372_p10)
}
 0x1a7   : > { %9313 = dma.hbm_to_vmem [thread:$0]  (%p13959_p4), %s11789_s30, 512, %s1519_s2, [#allocation42], %s14031_s28, %s14031_s28, %s14030_s11  }
 0x1a8   : > { %s10376_s15 = scalar_lea.hbm %s11799_s19, 512 }
 0x1a9   : > { %p10377_p6 = scmp.ne.s32.totalorder %s11799_s19, %s10376_s15  ;;  %p10382_p13 = scmp.lt.u32.totalorder %s10376_s15, %s11799_s19 }
 0x1ab   : > { %p10378_p11 = pnand %p10377_p6, %p13959_p4 }
 0x1ad   : > { %p10379_p12 = pneg %p10378_p11 }
 0x1af   : > { %p10384_p0 = pnand %p10382_p13, %p10379_p12 }
 0x1b1   : > { %10387 = shalt.err (!%p10384_p0)
}
 0x1b2   : > { %s10388_s26 = scalar_lea.vmem %s12147_s0, 512  ;;  %p10395_p7 = scmp.lt.s32.totalorder %s12147_s0, %s12147_s0 }
 0x1b3   : > { %p10389_p1 = scmp.ne.s32.totalorder %s12147_s0, %s10388_s26  ;;  %p10396_p8 = scmp.lt.s32.totalorder %s10388_s26, %s10388_s26 }
 0x1b5   : > { %p10390_p2 = pnand %p10389_p1, %p13959_p4  ;;  %p10397_p9 = por %p10396_p8, %p10395_p7 }
 0x1b7   : > { %p10391_p3 = pneg %p10390_p2 }
 0x1b9   : > { %p10398_p10 = pnand %p10397_p9, %p10391_p3 }
 0x1bb   : > { %10401 = shalt.err (!%p10398_p10)
}
 0x1bc   : > { %9317 = dma.hbm_to_vmem [thread:$0]  (%p13959_p4), %s11799_s19, 512, %s12147_s0, [#allocation45], %s14031_s28, %s14031_s28, %s14030_s11  }
 0x1bd   : > { %s11611_s2 = smov [#allocation47]   ;;  %s11612_s23 = smov [#allocation50]  }
 0x1be   : > { %s1566_s5 = sshll.u32 %s11611_s2, 4  ;;  %s1593_s10 = sshll.u32 %s11612_s23, 4  ;;  %s1567_s5 = int_to_ptr.vmem [resolvable:$true] %s1566_s5  ;;  %s12180_s10 = int_to_ptr.vmem [resolvable:$true] %s1593_s10 }
 0x1bf   : > { %s10402_s15 = scalar_lea.hbm %s14014_s8, 128 }
 0x1c0   : > { %p10403_p6 = scmp.ne.s32.totalorder %s14014_s8, %s10402_s15  ;;  %p10408_p13 = scmp.lt.u32.totalorder %s10402_s15, %s14014_s8 }
 0x1c2   : > { %p10404_p11 = pnand %p10403_p6, %p13959_p4 }
 0x1c4   : > { %p10405_p12 = pneg %p10404_p11 }
 0x1c6   : > { %p10410_p0 = pnand %p10408_p13, %p10405_p12 }
 0x1c8   : > { %10413 = shalt.err (!%p10410_p0)
}
 0x1c9   : > { %s10414_s26 = scalar_lea.vmem %s1567_s5, 128  ;;  %p10421_p7 = scmp.lt.s32.totalorder %s1567_s5, %s1567_s5 }
 0x1ca   : > { %p10415_p1 = scmp.ne.s32.totalorder %s1567_s5, %s10414_s26  ;;  %p10422_p8 = scmp.lt.s32.totalorder %s10414_s26, %s10414_s26 }
 0x1cc   : > { %p10416_p2 = pnand %p10415_p1, %p13959_p4  ;;  %p10423_p9 = por %p10422_p8, %p10421_p7 }
 0x1ce   : > { %p10417_p3 = pneg %p10416_p2 }
 0x1d0   : > { %p10424_p10 = pnand %p10423_p9, %p10417_p3 }
 0x1d2   : > { %10427 = shalt.err (!%p10424_p10)
}
 0x1d3   : > { %s14032_s0 = smov 1   ;;  %s14033_s2 = smov 16  }
 0x1d4   : > { %s14034_s23 = sld [smem:[#allocation132_spill]] }
 0x1d5   : > { %9321 = dma.hbm_to_vmem [thread:$0]  (%p13959_p4), %s14014_s8, 128, %s1567_s5, [#allocation48], %s14033_s2, %s14033_s2, %s14032_s0  }
 0x1da   : > { %s10428_s15 = scalar_lea.hbm %s14034_s23, 16 }
 0x1db   : > { %p10429_p6 = scmp.ne.s32.totalorder %s14034_s23, %s10428_s15  ;;  %p10434_p13 = scmp.lt.u32.totalorder %s10428_s15, %s14034_s23 }
 0x1dd   : > { %p10430_p11 = pnand %p10429_p6, %p13959_p4 }
 0x1df   : > { %p10431_p12 = pneg %p10430_p11 }
 0x1e1   : > { %p10436_p0 = pnand %p10434_p13, %p10431_p12 }
 0x1e3   : > { %10439 = shalt.err (!%p10436_p0)
}
 0x1e4   : > { %s10440_s26 = scalar_lea.vmem %s12180_s10, 16  ;;  %s10446_s3 = scalar_lea.vmem %s12180_s10, 32 }
 0x1e5   : > { %p10441_p1 = scmp.ne.s32.totalorder %s12180_s10, %s10440_s26  ;;  %p10447_p7 = scmp.lt.s32.totalorder %s12180_s10, %s12180_s10 }
 0x1e6   : > { %p10448_p8 = scmp.lt.s32.totalorder %s10446_s3, %s10440_s26 }
 0x1e7   : > { %p10442_p2 = pnand %p10441_p1, %p13959_p4 }
 0x1e8   : > { %p10449_p9 = por %p10448_p8, %p10447_p7 }
 0x1e9   : > { %p10443_p3 = pneg %p10442_p2 }
 0x1eb   : > { %p10450_p10 = pnand %p10449_p9, %p10443_p3 }
 0x1ed   : > { %10453 = shalt.err (!%p10450_p10)
}
 0x1ee   : > { %s14035_s5 = sld [smem:[#allocation134_spill]]  ;;  %s11613_s15 = smov [#allocation53]  }
 0x1ef   : > { %9325 = dma.hbm_to_vmem [thread:$0]  (%p13959_p4), %s14034_s23, 16, %s12180_s10, [#allocation51]  }
 0x1f0   : > { %s1617_s4 = sshll.u32 %s11613_s15, 4  ;;  %s11614_s6 = smov [#allocation56]   ;;  %s1618_s4 = int_to_ptr.vmem [resolvable:$true] %s1617_s4 }
 0x1f1   : > { %s1641_s8 = sshll.u32 %s11614_s6, 4  ;;  %s12211_s8 = int_to_ptr.vmem [resolvable:$true] %s1641_s8 }
 0x1f4   : > { %s10454_s3 = scalar_lea.hbm %s14035_s5, 16 }
 0x1f5   : > { %p10455_p6 = scmp.ne.s32.totalorder %s14035_s5, %s10454_s3  ;;  %p10460_p13 = scmp.lt.u32.totalorder %s10454_s3, %s14035_s5 }
 0x1f7   : > { %p10456_p11 = pnand %p10455_p6, %p13959_p4 }
 0x1f9   : > { %p10457_p12 = pneg %p10456_p11 }
 0x1fb   : > { %p10462_p0 = pnand %p10460_p13, %p10457_p12 }
 0x1fd   : > { %10465 = shalt.err (!%p10462_p0)
}
 0x1fe   : > { %s10466_s26 = scalar_lea.vmem %s1618_s4, 16  ;;  %s10472_s10 = scalar_lea.vmem %s1618_s4, 32 }
 0x1ff   : > { %p10467_p1 = scmp.ne.s32.totalorder %s1618_s4, %s10466_s26  ;;  %p10473_p7 = scmp.lt.s32.totalorder %s1618_s4, %s1618_s4 }
 0x200   : > { %p10474_p8 = scmp.lt.s32.totalorder %s10472_s10, %s10466_s26 }
 0x201   : > { %p10468_p2 = pnand %p10467_p1, %p13959_p4 }
 0x202   : > { %p10475_p9 = por %p10474_p8, %p10473_p7 }
 0x203   : > { %p10469_p3 = pneg %p10468_p2 }
 0x205   : > { %p10476_p10 = pnand %p10475_p9, %p10469_p3 }
 0x207   : > { %10479 = shalt.err (!%p10476_p10)
}
 0x208   : > { %s14036_s6 = sld [smem:[#allocation136_spill]] }
 0x209   : > { %9329 = dma.hbm_to_vmem [thread:$0]  (%p13959_p4), %s14035_s5, 16, %s1618_s4, [#allocation54]  }
 0x20e   : > { %s10480_s15 = scalar_lea.hbm %s14036_s6, 16 }
 0x20f   : > { %p10481_p6 = scmp.ne.s32.totalorder %s14036_s6, %s10480_s15  ;;  %p10486_p13 = scmp.lt.u32.totalorder %s10480_s15, %s14036_s6 }
 0x211   : > { %p10482_p11 = pnand %p10481_p6, %p13959_p4 }
 0x213   : > { %p10483_p12 = pneg %p10482_p11 }
 0x215   : > { %p10488_p0 = pnand %p10486_p13, %p10483_p12 }
 0x217   : > { %10491 = shalt.err (!%p10488_p0)
}
 0x218   : > { %s10492_s3 = scalar_lea.vmem %s12211_s8, 16  ;;  %s10498_s26 = scalar_lea.vmem %s12211_s8, 32 }
 0x219   : > { %p10493_p1 = scmp.ne.s32.totalorder %s12211_s8, %s10492_s3  ;;  %p10499_p7 = scmp.lt.s32.totalorder %s12211_s8, %s12211_s8 }
 0x21a   : > { %p10500_p8 = scmp.lt.s32.totalorder %s10498_s26, %s10492_s3 }
 0x21b   : > { %p10494_p2 = pnand %p10493_p1, %p13959_p4 }
 0x21c   : > { %p10501_p9 = por %p10500_p8, %p10499_p7 }
 0x21d   : > { %p10495_p3 = pneg %p10494_p2 }
 0x21f   : > { %p10502_p10 = pnand %p10501_p9, %p10495_p3 }
 0x221   : > { %10505 = shalt.err (!%p10502_p10)
}
 0x222   : > { %s14037_s4 = sld [smem:[#allocation138_spill]]  ;;  %s11615_s10 = smov [#allocation59]  }
 0x223   : > { %9333 = dma.hbm_to_vmem [thread:$0]  (%p13959_p4), %s14036_s6, 16, %s12211_s8, [#allocation57]  }
 0x224   : > { %s1665_s15 = sshll.u32 %s11615_s10, 4  ;;  %s11616_s5 = smov [#allocation62]   ;;  %s1666_s15 = int_to_ptr.vmem [resolvable:$true] %s1665_s15 }
 0x225   : > { %s1689_s12 = sshll.u32 %s11616_s5, 4  ;;  %s12239_s12 = int_to_ptr.vmem [resolvable:$true] %s1689_s12 }
 0x228   : > { %s10506_s3 = scalar_lea.hbm %s14037_s4, 16 }
 0x229   : > { %p10507_p6 = scmp.ne.s32.totalorder %s14037_s4, %s10506_s3  ;;  %p10512_p13 = scmp.lt.u32.totalorder %s10506_s3, %s14037_s4 }
 0x22b   : > { %p10508_p11 = pnand %p10507_p6, %p13959_p4 }
 0x22d   : > { %p10509_p12 = pneg %p10508_p11 }
 0x22f   : > { %p10514_p0 = pnand %p10512_p13, %p10509_p12 }
 0x231   : > { %10517 = shalt.err (!%p10514_p0)
}
 0x232   : > { %s10518_s26 = scalar_lea.vmem %s1666_s15, 16  ;;  %s10524_s8 = scalar_lea.vmem %s1666_s15, 32 }
 0x233   : > { %p10519_p1 = scmp.ne.s32.totalorder %s1666_s15, %s10518_s26  ;;  %p10525_p7 = scmp.lt.s32.totalorder %s1666_s15, %s1666_s15 }
 0x234   : > { %p10526_p8 = scmp.lt.s32.totalorder %s10524_s8, %s10518_s26 }
 0x235   : > { %p10520_p2 = pnand %p10519_p1, %p13959_p4 }
 0x236   : > { %p10527_p9 = por %p10526_p8, %p10525_p7 }
 0x237   : > { %p10521_p3 = pneg %p10520_p2 }
 0x239   : > { %p10528_p10 = pnand %p10527_p9, %p10521_p3 }
 0x23b   : > { %10531 = shalt.err (!%p10528_p10)
}
 0x23c   : > { %s14038_s5 = sld [smem:[#allocation140_spill]] }
 0x23d   : > { %9337 = dma.hbm_to_vmem [thread:$0]  (%p13959_p4), %s14037_s4, 16, %s1666_s15, [#allocation60]  }
 0x242   : > { %s10532_s10 = scalar_lea.hbm %s14038_s5, 16 }
 0x243   : > { %p10533_p6 = scmp.ne.s32.totalorder %s14038_s5, %s10532_s10  ;;  %p10538_p13 = scmp.lt.u32.totalorder %s10532_s10, %s14038_s5 }
 0x245   : > { %p10534_p11 = pnand %p10533_p6, %p13959_p4 }
 0x247   : > { %p10535_p12 = pneg %p10534_p11 }
 0x249   : > { %p10540_p0 = pnand %p10538_p13, %p10535_p12 }
 0x24b   : > { %10543 = shalt.err (!%p10540_p0)
}
 0x24c   : > { %s10544_s3 = scalar_lea.vmem %s12239_s12, 16  ;;  %s10550_s26 = scalar_lea.vmem %s12239_s12, 32 }
 0x24d   : > { %p10545_p1 = scmp.ne.s32.totalorder %s12239_s12, %s10544_s3  ;;  %p10551_p7 = scmp.lt.s32.totalorder %s12239_s12, %s12239_s12 }
 0x24e   : > { %p10552_p8 = scmp.lt.s32.totalorder %s10550_s26, %s10544_s3 }
 0x24f   : > { %p10546_p2 = pnand %p10545_p1, %p13959_p4 }
 0x250   : > { %p10553_p9 = por %p10552_p8, %p10551_p7 }
 0x251   : > { %p10547_p3 = pneg %p10546_p2 }
 0x253   : > { %p10554_p10 = pnand %p10553_p9, %p10547_p3 }
 0x255   : > { %10557 = shalt.err (!%p10554_p10)
}
 0x256   : > { %s14039_s15 = sld [smem:[#allocation142_spill]]  ;;  %s11617_s10 = smov [#allocation65]  }
 0x257   : > { %9341 = dma.hbm_to_vmem [thread:$0]  (%p13959_p4), %s14038_s5, 16, %s12239_s12, [#allocation63]  }
 0x258   : > { %s1712_s4 = sshll.u32 %s11617_s10, 4  ;;  %s11618_s6 = smov [#allocation68]   ;;  %s1713_s4 = int_to_ptr.vmem [resolvable:$true] %s1712_s4 }
 0x259   : > { %s1736_s13 = sshll.u32 %s11618_s6, 4  ;;  %s12267_s13 = int_to_ptr.vmem [resolvable:$true] %s1736_s13 }
 0x25c   : > { %s14040_s8 = smov %s14039_s15  ;;  %s10558_s3 = scalar_lea.hbm %s14039_s15, 256 }
 0x25d   : > { %p10559_p6 = scmp.ne.s32.totalorder %s14040_s8, %s10558_s3  ;;  %p10564_p13 = scmp.lt.u32.totalorder %s10558_s3, %s14040_s8 }
 0x25f   : > { %p10560_p11 = pnand %p10559_p6, %p13959_p4 }
 0x261   : > { %p10561_p12 = pneg %p10560_p11 }
 0x263   : > { %p10566_p0 = pnand %p10564_p13, %p10561_p12 }
 0x265   : > { %10569 = shalt.err (!%p10566_p0)
}
 0x266   : > { %s10570_s26 = scalar_lea.vmem %s1713_s4, 256  ;;  %p10577_p7 = scmp.lt.s32.totalorder %s1713_s4, %s1713_s4 }
 0x267   : > { %p10571_p1 = scmp.ne.s32.totalorder %s1713_s4, %s10570_s26  ;;  %p10578_p8 = scmp.lt.s32.totalorder %s10570_s26, %s10570_s26 }
 0x269   : > { %p10572_p2 = pnand %p10571_p1, %p13959_p4  ;;  %p10579_p9 = por %p10578_p8, %p10577_p7 }
 0x26b   : > { %p10573_p3 = pneg %p10572_p2 }
 0x26d   : > { %p10580_p10 = pnand %p10579_p9, %p10573_p3 }
 0x26f   : > { %10583 = shalt.err (!%p10580_p10)
}
 0x270   : > { %s14041_s12 = sld [smem:[#allocation144_spill]] }
 0x271   : > { %9345 = dma.hbm_to_vmem [thread:$0]  (%p13959_p4), %s14040_s8, 256, %s1713_s4, [#allocation66], %s14031_s28, %s14031_s28, %s14030_s11  }
 0x276   : > { %s10584_s6 = scalar_lea.hbm %s14041_s12, 256 }
 0x277   : > { %p10585_p6 = scmp.ne.s32.totalorder %s14041_s12, %s10584_s6  ;;  %p10590_p13 = scmp.lt.u32.totalorder %s10584_s6, %s14041_s12 }
 0x279   : > { %p10586_p11 = pnand %p10585_p6, %p13959_p4 }
 0x27b   : > { %p10587_p12 = pneg %p10586_p11 }
 0x27d   : > { %p10592_p0 = pnand %p10590_p13, %p10587_p12 }
 0x27f   : > { %10595 = shalt.err (!%p10592_p0)
}
 0x280   : > { %s10596_s15 = scalar_lea.vmem %s12267_s13, 256  ;;  %p10603_p7 = scmp.lt.s32.totalorder %s12267_s13, %s12267_s13 }
 0x281   : > { %p10597_p1 = scmp.ne.s32.totalorder %s12267_s13, %s10596_s15  ;;  %p10604_p8 = scmp.lt.s32.totalorder %s10596_s15, %s10596_s15 }
 0x283   : > { %p10598_p2 = pnand %p10597_p1, %p13959_p4  ;;  %p10605_p9 = por %p10604_p8, %p10603_p7 }
 0x285   : > { %p10599_p3 = pneg %p10598_p2 }
 0x287   : > { %p10606_p10 = pnand %p10605_p9, %p10599_p3 }
 0x289   : > { %10609 = shalt.err (!%p10606_p10)
}
 0x28a   : > { %s14042_s4 = sld [smem:[#allocation146_spill]]  ;;  %s11619_s10 = smov [#allocation71]  }
 0x28b   : > { %9349 = dma.hbm_to_vmem [thread:$0]  (%p13959_p4), %s14041_s12, 256, %s12267_s13, [#allocation69], %s14031_s28, %s14031_s28, %s14030_s11  }
 0x28c   : > { %s1760_s3 = sshll.u32 %s11619_s10, 4  ;;  %s11620_s26 = smov [#allocation74]   ;;  %s1761_s3 = int_to_ptr.vmem [resolvable:$true] %s1760_s3 }
 0x28d   : > { %s1784_s6 = sshll.u32 %s11620_s26, 4  ;;  %s12300_s6 = int_to_ptr.vmem [resolvable:$true] %s1784_s6 }
 0x290   : > { %s10610_s15 = scalar_lea.hbm %s14042_s4, 256 }
 0x291   : > { %p10611_p6 = scmp.ne.s32.totalorder %s14042_s4, %s10610_s15  ;;  %p10616_p13 = scmp.lt.u32.totalorder %s10610_s15, %s14042_s4 }
 0x293   : > { %p10612_p11 = pnand %p10611_p6, %p13959_p4 }
 0x295   : > { %p10613_p12 = pneg %p10612_p11 }
 0x297   : > { %p10618_p0 = pnand %p10616_p13, %p10613_p12 }
 0x299   : > { %10621 = shalt.err (!%p10618_p0)
}
 0x29a   : > { %s10622_s5 = scalar_lea.vmem %s1761_s3, 256  ;;  %p10629_p7 = scmp.lt.s32.totalorder %s1761_s3, %s1761_s3 }
 0x29b   : > { %p10623_p1 = scmp.ne.s32.totalorder %s1761_s3, %s10622_s5  ;;  %p10630_p8 = scmp.lt.s32.totalorder %s10622_s5, %s10622_s5 }
 0x29d   : > { %p10624_p2 = pnand %p10623_p1, %p13959_p4  ;;  %p10631_p9 = por %p10630_p8, %p10629_p7 }
 0x29f   : > { %p10625_p3 = pneg %p10624_p2 }
 0x2a1   : > { %p10632_p10 = pnand %p10631_p9, %p10625_p3 }
 0x2a3   : > { %10635 = shalt.err (!%p10632_p10)
}
 0x2a4   : > { %9353 = dma.hbm_to_vmem [thread:$0]  (%p13959_p4), %s14042_s4, 256, %s1761_s3, [#allocation72], %s14031_s28, %s14031_s28, %s14030_s11  }
 0x2a5   : > { %s10636_s13 = scalar_lea.hbm %s11899_s29, 128 }
 0x2a6   : > { %p10637_p6 = scmp.ne.s32.totalorder %s11899_s29, %s10636_s13  ;;  %p10642_p13 = scmp.lt.u32.totalorder %s10636_s13, %s11899_s29 }
 0x2a8   : > { %p10638_p11 = pnand %p10637_p6, %p13959_p4 }
 0x2aa   : > { %p10639_p12 = pneg %p10638_p11 }
 0x2ac   : > { %p10644_p0 = pnand %p10642_p13, %p10639_p12 }
 0x2ae   : > { %10647 = shalt.err (!%p10644_p0)
}
 0x2af   : > { %s10648_s5 = scalar_lea.vmem %s12300_s6, 128  ;;  %p10655_p7 = scmp.lt.s32.totalorder %s12300_s6, %s12300_s6 }
 0x2b0   : > { %p10649_p1 = scmp.ne.s32.totalorder %s12300_s6, %s10648_s5  ;;  %p10656_p8 = scmp.lt.s32.totalorder %s10648_s5, %s10648_s5 }
 0x2b2   : > { %p10650_p2 = pnand %p10649_p1, %p13959_p4  ;;  %p10657_p9 = por %p10656_p8, %p10655_p7 }
 0x2b4   : > { %p10651_p3 = pneg %p10650_p2 }
 0x2b6   : > { %p10658_p10 = pnand %p10657_p9, %p10651_p3 }
 0x2b8   : > { %10661 = shalt.err (!%p10658_p10)
}
 0x2b9   : > { %s14043_s10 = sld [smem:[#allocation111_spill]]  ;;  %s11621_s3 = smov [#allocation10]  }
 0x2ba   : > { %9357 = dma.hbm_to_vmem [thread:$0]  (%p13959_p4), %s11899_s29, 128, %s12300_s6, [#allocation75], %s14033_s2, %s14033_s2, %s14032_s0  }
 0x2bb   : > { %s1266_s26 = sshll.u32 %s11621_s3, 4  ;;  %s11622_s15 = smov [#allocation13]   ;;  %s1267_s26 = int_to_ptr.vmem [resolvable:$true] %s1266_s26 }
 0x2bc   : > { %s1290_s13 = sshll.u32 %s11622_s15, 4  ;;  %s12333_s13 = int_to_ptr.vmem [resolvable:$true] %s1290_s13 }
 0x2bf   : > { %s10662_s5 = scalar_lea.hbm %s14043_s10, 16 }
 0x2c0   : > { %p10663_p6 = scmp.ne.s32.totalorder %s14043_s10, %s10662_s5  ;;  %p10668_p13 = scmp.lt.u32.totalorder %s10662_s5, %s14043_s10 }
 0x2c2   : > { %p10664_p11 = pnand %p10663_p6, %p13959_p4 }
 0x2c4   : > { %p10665_p12 = pneg %p10664_p11 }
 0x2c6   : > { %p10670_p0 = pnand %p10668_p13, %p10665_p12 }
 0x2c8   : > { %10673 = shalt.err (!%p10670_p0)
}
 0x2c9   : > { %s10674_s4 = scalar_lea.vmem %s1267_s26, 16  ;;  %s10680_s6 = scalar_lea.vmem %s1267_s26, 32 }
 0x2ca   : > { %p10675_p1 = scmp.ne.s32.totalorder %s1267_s26, %s10674_s4  ;;  %p10681_p7 = scmp.lt.s32.totalorder %s1267_s26, %s1267_s26 }
 0x2cb   : > { %p10682_p8 = scmp.lt.s32.totalorder %s10680_s6, %s10674_s4 }
 0x2cc   : > { %p10676_p2 = pnand %p10675_p1, %p13959_p4 }
 0x2cd   : > { %p10683_p9 = por %p10682_p8, %p10681_p7 }
 0x2ce   : > { %p10677_p3 = pneg %p10676_p2 }
 0x2d0   : > { %p10684_p10 = pnand %p10683_p9, %p10677_p3 }
 0x2d2   : > { %10687 = shalt.err (!%p10684_p10)
}
 0x2d3   : > { %s14044_s3 = sld [smem:[#allocation112_spill]] }
 0x2d4   : > { %9271 = dma.hbm_to_vmem [thread:$0]  (%p13959_p4), %s14043_s10, 16, %s1267_s26, [#allocation9]  }
 0x2d9   : > { %s10688_s15 = scalar_lea.hbm %s14044_s3, 16 }
 0x2da   : > { %p10689_p6 = scmp.ne.s32.totalorder %s14044_s3, %s10688_s15  ;;  %p10694_p13 = scmp.lt.u32.totalorder %s10688_s15, %s14044_s3 }
 0x2dc   : > { %p10690_p11 = pnand %p10689_p6, %p13959_p4 }
 0x2de   : > { %p10691_p12 = pneg %p10690_p11 }
 0x2e0   : > { %p10696_p0 = pnand %p10694_p13, %p10691_p12 }
 0x2e2   : > { %10699 = shalt.err (!%p10696_p0)
}
 0x2e3   : > { %s10700_s4 = scalar_lea.vmem %s12333_s13, 16  ;;  %s10706_s5 = scalar_lea.vmem %s12333_s13, 32 }
 0x2e4   : > { %p10701_p1 = scmp.ne.s32.totalorder %s12333_s13, %s10700_s4  ;;  %p10707_p7 = scmp.lt.s32.totalorder %s12333_s13, %s12333_s13 }
 0x2e5   : > { %p10708_p8 = scmp.lt.s32.totalorder %s10706_s5, %s10700_s4 }
 0x2e6   : > { %p10702_p2 = pnand %p10701_p1, %p13959_p4 }
 0x2e7   : > { %p10709_p9 = por %p10708_p8, %p10707_p7 }
 0x2e8   : > { %p10703_p3 = pneg %p10702_p2 }
 0x2ea   : > { %p10710_p10 = pnand %p10709_p9, %p10703_p3 }
 0x2ec   : > { %10713 = shalt.err (!%p10710_p10)
}
 0x2ed   : > { %s14045_s26 = sld [smem:[#allocation114_spill]]  ;;  %s11623_s6 = smov [#allocation16]  }
 0x2ee   : > { %9275 = dma.hbm_to_vmem [thread:$0]  (%p13959_p4), %s14044_s3, 16, %s12333_s13, [#allocation12]  }
 0x2ef   : > { %s1313_s15 = sshll.u32 %s11623_s6, 4  ;;  %s11624_s8 = smov [#allocation19]   ;;  %s1314_s15 = int_to_ptr.vmem [resolvable:$true] %s1313_s15 }
 0x2f0   : > { %s1337_s10 = sshll.u32 %s11624_s8, 4  ;;  %s12361_s10 = int_to_ptr.vmem [resolvable:$true] %s1337_s10 }
 0x2f3   : > { %s10714_s4 = scalar_lea.hbm %s14045_s26, 512 }
 0x2f4   : > { %p10715_p6 = scmp.ne.s32.totalorder %s14045_s26, %s10714_s4  ;;  %p10720_p13 = scmp.lt.u32.totalorder %s10714_s4, %s14045_s26 }
 0x2f6   : > { %p10716_p11 = pnand %p10715_p6, %p13959_p4 }
 0x2f8   : > { %p10717_p12 = pneg %p10716_p11 }
 0x2fa   : > { %p10722_p0 = pnand %p10720_p13, %p10717_p12 }
 0x2fc   : > { %10725 = shalt.err (!%p10722_p0)
}
 0x2fd   : > { %s10726_s5 = scalar_lea.vmem %s1314_s15, 512  ;;  %p10733_p7 = scmp.lt.s32.totalorder %s1314_s15, %s1314_s15 }
 0x2fe   : > { %p10727_p1 = scmp.ne.s32.totalorder %s1314_s15, %s10726_s5  ;;  %p10734_p8 = scmp.lt.s32.totalorder %s10726_s5, %s10726_s5 }
 0x300   : > { %p10728_p2 = pnand %p10727_p1, %p13959_p4  ;;  %p10735_p9 = por %p10734_p8, %p10733_p7 }
 0x302   : > { %p10729_p3 = pneg %p10728_p2 }
 0x304   : > { %p10736_p10 = pnand %p10735_p9, %p10729_p3 }
 0x306   : > { %10739 = shalt.err (!%p10736_p10)
}
 0x307   : > { %s14046_s8 = sld [smem:[#allocation116_spill]] }
 0x308   : > { %9279 = dma.hbm_to_vmem [thread:$0]  (%p13959_p4), %s14045_s26, 512, %s1314_s15, [#allocation15], %s14031_s28, %s14031_s28, %s14030_s11  }
 0x30d   : > { %s10740_s13 = scalar_lea.hbm %s14046_s8, 256 }
 0x30e   : > { %p10741_p6 = scmp.ne.s32.totalorder %s14046_s8, %s10740_s13  ;;  %p10746_p13 = scmp.lt.u32.totalorder %s10740_s13, %s14046_s8 }
 0x310   : > { %p10742_p11 = pnand %p10741_p6, %p13959_p4 }
 0x312   : > { %p10743_p12 = pneg %p10742_p11 }
 0x314   : > { %p10748_p0 = pnand %p10746_p13, %p10743_p12 }
 0x316   : > { %10751 = shalt.err (!%p10748_p0)
}
 0x317   : > { %s10752_s6 = scalar_lea.vmem %s12361_s10, 256  ;;  %p10759_p7 = scmp.lt.s32.totalorder %s12361_s10, %s12361_s10 }
 0x318   : > { %p10753_p1 = scmp.ne.s32.totalorder %s12361_s10, %s10752_s6  ;;  %p10760_p8 = scmp.lt.s32.totalorder %s10752_s6, %s10752_s6 }
 0x31a   : > { %p10754_p2 = pnand %p10753_p1, %p13959_p4  ;;  %p10761_p9 = por %p10760_p8, %p10759_p7 }
 0x31c   : > { %p10755_p3 = pneg %p10754_p2 }
 0x31e   : > { %p10762_p10 = pnand %p10761_p9, %p10755_p3 }
 0x320   : > { %10765 = shalt.err (!%p10762_p10)
}
 0x321   : > { %s14047_s15 = sld [smem:[#allocation117_spill]]  ;;  %s11625_s5 = smov [#allocation22]  }
 0x322   : > { %9283 = dma.hbm_to_vmem [thread:$0]  (%p13959_p4), %s14046_s8, 256, %s12361_s10, [#allocation18], %s14031_s28, %s14031_s28, %s14030_s11  }
 0x323   : > { %s1361_s13 = sshll.u32 %s11625_s5, 4  ;;  %s11626_s3 = smov [#allocation25]   ;;  %s1362_s13 = int_to_ptr.vmem [resolvable:$true] %s1361_s13 }
 0x324   : > { %s1385_s12 = sshll.u32 %s11626_s3, 4  ;;  %s12394_s12 = int_to_ptr.vmem [resolvable:$true] %s1385_s12 }
 0x327   : > { %s14048_s4 = smov %s14047_s15  ;;  %s10766_s6 = scalar_lea.hbm %s14047_s15, 256 }
 0x328   : > { %p10767_p6 = scmp.ne.s32.totalorder %s14048_s4, %s10766_s6  ;;  %p10772_p13 = scmp.lt.u32.totalorder %s10766_s6, %s14048_s4 }
 0x32a   : > { %p10768_p11 = pnand %p10767_p6, %p13959_p4 }
 0x32c   : > { %p10769_p12 = pneg %p10768_p11 }
 0x32e   : > { %p10774_p0 = pnand %p10772_p13, %p10769_p12 }
 0x330   : > { %10777 = shalt.err (!%p10774_p0)
}
 0x331   : > { %s10778_s14 = scalar_lea.vmem %s1362_s13, 256  ;;  %p10785_p7 = scmp.lt.s32.totalorder %s1362_s13, %s1362_s13 }
 0x332   : > { %p10779_p1 = scmp.ne.s32.totalorder %s1362_s13, %s10778_s14  ;;  %p10786_p8 = scmp.lt.s32.totalorder %s10778_s14, %s10778_s14 }
 0x334   : > { %p10780_p2 = pnand %p10779_p1, %p13959_p4  ;;  %p10787_p9 = por %p10786_p8, %p10785_p7 }
 0x336   : > { %p10781_p3 = pneg %p10780_p2 }
 0x338   : > { %p10788_p10 = pnand %p10787_p9, %p10781_p3 }
 0x33a   : > { %10791 = shalt.err (!%p10788_p10)
}
 0x33b   : > { %s14049_s10 = sld [smem:[#allocation119_spill]] }
 0x33c   : > { %9287 = dma.hbm_to_vmem [thread:$0]  (%p13959_p4), %s14048_s4, 256, %s1362_s13, [#allocation21], %s14031_s28, %s14031_s28, %s14030_s11  }
 0x341   : > { %s10792_s3 = scalar_lea.hbm %s14049_s10, 512 }
 0x342   : > { %p10793_p6 = scmp.ne.s32.totalorder %s14049_s10, %s10792_s3  ;;  %p10798_p13 = scmp.lt.u32.totalorder %s10792_s3, %s14049_s10 }
 0x344   : > { %p10794_p11 = pnand %p10793_p6, %p13959_p4 }
 0x346   : > { %p10795_p12 = pneg %p10794_p11 }
 0x348   : > { %p10800_p0 = pnand %p10798_p13, %p10795_p12 }
 0x34a   : > { %10803 = shalt.err (!%p10800_p0)
}
 0x34b   : > { %s10804_s14 = scalar_lea.vmem %s12394_s12, 512  ;;  %p10811_p7 = scmp.lt.s32.totalorder %s12394_s12, %s12394_s12 }
 0x34c   : > { %p10805_p1 = scmp.ne.s32.totalorder %s12394_s12, %s10804_s14  ;;  %p10812_p8 = scmp.lt.s32.totalorder %s10804_s14, %s10804_s14 }
 0x34e   : > { %p10806_p2 = pnand %p10805_p1, %p13959_p4  ;;  %p10813_p9 = por %p10812_p8, %p10811_p7 }
 0x350   : > { %p10807_p3 = pneg %p10806_p2 }
 0x352   : > { %p10814_p10 = pnand %p10813_p9, %p10807_p3 }
 0x354   : > { %10817 = shalt.err (!%p10814_p10)
}
 0x355   : > { %s14050_s15 = sld [smem:[#allocation120_spill]]  ;;  %s11627_s13 = smov [#allocation28]  }
 0x356   : > { %9291 = dma.hbm_to_vmem [thread:$0]  (%p13959_p4), %s14049_s10, 512, %s12394_s12, [#allocation24], %s14031_s28, %s14031_s28, %s14030_s11  }
 0x357   : > { %s1409_s6 = sshll.u32 %s11627_s13, 4  ;;  %s11628_s3 = smov [#allocation31]   ;;  %s1410_s6 = int_to_ptr.vmem [resolvable:$true] %s1409_s6 }
 0x358   : > { %s1433_s4 = sshll.u32 %s11628_s3, 4  ;;  %s12427_s4 = int_to_ptr.vmem [resolvable:$true] %s1433_s4 }
 0x35b   : > { %s14051_s5 = smov %s14050_s15  ;;  %s10818_s14 = scalar_lea.hbm %s14050_s15, 512 }
 0x35c   : > { %p10819_p6 = scmp.ne.s32.totalorder %s14051_s5, %s10818_s14  ;;  %p10824_p13 = scmp.lt.u32.totalorder %s10818_s14, %s14051_s5 }
 0x35e   : > { %p10820_p11 = pnand %p10819_p6, %p13959_p4 }
 0x360   : > { %p10821_p12 = pneg %p10820_p11 }
 0x362   : > { %p10826_p0 = pnand %p10824_p13, %p10821_p12 }
 0x364   : > { %10829 = shalt.err (!%p10826_p0)
}
 0x365   : > { %s10830_s8 = scalar_lea.vmem %s1410_s6, 512  ;;  %p10837_p7 = scmp.lt.s32.totalorder %s1410_s6, %s1410_s6 }
 0x366   : > { %p10831_p1 = scmp.ne.s32.totalorder %s1410_s6, %s10830_s8  ;;  %p10838_p8 = scmp.lt.s32.totalorder %s10830_s8, %s10830_s8 }
 0x368   : > { %p10832_p2 = pnand %p10831_p1, %p13959_p4  ;;  %p10839_p9 = por %p10838_p8, %p10837_p7 }
 0x36a   : > { %p10833_p3 = pneg %p10832_p2 }
 0x36c   : > { %p10840_p10 = pnand %p10839_p9, %p10833_p3 }
 0x36e   : > { %10843 = shalt.err (!%p10840_p10)
}
 0x36f   : > { %s14052_s12 = sld [smem:[#allocation122_spill]] }
 0x370   : > { %9295 = dma.hbm_to_vmem [thread:$0]  (%p13959_p4), %s14051_s5, 512, %s1410_s6, [#allocation27], %s14031_s28, %s14031_s28, %s14030_s11  }
 0x375   : > { %s10844_s15 = scalar_lea.hbm %s14052_s12, 128 }
 0x376   : > { %p10845_p6 = scmp.ne.s32.totalorder %s14052_s12, %s10844_s15  ;;  %p10850_p13 = scmp.lt.u32.totalorder %s10844_s15, %s14052_s12 }
 0x378   : > { %p10846_p11 = pnand %p10845_p6, %p13959_p4 }
 0x37a   : > { %p10847_p12 = pneg %p10846_p11 }
 0x37c   : > { %p10852_p0 = pnand %p10850_p13, %p10847_p12 }
 0x37e   : > { %10855 = shalt.err (!%p10852_p0)
}
 0x37f   : > { %s10856_s8 = scalar_lea.vmem %s12427_s4, 128  ;;  %p10863_p7 = scmp.lt.s32.totalorder %s12427_s4, %s12427_s4 }
 0x380   : > { %p10857_p1 = scmp.ne.s32.totalorder %s12427_s4, %s10856_s8  ;;  %p10864_p8 = scmp.lt.s32.totalorder %s10856_s8, %s10856_s8 }
 0x382   : > { %p10858_p2 = pnand %p10857_p1, %p13959_p4  ;;  %p10865_p9 = por %p10864_p8, %p10863_p7 }
 0x384   : > { %p10859_p3 = pneg %p10858_p2 }
 0x386   : > { %p10866_p10 = pnand %p10865_p9, %p10859_p3 }
 0x388   : > { %10869 = shalt.err (!%p10866_p10)
}
 0x389   : > { %s14053_s13 = sld [smem:[#allocation124_spill]]  ;;  %s11629_s6 = smov [#allocation34]  }
 0x38a   : > { %9299 = dma.hbm_to_vmem [thread:$0]  (%p13959_p4), %s14052_s12, 128, %s12427_s4, [#allocation30], %s14033_s2, %s14033_s2, %s14032_s0  }
 0x38b   : > { %s1460_s3 = sshll.u32 %s11629_s6, 4  ;;  %s11630_s14 = smov [#allocation37]   ;;  %s1461_s3 = int_to_ptr.vmem [resolvable:$true] %s1460_s3 }
 0x38c   : > { %s1484_s15 = sshll.u32 %s11630_s14, 4  ;;  %s12460_s15 = int_to_ptr.vmem [resolvable:$true] %s1484_s15 }
 0x38f   : > { %s10870_s8 = scalar_lea.hbm %s14053_s13, 16 }
 0x390   : > { %p10871_p6 = scmp.ne.s32.totalorder %s14053_s13, %s10870_s8  ;;  %p10876_p13 = scmp.lt.u32.totalorder %s10870_s8, %s14053_s13 }
 0x392   : > { %p10872_p11 = pnand %p10871_p6, %p13959_p4 }
 0x394   : > { %p10873_p12 = pneg %p10872_p11 }
 0x396   : > { %p10878_p0 = pnand %p10876_p13, %p10873_p12 }
 0x398   : > { %10881 = shalt.err (!%p10878_p0)
}
 0x399   : > { %s10882_s5 = scalar_lea.vmem %s1461_s3, 16  ;;  %s10888_s4 = scalar_lea.vmem %s1461_s3, 32 }
 0x39a   : > { %p10883_p1 = scmp.ne.s32.totalorder %s1461_s3, %s10882_s5  ;;  %p10889_p7 = scmp.lt.s32.totalorder %s1461_s3, %s1461_s3 }
 0x39b   : > { %p10890_p8 = scmp.lt.s32.totalorder %s10888_s4, %s10882_s5 }
 0x39c   : > { %p10884_p2 = pnand %p10883_p1, %p13959_p4 }
 0x39d   : > { %p10891_p9 = por %p10890_p8, %p10889_p7 }
 0x39e   : > { %p10885_p3 = pneg %p10884_p2 }
 0x3a0   : > { %p10892_p10 = pnand %p10891_p9, %p10885_p3 }
 0x3a2   : > { %10895 = shalt.err (!%p10892_p10)
}
 0x3a3   : > { %s14054_s6 = sld [smem:[#allocation125_spill]] }
 0x3a4   : > { %9303 = dma.hbm_to_vmem [thread:$0]  (%p13959_p4), %s14053_s13, 16, %s1461_s3, [#allocation33]  }
 0x3a9   : > { %s10896_s14 = scalar_lea.hbm %s14054_s6, 16 }
 0x3aa   : > { %p10897_p6 = scmp.ne.s32.totalorder %s14054_s6, %s10896_s14  ;;  %p10902_p13 = scmp.lt.u32.totalorder %s10896_s14, %s14054_s6 }
 0x3ac   : > { %p10898_p11 = pnand %p10897_p6, %p13959_p4 }
 0x3ae   : > { %p10899_p12 = pneg %p10898_p11 }
 0x3b0   : > { %p10904_p0 = pnand %p10902_p13, %p10899_p12 }
 0x3b2   : > { %10907 = shalt.err (!%p10904_p0)
}
 0x3b3   : > { %s10908_s5 = scalar_lea.vmem %s12460_s15, 16  ;;  %s10914_s8 = scalar_lea.vmem %s12460_s15, 32 }
 0x3b4   : > { %p10909_p1 = scmp.ne.s32.totalorder %s12460_s15, %s10908_s5  ;;  %p10915_p7 = scmp.lt.s32.totalorder %s12460_s15, %s12460_s15 }
 0x3b5   : > { %p10916_p8 = scmp.lt.s32.totalorder %s10914_s8, %s10908_s5 }
 0x3b6   : > { %p10910_p2 = pnand %p10909_p1, %p13959_p4 }
 0x3b7   : > { %p10917_p9 = por %p10916_p8, %p10915_p7 }
 0x3b8   : > { %p10911_p3 = pneg %p10910_p2 }
 0x3ba   : > { %p10918_p10 = pnand %p10917_p9, %p10911_p3 }
 0x3bc   : > { %10921 = shalt.err (!%p10918_p10)
}
 0x3bd   : > { %s14055_s3 = sld [smem:[#allocation127_spill]]  ;;  %s11631_s4 = smov [#allocation40]  }
 0x3be   : > { %9307 = dma.hbm_to_vmem [thread:$0]  (%p13959_p4), %s14054_s6, 16, %s12460_s15, [#allocation36]  }
 0x3bf   : > { %s1508_s14 = sshll.u32 %s11631_s4, 4  ;;  %s11632_s10 = smov [#allocation43]   ;;  %s1509_s14 = int_to_ptr.vmem [resolvable:$true] %s1508_s14 }
 0x3c0   : > { %s1532_s12 = sshll.u32 %s11632_s10, 4  ;;  %s12488_s12 = int_to_ptr.vmem [resolvable:$true] %s1532_s12 }
 0x3c3   : > { %s10922_s5 = scalar_lea.hbm %s14055_s3, 16 }
 0x3c4   : > { %p10923_p6 = scmp.ne.s32.totalorder %s14055_s3, %s10922_s5  ;;  %p10928_p13 = scmp.lt.u32.totalorder %s10922_s5, %s14055_s3 }
 0x3c6   : > { %p10924_p11 = pnand %p10923_p6, %p13959_p4 }
 0x3c8   : > { %p10925_p12 = pneg %p10924_p11 }
 0x3ca   : > { %p10930_p0 = pnand %p10928_p13, %p10925_p12 }
 0x3cc   : > { %10933 = shalt.err (!%p10930_p0)
}
 0x3cd   : > { %s10934_s8 = scalar_lea.vmem %s1509_s14, 16  ;;  %s10940_s15 = scalar_lea.vmem %s1509_s14, 32 }
 0x3ce   : > { %p10935_p1 = scmp.ne.s32.totalorder %s1509_s14, %s10934_s8  ;;  %p10941_p7 = scmp.lt.s32.totalorder %s1509_s14, %s1509_s14 }
 0x3cf   : > { %p10942_p8 = scmp.lt.s32.totalorder %s10940_s15, %s10934_s8 }
 0x3d0   : > { %p10936_p2 = pnand %p10935_p1, %p13959_p4 }
 0x3d1   : > { %p10943_p9 = por %p10942_p8, %p10941_p7 }
 0x3d2   : > { %p10937_p3 = pneg %p10936_p2 }
 0x3d4   : > { %p10944_p10 = pnand %p10943_p9, %p10937_p3 }
 0x3d6   : > { %10947 = shalt.err (!%p10944_p10)
}
 0x3d7   : > { %s14056_s10 = sld [smem:[#allocation128_spill]] }
 0x3d8   : > { %9311 = dma.hbm_to_vmem [thread:$0]  (%p13959_p4), %s14055_s3, 16, %s1509_s14, [#allocation39]  }
 0x3dd   : > { %s10948_s4 = scalar_lea.hbm %s14056_s10, 16 }
 0x3de   : > { %p10949_p6 = scmp.ne.s32.totalorder %s14056_s10, %s10948_s4  ;;  %p10954_p13 = scmp.lt.u32.totalorder %s10948_s4, %s14056_s10 }
 0x3e0   : > { %p10950_p11 = pnand %p10949_p6, %p13959_p4 }
 0x3e2   : > { %p10951_p12 = pneg %p10950_p11 }
 0x3e4   : > { %p10956_p0 = pnand %p10954_p13, %p10951_p12 }
 0x3e6   : > { %10959 = shalt.err (!%p10956_p0)
}
 0x3e7   : > { %s10960_s5 = scalar_lea.vmem %s12488_s12, 16  ;;  %s10966_s8 = scalar_lea.vmem %s12488_s12, 32 }
 0x3e8   : > { %p10961_p1 = scmp.ne.s32.totalorder %s12488_s12, %s10960_s5  ;;  %p10967_p7 = scmp.lt.s32.totalorder %s12488_s12, %s12488_s12 }
 0x3e9   : > { %p10968_p8 = scmp.lt.s32.totalorder %s10966_s8, %s10960_s5 }
 0x3ea   : > { %p10962_p2 = pnand %p10961_p1, %p13959_p4 }
 0x3eb   : > { %p10969_p9 = por %p10968_p8, %p10967_p7 }
 0x3ec   : > { %p10963_p3 = pneg %p10962_p2 }
 0x3ee   : > { %p10970_p10 = pnand %p10969_p9, %p10963_p3 }
 0x3f0   : > { %10973 = shalt.err (!%p10970_p10)
}
 0x3f1   : > { %s14057_s14 = sld [smem:[#allocation129_spill]]  ;;  %s11633_s15 = smov [#allocation46]  }
 0x3f2   : > { %9315 = dma.hbm_to_vmem [thread:$0]  (%p13959_p4), %s14056_s10, 16, %s12488_s12, [#allocation42]  }
 0x3f3   : > { %s1556_s4 = sshll.u32 %s11633_s15, 4  ;;  %s11634_s3 = smov [#allocation49]   ;;  %s1557_s4 = int_to_ptr.vmem [resolvable:$true] %s1556_s4 }
 0x3f4   : > { %s1579_s6 = sshll.u32 %s11634_s3, 4  ;;  %s12516_s6 = int_to_ptr.vmem [resolvable:$true] %s1579_s6 }
 0x3f7   : > { %s10974_s5 = scalar_lea.hbm %s14057_s14, 16 }
 0x3f8   : > { %p10975_p6 = scmp.ne.s32.totalorder %s14057_s14, %s10974_s5  ;;  %p10980_p13 = scmp.lt.u32.totalorder %s10974_s5, %s14057_s14 }
 0x3fa   : > { %p10976_p11 = pnand %p10975_p6, %p13959_p4 }
 0x3fc   : > { %p10977_p12 = pneg %p10976_p11 }
 0x3fe   : > { %p10982_p0 = pnand %p10980_p13, %p10977_p12 }
 0x400   : > { %10985 = shalt.err (!%p10982_p0)
}
 0x401   : > { %s10986_s8 = scalar_lea.vmem %s1557_s4, 16  ;;  %s10992_s12 = scalar_lea.vmem %s1557_s4, 32 }
 0x402   : > { %p10987_p1 = scmp.ne.s32.totalorder %s1557_s4, %s10986_s8  ;;  %p10993_p7 = scmp.lt.s32.totalorder %s1557_s4, %s1557_s4 }
 0x403   : > { %p10994_p8 = scmp.lt.s32.totalorder %s10992_s12, %s10986_s8 }
 0x404   : > { %p10988_p2 = pnand %p10987_p1, %p13959_p4 }
 0x405   : > { %p10995_p9 = por %p10994_p8, %p10993_p7 }
 0x406   : > { %p10989_p3 = pneg %p10988_p2 }
 0x408   : > { %p10996_p10 = pnand %p10995_p9, %p10989_p3 }
 0x40a   : > { %10999 = shalt.err (!%p10996_p10)
}
 0x40b   : > { %s14058_s3 = sld [smem:[#allocation131_spill]] }
 0x40c   : > { %9319 = dma.hbm_to_vmem [thread:$0]  (%p13959_p4), %s14057_s14, 16, %s1557_s4, [#allocation45]  }
 0x411   : > { %s11000_s15 = scalar_lea.hbm %s14058_s3, 512 }
 0x412   : > { %p11001_p6 = scmp.ne.s32.totalorder %s14058_s3, %s11000_s15  ;;  %p11006_p13 = scmp.lt.u32.totalorder %s11000_s15, %s14058_s3 }
 0x414   : > { %p11002_p11 = pnand %p11001_p6, %p13959_p4 }
 0x416   : > { %p11003_p12 = pneg %p11002_p11 }
 0x418   : > { %p11008_p0 = pnand %p11006_p13, %p11003_p12 }
 0x41a   : > { %11011 = shalt.err (!%p11008_p0)
}
 0x41b   : > { %s11012_s5 = scalar_lea.vmem %s12516_s6, 512  ;;  %p11019_p7 = scmp.lt.s32.totalorder %s12516_s6, %s12516_s6 }
 0x41c   : > { %p11013_p1 = scmp.ne.s32.totalorder %s12516_s6, %s11012_s5  ;;  %p11020_p8 = scmp.lt.s32.totalorder %s11012_s5, %s11012_s5 }
 0x41e   : > { %p11014_p2 = pnand %p11013_p1, %p13959_p4  ;;  %p11021_p9 = por %p11020_p8, %p11019_p7 }
 0x420   : > { %p11015_p3 = pneg %p11014_p2 }
 0x422   : > { %p11022_p10 = pnand %p11021_p9, %p11015_p3 }
 0x424   : > { %11025 = shalt.err (!%p11022_p10)
}
 0x425   : > { %s14059_s4 = sld [smem:[#allocation133_spill]]  ;;  %s11635_s8 = smov [#allocation52]  }
 0x426   : > { %9323 = dma.hbm_to_vmem [thread:$0]  (%p13959_p4), %s14058_s3, 512, %s12516_s6, [#allocation48], %s14031_s28, %s14031_s28, %s14030_s11  }
 0x427   : > { %s1603_s12 = sshll.u32 %s11635_s8, 4  ;;  %s11636_s15 = smov [#allocation55]   ;;  %s1604_s12 = int_to_ptr.vmem [resolvable:$true] %s1603_s12 }
 0x428   : > { %s1627_s10 = sshll.u32 %s11636_s15, 4  ;;  %s12546_s10 = int_to_ptr.vmem [resolvable:$true] %s1627_s10 }
 0x42b   : > { %s11026_s5 = scalar_lea.hbm %s14059_s4, 256 }
 0x42c   : > { %p11027_p6 = scmp.ne.s32.totalorder %s14059_s4, %s11026_s5  ;;  %p11032_p13 = scmp.lt.u32.totalorder %s11026_s5, %s14059_s4 }
 0x42e   : > { %p11028_p11 = pnand %p11027_p6, %p13959_p4 }
 0x430   : > { %p11029_p12 = pneg %p11028_p11 }
 0x432   : > { %p11034_p0 = pnand %p11032_p13, %p11029_p12 }
 0x434   : > { %11037 = shalt.err (!%p11034_p0)
}
 0x435   : > { %s11038_s13 = scalar_lea.vmem %s1604_s12, 256  ;;  %p11045_p7 = scmp.lt.s32.totalorder %s1604_s12, %s1604_s12 }
 0x436   : > { %p11039_p1 = scmp.ne.s32.totalorder %s1604_s12, %s11038_s13  ;;  %p11046_p8 = scmp.lt.s32.totalorder %s11038_s13, %s11038_s13 }
 0x438   : > { %p11040_p2 = pnand %p11039_p1, %p13959_p4  ;;  %p11047_p9 = por %p11046_p8, %p11045_p7 }
 0x43a   : > { %p11041_p3 = pneg %p11040_p2 }
 0x43c   : > { %p11048_p10 = pnand %p11047_p9, %p11041_p3 }
 0x43e   : > { %11051 = shalt.err (!%p11048_p10)
}
 0x43f   : > { %s14060_s6 = sld [smem:[#allocation135_spill]] }
 0x440   : > { %9327 = dma.hbm_to_vmem [thread:$0]  (%p13959_p4), %s14059_s4, 256, %s1604_s12, [#allocation51], %s14031_s28, %s14031_s28, %s14030_s11  }
 0x445   : > { %s11052_s8 = scalar_lea.hbm %s14060_s6, 256 }
 0x446   : > { %p11053_p6 = scmp.ne.s32.totalorder %s14060_s6, %s11052_s8  ;;  %p11058_p13 = scmp.lt.u32.totalorder %s11052_s8, %s14060_s6 }
 0x448   : > { %p11054_p11 = pnand %p11053_p6, %p13959_p4 }
 0x44a   : > { %p11055_p12 = pneg %p11054_p11 }
 0x44c   : > { %p11060_p0 = pnand %p11058_p13, %p11055_p12 }
 0x44e   : > { %11063 = shalt.err (!%p11060_p0)
}
 0x44f   : > { %s11064_s13 = scalar_lea.vmem %s12546_s10, 256  ;;  %p11071_p7 = scmp.lt.s32.totalorder %s12546_s10, %s12546_s10 }
 0x450   : > { %p11065_p1 = scmp.ne.s32.totalorder %s12546_s10, %s11064_s13  ;;  %p11072_p8 = scmp.lt.s32.totalorder %s11064_s13, %s11064_s13 }
 0x452   : > { %p11066_p2 = pnand %p11065_p1, %p13959_p4  ;;  %p11073_p9 = por %p11072_p8, %p11071_p7 }
 0x454   : > { %p11067_p3 = pneg %p11066_p2 }
 0x456   : > { %p11074_p10 = pnand %p11073_p9, %p11067_p3 }
 0x458   : > { %11077 = shalt.err (!%p11074_p10)
}
 0x459   : > { %s14061_s12 = sld [smem:[#allocation137_spill]]  ;;  %s11637_s15 = smov [#allocation58]  }
 0x45a   : > { %9331 = dma.hbm_to_vmem [thread:$0]  (%p13959_p4), %s14060_s6, 256, %s12546_s10, [#allocation54], %s14031_s28, %s14031_s28, %s14030_s11  }
 0x45b   : > { %s1651_s5 = sshll.u32 %s11637_s15, 4  ;;  %s11638_s8 = smov [#allocation61]   ;;  %s1652_s5 = int_to_ptr.vmem [resolvable:$true] %s1651_s5 }
 0x45c   : > { %s1675_s3 = sshll.u32 %s11638_s8, 4  ;;  %s12579_s3 = int_to_ptr.vmem [resolvable:$true] %s1675_s3 }
 0x45f   : > { %s11078_s13 = scalar_lea.hbm %s14061_s12, 256 }
 0x460   : > { %p11079_p6 = scmp.ne.s32.totalorder %s14061_s12, %s11078_s13  ;;  %p11084_p13 = scmp.lt.u32.totalorder %s11078_s13, %s14061_s12 }
 0x462   : > { %p11080_p11 = pnand %p11079_p6, %p13959_p4 }
 0x464   : > { %p11081_p12 = pneg %p11080_p11 }
 0x466   : > { %p11086_p0 = pnand %p11084_p13, %p11081_p12 }
 0x468   : > { %11089 = shalt.err (!%p11086_p0)
}
 0x469   : > { %s11090_s4 = scalar_lea.vmem %s1652_s5, 256  ;;  %p11097_p7 = scmp.lt.s32.totalorder %s1652_s5, %s1652_s5 }
 0x46a   : > { %p11091_p1 = scmp.ne.s32.totalorder %s1652_s5, %s11090_s4  ;;  %p11098_p8 = scmp.lt.s32.totalorder %s11090_s4, %s11090_s4 }
 0x46c   : > { %p11092_p2 = pnand %p11091_p1, %p13959_p4  ;;  %p11099_p9 = por %p11098_p8, %p11097_p7 }
 0x46e   : > { %p11093_p3 = pneg %p11092_p2 }
 0x470   : > { %p11100_p10 = pnand %p11099_p9, %p11093_p3 }
 0x472   : > { %11103 = shalt.err (!%p11100_p10)
}
 0x473   : > { %s14062_s10 = sld [smem:[#allocation139_spill]] }
 0x474   : > { %9335 = dma.hbm_to_vmem [thread:$0]  (%p13959_p4), %s14061_s12, 256, %s1652_s5, [#allocation57], %s14031_s28, %s14031_s28, %s14030_s11  }
 0x479   : > { %s11104_s15 = scalar_lea.hbm %s14062_s10, 256 }
 0x47a   : > { %p11105_p6 = scmp.ne.s32.totalorder %s14062_s10, %s11104_s15  ;;  %p11110_p13 = scmp.lt.u32.totalorder %s11104_s15, %s14062_s10 }
 0x47c   : > { %p11106_p11 = pnand %p11105_p6, %p13959_p4 }
 0x47e   : > { %p11107_p12 = pneg %p11106_p11 }
 0x480   : > { %p11112_p0 = pnand %p11110_p13, %p11107_p12 }
 0x482   : > { %11115 = shalt.err (!%p11112_p0)
}
 0x483   : > { %s11116_s4 = scalar_lea.vmem %s12579_s3, 256  ;;  %p11123_p7 = scmp.lt.s32.totalorder %s12579_s3, %s12579_s3 }
 0x484   : > { %p11117_p1 = scmp.ne.s32.totalorder %s12579_s3, %s11116_s4  ;;  %p11124_p8 = scmp.lt.s32.totalorder %s11116_s4, %s11116_s4 }
 0x486   : > { %p11118_p2 = pnand %p11117_p1, %p13959_p4  ;;  %p11125_p9 = por %p11124_p8, %p11123_p7 }
 0x488   : > { %p11119_p3 = pneg %p11118_p2 }
 0x48a   : > { %p11126_p10 = pnand %p11125_p9, %p11119_p3 }
 0x48c   : > { %11129 = shalt.err (!%p11126_p10)
}
 0x48d   : > { %s14063_s5 = sld [smem:[#allocation141_spill]]  ;;  %s11639_s8 = smov [#allocation64]  }
 0x48e   : > { %9339 = dma.hbm_to_vmem [thread:$0]  (%p13959_p4), %s14062_s10, 256, %s12579_s3, [#allocation60], %s14031_s28, %s14031_s28, %s14030_s11  }
 0x48f   : > { %s1699_s13 = sshll.u32 %s11639_s8, 4  ;;  %s11640_s15 = smov [#allocation67]   ;;  %s1700_s13 = int_to_ptr.vmem [resolvable:$true] %s1699_s13 }
 0x490   : > { %s1726_s6 = sshll.u32 %s11640_s15, 4  ;;  %s12612_s6 = int_to_ptr.vmem [resolvable:$true] %s1726_s6 }
 0x493   : > { %s11130_s4 = scalar_lea.hbm %s14063_s5, 128 }
 0x494   : > { %p11131_p6 = scmp.ne.s32.totalorder %s14063_s5, %s11130_s4  ;;  %p11136_p13 = scmp.lt.u32.totalorder %s11130_s4, %s14063_s5 }
 0x496   : > { %p11132_p11 = pnand %p11131_p6, %p13959_p4 }
 0x498   : > { %p11133_p12 = pneg %p11132_p11 }
 0x49a   : > { %p11138_p0 = pnand %p11136_p13, %p11133_p12 }
 0x49c   : > { %11141 = shalt.err (!%p11138_p0)
}
 0x49d   : > { %s11142_s12 = scalar_lea.vmem %s1700_s13, 128  ;;  %p11149_p7 = scmp.lt.s32.totalorder %s1700_s13, %s1700_s13 }
 0x49e   : > { %p11143_p1 = scmp.ne.s32.totalorder %s1700_s13, %s11142_s12  ;;  %p11150_p8 = scmp.lt.s32.totalorder %s11142_s12, %s11142_s12 }
 0x4a0   : > { %p11144_p2 = pnand %p11143_p1, %p13959_p4  ;;  %p11151_p9 = por %p11150_p8, %p11149_p7 }
 0x4a2   : > { %p11145_p3 = pneg %p11144_p2 }
 0x4a4   : > { %p11152_p10 = pnand %p11151_p9, %p11145_p3 }
 0x4a6   : > { %11155 = shalt.err (!%p11152_p10)
}
 0x4a7   : > { %s14064_s3 = sld [smem:[#allocation143_spill]] }
 0x4a8   : > { %9343 = dma.hbm_to_vmem [thread:$0]  (%p13959_p4), %s14063_s5, 128, %s1700_s13, [#allocation63], %s14033_s2, %s14033_s2, %s14032_s0  }
 0x4ad   : > { %s11156_s8 = scalar_lea.hbm %s14064_s3, 16 }
 0x4ae   : > { %p11157_p6 = scmp.ne.s32.totalorder %s14064_s3, %s11156_s8  ;;  %p11162_p13 = scmp.lt.u32.totalorder %s11156_s8, %s14064_s3 }
 0x4b0   : > { %p11158_p11 = pnand %p11157_p6, %p13959_p4 }
 0x4b2   : > { %p11159_p12 = pneg %p11158_p11 }
 0x4b4   : > { %p11164_p0 = pnand %p11162_p13, %p11159_p12 }
 0x4b6   : > { %11167 = shalt.err (!%p11164_p0)
}
 0x4b7   : > { %s11168_s12 = scalar_lea.vmem %s12612_s6, 16  ;;  %s11174_s15 = scalar_lea.vmem %s12612_s6, 32 }
 0x4b8   : > { %p11169_p1 = scmp.ne.s32.totalorder %s12612_s6, %s11168_s12  ;;  %p11175_p7 = scmp.lt.s32.totalorder %s12612_s6, %s12612_s6 }
 0x4b9   : > { %p11176_p8 = scmp.lt.s32.totalorder %s11174_s15, %s11168_s12 }
 0x4ba   : > { %p11170_p2 = pnand %p11169_p1, %p13959_p4 }
 0x4bb   : > { %p11177_p9 = por %p11176_p8, %p11175_p7 }
 0x4bc   : > { %p11171_p3 = pneg %p11170_p2 }
 0x4be   : > { %p11178_p10 = pnand %p11177_p9, %p11171_p3 }
 0x4c0   : > { %11181 = shalt.err (!%p11178_p10)
}
 0x4c1   : > { %s14065_s0 = sld [smem:[#allocation145_spill]]  ;;  %s11641_s13 = smov [#allocation70]  }
 0x4c2   : > { %9347 = dma.hbm_to_vmem [thread:$0]  (%p13959_p4), %s14064_s3, 16, %s12612_s6, [#allocation66]  }
 0x4c3   : > { %s1750_s4 = sshll.u32 %s11641_s13, 4  ;;  %s11642_s8 = smov [#allocation73]   ;;  %s1751_s4 = int_to_ptr.vmem [resolvable:$true] %s1750_s4 }
 0x4c4   : > { %s1774_s5 = sshll.u32 %s11642_s8, 4  ;;  %s12643_s5 = int_to_ptr.vmem [resolvable:$true] %s1774_s5 }
 0x4c7   : > { %s14066_s2 = smov %s14065_s0  ;;  %s11182_s12 = scalar_lea.hbm %s14065_s0, 16 }
 0x4c8   : > { %p11183_p6 = scmp.ne.s32.totalorder %s14066_s2, %s11182_s12  ;;  %p11188_p13 = scmp.lt.u32.totalorder %s11182_s12, %s14066_s2 }
 0x4ca   : > { %p11184_p11 = pnand %p11183_p6, %p13959_p4 }
 0x4cc   : > { %p11185_p12 = pneg %p11184_p11 }
 0x4ce   : > { %p11190_p0 = pnand %p11188_p13, %p11185_p12 }
 0x4d0   : > { %11193 = shalt.err (!%p11190_p0)
}
 0x4d1   : > { %s11194_s15 = scalar_lea.vmem %s1751_s4, 16  ;;  %s11200_s6 = scalar_lea.vmem %s1751_s4, 32 }
 0x4d2   : > { %p11195_p1 = scmp.ne.s32.totalorder %s1751_s4, %s11194_s15  ;;  %p11201_p7 = scmp.lt.s32.totalorder %s1751_s4, %s1751_s4 }
 0x4d3   : > { %p11202_p8 = scmp.lt.s32.totalorder %s11200_s6, %s11194_s15 }
 0x4d4   : > { %p11196_p2 = pnand %p11195_p1, %p13959_p4 }
 0x4d5   : > { %p11203_p9 = por %p11202_p8, %p11201_p7 }
 0x4d6   : > { %p11197_p3 = pneg %p11196_p2 }
 0x4d8   : > { %p11204_p10 = pnand %p11203_p9, %p11197_p3 }
 0x4da   : > { %11207 = shalt.err (!%p11204_p10)
}
 0x4db   : > { %s14067_s0 = sld [smem:[#allocation147_spill]] }
 0x4dc   : > { %9351 = dma.hbm_to_vmem [thread:$0]  (%p13959_p4), %s14066_s2, 16, %s1751_s4, [#allocation69]  }
 0x4e1   : > { %s14068_s13 = smov %s14067_s0  ;;  %s11208_s8 = scalar_lea.hbm %s14067_s0, 16 }
 0x4e2   : > { %p11209_p6 = scmp.ne.s32.totalorder %s14068_s13, %s11208_s8  ;;  %p11214_p13 = scmp.lt.u32.totalorder %s11208_s8, %s14068_s13 }
 0x4e4   : > { %p11210_p11 = pnand %p11209_p6, %p13959_p4 }
 0x4e6   : > { %p11211_p12 = pneg %p11210_p11 }
 0x4e8   : > { %p11216_p0 = pnand %p11214_p13, %p11211_p12 }
 0x4ea   : > { %11219 = shalt.err (!%p11216_p0)
}
 0x4eb   : > { %s11220_s12 = scalar_lea.vmem %s12643_s5, 16  ;;  %s11226_s15 = scalar_lea.vmem %s12643_s5, 32 }
 0x4ec   : > { %p11221_p1 = scmp.ne.s32.totalorder %s12643_s5, %s11220_s12  ;;  %p11227_p7 = scmp.lt.s32.totalorder %s12643_s5, %s12643_s5 }
 0x4ed   : > { %p11228_p8 = scmp.lt.s32.totalorder %s11226_s15, %s11220_s12 }
 0x4ee   : > { %p11222_p2 = pnand %p11221_p1, %p13959_p4 }
 0x4ef   : > { %p11229_p9 = por %p11228_p8, %p11227_p7 }
 0x4f0   : > { %p11223_p3 = pneg %p11222_p2 }
 0x4f2   : > { %p11230_p10 = pnand %p11229_p9, %p11223_p3 }
 0x4f4   : > { %11233 = shalt.err (!%p11230_p10)
}
 0x4f5   : > { %9355 = dma.hbm_to_vmem [thread:$0]  (%p13959_p4), %s14068_s13, 16, %s12643_s5, [#allocation72]  }
 0x4f6   : > { %s11643_s4 = smov [#allocation76]   ;;  %s11644_s0 = smov [#allocation77]  }
 0x4f7   : > { %s1797_s6 = sshll.u32 %s11643_s4, 4  ;;  %s1811_s8 = sshll.u32 %s11644_s0, 4  ;;  %s1798_s6 = int_to_ptr.vmem [resolvable:$true] %s1797_s6  ;;  %s12671_s8 = int_to_ptr.vmem [resolvable:$true] %s1811_s8 }
 0x4f8   : > { %s11234_s12 = scalar_lea.hbm %s14010_s9, 256 }
 0x4f9   : > { %p11235_p6 = scmp.ne.s32.totalorder %s14010_s9, %s11234_s12  ;;  %p11240_p13 = scmp.lt.u32.totalorder %s11234_s12, %s14010_s9 }
 0x4fb   : > { %p11236_p11 = pnand %p11235_p6, %p13959_p4 }
 0x4fd   : > { %p11237_p12 = pneg %p11236_p11 }
 0x4ff   : > { %p11242_p0 = pnand %p11240_p13, %p11237_p12 }
 0x501   : > { %11245 = shalt.err (!%p11242_p0)
}
 0x502   : > { %s11246_s15 = scalar_lea.vmem %s1798_s6, 256  ;;  %p11253_p7 = scmp.lt.s32.totalorder %s1798_s6, %s1798_s6 }
 0x503   : > { %p11247_p1 = scmp.ne.s32.totalorder %s1798_s6, %s11246_s15  ;;  %p11254_p8 = scmp.lt.s32.totalorder %s11246_s15, %s11246_s15 }
 0x505   : > { %p11248_p2 = pnand %p11247_p1, %p13959_p4  ;;  %p11255_p9 = por %p11254_p8, %p11253_p7 }
 0x507   : > { %p11249_p3 = pneg %p11248_p2 }
 0x509   : > { %p11256_p10 = pnand %p11255_p9, %p11249_p3 }
 0x50b   : > { %11259 = shalt.err (!%p11256_p10)
}
 0x50c   : > { %9359 = dma.hbm_to_vmem [thread:$0]  (%p13959_p4), %s14010_s9, 256, %s1798_s6, [#allocation75], %s14031_s28, %s14031_s28, %s14030_s11  }
 0x50d   : > { %s11260_s5 = scalar_lea.hbm %s11909_s21, 16 }
 0x50e   : > { %p11261_p6 = scmp.ne.s32.totalorder %s11909_s21, %s11260_s5  ;;  %p11266_p13 = scmp.lt.u32.totalorder %s11260_s5, %s11909_s21 }
 0x510   : > { %p11262_p11 = pnand %p11261_p6, %p13959_p4 }
 0x512   : > { %p11263_p12 = pneg %p11262_p11 }
 0x514   : > { %p11268_p0 = pnand %p11266_p13, %p11263_p12 }
 0x516   : > { %11271 = shalt.err (!%p11268_p0)
}
 0x517   : > { %s11272_s4 = scalar_lea.vmem %s12671_s8, 16  ;;  %s11278_s0 = scalar_lea.vmem %s12671_s8, 32 }
 0x518   : > { %p11273_p1 = scmp.ne.s32.totalorder %s12671_s8, %s11272_s4  ;;  %p11279_p7 = scmp.lt.s32.totalorder %s12671_s8, %s12671_s8 }
 0x519   : > { %p11280_p8 = scmp.lt.s32.totalorder %s11278_s0, %s11272_s4 }
 0x51a   : > { %p11274_p2 = pnand %p11273_p1, %p13959_p4 }
 0x51b   : > { %p11281_p9 = por %p11280_p8, %p11279_p7 }
 0x51c   : > { %p11275_p3 = pneg %p11274_p2 }
 0x51e   : > { %p11282_p10 = pnand %p11281_p9, %p11275_p3 }
 0x520   : > { %11285 = shalt.err (!%p11282_p10)
}
 0x521   : > { %9361 = dma.hbm_to_vmem [thread:$0]  (%p13959_p4), %s11909_s21, 16, %s12671_s8, [#allocation78]  }
 0x522 PF: > { %s14069_s11 = sld [smem:[#allocation108_spill]]  ;;  %s14070_s28 = sld [smem:[#allocation109_spill]] }
 0x523   : > { %p9525_p6 = scmp.lt.s32.totalorder %s11542_s18, 2  ;;  %s12704_s6 = sand.u32 1, %s11538_s16  }
 0x524   : > { %s1843_s12 = sand.u32 1, %s11542_s18   ;;  %s13960_s15 = sshll.u32 %s12704_s6, 2 }
 0x525   : > { %p12710_p11 = pnand %p9525_p6, %p11955_p5  ;;  %s8460_s5 = sshll.u32 %s11542_s18, 6 }
 0x526   : > { %s1847_s0 = scalar_lea.vmem [#allocation5], %s13960_s15  ;;  %s12725_s7 = scalar_lea.sflag [#allocation6], %s1843_s12 }
 0x527   : > { %s14071_s8 = scalar_select %p12710_p11, 1, 0 }
 0x528   : > { %s12716_s4 = scalar_lea.hbm %s14069_s11, %s8460_s5  ;;  %s1854_s2 = sshll.u32 %s1847_s0, 4  ;;  %s12720_s2 = int_to_ptr.vmem [resolvable:$true] %s1854_s2 }
 0x529   : > { %s12723_s3 = scalar_lea.hbm %s14070_s28, %s8460_s5  ;;  %s11286_s9 = scalar_lea.hbm %s12716_s4, 64 }
 0x52a   : > { %p11287_p5 = scmp.ne.s32.totalorder %s12716_s4, %s11286_s9  ;;  %p12731_p12 = pneg %p12710_p11 }
 0x52b   : > { %s11291_s13 = scalar_lea.hbm %s14069_s11, 128  ;;  %p11292_p1 = scmp.lt.u32.totalorder %s12716_s4, %s14069_s11 }
 0x52c   : > { %p11289_p13 = pnand %p12731_p12, %p11287_p5  ;;  %p11293_p2 = scmp.lt.u32.totalorder %s11291_s13, %s11286_s9 }
 0x52d   : > { %p11295_p7 = scmp.lt.u32.totalorder %s11286_s9, %s12716_s4 }
 0x52e   : > { %p11290_p0 = pneg %p11289_p13  ;;  %p11294_p3 = por %p11293_p2, %p11292_p1 }
 0x530   : > { %p11296_p8 = por %p11295_p7, %p11294_p3 }
 0x532   : > { %p11297_p9 = pnand %p11296_p8, %p11290_p0 }
 0x534   : > { %11300 = shalt.err (!%p11297_p9)
}
 0x535   : > { %s11301_s12 = scalar_lea.vmem %s12720_s2, 64  ;;  %s11645_s5 = smov [#allocation5]  }
 0x536   : > { %p11302_p10 = scmp.ne.s32.totalorder %s12720_s2, %s11301_s12  ;;  %s11306_s0 = sshll.u32 %s11645_s5, 4  ;;  %s11307_s0 = int_to_ptr.vmem [resolvable:$false] %s11306_s0 }
 0x537   : > { %s11308_s15 = scalar_lea.vmem %s11307_s0, 128  ;;  %p11309_p5 = scmp.lt.s32.totalorder %s12720_s2, %s11307_s0 }
 0x538   : > { %p11304_p6 = pnand %p11302_p10, %p12731_p12  ;;  %p11310_p13 = scmp.lt.s32.totalorder %s11308_s15, %s11301_s12 }
 0x53a   : > { %p11305_p4 = pneg %p11304_p6  ;;  %p11311_p1 = por %p11310_p13, %p11309_p5 }
 0x53c   : > { %p11312_p2 = pnand %p11311_p1, %p11305_p4 }
 0x53e   : > { %11315 = shalt.err (!%p11312_p2)
}
 0x53f   : > { %s14073_s9 = sld [smem:[#allocation107_spill]]  ;;  %s8456_s13 = sshll.u32 %s12704_s6, 3 }
 0x540   : > { %9470 = dma.hbm_to_vmem [thread:$0]  (!%p12710_p11), %s12716_s4, 64, %s12720_s2, %s12725_s7  }
 0x541   : > { %s8662_s15 = sshll.u32 %s11542_s18, 7  ;;  %s1826_s5 = scalar_lea.vmem [#allocation2], %s8456_s13 }
 0x542   : > { %s1833_s0 = sshll.u32 %s1826_s5, 4  ;;  %s1823_s11 = scalar_lea.sflag [#allocation3], %s12704_s6  ;;  %s12757_s0 = int_to_ptr.vmem [resolvable:$true] %s1833_s0 }
 0x545   : > { %s12755_s12 = scalar_lea.hbm %s14073_s9, %s8662_s15  ;;  %s11321_s2 = scalar_lea.hbm %s14073_s9, 256 }
 0x546   : > { %s11316_s14 = scalar_lea.hbm %s12755_s12, 128  ;;  %p11322_p8 = scmp.lt.u32.totalorder %s12755_s12, %s14073_s9 }
 0x547   : > { %p11317_p4 = scmp.ne.s32.totalorder %s12755_s12, %s11316_s14  ;;  %p11323_p9 = scmp.lt.u32.totalorder %s11321_s2, %s11316_s14 }
 0x548   : > { %p11325_p6 = scmp.lt.u32.totalorder %s11316_s14, %s12755_s12 }
 0x549   : > { %p11319_p3 = pnand %p11317_p4, %p12731_p12  ;;  %p11324_p10 = por %p11323_p9, %p11322_p8 }
 0x54b   : > { %p11320_p7 = pneg %p11319_p3  ;;  %p11326_p5 = por %p11325_p6, %p11324_p10 }
 0x54d   : > { %p11327_p13 = pnand %p11326_p5, %p11320_p7 }
 0x54f   : > { %11330 = shalt.err (!%p11327_p13)
}
 0x550   : > { %s11331_s4 = scalar_lea.vmem %s12757_s0, 128  ;;  %s11646_s13 = smov [#allocation2]  }
 0x551   : > { %p11332_p1 = scmp.ne.s32.totalorder %s12757_s0, %s11331_s4  ;;  %s11336_s15 = sshll.u32 %s11646_s13, 4  ;;  %s11337_s15 = int_to_ptr.vmem [resolvable:$false] %s11336_s15 }
 0x552   : > { %s11338_s5 = scalar_lea.vmem %s11337_s15, 256  ;;  %p11339_p4 = scmp.lt.s32.totalorder %s12757_s0, %s11337_s15 }
 0x553   : > { %p11334_p2 = pnand %p11332_p1, %p12731_p12  ;;  %p11340_p3 = scmp.lt.s32.totalorder %s11338_s5, %s11331_s4 }
 0x555   : > { %p11335_p0 = pneg %p11334_p2  ;;  %p11341_p8 = por %p11340_p3, %p11339_p4 }
 0x557   : > { %p11342_p9 = pnand %p11341_p8, %p11335_p0 }
 0x559   : > { %11345 = shalt.err (!%p11342_p9)
}
 0x55a   : > { %s11647_s14 = smov 64   ;;  %s11648_s2 = smov 4  }
 0x55b   : > { %9467 = dma.hbm_to_vmem [thread:$0]  (!%p12710_p11), %s12755_s12, 128, %s12757_s0, %s1823_s11, %s11647_s14, %s11647_s14, %s11648_s2  }
 0x55c   : > { %s14074_s4 = sshll.u32 %s12704_s6, 2  ;;  %s11346_s5 = scalar_lea.hbm %s12723_s3, 64 }
 0x55d   : > { %s1865_s13 = scalar_lea.vmem [#allocation7], %s14074_s4  ;;  %p11347_p0 = scmp.ne.s32.totalorder %s12723_s3, %s11346_s5 }
 0x55e   : > { %s1872_s15 = sshll.u32 %s1865_s13, 4  ;;  %s11351_s9 = scalar_lea.hbm %s14070_s28, 128  ;;  %s1873_s15 = int_to_ptr.vmem [resolvable:$true] %s1872_s15 }
 0x55f   : > { %p11349_p7 = pnand %p11347_p0, %p12731_p12  ;;  %p11352_p6 = scmp.lt.u32.totalorder %s12723_s3, %s14070_s28 }
 0x560   : > { %p11353_p5 = scmp.lt.u32.totalorder %s11351_s9, %s11346_s5  ;;  %p11355_p1 = scmp.lt.u32.totalorder %s11346_s5, %s12723_s3 }
 0x561   : > { %p11350_p10 = pneg %p11349_p7 }
 0x562   : > { %p11354_p13 = por %p11353_p5, %p11352_p6 }
 0x564   : > { %p11356_p2 = por %p11355_p1, %p11354_p13 }
 0x566   : > { %p11357_p4 = pnand %p11356_p2, %p11350_p10 }
 0x568   : > { %11360 = shalt.err (!%p11357_p4)
}
 0x569   : > { %s11361_s17 = scalar_lea.vmem %s1873_s15, 64  ;;  %s11649_s11 = smov [#allocation7]  }
 0x56a   : > { %p11362_p3 = scmp.ne.s32.totalorder %s1873_s15, %s11361_s17  ;;  %s11366_s6 = sshll.u32 %s11649_s11, 4  ;;  %s11367_s6 = int_to_ptr.vmem [resolvable:$false] %s11366_s6 }
 0x56b   : > { %s11368_s12 = scalar_lea.vmem %s11367_s6, 128  ;;  %p11369_p0 = scmp.lt.s32.totalorder %s1873_s15, %s11367_s6 }
 0x56c   : > { %p11364_p8 = pnand %p11362_p3, %p12731_p12  ;;  %p11370_p7 = scmp.lt.s32.totalorder %s11368_s12, %s11361_s17 }
 0x56e   : > { %p11365_p9 = pneg %p11364_p8  ;;  %p11371_p11 = por %p11370_p7, %p11369_p0 }
 0x570   : > { %p11372_p5 = pnand %p11371_p11, %p11365_p9 }
 0x572   : > { %11375 = shalt.err (!%p11372_p5)
}
 0x573   : > { %p14075_p6 = scmp.ne.s32.totalorder %s14071_s8, 0  ;;  %p14076_p10 = scmp.ne.s32.totalorder %s14029_s1, 0 }
 0x574   : > { %s14077_s10 = sld [smem:[#allocation151_spill]] (!%p14076_p10)  ;;  %s14078_s9 = sld [smem:[#allocation154_spill]] (!%p14076_p10) }
 0x575   : > { %9473 = dma.hbm_to_vmem [thread:$0]  (!%p14075_p6), %s12723_s3, 64, %s1873_s15, %s12725_s7  }
 0x576   : > { %1881 = sbr.rel (%p14076_p10) target bundleno = 8617 (0x21a9), region = 220 }
 0x57a   : > { %s12798_s0 = sand.u32 (!%p14076_p10), 1, %s14077_s10   ;;  %p14079_p11 = scmp.ne.s32.totalorder (!%p14076_p10), %s14078_s9, 0 }
 0x57b   : > { %s8464_s14 = sshll.u32 (!%p14076_p10), %s12798_s0, 3  ;;  %s1884_s2 = scalar_lea.sflag (!%p14076_p10), [#allocation3], %s12798_s0 }
 0x57c   : > { %s12802_s17 = scalar_lea.vmem (!%p14076_p10), [#allocation2], %s8464_s14 }
 0x57d   : > { %11421 = dma.done.wait (%p14079_p11), %s1884_s2, 128  }
 0x57e   : > { %11423 = vsyncadd (%p14079_p11), %s1884_s2, 4294967168  ;;  %s1892_s1 = sand.u32 1, %s11937_s22   ;;  %s12810_s3 = sshll.u32 %s12798_s0, 2 }
 0x57f   : > { %s1893_s8 = scalar_lea.sflag [#allocation6], %s1892_s1  ;;  %s1896_s7 = scalar_lea.vmem [#allocation5], %s12810_s3 }
 0x580   : > { %11425 = dma.done.wait (%p14079_p11), %s1893_s8, 128  }
 0x581   : > { %11427 = vsyncadd (%p14079_p11), %s1893_s8, 4294967168  ;;  %s1905_s4 = scalar_lea.vmem [#allocation7], %s12810_s3  ;;  %p14080_p12 = scmp.eq.s32.totalorder %s11937_s22, 0 }
 0x583   : > { %11429 = dma.done.wait (%p14080_p12), [#allocation9], 528   ;;  %p14081_p13 = pmov %p14080_p12 }
 0x584   : > { %p14082_p1 = pmov %p14080_p12 }
 0x585   : > { %11431 = vsyncadd (%p14081_p13), [#allocation9], 4294966768 }
 0x586   : > { %11433 = dma.done.wait (%p14082_p1), [#allocation12], 528   ;;  %p14083_p2 = pmov %p14082_p1 }
 0x587   : > { %p14084_p4 = pmov %p14082_p1 }
 0x588   : > { %11435 = vsyncadd (%p14083_p2), [#allocation12], 4294966768 }
 0x589   : > { %11437 = dma.done.wait (%p14084_p4), [#allocation15], 640   ;;  %p14085_p3 = pmov %p14082_p1 }
 0x58a   : > { %p14086_p8 = pmov %p14082_p1 }
 0x58b   : > { %11439 = vsyncadd (%p14085_p3), [#allocation15], 4294966656 }
 0x58c   : > { %11441 = dma.done.wait (%p14086_p8), [#allocation18], 272   ;;  %p14087_p9 = pmov %p14082_p1 }
 0x58d   : > { %p14088_p0 = pmov %p14082_p1 }
 0x58e   : > { %11443 = vsyncadd (%p14087_p9), [#allocation18], 4294967024 }
 0x58f   : > { %11445 = dma.done.wait (%p14088_p0), [#allocation21], 272   ;;  %p14089_p7 = pmov %p14088_p0 }
 0x590   : > { %p14090_p5 = pmov %p14088_p0 }
 0x591   : > { %11447 = vsyncadd (%p14089_p7), [#allocation21], 4294967024 }
 0x592   : > { %11449 = dma.done.wait (%p14090_p5), [#allocation24], 528   ;;  %p14091_p6 = pmov %p14088_p0 }
 0x593   : > { %p14092_p10 = pmov %p14088_p0 }
 0x594   : > { %11451 = vsyncadd (%p14091_p6), [#allocation24], 4294966768 }
 0x595   : > { %11453 = dma.done.wait (%p14092_p10), [#allocation27], 528   ;;  %p14093_p11 = pmov %p14088_p0 }
 0x596   : > { %p14094_p12 = pmov %p14088_p0 }
 0x597   : > { %11455 = vsyncadd (%p14093_p11), [#allocation27], 4294966768 }
 0x598   : > { %11457 = dma.done.wait (%p14094_p12), [#allocation30], 144   ;;  %p14095_p13 = pmov %p14088_p0 }
 0x599   : > { %p14096_p1 = pmov %p14088_p0 }
 0x59a   : > { %11459 = vsyncadd (%p14095_p13), [#allocation30], 4294967152 }
 0x59b   : > { %11461 = dma.done.wait (%p14096_p1), [#allocation33], 528   ;;  %p14097_p2 = pmov %p14088_p0 }
 0x59c   : > { %p14098_p4 = pmov %p14088_p0 }
 0x59d   : > { %11463 = vsyncadd (%p14097_p2), [#allocation33], 4294966768 }
 0x59e   : > { %11465 = dma.done.wait (%p14098_p4), [#allocation36], 272   ;;  %p14099_p3 = pmov %p14088_p0 }
 0x59f   : > { %p14100_p8 = pmov %p14088_p0 }
 0x5a0   : > { %11467 = vsyncadd (%p14099_p3), [#allocation36], 4294967024 }
 0x5a1   : > { %11469 = dma.done.wait (%p14100_p8), [#allocation39], 272   ;;  %p14101_p9 = pmov %p14088_p0 }
 0x5a3   : > { %11471 = vsyncadd (%p14101_p9), [#allocation39], 4294967024 }
 0x5a4   : > { %11473 = dma.done.wait (%p14088_p0), [#allocation42], 528   ;;  %p14102_p7 = pmov %p14088_p0 }
 0x5a5   : > { %p14103_p5 = pmov %p14088_p0 }
 0x5a6   : > { %11475 = vsyncadd (%p14102_p7), [#allocation42], 4294966768 }
 0x5a7   : > { %11477 = dma.done.wait (%p14103_p5), [#allocation45], 528   ;;  %p14104_p6 = pmov %p14088_p0 }
 0x5a8   : > { %p14105_p10 = pmov %p14088_p0 }
 0x5a9   : > { %11479 = vsyncadd (%p14104_p6), [#allocation45], 4294966768 }
 0x5aa   : > { %11481 = dma.done.wait (%p14105_p10), [#allocation48], 640   ;;  %p14106_p11 = pmov %p14088_p0 }
 0x5ab   : > { %p14107_p12 = pmov %p14088_p0 }
 0x5ac   : > { %11483 = vsyncadd (%p14106_p11), [#allocation48], 4294966656 }
 0x5ad   : > { %11485 = dma.done.wait (%p14107_p12), [#allocation51], 272   ;;  %p14108_p13 = pmov %p14088_p0 }
 0x5ae   : > { %p14109_p1 = pmov %p14088_p0 }
 0x5af   : > { %11487 = vsyncadd (%p14108_p13), [#allocation51], 4294967024 }
 0x5b0   : > { %11489 = dma.done.wait (%p14109_p1), [#allocation54], 272   ;;  %p14110_p2 = pmov %p14088_p0 }
 0x5b1   : > { %p14111_p4 = pmov %p14088_p0 }
 0x5b2   : > { %11491 = vsyncadd (%p14110_p2), [#allocation54], 4294967024 }
 0x5b3   : > { %11493 = dma.done.wait (%p14111_p4), [#allocation57], 272   ;;  %p14112_p3 = pmov %p14088_p0 }
 0x5b4   : > { %p14113_p8 = pmov %p14088_p0 }
 0x5b5   : > { %11495 = vsyncadd (%p14112_p3), [#allocation57], 4294967024 }
 0x5b6   : > { %11497 = dma.done.wait (%p14113_p8), [#allocation60], 272   ;;  %p14114_p9 = pmov %p14088_p0 }
 0x5b8   : > { %11499 = vsyncadd (%p14114_p9), [#allocation60], 4294967024 }
 0x5b9   : > { %11501 = dma.done.wait (%p14088_p0), [#allocation63], 144   ;;  %p14115_p7 = pmov %p14088_p0 }
 0x5ba   : > { %p14116_p5 = pmov %p14088_p0 }
 0x5bb   : > { %11503 = vsyncadd (%p14115_p7), [#allocation63], 4294967152 }
 0x5bc   : > { %11505 = dma.done.wait (%p14116_p5), [#allocation66], 272   ;;  %p14117_p6 = pmov %p14088_p0 }
 0x5bd   : > { %p14118_p10 = pmov %p14088_p0 }
 0x5be   : > { %11507 = vsyncadd (%p14117_p6), [#allocation66], 4294967024 }
 0x5bf   : > { %11509 = dma.done.wait (%p14118_p10), [#allocation69], 272   ;;  %p14119_p11 = pmov %p14088_p0 }
 0x5c0   : > { %p14120_p12 = pmov %p14088_p0 }
 0x5c1   : > { %11511 = vsyncadd (%p14119_p11), [#allocation69], 4294967024 }
 0x5c2   : > { %11513 = dma.done.wait (%p14120_p12), [#allocation72], 272   ;;  %p14121_p13 = pmov %p14088_p0 }
 0x5c3   : > { %p14122_p1 = pmov %p14088_p0 }
 0x5c4   : > { %11515 = vsyncadd (%p14121_p13), [#allocation72], 4294967024 }
 0x5c5   : > { %11517 = dma.done.wait (%p14122_p1), [#allocation75], 384   ;;  %p14123_p2 = pmov %p14088_p0 }
 0x5c6   : > { %p14124_p4 = pmov %p14088_p0 }
 0x5c7   : > { %11519 = vsyncadd (%p14123_p2), [#allocation75], 4294966912 }
 0x5c8   : > { %11521 = dma.done.wait (%p14124_p4), [#allocation78], 16   ;;  %p14125_p3 = pmov %p14088_p0 }
 0x5c9   : > { %v11650_v0 = vmov 0.0   ;;  %vm11651_vm0 = vmmov 0   ;;  %v9714_v1 = vld [vmem:[#allocation11] sm:$0xff]   ;;  %v9715_v2 = vld [vmem:[#allocation11 + $0x8] sm:$0xff]   ;;  %v9716_v4 = vld [vmem:[#allocation11 + $0x10] sm:$0xff]   ;;  %vm2269_vm1 = vcmask 523264   ;;  %v2426_v10 = vlaneseq }
 0x5ca   : > { %11523 = vsyncadd (%p14125_p3), [#allocation78], 4294967280  ;;  %8836 = vmatprep.subr.bf16.mxu1 %v11650_v0  ;;  %8844 = vmatprep.mubr.msk.bf16.mxu1 %vm11651_vm0, %v11650_v0  ;;  %v9719_v3 = vld [vmem:[#allocation8] sm:$0xff]   ;;  %v9720_v5 = vld [vmem:[#allocation8 + $0x8] sm:$0xff]   ;;  %s11652_s13 = smov 64   ;;  %vm2676_vm2 = vcmask 130048  }
 0x5cb   : > { %8824 = vmatprep.subr.bf16.mxu0 %v11650_v0  ;;  %8832 = vmatprep.mubr.msk.bf16.mxu0 %vm11651_vm0, %v11650_v0  ;;  %v9717_v6 = vld [vmem:[#allocation11 + $0x18] sm:$0xff]   ;;  %v9721_v7 = vld [vmem:[#allocation8 + $0x10] sm:$0xff]   ;;  %v8522_v11 = vld [vmem:[#allocation13] ss:$0 sm:$0xff]  ;;  %v12935_v13 = vshrl.u32 %v2426_v10, 7  ;;  %vm3424_vm3 = vcmask 261120  }
 0x5cc   : > { %8837 = vmatpush3.bf16.msra.mxu1 %v9714_v1  ;;  %8825 = vmatpush3.bf16.msra.mxu0 %v9719_v3  ;;  %v9718_v8 = vld [vmem:[%s12802_s17] sm:$0xff]   ;;  %v9722_v9 = vld [vmem:[#allocation8 + $0x18] sm:$0xff]   ;;  %v11653_v62 = vmov 1966171168   ;;  %vm7756_vm4 = vcmask 253952   ;;  %s13274_s15 = scalar_lea.vmem [#allocation79], %s12810_s3 }
 0x5cd   : > { %8838 = vmatprep.subr.bf16.mxu1 %v11650_v0  ;;  %8826 = vmatprep.subr.bf16.mxu0 %v11650_v0  ;;  %v2862_v16 = vld [vmem:[#allocation14] sm:$0x1]  ;;  %v2863_v17 = vld [vmem:[#allocation14 + $0x1] sm:$0x1]  ;;  %v8515_v20 = vld [vmem:[#allocation10] ss:$0 sm:$0xff]  ;;  %v2557_v63 = vunpack.c.l.s4 %v11653_v62 }
 0x5ce   : > { %v12938_v21 = vsub.s32 0, %v12935_v13  ;;  %v2871_v22 = vpack.i.b16 %v2862_v16, %v2862_v16  ;;  %v2878_v23 = vpack.i.b16 %v2863_v17, %v2863_v17  ;;  %v12952_v38 = vsub.s32 4, %v12935_v13  ;;  %s11654_s5 = smov 96   ;;  %s14126_s11 = sld [smem:[#allocation149_spill]] }
 0x5cf   : > { %v12955_v39 = vsub.s32 1, %v12935_v13  ;;  %v12960_v42 = vsub.s32 5, %v12935_v13  ;;  %v12964_v44 = vsub.s32 2, %v12935_v13  ;;  %v12968_v46 = vsub.s32 6, %v12935_v13  ;;  %s14127_s6 = sld [smem:[#allocation155_spill]]  ;;  %s8659_s12 = sshll.u32 %s11937_s22, 6 }
 0x5d0   : > { %8839 = vmatpush3.bf16.msra.mxu1 %v9715_v2  ;;  %8827 = vmatpush3.bf16.msra.mxu0 %v9720_v5  ;;  %v2876_v31 = vrot.slane %v2871_v22, %v12938_v21  ;;  %v2883_v32 = vrot.slane %v2878_v23, %v12938_v21  ;;  %v12972_v48 = vsub.s32 3, %v12935_v13  ;;  %v12976_v50 = vsub.s32 7, %v12935_v13  ;;  %s7796_s10 = sshll.u32 %s13274_s15, 4  ;;  %s7783_s14 = scalar_lea.sflag [#allocation4], %s12798_s0  ;;  %s13829_s10 = int_to_ptr.vmem [resolvable:$true] %s7796_s10 }
 0x5d1   : > { %8840 = vmatprep.subr.bf16.mxu1 %v11650_v0  ;;  %8828 = vmatprep.subr.bf16.mxu0 %v11650_v0  ;;  %v2558_v2 = vunpack.c.0.s8 %v2557_v63  ;;  %s11376_s2 = scalar_lea.vmem %s13829_s10, 64 }
 0x5d2   : > { %p11377_p8 = scmp.ne.s32.totalorder %s13829_s10, %s11376_s2 }
 0x5d3   : > { %v12986_v5 = vsub.s32 %v2558_v2, %v12935_v13 }
 0x5d4   : > { %8841 = vmatpush3.bf16.msra.mxu1 %v9716_v4  ;;  %8829 = vmatpush3.bf16.msra.mxu0 %v9721_v7  ;;  %s13827_s9 = scalar_lea.hbm %s14126_s11, %s8659_s12 }
 0x5d5   : > { %8842 = vmatprep.subr.bf16.mxu1 %v11650_v0  ;;  %8830 = vmatprep.subr.bf16.mxu0 %v11650_v0  ;;  %p14128_p9 = scmp.ne.s32.totalorder %s14127_s6, 0 }
 0x5d7   : > { %p11378_p0 = pnand %p11377_p8, %p14128_p9 }
 0x5d8   : > { %8843 = vmatpush3.bf16.msra.mxu1 %v9717_v6  ;;  %8831 = vmatpush3.bf16.msra.mxu0 %v9722_v9 }
 0x5d9   : > { %8854 = vmatprep.subr.bf16.mxu1 %v11650_v0  ;;  %8848 = vmatprep.subr.bf16.mxu0 %v11650_v0  ;;  %p11379_p7 = pneg %p11378_p0 }
 0x5db   : > { %8845 = vmatmul.mubr.msk.bf16.vlgmr.msra.gmra.mrb[0].mxu1 %vm2269_vm1, %v9718_v8  ;;  %8833 = vmatmul.mubr.msk.bf16.vlgmr.msra.gmra.mrb[0].mxu0 %vm2269_vm1, %v9718_v8 }
 0x5dc   : > { %8856 = vmatprep.mubr.msk.bf16.mxu1 %vm11651_vm0, %v11650_v0  ;;  %8850 = vmatprep.mubr.msk.bf16.mxu0 %vm11651_vm0, %v11650_v0 }
 0x6ae   : > { %v2387_v12 = vpop.f32.mrb[0].mxu1  ;;  %v2307_v25 = vpop.f32.mrb[0].mxu0 }
 0x6af   : > { %v8846_v14 = vpop.f32.mrb[1].mxu1  ;;  %v2388_v15 = vadd.f32 %v8522_v11, %v2387_v12  ;;  %v2308_v26 = vadd.f32 %v8515_v20, %v2307_v25  ;;  %v8834_v27 = vpop.f32.mrb[1].mxu0 }
 0x6b0   : > { %v2390_v18 = vpop.f32.mrb[2].mxu1  ;;  %v2310_v28 = vpop.f32.mrb[2].mxu0 }
 0x6b1   : > { %2394 = vxpose.xlu1.b32.start [1/2] (short) (narrow) %v2388_v15, 8  ;;  %v8847_v19 = vpop.f32.mrb[3].mxu1  ;;  %v2391_v24 = vadd.f32 %v8522_v11, %v2390_v18  ;;  %2516 = vrot.lane.b32.xlu0 %v2308_v26, %s11652_s13  ;;  %v2311_v29 = vadd.f32 %v8515_v20, %v2310_v28  ;;  %v8835_v30 = vpop.f32.mrb[3].mxu0 }
 0x6b3   : > { %v12943_v33 = vpack.c.bf16 %v2311_v29, %v2308_v26 }
 0x6b5   : > { %2395 = vxpose.xlu1.b32.end [2/2] (short) (narrow) %v2391_v24, 8  ;;  %2518 = vrot.lane.b32.xlu0 %v2311_v29, %s11652_s13  ;;  %v2926_v34 = vmul.bf16 %v2876_v31, %v12943_v33  ;;  %v2927_v35 = vmul.bf16 %v2883_v32, %v12943_v33 }
 0x6b7   : > { %8849 = vmatpush3.bf16.msra.mxu0 %v2926_v34  ;;  %8855 = vmatpush3.bf16.msra.mxu1 %v2927_v35 }
 0x6b8   : > { %8860 = vmatprep.subr.bf16.mxu0 %v11650_v0  ;;  %8866 = vmatprep.subr.bf16.mxu1 %v11650_v0 }
 0x723   : > { %v2517_v52 = vpop.permute.xlu0 %2516 }
 0x727   : > { %v2519_v53 = vpop.permute.xlu0 %2518 }
 0x731   : > { %v2410_v36 = vpop.trf.xlu1 }
 0x732   : > { %v2429_v37 = vrot.slane %v2410_v36, %v12938_v21  ;;  %v2473_v40 = vrot.slane %v2410_v36, %v12952_v38  ;;  %v2440_v41 = vrot.slane %v2410_v36, %v12955_v39  ;;  %v2484_v43 = vrot.slane %v2410_v36, %v12960_v42 }
 0x733   : > { %v2451_v45 = vrot.slane %v2410_v36, %v12964_v44  ;;  %v2495_v47 = vrot.slane %v2410_v36, %v12968_v46  ;;  %v2462_v49 = vrot.slane %v2410_v36, %v12972_v48  ;;  %v2506_v51 = vrot.slane %v2410_v36, %v12976_v50 }
 0x734   : > { %2435 = vbcast.lane.b32.xlu1 %v2429_v37, 264  ;;  %2431 = vbcast.lane.b32.xlu0 %v2429_v37, 256 }
 0x738   : > { %2479 = vbcast.lane.b32.xlu1 %v2473_v40, 264  ;;  %2442 = vbcast.lane.b32.xlu0 %v2440_v41, 256 }
 0x73c   : > { %2486 = vbcast.lane.b32.xlu1 %v2484_v43, 256  ;;  %2446 = vbcast.lane.b32.xlu0 %v2440_v41, 264 }
 0x740   : > { %2490 = vbcast.lane.b32.xlu1 %v2484_v43, 264  ;;  %2453 = vbcast.lane.b32.xlu0 %v2451_v45, 256 }
 0x744   : > { %2497 = vbcast.lane.b32.xlu1 %v2495_v47, 256  ;;  %2457 = vbcast.lane.b32.xlu0 %v2451_v45, 264 }
 0x748   : > { %2501 = vbcast.lane.b32.xlu1 %v2495_v47, 264  ;;  %2464 = vbcast.lane.b32.xlu0 %v2462_v49, 256 }
 0x74c   : > { %2508 = vbcast.lane.b32.xlu1 %v2506_v51, 256  ;;  %2468 = vbcast.lane.b32.xlu0 %v2462_v49, 264 }
 0x750   : > { %2512 = vbcast.lane.b32.xlu1 %v2506_v51, 264  ;;  %2475 = vbcast.lane.b32.xlu0 %v2473_v40, 256 }
 0x76e   : > { %2522 = vxpose.xlu0.b32.start [1/2] (short) (narrow) %v2517_v52, 8 }
 0x772   : > { %2523 = vxpose.xlu0.b32.end [2/2] (short) (narrow) %v2519_v53, 8 }
 0x7a6   : > { %v2432_v54 = vpop.permute.xlu0 %2431  ;;  %v2436_v59 = vpop.permute.xlu1 %2435 }
 0x7aa   : > { %v2443_v55 = vpop.permute.xlu0 %2442  ;;  %v2480_v61 = vpop.permute.xlu1 %2479 }
 0x7ae   : > { %v2447_v56 = vpop.permute.xlu0 %2446  ;;  %v12981_v3 = vpop.permute.xlu1 %2486 }
 0x7b2   : > { %v2454_v57 = vpop.permute.xlu0 %2453  ;;  %v2491_v7 = vpop.permute.xlu1 %2490 }
 0x7b6   : > { %v2458_v58 = vpop.permute.xlu0 %2457  ;;  %v12994_v18 = vpop.permute.xlu1 %2497 }
 0x7ba   : > { %v12979_v60 = vpop.permute.xlu0 %2464  ;;  %v2502_v29 = vpop.permute.xlu1 %2501 }
 0x7be   : > { %v2469_v1 = vpop.permute.xlu0 %2468  ;;  %v2509_v43 = vpop.permute.xlu1 %2508 }
 0x7c2   : > { %v12983_v4 = vpop.permute.xlu0 %2475 }
 0x7ee   : > { %v2538_v6 = vpop.trf.xlu0 }
 0x7ef   : > { %v2555_v8 = vcombine.high %v2538_v6, %v2538_v6  ;;  %v2562_v9 = vrot.slane %v2538_v6, %v12986_v5 }
 0x7f1   : > { %v2569_v10 = vrot.slane %v2555_v8, %v12986_v5  ;;  %v2570_v11 = vcombine.high %v2562_v9, %v2562_v9  ;;  %v2578_v12 = vrot.slane %v2562_v9, %v12986_v5 }
 0x7f3   : > { %v2592_v14 = vrot.slane %v2570_v11, %v12986_v5  ;;  %v2571_v15 = vcombine.high %v2569_v10, %v2569_v10  ;;  %v2585_v16 = vrot.slane %v2569_v10, %v12986_v5  ;;  %v2607_v17 = vrot.slane %v2578_v12, %v12938_v21 }
 0x7f4   : > { %v2600_v23 = vcombine.high %v2578_v12, %v2578_v12 }
 0x7f5   : > { %v2602_v13 = vcombine.high %v2592_v14, %v2592_v14  ;;  %v2611_v19 = vrot.slane %v2592_v14, %v12938_v21  ;;  %v2644_v20 = vadd.f32 %v2607_v17, %v2432_v54  ;;  %v2645_v22 = vadd.f32 %v2607_v17, %v2436_v59 }
 0x7f6   : > { %v2599_v25 = vrot.slane %v2571_v15, %v12986_v5  ;;  %v2623_v26 = vrot.slane %v2585_v16, %v12938_v21  ;;  %v2615_v30 = vrot.slane %v2600_v23, %v12938_v21  ;;  %v2601_v32 = vcombine.high %v2585_v16, %v2585_v16 }
 0x7f7   : > { %v2619_v24 = vrot.slane %v2602_v13, %v12938_v21  ;;  %v2646_v27 = vadd.f32 %v2611_v19, %v2443_v55  ;;  %9775 = vtanh.f32 %v2644_v20  ;;  %v2647_v31 = vadd.f32 %v2611_v19, %v2447_v56 }
 0x7f8   : > { %9777 = vtanh.f32 %v2645_v22  ;;  %v2627_v34 = vrot.slane %v2599_v25, %v12938_v21  ;;  %v2653_v35 = vadd.f32 %v2623_v26, %v2480_v61  ;;  %v2648_v36 = vadd.f32 %v2615_v30, %v2454_v57  ;;  %v2513_v57 = vpop.permute.xlu1 %2512 }
 0x7f9   : > { %v2651_v28 = vadd.f32 %v2619_v24, %v2469_v1  ;;  %9779 = vtanh.f32 %v2646_v27  ;;  %v2603_v37 = vcombine.high %v2599_v25, %v2599_v25  ;;  %v2631_v40 = vrot.slane %v2601_v32, %v12938_v21 }
 0x7fa   : > { %v2655_v41 = vadd.f32 %v2627_v34, %v2491_v7  ;;  %v2649_v47 = vadd.f32 %v2615_v30, %v2458_v58  ;;  %v2650_v59 = vadd.f32 %v2619_v24, %v12979_v60  ;;  %v2652_v2 = vadd.f32 %v2623_v26, %v12983_v4 }
 0x7fb   : > { %9781 = vtanh.f32 %v2651_v28  ;;  %v2635_v51 = vrot.slane %v2603_v37, %v12938_v21  ;;  %v2657_v53 = vadd.f32 %v2631_v40, %v2502_v29  ;;  %v2654_v9 = vadd.f32 %v2627_v34, %v12981_v3 }
 0x7fc   : > { %9783 = vtanh.f32 %v2647_v31  ;;  %v2656_v14 = vadd.f32 %v2631_v40, %v12994_v18 }
 0x7fd   : > { %9785 = vtanh.f32 %v2653_v35  ;;  %v2659_v62 = vadd.f32 %v2635_v51, %v2513_v57  ;;  %v2658_v13 = vadd.f32 %v2635_v51, %v2509_v43 }
 0x7fe   : > { %9787 = vtanh.f32 %v2648_v36 }
 0x7ff   : > { %9789 = vtanh.f32 %v2655_v41 }
 0x800   : > { %9791 = vtanh.f32 %v2649_v47 }
 0x801   : > { %v13003_v45 = vpop.eup %9775  ;;  %9793 = vtanh.f32 %v2657_v53 }
 0x802   : > { %v13005_v49 = vpop.eup %9777  ;;  %v2677_v52 = vsel %vm2676_vm2, %v13003_v45, -inf  ;;  %9795 = vtanh.f32 %v2650_v59 }
 0x803   : > { %v13010_v54 = vpop.eup %9779  ;;  %v2680_v55 = vsel %vm2676_vm2, %v13005_v49, -inf  ;;  %2678 = vmax.xlane.f32.xlu1 %v2677_v52  ;;  %9797 = vtanh.f32 %v2659_v62 }
 0x804   : > { %2681 = vmax.xlane.f32.xlu0 %v2680_v55  ;;  %v2683_v61 = vsel %vm2676_vm2, %v13010_v54, -inf  ;;  %9799 = vtanh.f32 %v2652_v2 }
 0x805   : > { %v13014_v56 = vpop.eup %9781  ;;  %9801 = vtanh.f32 %v2654_v9 }
 0x806   : > { %v2698_v58 = vsel %vm2676_vm2, %v13014_v56, -inf  ;;  %v13021_v63 = vpop.eup %9783  ;;  %9803 = vtanh.f32 %v2656_v14 }
 0x807   : > { %2684 = vmax.xlane.f32.xlu1 %v2683_v61  ;;  %v13023_v1 = vpop.eup %9785  ;;  %v2686_v6 = vsel %vm2676_vm2, %v13021_v63, -inf  ;;  %9805 = vtanh.f32 %v2658_v13 }
 0x808   : > { %2699 = vmax.xlane.f32.xlu0 %v2698_v58  ;;  %v9788_v7 = vpop.eup %9787  ;;  %v2704_v60 = vsel %vm2676_vm2, %v13023_v1, -inf }
 0x809   : > { %v13030_v8 = vpop.eup %9789  ;;  %v2689_v10 = vsel %vm2676_vm2, %v9788_v7, -inf }
 0x80a   : > { %v13034_v11 = vpop.eup %9791  ;;  %v2710_v4 = vsel %vm2676_vm2, %v13030_v8, -inf }
 0x80b   : > { %2687 = vmax.xlane.f32.xlu1 %v2686_v6  ;;  %v13038_v12 = vpop.eup %9793  ;;  %v2692_v15 = vsel %vm2676_vm2, %v13034_v11, -inf }
 0x80c   : > { %2705 = vmax.xlane.f32.xlu0 %v2704_v60  ;;  %v13043_v16 = vpop.eup %9795  ;;  %v2716_v3 = vsel %vm2676_vm2, %v13038_v12, -inf }
 0x80d   : > { %v13047_v17 = vpop.eup %9797  ;;  %v2695_v19 = vsel %vm2676_vm2, %v13043_v16, -inf }
 0x80e   : > { %v13051_v20 = vpop.eup %9799  ;;  %v2722_v18 = vsel %vm2676_vm2, %v13047_v17, -inf }
 0x80f   : > { %2690 = vmax.xlane.f32.xlu1 %v2689_v10  ;;  %v2701_v22 = vsel %vm2676_vm2, %v13051_v20, -inf  ;;  %v13057_v23 = vpop.eup %9801 }
 0x810   : > { %2711 = vmax.xlane.f32.xlu0 %v2710_v4  ;;  %v2707_v24 = vsel %vm2676_vm2, %v13057_v23, -inf  ;;  %v13061_v25 = vpop.eup %9803 }
 0x811   : > { %v2713_v26 = vsel %vm2676_vm2, %v13061_v25, -inf  ;;  %v13065_v27 = vpop.eup %9805 }
 0x812   : > { %v2719_v28 = vsel %vm2676_vm2, %v13065_v27, -inf }
 0x813   : > { %2693 = vmax.xlane.f32.xlu1 %v2692_v15 }
 0x814   : > { %2717 = vmax.xlane.f32.xlu0 %v2716_v3 }
 0x817   : > { %2696 = vmax.xlane.f32.xlu1 %v2695_v19 }
 0x818   : > { %2723 = vmax.xlane.f32.xlu0 %v2722_v18 }
 0x81b   : > { %2702 = vmax.xlane.f32.xlu1 %v2701_v22 }
 0x81f   : > { %2708 = vmax.xlane.f32.xlu1 %v2707_v24 }
 0x823   : > { %2714 = vmax.xlane.f32.xlu1 %v2713_v26 }
 0x827   : > { %2720 = vmax.xlane.f32.xlu1 %v2719_v28 }
 0x890   : > { %v2679_v29 = vpop.xlane.xlu1 %2678 }
 0x891   : > { %v2682_v30 = vpop.xlane.xlu0 %2681  ;;  %v2725_v31 = vsub.f32 %v13003_v45, %v2679_v29 }
 0x892   : > { %v2726_v32 = vsub.f32 %v13005_v49, %v2682_v30 }
 0x893   : > { %v2741_v34 = vmul.f32 1.442695, %v2725_v31 }
 0x894   : > { %v2743_v35 = vmul.f32 1.442695, %v2726_v32  ;;  %v2685_v36 = vpop.xlane.xlu1 %2684 }
 0x895   : > { %9807 = vpow2.f32 %v2741_v34  ;;  %v2727_v37 = vsub.f32 %v13010_v54, %v2685_v36  ;;  %v2700_v40 = vpop.xlane.xlu0 %2699 }
 0x896   : > { %9809 = vpow2.f32 %v2743_v35  ;;  %v2732_v49 = vsub.f32 %v13014_v56, %v2700_v40 }
 0x897   : > { %v2745_v41 = vmul.f32 1.442695, %v2727_v37 }
 0x898   : > { %v2688_v43 = vpop.xlane.xlu1 %2687  ;;  %v2755_v6 = vmul.f32 1.442695, %v2732_v49 }
 0x899   : > { %9811 = vpow2.f32 %v2745_v41  ;;  %v2728_v47 = vsub.f32 %v13021_v63, %v2688_v43  ;;  %v2706_v51 = vpop.xlane.xlu0 %2705 }
 0x89a   : > { %v2734_v56 = vsub.f32 %v13023_v1, %v2706_v51 }
 0x89b   : > { %v2747_v52 = vmul.f32 1.442695, %v2728_v47 }
 0x89c   : > { %v2691_v53 = vpop.xlane.xlu1 %2690  ;;  %v2759_v14 = vmul.f32 1.442695, %v2734_v56 }
 0x89d   : > { %9813 = vpow2.f32 %v2747_v52  ;;  %v2729_v45 = vsub.f32 %v9788_v7, %v2691_v53  ;;  %v2712_v54 = vpop.xlane.xlu0 %2711 }
 0x89e   : > { %v2736_v15 = vsub.f32 %v13030_v8, %v2712_v54 }
 0x89f   : > { %v13073_v55 = vpop.eup %9807  ;;  %v2749_v57 = vmul.f32 1.442695, %v2729_v45 }
 0x8a0   : > { %v13076_v58 = vpop.eup %9809  ;;  %v2694_v59 = vpop.xlane.xlu1 %2693  ;;  %v2773_v61 = vsel %vm2676_vm2, %v13073_v55, 0.0 }
 0x8a1   : > { %9815 = vpow2.f32 %v2749_v57  ;;  %v2730_v62 = vsub.f32 %v13034_v11, %v2694_v59  ;;  %v2776_v63 = vsel %vm2676_vm2, %v13076_v58, 0.0  ;;  %2774 = vadd.xlane.f32.xlu1 %v2773_v61  ;;  %v2718_v11 = vpop.xlane.xlu0 %2717 }
 0x8a2   : > { %2777 = vadd.xlane.f32.xlu0 %v2776_v63  ;;  %v2738_v22 = vsub.f32 %v13038_v12, %v2718_v11 }
 0x8a3   : > { %v13083_v2 = vpop.eup %9811  ;;  %v2751_v7 = vmul.f32 1.442695, %v2730_v62 }
 0x8a4   : > { %v2697_v60 = vpop.xlane.xlu1 %2696  ;;  %v2779_v9 = vsel %vm2676_vm2, %v13083_v2, 0.0 }
 0x8a5   : > { %9817 = vpow2.f32 %v2751_v7  ;;  %v2731_v10 = vsub.f32 %v13043_v16, %v2697_v60  ;;  %2780 = vadd.xlane.f32.xlu1 %v2779_v9  ;;  %v2763_v16 = vmul.f32 1.442695, %v2736_v15  ;;  %v2724_v26 = vpop.xlane.xlu0 %2723 }
 0x8a6   : > { %9819 = vpow2.f32 %v2755_v6  ;;  %v2740_v31 = vsub.f32 %v13047_v17, %v2724_v26 }
 0x8a7   : > { %v13089_v4 = vpop.eup %9813  ;;  %v2753_v3 = vmul.f32 1.442695, %v2731_v10 }
 0x8a8   : > { %v2703_v13 = vpop.xlane.xlu1 %2702  ;;  %v2782_v1 = vsel %vm2676_vm2, %v13089_v4, 0.0 }
 0x8a9   : > { %9821 = vpow2.f32 %v2753_v3  ;;  %v2733_v19 = vsub.f32 %v13051_v20, %v2703_v13  ;;  %2783 = vadd.xlane.f32.xlu0 %v2782_v1  ;;  %v2767_v20 = vmul.f32 1.442695, %v2738_v22 }
 0x8aa   : > { %9823 = vpow2.f32 %v2759_v14  ;;  %v2864_v14 = vld [vmem:[#allocation14 + $0x2] sm:$0x1] }
 0x8ab   : > { %v13095_v18 = vpop.eup %9815  ;;  %v2757_v24 = vmul.f32 1.442695, %v2733_v19  ;;  %v2885_v3 = vpack.i.b16 %v2864_v14, %v2864_v14 }
 0x8ac   : > { %v2709_v28 = vpop.xlane.xlu1 %2708  ;;  %v2785_v8 = vsel %vm2676_vm2, %v13095_v18, 0.0 }
 0x8ad   : > { %9825 = vpow2.f32 %v2757_v24  ;;  %v2735_v29 = vsub.f32 %v13057_v23, %v2709_v28  ;;  %2786 = vadd.xlane.f32.xlu1 %v2785_v8  ;;  %v2771_v23 = vmul.f32 1.442695, %v2740_v31  ;;  %v2890_v22 = vrot.slane %v2885_v3, %v12938_v21  ;;  %v2865_v24 = vld [vmem:[#allocation14 + $0x3] sm:$0x1] }
 0x8ae   : > { %9827 = vpow2.f32 %v2763_v16  ;;  %v2892_v8 = vpack.i.b16 %v2865_v24, %v2865_v24 }
 0x8af   : > { %v13101_v30 = vpop.eup %9817  ;;  %v2761_v32 = vmul.f32 1.442695, %v2735_v29 }
 0x8b0   : > { %v2715_v34 = vpop.xlane.xlu1 %2714  ;;  %v2788_v12 = vsel %vm2676_vm2, %v13101_v30, 0.0  ;;  %v13106_v35 = vpop.eup %9819 }
 0x8b1   : > { %9829 = vpow2.f32 %v2761_v32  ;;  %v2737_v36 = vsub.f32 %v13061_v25, %v2715_v34  ;;  %2789 = vadd.xlane.f32.xlu0 %v2788_v12  ;;  %v2794_v17 = vsel %vm2676_vm2, %v13106_v35, 0.0  ;;  %v2897_v32 = vrot.slane %v2892_v8, %v12938_v21 }
 0x8b2   : > { %9831 = vpow2.f32 %v2767_v20  ;;  %v2928_v20 = vmul.bf16 %v2890_v22, %v12943_v33 }
 0x8b3   : > { %v13109_v37 = vpop.eup %9821  ;;  %v2765_v40 = vmul.f32 1.442695, %v2737_v36 }
 0x8b4   : > { %v2721_v41 = vpop.xlane.xlu1 %2720  ;;  %v2791_v43 = vsel %vm2676_vm2, %v13109_v37, 0.0  ;;  %v13115_v47 = vpop.eup %9823 }
 0x8b5   : > { %9833 = vpow2.f32 %v2765_v40  ;;  %v2739_v51 = vsub.f32 %v13065_v27, %v2721_v41  ;;  %2795 = vadd.xlane.f32.xlu0 %v2794_v17  ;;  %2792 = vadd.xlane.f32.xlu1 %v2791_v43  ;;  %v2800_v53 = vsel %vm2676_vm2, %v13115_v47, 0.0  ;;  %v2929_v41 = vmul.bf16 %v2897_v32, %v12943_v33 }
 0x8b6   : > { %9835 = vpow2.f32 %v2771_v23  ;;  %v2866_v23 = vld [vmem:[#allocation14 + $0x4] sm:$0x1] }
 0x8b7   : > { %v13118_v25 = vpop.eup %9825  ;;  %v2769_v52 = vmul.f32 1.442695, %v2739_v51  ;;  %v2899_v17 = vpack.i.b16 %v2866_v23, %v2866_v23 }
 0x8b8   : > { %v2797_v45 = vsel %vm2676_vm2, %v13118_v25, 0.0  ;;  %v13124_v49 = vpop.eup %9827 }
 0x8b9   : > { %9837 = vpow2.f32 %v2769_v52  ;;  %2801 = vadd.xlane.f32.xlu0 %v2800_v53  ;;  %2798 = vadd.xlane.f32.xlu1 %v2797_v45  ;;  %v2806_v27 = vsel %vm2676_vm2, %v13124_v49, 0.0  ;;  %v2904_v53 = vrot.slane %v2899_v17, %v12938_v21 }
 0x8bb   : > { %v13126_v57 = vpop.eup %9829 }
 0x8bc   : > { %v2803_v54 = vsel %vm2676_vm2, %v13126_v57, 0.0  ;;  %v13132_v59 = vpop.eup %9831 }
 0x8bd   : > { %2807 = vadd.xlane.f32.xlu0 %v2806_v27  ;;  %2804 = vadd.xlane.f32.xlu1 %v2803_v54  ;;  %v2812_v62 = vsel %vm2676_vm2, %v13132_v59, 0.0 }
 0x8bf   : > { %v13134_v61 = vpop.eup %9833 }
 0x8c0   : > { %v2809_v63 = vsel %vm2676_vm2, %v13134_v61, 0.0  ;;  %v13140_v6 = vpop.eup %9835 }
 0x8c1   : > { %2813 = vadd.xlane.f32.xlu0 %v2812_v62  ;;  %2810 = vadd.xlane.f32.xlu1 %v2809_v63  ;;  %v2818_v7 = vsel %vm2676_vm2, %v13140_v6, 0.0 }
 0x8c3   : > { %v13142_v56 = vpop.eup %9837 }
 0x8c4   : > { %v2815_v60 = vsel %vm2676_vm2, %v13142_v56, 0.0 }
 0x8c5   : > { %2819 = vadd.xlane.f32.xlu0 %v2818_v7  ;;  %2816 = vadd.xlane.f32.xlu1 %v2815_v60  ;;  %v2868_v7 = vld [vmem:[#allocation14 + $0x6] sm:$0x1] }
 0x92e   : > { %v2775_v9 = vpop.xlane.xlu1 %2774 }
 0x92f   : > { %v2778_v10 = vpop.xlane.xlu0 %2777  ;;  %9839 = vrcp.f32 %v2775_v9 }
 0x930   : > { %9841 = vrcp.f32 %v2778_v10  ;;  %v2930_v10 = vmul.bf16 %v2904_v53, %v12943_v33 }
 0x932   : > { %v2781_v11 = vpop.xlane.xlu1 %2780 }
 0x933   : > { %9843 = vrcp.f32 %v2781_v11 }
 0x936   : > { %v2784_v15 = vpop.xlane.xlu0 %2783 }
 0x937   : > { %9845 = vrcp.f32 %v2784_v15 }
 0x939   : > { %v9840_v13 = vpop.eup %9839 }
 0x93a   : > { %v9842_v1 = vpop.eup %9841  ;;  %v2837_v19 = vmul.f32 %v9840_v13, %v13073_v55  ;;  %v2787_v16 = vpop.xlane.xlu1 %2786 }
 0x93b   : > { %v2838_v26 = vmul.f32 %v9842_v1, %v13076_v58  ;;  %9847 = vrcp.f32 %v2787_v16  ;;  %v2869_v1 = vld [vmem:[#allocation14 + $0x7] sm:$0x1] }
 0x93c   : > { %v2920_v8 = vpack.i.b16 %v2869_v1, %v2869_v1 }
 0x93d   : > { %v2853_v28 = vpack.c.bf16 %v2838_v26, %v2837_v19  ;;  %v9844_v31 = vpop.eup %9843 }
 0x93e   : > { %v2790_v29 = vpop.xlane.xlu0 %2789  ;;  %v2839_v58 = vmul.f32 %v9844_v31, %v13083_v2  ;;  %v2867_v2 = vld [vmem:[#allocation14 + $0x5] sm:$0x1] }
 0x93f   : > { %9849 = vrcp.f32 %v2790_v29  ;;  %8851 = vmatmul.mubr.msk.bf16.vlgmr.msra.gmra.mrb[4].mxu0 %vm2676_vm2, %v2853_v28  ;;  %v2906_v63 = vpack.i.b16 %v2867_v2, %v2867_v2 }
 0x940   : > { %8861 = vmatpush3.bf16.msra.mxu0 %v2928_v20  ;;  %8862 = vmatprep.mubr.msk.bf16.mxu0 %vm11651_vm0, %v11650_v0 }
 0x941   : > { %v9846_v55 = vpop.eup %9845  ;;  %8872 = vmatprep.subr.bf16.mxu0 %v11650_v0 }
 0x942   : > { %v2840_v34 = vmul.f32 %v9846_v55, %v13089_v4  ;;  %v2796_v12 = vpop.xlane.xlu0 %2795  ;;  %v2793_v36 = vpop.xlane.xlu1 %2792 }
 0x943   : > { %9851 = vrcp.f32 %v2796_v12 }
 0x944   : > { %9853 = vrcp.f32 %v2793_v36  ;;  %v2854_v40 = vpack.c.bf16 %v2840_v34, %v2839_v58  ;;  %v2925_v58 = vrot.slane %v2920_v8, %v12938_v21 }
 0x945   : > { %v9848_v52 = vpop.eup %9847 }
 0x946   : > { %v2802_v43 = vpop.xlane.xlu0 %2801  ;;  %v2799_v51 = vpop.xlane.xlu1 %2798  ;;  %8857 = vmatmul.mubr.msk.bf16.vlgmr.msra.gmra.mrb[4].mxu1 %vm2676_vm2, %v2854_v40  ;;  %v2841_v45 = vmul.f32 %v9848_v52, %v13095_v18  ;;  %v2911_v18 = vrot.slane %v2906_v63, %v12938_v21  ;;  %v9727_v52 = vld [vmem:[#allocation19] sm:$0xff]  }
 0x947   : > { %9855 = vrcp.f32 %v2802_v43  ;;  %8867 = vmatpush3.bf16.msra.mxu1 %v2929_v41  ;;  %8868 = vmatprep.mubr.msk.bf16.mxu1 %vm11651_vm0, %v11650_v0 }
 0x948   : > { %9857 = vrcp.f32 %v2799_v51  ;;  %8878 = vmatprep.subr.bf16.mxu1 %v11650_v0  ;;  %v2931_v28 = vmul.bf16 %v2911_v18, %v12943_v33 }
 0x949   : > { %v9850_v4 = vpop.eup %9849 }
 0x94a   : > { %v2842_v27 = vmul.f32 %v9850_v4, %v13101_v30  ;;  %v2808_v54 = vpop.xlane.xlu0 %2807  ;;  %v2805_v62 = vpop.xlane.xlu1 %2804  ;;  %v2913_v30 = vpack.i.b16 %v2868_v7, %v2868_v7 }
 0x94b   : > { %9859 = vrcp.f32 %v2808_v54 }
 0x94c   : > { %9861 = vrcp.f32 %v2805_v62  ;;  %v2855_v60 = vpack.c.bf16 %v2842_v27, %v2841_v45 }
 0x94d   : > { %v9852_v9 = vpop.eup %9851 }
 0x94e   : > { %v9854_v11 = vpop.eup %9853  ;;  %v2844_v14 = vmul.f32 %v9852_v9, %v13106_v35  ;;  %v2814_v15 = vpop.xlane.xlu0 %2813  ;;  %8863 = vmatmul.mubr.msk.bf16.vlgmr.msra.gmra.mrb[8].mxu0 %vm2676_vm2, %v2855_v60 }
 0x94f   : > { %v2811_v3 = vpop.xlane.xlu1 %2810  ;;  %v2843_v13 = vmul.f32 %v9854_v11, %v13109_v37  ;;  %9863 = vrcp.f32 %v2814_v15  ;;  %8873 = vmatpush3.bf16.msra.mxu0 %v2930_v10  ;;  %8874 = vmatprep.mubr.msk.bf16.mxu0 %vm11651_vm0, %v11650_v0  ;;  %v2918_v37 = vrot.slane %v2913_v30, %v12938_v21 }
 0x950   : > { %9865 = vrcp.f32 %v2811_v3  ;;  %8884 = vmatprep.subr.bf16.mxu0 %v11650_v0 }
 0x951   : > { %v9856_v19 = vpop.eup %9855  ;;  %v2856_v35 = vpack.c.bf16 %v2844_v14, %v2843_v13  ;;  %v2932_v32 = vmul.bf16 %v2918_v37, %v12943_v33 }
 0x952   : > { %v9858_v16 = vpop.eup %9857  ;;  %v2846_v22 = vmul.f32 %v9856_v19, %v13115_v47  ;;  %v2820_v24 = vpop.xlane.xlu0 %2819 }
 0x953   : > { %v2817_v26 = vpop.xlane.xlu1 %2816  ;;  %v2845_v29 = vmul.f32 %v9858_v16, %v13118_v25  ;;  %9867 = vrcp.f32 %v2820_v24  ;;  %8869 = vmatmul.mubr.msk.bf16.vlgmr.msra.gmra.mrb[8].mxu1 %vm2676_vm2, %v2856_v35 }
 0x954   : > { %9869 = vrcp.f32 %v2817_v26  ;;  %8879 = vmatpush3.bf16.msra.mxu1 %v2931_v28  ;;  %8880 = vmatprep.mubr.msk.bf16.mxu1 %vm11651_vm0, %v11650_v0 }
 0x955   : > { %v9860_v20 = vpop.eup %9859  ;;  %v2857_v31 = vpack.c.bf16 %v2846_v22, %v2845_v29  ;;  %8890 = vmatprep.subr.bf16.mxu1 %v11650_v0 }
 0x956   : > { %v9862_v47 = vpop.eup %9861  ;;  %v2848_v55 = vmul.f32 %v9860_v20, %v13124_v49  ;;  %v2933_v49 = vmul.bf16 %v2925_v58, %v12943_v33 }
 0x957   : > { %v2847_v25 = vmul.f32 %v9862_v47, %v13126_v57  ;;  %8875 = vmatmul.mubr.msk.bf16.vlgmr.msra.gmra.mrb[12].mxu0 %vm2676_vm2, %v2857_v31 }
 0x958   : > { %8885 = vmatpush3.bf16.msra.mxu0 %v2932_v32  ;;  %8886 = vmatprep.mubr.msk.bf16.mxu0 %vm11651_vm0, %v11650_v0 }
 0x959   : > { %v9864_v34 = vpop.eup %9863  ;;  %v2858_v12 = vpack.c.bf16 %v2848_v55, %v2847_v25  ;;  %8896 = vmatprep.subr.bf16.mxu0 %v11650_v0 }
 0x95a   : > { %v9866_v36 = vpop.eup %9865  ;;  %v2850_v23 = vmul.f32 %v9864_v34, %v13132_v59  ;;  %v9723_v59 = vld [vmem:[#allocation16] sm:$0xff]  }
 0x95b   : > { %v2849_v40 = vmul.f32 %v9866_v36, %v13134_v61  ;;  %8881 = vmatmul.mubr.msk.bf16.vlgmr.msra.gmra.mrb[12].mxu1 %vm2676_vm2, %v2858_v12  ;;  %v9724_v61 = vld [vmem:[#allocation16 + $0x8] sm:$0xff]  }
 0x95c   : > { %8891 = vmatpush3.bf16.msra.mxu1 %v2933_v49  ;;  %8892 = vmatprep.mubr.msk.bf16.mxu1 %vm11651_vm0, %v11650_v0 }
 0x95d   : > { %v9868_v57 = vpop.eup %9867  ;;  %v2859_v41 = vpack.c.bf16 %v2850_v23, %v2849_v40  ;;  %8908 = vmatprep.subr.bf16.mxu1 %v11650_v0 }
 0x95e   : > { %v9870_v17 = vpop.eup %9869  ;;  %v2852_v43 = vmul.f32 %v9868_v57, %v13140_v6  ;;  %v9725_v6 = vld [vmem:[#allocation16 + $0x10] sm:$0xff]  }
 0x95f   : > { %v2851_v51 = vmul.f32 %v9870_v17, %v13142_v56  ;;  %8887 = vmatmul.mubr.msk.bf16.vlgmr.msra.gmra.mrb[16].mxu0 %vm2676_vm2, %v2859_v41  ;;  %v9726_v56 = vld [vmem:[#allocation16 + $0x18] sm:$0xff]  }
 0x960   : > { %8904 = vmatprep.mubr.msk.bf16.mxu0 %vm11651_vm0, %v11650_v0  ;;  %8897 = vmatpush3.bf16.msra.mxu0 %v9723_v59 }
 0x961   : > { %v2860_v33 = vpack.c.bf16 %v2852_v43, %v2851_v51  ;;  %8898 = vmatprep.subr.bf16.mxu0 %v11650_v0 }
 0x963   : > { %8893 = vmatmul.mubr.msk.bf16.vlgmr.msra.gmra.mrb[16].mxu1 %vm2676_vm2, %v2860_v33 }
 0x964   : > { %8912 = vmatprep.mubr.msk.bf16.mxu1 %vm11651_vm0, %v11650_v0  ;;  %8899 = vmatpush3.bf16.msra.mxu0 %v9724_v61 }
 0x965   : > { %8900 = vmatprep.subr.bf16.mxu0 %v11650_v0  ;;  %8909 = vmatpush3.bf16.msra.mxu1 %v9727_v52 }
 0x966   : > { %8910 = vmatprep.subr.bf16.mxu1 %v11650_v0 }
 0x968   : > { %8901 = vmatpush3.bf16.msra.mxu0 %v9725_v6 }
 0x969   : > { %8902 = vmatprep.subr.bf16.mxu0 %v11650_v0 }
 0x96c   : > { %8903 = vmatpush3.bf16.msra.mxu0 %v9726_v56 }
 0x96d   : > { %8924 = vmatprep.subr.bf16.mxu0 %v11650_v0 }
 0xa12   : > { %v2971_v2 = vpop.f32.mrb[4].mxu0 }
 0xa13   : > { %v8852_v4 = vpop.f32.mrb[5].mxu0  ;;  %v3286_v54 = vsel %vm2269_vm1, %v2971_v2, 0.0 }
 0xa14   : > { %v2974_v53 = vpop.f32.mrb[6].mxu0 }
 0xa15   : > { %v8853_v45 = vpop.f32.mrb[7].mxu0  ;;  %v3301_v9 = vsel %vm2269_vm1, %v2974_v53, 0.0 }
 0xa19   : > { %v3015_v27 = vpop.f32.mrb[4].mxu1 }
 0xa1a   : > { %v3287_v62 = vsel %vm2269_vm1, %v3015_v27, 0.0  ;;  %v8858_v63 = vpop.f32.mrb[5].mxu1 }
 0xa1b   : > { %v3288_v7 = vadd.f32 %v3287_v62, %v3286_v54  ;;  %v3018_v60 = vpop.f32.mrb[6].mxu1 }
 0xa1c   : > { %v3302_v10 = vsel %vm2269_vm1, %v3018_v60, 0.0  ;;  %v8859_v11 = vpop.f32.mrb[7].mxu1  ;;  %v9728_v60 = vld [vmem:[#allocation19 + $0x8] sm:$0xff]  }
 0xa1d   : > { %v3303_v14 = vadd.f32 %v3302_v10, %v3301_v9  ;;  %8911 = vmatpush3.bf16.msra.mxu1 %v9728_v60  ;;  %v9729_v9 = vld [vmem:[#allocation25] sm:$0xff]   ;;  %v9730_v10 = vld [vmem:[#allocation25 + $0x8] sm:$0xff]   ;;  %v9731_v11 = vld [vmem:[#allocation25 + $0x10] sm:$0xff]  }
 0xa1e   : > { %8916 = vmatprep.subr.bf16.mxu1 %v11650_v0 }
 0xa21   : > { %v3059_v15 = vpop.f32.mrb[8].mxu0 }
 0xa22   : > { %v3289_v3 = vsel %vm2269_vm1, %v3059_v15, 0.0  ;;  %v8864_v18 = vpop.f32.mrb[9].mxu0  ;;  %v13236_v15 = vld [vmem:[%s12802_s17] sm:$0xff]   ;;  %s11655_s17 = smov [#allocation79]  }
 0xa23   : > { %v3290_v30 = vadd.f32 %v3289_v3, %v3288_v7  ;;  %v3062_v13 = vpop.f32.mrb[10].mxu0  ;;  %v8536_v3 = vld [vmem:[#allocation17] ss:$0 sm:$0xff]  ;;  %s11380_s22 = sshll.u32 %s11655_s17, 4  ;;  %s11381_s22 = int_to_ptr.vmem [resolvable:$false] %s11380_s22 }
 0xa24   : > { %v3304_v1 = vsel %vm2269_vm1, %v3062_v13, 0.0  ;;  %v8865_v19 = vpop.f32.mrb[11].mxu0  ;;  %s11382_s1 = scalar_lea.vmem %s11381_s22, 128  ;;  %p11383_p5 = scmp.lt.s32.totalorder %s13829_s10, %s11381_s22 }
 0xa25   : > { %v3305_v35 = vadd.f32 %v3304_v1, %v3303_v14  ;;  %v9732_v14 = vld [vmem:[#allocation25 + $0x18] sm:$0xff]   ;;  %p11384_p6 = scmp.lt.s32.totalorder %s11382_s1, %s11376_s2 }
 0xa26   : > { %v3103_v16 = vpop.f32.mrb[8].mxu1 }
 0xa27   : > { %v3291_v22 = vsel %vm2269_vm1, %v3103_v16, 0.0  ;;  %v8870_v24 = vpop.f32.mrb[9].mxu1  ;;  %p11385_p10 = por %p11384_p6, %p11383_p5 }
 0xa28   : > { %v3292_v26 = vadd.f32 %v3291_v22, %v3290_v30  ;;  %v3106_v28 = vpop.f32.mrb[10].mxu1  ;;  %v9733_v22 = vld [vmem:[#allocation22] sm:$0xff]   ;;  %v9734_v24 = vld [vmem:[#allocation22 + $0x8] sm:$0xff]  }
 0xa29   : > { %v3306_v37 = vsel %vm2269_vm1, %v3106_v28, 0.0  ;;  %v8871_v8 = vpop.f32.mrb[11].mxu1  ;;  %p11386_p11 = pnand %p11385_p10, %p11379_p7 }
 0xa2a   : > { %v3307_v29 = vadd.f32 %v3306_v37, %v3305_v35  ;;  %v3147_v20 = vpop.f32.mrb[12].mxu0  ;;  %v4032_v37 = vld [vmem:[#allocation31] sm:$0x1] }
 0xa2b   : > { %v3293_v31 = vsel %vm2269_vm1, %v3147_v20, 0.0  ;;  %v8876_v47 = vpop.f32.mrb[13].mxu0  ;;  %v4041_v20 = vpack.i.b16 %v4032_v37, %v4032_v37 }
 0xa2c   : > { %v3294_v55 = vadd.f32 %v3293_v31, %v3292_v26  ;;  %v3150_v32 = vpop.f32.mrb[14].mxu0  ;;  %v8550_v26 = vld [vmem:[#allocation26] ss:$0 sm:$0xff] }
 0xa2d   : > { %v3308_v58 = vsel %vm2269_vm1, %v3150_v32, 0.0  ;;  %v8877_v25 = vpop.f32.mrb[15].mxu0  ;;  %v4046_v32 = vrot.slane %v4041_v20, %v12938_v21 }
 0xa2e   : > { %v3309_v34 = vadd.f32 %v3308_v58, %v3307_v29  ;;  %v3191_v12 = vpop.f32.mrb[12].mxu1 }
 0xa2f   : > { %v3295_v36 = vsel %vm2269_vm1, %v3191_v12, 0.0  ;;  %v8882_v23 = vpop.f32.mrb[13].mxu1 }
 0xa30   : > { %v3296_v49 = vadd.f32 %v3295_v36, %v3294_v55  ;;  %v3194_v40 = vpop.f32.mrb[14].mxu1 }
 0xa31   : > { %v3310_v57 = vsel %vm2269_vm1, %v3194_v40, 0.0  ;;  %v8883_v41 = vpop.f32.mrb[15].mxu1 }
 0xa32   : > { %v3311_v17 = vadd.f32 %v3310_v57, %v3309_v34  ;;  %v3235_v43 = vpop.f32.mrb[16].mxu0  ;;  %v8542_v34 = vld [vmem:[#allocation20] ss:$0 sm:$0xff] }
 0xa33   : > { %v3297_v51 = vsel %vm2269_vm1, %v3235_v43, 0.0  ;;  %v8888_v33 = vpop.f32.mrb[17].mxu0  ;;  %v9735_v43 = vld [vmem:[#allocation28] sm:$0xff]  }
 0xa34   : > { %v3298_v59 = vadd.f32 %v3297_v51, %v3296_v49  ;;  %v3238_v61 = vpop.f32.mrb[18].mxu0  ;;  %v9736_v33 = vld [vmem:[#allocation28 + $0x8] sm:$0xff]  }
 0xa35   : > { %v3312_v6 = vsel %vm2269_vm1, %v3238_v61, 0.0  ;;  %v8889_v56 = vpop.f32.mrb[19].mxu0  ;;  %v9737_v61 = vld [vmem:[#allocation28 + $0x10] sm:$0xff]  }
 0xa36   : > { %v3313_v52 = vadd.f32 %v3312_v6, %v3311_v17  ;;  %v3279_v2 = vpop.f32.mrb[16].mxu1  ;;  %v9738_v56 = vld [vmem:[#allocation28 + $0x18] sm:$0xff]  }
 0xa37   : > { %v3299_v4 = vsel %vm2269_vm1, %v3279_v2, 0.0  ;;  %v8894_v53 = vpop.f32.mrb[17].mxu1  ;;  %v2223_v2 = vld [vmem:[%s1896_s7] sm:$0xf] }
 0xa38   : > { %v3300_v45 = vadd.f32 %v3299_v4, %v3298_v59  ;;  %v3282_v27 = vpop.f32.mrb[18].mxu1  ;;  %v4033_v59 = vld [vmem:[#allocation31 + $0x1] sm:$0x1]  ;;  %v8546_v53 = vld [vmem:[#allocation23] ss:$0 sm:$0xff] }
 0xa39   : > { %v3314_v54 = vsel %vm2269_vm1, %v3282_v27, 0.0  ;;  %v8895_v62 = vpop.f32.mrb[19].mxu1  ;;  %v4048_v6 = vpack.i.b16 %v4033_v59, %v4033_v59 }
 0xa3a   : > { %v3315_v63 = vadd.f32 %v3314_v54, %v3313_v52 }
 0xa3b   : > { %v4053_v52 = vrot.slane %v4048_v6, %v12938_v21 }
 0xa3c   : > { %v3316_v7 = vpack.c.bf16 %v3315_v63, %v3300_v45 }
 0xa3e   : > { %8905 = vmatmul.mubr.msk.bf16.vlgmr.msra.gmra.mrb[20].mxu0 %vm2269_vm1, %v3316_v7 }
 0xa3f   : > { %8932 = vmatprep.mubr.msk.bf16.mxu0 %vm11651_vm0, %v11650_v0  ;;  %8925 = vmatpush3.bf16.msra.mxu0 %v9729_v9 }
 0xa40   : > { %8926 = vmatprep.subr.bf16.mxu0 %v11650_v0 }
 0xa43   : > { %8927 = vmatpush3.bf16.msra.mxu0 %v9730_v10 }
 0xa44   : > { %8928 = vmatprep.subr.bf16.mxu0 %v11650_v0 }
 0xa47   : > { %8929 = vmatpush3.bf16.msra.mxu0 %v9731_v11 }
 0xa48   : > { %8930 = vmatprep.subr.bf16.mxu0 %v11650_v0 }
 0xa4b   : > { %8931 = vmatpush3.bf16.msra.mxu0 %v9732_v14 }
 0xa4c   : > { %8948 = vmatprep.subr.bf16.mxu0 %v11650_v0 }
 0xa4e   : > { %8933 = vmatmul.mubr.msk.bf16.vlgmr.msra.gmra.mrb[24].mxu0 %vm2269_vm1, %v13236_v15 }
 0xa4f   : > { %8950 = vmatprep.mubr.msk.bf16.mxu0 %vm11651_vm0, %v11650_v0 }
 0xb11   : > { %v3393_v18 = vpop.f32.mrb[20].mxu0 }
 0xb12   : > { %v8906_v30 = vpop.f32.mrb[21].mxu0  ;;  %v3394_v1 = vadd.f32 %v8536_v3, %v3393_v18 }
 0xb13   : > { %v3396_v13 = vpop.f32.mrb[22].mxu0 }
 0xb14   : > { %v3397_v19 = vadd.f32 %v8536_v3, %v3396_v13  ;;  %v8907_v35 = vpop.f32.mrb[23].mxu0  ;;  %v8556_v13 = vld [vmem:[#allocation29] ss:$0 sm:$0xff] }
 0xb16   : > { %v3400_v16 = vpack.c.bf16 %v3397_v19, %v3394_v1 }
 0xb18   : > { %8913 = vmatmul.mubr.msk.bf16.vlgmr.msra.gmra.mrb[20].mxu1 %vm3424_vm3, %v3400_v16 }
 0xb19   : > { %8920 = vmatprep.mubr.msk.bf16.mxu1 %vm11651_vm0, %v11650_v0  ;;  %8917 = vmatpush3.bf16.msra.mxu1 %v9733_v22 }
 0xb1a   : > { %8918 = vmatprep.subr.bf16.mxu1 %v11650_v0 }
 0xb1d   : > { %8919 = vmatpush3.bf16.msra.mxu1 %v9734_v24 }
 0xb1e   : > { %8936 = vmatprep.subr.bf16.mxu1 %v11650_v0 }
 0xb21   : > { %v3612_v28 = vpop.f32.mrb[24].mxu0 }
 0xb22   : > { %v3613_v8 = vadd.f32 %v8550_v26, %v3612_v28  ;;  %v8934_v29 = vpop.f32.mrb[25].mxu0 }
 0xb23   : > { %v3615_v31 = vpop.f32.mrb[26].mxu0 }
 0xb24   : > { %v3616_v47 = vadd.f32 %v8550_v26, %v3615_v31  ;;  %v8935_v55 = vpop.f32.mrb[27].mxu0  ;;  %3791 = vrot.lane.b32.xlu1 %v3613_v8, %s11652_s13 }
 0xb26   : > { %v13249_v58 = vpack.c.bf16 %v3616_v47, %v3613_v8  ;;  %3793 = vrot.lane.b32.xlu0 %v3616_v47, %s11652_s13 }
 0xb28   : > { %v4096_v25 = vmul.bf16 %v4046_v32, %v13249_v58  ;;  %v4097_v4 = vmul.bf16 %v4053_v52, %v13249_v58 }
 0xb2a   : > { %8949 = vmatpush3.bf16.msra.mxu0 %v4096_v25 }
 0xb2b   : > { %8960 = vmatprep.subr.bf16.mxu0 %v11650_v0 }
 0xb96   : > { %v3792_v28 = vpop.permute.xlu1 %3791 }
 0xb98   : > { %v3794_v25 = vpop.permute.xlu0 %3793 }
 0xbeb   : > { %v3462_v12 = vpop.f32.mrb[20].mxu1 }
 0xbec   : > { %v3463_v36 = vadd.f32 %v8542_v34, %v3462_v12  ;;  %v8914_v23 = vpop.f32.mrb[21].mxu1 }
 0xbed   : > { %v3465_v49 = vpop.f32.mrb[22].mxu1 }
 0xbee   : > { %v3466_v40 = vadd.f32 %v8542_v34, %v3465_v49  ;;  %v8915_v57 = vpop.f32.mrb[23].mxu1  ;;  %v3469_v41 = vmax.f32 %v3463_v36, 0.0 }
 0xbf0   : > { %v3470_v17 = vmax.f32 %v3466_v40, 0.0 }
 0xbf2   : > { %v3471_v51 = vpack.c.bf16 %v3470_v17, %v3469_v41 }
 0xbf4   : > { %8921 = vmatmul.mubr.msk.bf16.vlgmr.msra.gmra.mrb[24].mxu1 %vm3424_vm3, %v3471_v51 }
 0xbf5   : > { %8937 = vmatpush3.bf16.msra.mxu1 %v9735_v43  ;;  %8944 = vmatprep.mubr.msk.bf16.mxu1 %vm11651_vm0, %v11650_v0 }
 0xbf6   : > { %8938 = vmatprep.subr.bf16.mxu1 %v11650_v0 }
 0xbf9   : > { %8939 = vmatpush3.bf16.msra.mxu1 %v9736_v33 }
 0xbfa   : > { %8940 = vmatprep.subr.bf16.mxu1 %v11650_v0 }
 0xbfd   : > { %8941 = vmatpush3.bf16.msra.mxu1 %v9737_v61 }
 0xbfe   : > { %8942 = vmatprep.subr.bf16.mxu1 %v11650_v0 }
 0xc01   : > { %8943 = vmatpush3.bf16.msra.mxu1 %v9738_v56 }
 0xc02   : > { %8954 = vmatprep.subr.bf16.mxu1 %v11650_v0 }
 0xc04   : > { %8945 = vmatmul.mubr.msk.bf16.vlgmr.msra.gmra.mrb[28].mxu1 %vm2269_vm1, %v2223_v2 }
 0xc05   : > { %8955 = vmatpush3.bf16.msra.mxu1 %v4097_v4  ;;  %8956 = vmatprep.mubr.msk.bf16.mxu1 %vm11651_vm0, %v11650_v0 }
 0xc06   : > { %8966 = vmatprep.subr.bf16.mxu1 %v11650_v0 }
 0xcc7   : > { %v3532_v45 = vpop.f32.mrb[24].mxu1 }
 0xcc8   : > { %v3533_v27 = vadd.f32 %v8546_v53, %v3532_v45  ;;  %v8922_v54 = vpop.f32.mrb[25].mxu1 }
 0xcc9   : > { %v3535_v62 = vpop.f32.mrb[26].mxu1 }
 0xcca   : > { %v3536_v63 = vadd.f32 %v8546_v53, %v3535_v62  ;;  %v8923_v7 = vpop.f32.mrb[27].mxu1  ;;  %v7747_v60 = vsel %vm3424_vm3, %v3533_v27, 0.0 }
 0xccc   : > { %v13270_v9 = vpack.c.bf16 %v3536_v63, %v3533_v27  ;;  %v7748_v10 = vsel %vm3424_vm3, %v3536_v63, 0.0 }
 0xccd   : > { %v7749_v11 = vadd.f32 %v7748_v10, %v7747_v60 }
 0xccf   : > { %v7750_v14 = vrot.slane %v7749_v11, 4 }
 0xcd1   : > { %v7751_v3 = vadd.f32 %v7750_v14, %v7749_v11 }
 0xcd3   : > { %v7752_v18 = vrot.slane %v7751_v3, 2 }
 0xcd5   : > { %v7753_v30 = vadd.f32 %v7752_v18, %v7751_v3 }
 0xcd7   : > { %v7754_v1 = vrot.slane %v7753_v30, 1  ;;  %v3695_v19 = vpop.f32.mrb[28].mxu1 }
 0xcd8   : > { %v3696_v35 = vadd.f32 %v8556_v13, %v3695_v19  ;;  %v8946_v16 = vpop.f32.mrb[29].mxu1 }
 0xcd9   : > { %v7755_v22 = vadd.f32 %v7754_v1, %v7753_v30  ;;  %v3698_v24 = vpop.f32.mrb[30].mxu1 }
 0xcda   : > { %v8947_v26 = vpop.f32.mrb[31].mxu1  ;;  %3701 = vxpose.xlu1.b32.start.end [1/1] (short) (narrow) %v3696_v35, 8 }
 0xcdb   : > { %7757 = vst.msk [vmem:[%s13274_s15] sm:$0x1] %vm7756_vm4, %v7755_v22 }
 0xd5a   : > { %v3717_v37 = vpop.trf.xlu1 }
 0xd5b   : > { %v3771_v8 = vrot.slane %v3717_v37, %v12960_v42  ;;  %v3736_v29 = vrot.slane %v3717_v37, %v12938_v21  ;;  %v3785_v20 = vrot.slane %v3717_v37, %v12976_v50  ;;  %v3743_v31 = vrot.slane %v3717_v37, %v12955_v39 }
 0xd5c   : > { %v3750_v47 = vrot.slane %v3717_v37, %v12964_v44  ;;  %v3757_v55 = vrot.slane %v3717_v37, %v12972_v48  ;;  %v3764_v32 = vrot.slane %v3717_v37, %v12952_v38  ;;  %v3778_v34 = vrot.slane %v3717_v37, %v12968_v46 }
 0xd5d   : > { %3773 = vbcast.lane.b32.xlu1 %v3771_v8, 256  ;;  %3738 = vbcast.lane.b32.xlu0 %v3736_v29, 256 }
 0xd61   : > { %3787 = vbcast.lane.b32.xlu1 %v3785_v20, 256  ;;  %3745 = vbcast.lane.b32.xlu0 %v3743_v31, 256 }
 0xd65   : > { %3752 = vbcast.lane.b32.xlu0 %v3750_v47, 256 }
 0xd69   : > { %3759 = vbcast.lane.b32.xlu0 %v3757_v55, 256 }
 0xd6d   : > { %3766 = vbcast.lane.b32.xlu0 %v3764_v32, 256 }
 0xd8b   : > { %3797 = vxpose.xlu0.b32.start [1/2] (short) (narrow) %v3792_v28, 8 }
 0xd8f   : > { %3798 = vxpose.xlu0.b32.end [2/2] (short) (narrow) %v3794_v25, 8 }
 0xdb8   : > { %3780 = vbcast.lane.b32.xlu0 %v3778_v34, 256 }
 0xdcf   : > { %v3739_v12 = vpop.permute.xlu0 %3738  ;;  %v3774_v14 = vpop.permute.xlu1 %3773 }
 0xdd3   : > { %v3746_v36 = vpop.permute.xlu0 %3745  ;;  %v3788_v29 = vpop.permute.xlu1 %3787 }
 0xdd7   : > { %v3753_v23 = vpop.permute.xlu0 %3752 }
 0xddb   : > { %v3760_v49 = vpop.permute.xlu0 %3759 }
 0xddf   : > { %v3767_v40 = vpop.permute.xlu0 %3766 }
 0xe0b   : > { %v3813_v57 = vpop.trf.xlu0 }
 0xe0c   : > { %v3830_v41 = vcombine.high %v3813_v57, %v3813_v57  ;;  %v3837_v17 = vrot.slane %v3813_v57, %v12986_v5 }
 0xe0e   : > { %v3845_v43 = vcombine.high %v3837_v17, %v3837_v17  ;;  %v3853_v51 = vrot.slane %v3837_v17, %v12986_v5  ;;  %v3844_v33 = vrot.slane %v3830_v41, %v12986_v5 }
 0xe10   : > { %v3867_v59 = vrot.slane %v3845_v43, %v12986_v5  ;;  %v3875_v61 = vcombine.high %v3853_v51, %v3853_v51  ;;  %v3882_v6 = vrot.slane %v3853_v51, %v12938_v21  ;;  %v3846_v4 = vcombine.high %v3844_v33, %v3844_v33 }
 0xe11   : > { %v3860_v53 = vrot.slane %v3844_v33, %v12986_v5 }
 0xe12   : > { %v3877_v56 = vcombine.high %v3867_v59, %v3867_v59  ;;  %v3886_v52 = vrot.slane %v3867_v59, %v12938_v21  ;;  %v3890_v2 = vrot.slane %v3875_v61, %v12938_v21  ;;  %v3919_v45 = vadd.f32 %v3882_v6, %v3739_v12 }
 0xe13   : > { %v3874_v63 = vrot.slane %v3846_v4, %v12986_v5  ;;  %v3898_v7 = vrot.slane %v3860_v53, %v12938_v21  ;;  %v3876_v24 = vcombine.high %v3860_v53, %v3860_v53 }
 0xe14   : > { %v3894_v27 = vrot.slane %v3877_v56, %v12938_v21  ;;  %v3920_v54 = vadd.f32 %v3886_v52, %v3746_v36  ;;  %v3921_v62 = vadd.f32 %v3890_v2, %v3753_v23  ;;  %9871 = vtanh.f32 %v3919_v45 }
 0xe15   : > { %v3902_v10 = vrot.slane %v3874_v63, %v12938_v21  ;;  %v3923_v11 = vadd.f32 %v3898_v7, %v3767_v40  ;;  %v3878_v35 = vcombine.high %v3874_v63, %v3874_v63  ;;  %v3906_v8 = vrot.slane %v3876_v24, %v12938_v21 }
 0xe16   : > { %9873 = vtanh.f32 %v3920_v54  ;;  %v3922_v60 = vadd.f32 %v3894_v27, %v3760_v49 }
 0xe17   : > { %9875 = vtanh.f32 %v3921_v62  ;;  %v3924_v18 = vadd.f32 %v3902_v10, %v3774_v14  ;;  %v3910_v26 = vrot.slane %v3878_v35, %v12938_v21 }
 0xe18   : > { %9877 = vtanh.f32 %v3922_v60 }
 0xe19   : > { %9879 = vtanh.f32 %v3923_v11  ;;  %v3926_v47 = vadd.f32 %v3910_v26, %v3788_v29 }
 0xe1a   : > { %9881 = vtanh.f32 %v3924_v18 }
 0xe1e   : > { %v9872_v3 = vpop.eup %9871 }
 0xe1f   : > { %v3935_v13 = vsel %vm2676_vm2, %v9872_v3, -inf }
 0xe20   : > { %v9874_v30 = vpop.eup %9873  ;;  %3936 = vmax.xlane.f32.xlu1 %v3935_v13 }
 0xe21   : > { %v9876_v1 = vpop.eup %9875  ;;  %v3938_v19 = vsel %vm2676_vm2, %v9874_v30, -inf }
 0xe22   : > { %3939 = vmax.xlane.f32.xlu0 %v3938_v19  ;;  %v3941_v16 = vsel %vm2676_vm2, %v9876_v1, -inf  ;;  %v9878_v22 = vpop.eup %9877 }
 0xe23   : > { %v3944_v28 = vsel %vm2676_vm2, %v9878_v22, -inf  ;;  %v9880_v37 = vpop.eup %9879 }
 0xe24   : > { %3942 = vmax.xlane.f32.xlu1 %v3941_v16  ;;  %v3947_v55 = vsel %vm2676_vm2, %v9880_v37, -inf  ;;  %v9882_v32 = vpop.eup %9881 }
 0xe25   : > { %v3950_v25 = vsel %vm2676_vm2, %v9882_v32, -inf }
 0xe28   : > { %3945 = vmax.xlane.f32.xlu1 %v3944_v28 }
 0xe2a   : > { %v3781_v20 = vpop.permute.xlu0 %3780 }
 0xe2b   : > { %v3925_v31 = vadd.f32 %v3906_v8, %v3781_v20 }
 0xe2c   : > { %3948 = vmax.xlane.f32.xlu1 %v3947_v55  ;;  %v4035_v55 = vld [vmem:[#allocation31 + $0x3] sm:$0x1] }
 0xe2d   : > { %9883 = vtanh.f32 %v3925_v31 }
 0xe2e   : > { %9885 = vtanh.f32 %v3926_v47  ;;  %v4034_v47 = vld [vmem:[#allocation31 + $0x2] sm:$0x1] }
 0xe30   : > { %3951 = vmax.xlane.f32.xlu1 %v3950_v25 }
 0xe37   : > { %v9884_v34 = vpop.eup %9883 }
 0xe38   : > { %v3953_v12 = vsel %vm2676_vm2, %v9884_v34, -inf  ;;  %v9886_v36 = vpop.eup %9885 }
 0xe39   : > { %3954 = vmax.xlane.f32.xlu1 %v3953_v12  ;;  %v3956_v23 = vsel %vm2676_vm2, %v9886_v36, -inf }
 0xe3d   : > { %3957 = vmax.xlane.f32.xlu1 %v3956_v23 }
 0xead   : > { %v3937_v49 = vpop.xlane.xlu1 %3936 }
 0xeae   : > { %v3959_v40 = vsub.f32 %v9872_v3, %v3937_v49 }
 0xeaf   : > { %v3940_v57 = vpop.xlane.xlu0 %3939 }
 0xeb0   : > { %v3960_v41 = vsub.f32 %v9874_v30, %v3940_v57  ;;  %v3967_v17 = vmul.f32 1.442695, %v3959_v40 }
 0xeb1   : > { %v3943_v51 = vpop.xlane.xlu1 %3942 }
 0xeb2   : > { %v3969_v43 = vmul.f32 1.442695, %v3960_v41  ;;  %9887 = vpow2.f32 %v3967_v17  ;;  %v3961_v33 = vsub.f32 %v9876_v1, %v3943_v51  ;;  %v4036_v41 = vld [vmem:[#allocation31 + $0x4] sm:$0x1] }
 0xeb4   : > { %9889 = vpow2.f32 %v3969_v43  ;;  %v3971_v59 = vmul.f32 1.442695, %v3961_v33  ;;  %v4037_v43 = vld [vmem:[#allocation31 + $0x5] sm:$0x1] }
 0xeb5   : > { %v3946_v61 = vpop.xlane.xlu1 %3945 }
 0xeb6   : > { %9891 = vpow2.f32 %v3971_v59  ;;  %v3962_v6 = vsub.f32 %v9878_v22, %v3946_v61 }
 0xeb8   : > { %v3973_v56 = vmul.f32 1.442695, %v3962_v6  ;;  %v4069_v6 = vpack.i.b16 %v4036_v41, %v4036_v41 }
 0xeb9   : > { %v3949_v52 = vpop.xlane.xlu1 %3948 }
 0xeba   : > { %9893 = vpow2.f32 %v3973_v56  ;;  %v3963_v2 = vsub.f32 %v9880_v37, %v3949_v52 }
 0xebc   : > { %v9888_v4 = vpop.eup %9887  ;;  %v3975_v53 = vmul.f32 1.442695, %v3963_v2  ;;  %v4076_v2 = vpack.i.b16 %v4037_v43, %v4037_v43 }
 0xebd   : > { %v3952_v27 = vpop.xlane.xlu1 %3951  ;;  %v3983_v54 = vsel %vm2676_vm2, %v9888_v4, 0.0 }
 0xebe   : > { %v9890_v45 = vpop.eup %9889  ;;  %9895 = vpow2.f32 %v3975_v53  ;;  %v3964_v62 = vsub.f32 %v9882_v32, %v3952_v27  ;;  %3984 = vadd.xlane.f32.xlu0 %v3983_v54  ;;  %v4055_v32 = vpack.i.b16 %v4034_v47, %v4034_v47  ;;  %v4081_v54 = vrot.slane %v4076_v2, %v12938_v21 }
 0xebf   : > { %v3986_v63 = vsel %vm2676_vm2, %v9890_v45, 0.0 }
 0xec0   : > { %3987 = vadd.xlane.f32.xlu1 %v3986_v63  ;;  %v9892_v7 = vpop.eup %9891  ;;  %v3977_v60 = vmul.f32 1.442695, %v3964_v62  ;;  %v4038_v62 = vld [vmem:[#allocation31 + $0x6] sm:$0x1]  ;;  %v4039_v63 = vld [vmem:[#allocation31 + $0x7] sm:$0x1] }
 0xec1   : > { %v3989_v10 = vsel %vm2676_vm2, %v9892_v7, 0.0 }
 0xec2   : > { %9897 = vpow2.f32 %v3977_v60  ;;  %3990 = vadd.xlane.f32.xlu0 %v3989_v10 }
 0xec4   : > { %v13311_v11 = vpop.eup %9893 }
 0xec5   : > { %v3992_v3 = vsel %vm2676_vm2, %v13311_v11, 0.0 }
 0xec6   : > { %v3955_v14 = vpop.xlane.xlu1 %3954  ;;  %3993 = vadd.xlane.f32.xlu1 %v3992_v3  ;;  %v4083_v3 = vpack.i.b16 %v4038_v62, %v4038_v62 }
 0xec7   : > { %v3965_v18 = vsub.f32 %v9884_v34, %v3955_v14  ;;  %v4062_v34 = vpack.i.b16 %v4035_v55, %v4035_v55 }
 0xec8   : > { %v13315_v30 = vpop.eup %9895 }
 0xec9   : > { %v3979_v13 = vmul.f32 1.442695, %v3965_v18  ;;  %v3995_v1 = vsel %vm2676_vm2, %v13315_v30, 0.0  ;;  %v4067_v57 = vrot.slane %v4062_v34, %v12938_v21  ;;  %v9742_v34 = vld [vmem:[#allocation32 + $0x18] sm:$0xff]  }
 0xeca   : > { %v3958_v19 = vpop.xlane.xlu1 %3957  ;;  %3996 = vadd.xlane.f32.xlu0 %v3995_v1  ;;  %v4090_v1 = vpack.i.b16 %v4039_v63, %v4039_v63 }
 0xecb   : > { %9899 = vpow2.f32 %v3979_v13  ;;  %v3966_v35 = vsub.f32 %v9886_v36, %v3958_v19  ;;  %v4060_v36 = vrot.slane %v4055_v32, %v12938_v21  ;;  %v4099_v52 = vmul.bf16 %v4067_v57, %v13249_v58 }
 0xecc   : > { %v13319_v16 = vpop.eup %9897  ;;  %v4101_v13 = vmul.bf16 %v4081_v54, %v13249_v58 }
 0xecd   : > { %v3981_v22 = vmul.f32 1.442695, %v3966_v35  ;;  %v3998_v24 = vsel %vm2676_vm2, %v13319_v16, 0.0  ;;  %v4098_v59 = vmul.bf16 %v4060_v36, %v13249_v58  ;;  %v4088_v35 = vrot.slane %v4083_v3, %v12938_v21 }
 0xece   : > { %3999 = vadd.xlane.f32.xlu1 %v3998_v24 }
 0xecf   : > { %9901 = vpow2.f32 %v3981_v22 }
 0xed5   : > { %v13323_v26 = vpop.eup %9899 }
 0xed6   : > { %v4001_v28 = vsel %vm2676_vm2, %v13323_v26, 0.0 }
 0xed7   : > { %4002 = vadd.xlane.f32.xlu0 %v4001_v28  ;;  %v4095_v28 = vrot.slane %v4090_v1, %v12938_v21 }
 0xed9   : > { %v13327_v37 = vpop.eup %9901 }
 0xeda   : > { %v4004_v8 = vsel %vm2676_vm2, %v13327_v37, 0.0 }
 0xedb   : > { %4005 = vadd.xlane.f32.xlu1 %v4004_v8  ;;  %v4102_v8 = vmul.bf16 %v4088_v35, %v13249_v58 }
 0xf4b   : > { %v3985_v29 = vpop.xlane.xlu0 %3984 }
 0xf4c   : > { %9903 = vrcp.f32 %v3985_v29 }
 0xf4d   : > { %v3988_v20 = vpop.xlane.xlu1 %3987 }
 0xf4e   : > { %9905 = vrcp.f32 %v3988_v20  ;;  %v4103_v20 = vmul.bf16 %v4095_v28, %v13249_v58 }
 0xf4f   : > { %v3991_v31 = vpop.xlane.xlu0 %3990 }
 0xf50   : > { %9907 = vrcp.f32 %v3991_v31 }
 0xf53   : > { %v3994_v25 = vpop.xlane.xlu1 %3993 }
 0xf54   : > { %9909 = vrcp.f32 %v3994_v25  ;;  %v9739_v25 = vld [vmem:[#allocation32] sm:$0xff]  }
 0xf56   : > { %v9904_v12 = vpop.eup %9903 }
 0xf57   : > { %v4015_v49 = vmul.f32 %v9904_v12, %v9888_v4  ;;  %v3997_v40 = vpop.xlane.xlu0 %3996  ;;  %v9743_v12 = vld [vmem:[#allocation35] sm:$0xff]  }
 0xf58   : > { %v9906_v23 = vpop.eup %9905  ;;  %9911 = vrcp.f32 %v3997_v40 }
 0xf59   : > { %v4016_v17 = vmul.f32 %v9906_v23, %v9890_v45  ;;  %v4023_v51 = vpack.c.bf16 %v4015_v49, %v4015_v49  ;;  %v4074_v45 = vrot.slane %v4069_v6, %v12938_v21 }
 0xf5a   : > { %v9908_v33 = vpop.eup %9907 }
 0xf5b   : > { %v4024_v61 = vpack.c.bf16 %v4016_v17, %v4016_v17  ;;  %v4000_v56 = vpop.xlane.xlu1 %3999  ;;  %8951 = vmatmul.mubr.msk.bf16.vlgmr.msra.gmra.mrb[28].mxu0 %vm2676_vm2, %v4023_v51  ;;  %v4017_v4 = vmul.f32 %v9908_v33, %v9892_v7  ;;  %v4100_v10 = vmul.bf16 %v4074_v45, %v13249_v58 }
 0xf5c   : > { %9913 = vrcp.f32 %v4000_v56  ;;  %8961 = vmatpush3.bf16.msra.mxu0 %v4098_v59  ;;  %8962 = vmatprep.mubr.msk.bf16.mxu0 %vm11651_vm0, %v11650_v0 }
 0xf5d   : > { %8957 = vmatmul.mubr.msk.bf16.vlgmr.msra.gmra.mrb[32].mxu1 %vm2676_vm2, %v4024_v61  ;;  %8972 = vmatprep.subr.bf16.mxu0 %v11650_v0  ;;  %v4025_v7 = vpack.c.bf16 %v4017_v4, %v4017_v4 }
 0xf5e   : > { %8967 = vmatpush3.bf16.msra.mxu1 %v4099_v52  ;;  %v9910_v53 = vpop.eup %9909  ;;  %8968 = vmatprep.mubr.msk.bf16.mxu1 %vm11651_vm0, %v11650_v0 }
 0xf5f   : > { %v4018_v27 = vmul.f32 %v9910_v53, %v13311_v11  ;;  %8978 = vmatprep.subr.bf16.mxu1 %v11650_v0 }
 0xf61   : > { %v4026_v14 = vpack.c.bf16 %v4018_v27, %v4018_v27 }
 0xf62   : > { %v9912_v60 = vpop.eup %9911 }
 0xf63   : > { %8963 = vmatmul.mubr.msk.bf16.vlgmr.msra.gmra.mrb[32].mxu0 %vm2676_vm2, %v4025_v7  ;;  %v4019_v11 = vmul.f32 %v9912_v60, %v13315_v30 }
 0xf64   : > { %v4003_v18 = vpop.xlane.xlu0 %4002  ;;  %8973 = vmatpush3.bf16.msra.mxu0 %v4100_v10  ;;  %8974 = vmatprep.mubr.msk.bf16.mxu0 %vm11651_vm0, %v11650_v0 }
 0xf65   : > { %9915 = vrcp.f32 %v4003_v18  ;;  %8969 = vmatmul.mubr.msk.bf16.vlgmr.msra.gmra.mrb[36].mxu1 %vm2676_vm2, %v4026_v14  ;;  %8984 = vmatprep.subr.bf16.mxu0 %v11650_v0  ;;  %v4027_v30 = vpack.c.bf16 %v4019_v11, %v4019_v11 }
 0xf66   : > { %8979 = vmatpush3.bf16.msra.mxu1 %v4101_v13  ;;  %v9914_v19 = vpop.eup %9913  ;;  %8980 = vmatprep.mubr.msk.bf16.mxu1 %vm11651_vm0, %v11650_v0 }
 0xf67   : > { %v4020_v22 = vmul.f32 %v9914_v19, %v13319_v16  ;;  %8990 = vmatprep.subr.bf16.mxu1 %v11650_v0 }
 0xf68   : > { %v4006_v24 = vpop.xlane.xlu1 %4005 }
 0xf69   : > { %9917 = vrcp.f32 %v4006_v24  ;;  %v4028_v29 = vpack.c.bf16 %v4020_v22, %v4020_v22 }
 0xf6b   : > { %8975 = vmatmul.mubr.msk.bf16.vlgmr.msra.gmra.mrb[36].mxu0 %vm2676_vm2, %v4027_v30 }
 0xf6c   : > { %8985 = vmatpush3.bf16.msra.mxu0 %v4102_v8  ;;  %8986 = vmatprep.mubr.msk.bf16.mxu0 %vm11651_vm0, %v11650_v0 }
 0xf6d   : > { %8981 = vmatmul.mubr.msk.bf16.vlgmr.msra.gmra.mrb[40].mxu1 %vm2676_vm2, %v4028_v29  ;;  %8996 = vmatprep.subr.bf16.mxu0 %v11650_v0 }
 0xf6e   : > { %8991 = vmatpush3.bf16.msra.mxu1 %v4103_v20  ;;  %8992 = vmatprep.mubr.msk.bf16.mxu1 %vm11651_vm0, %v11650_v0 }
 0xf6f   : > { %v9916_v16 = vpop.eup %9915  ;;  %9008 = vmatprep.subr.bf16.mxu1 %v11650_v0 }
 0xf70   : > { %v4021_v31 = vmul.f32 %v9916_v16, %v13323_v26  ;;  %v9740_v26 = vld [vmem:[#allocation32 + $0x8] sm:$0xff]  }
 0xf72   : > { %v4029_v47 = vpack.c.bf16 %v4021_v31, %v4021_v31 }
 0xf73   : > { %v9918_v55 = vpop.eup %9917 }
 0xf74   : > { %v4022_v58 = vmul.f32 %v9918_v55, %v13327_v37  ;;  %8987 = vmatmul.mubr.msk.bf16.vlgmr.msra.gmra.mrb[40].mxu0 %vm2676_vm2, %v4029_v47  ;;  %v9741_v37 = vld [vmem:[#allocation32 + $0x10] sm:$0xff]  }
 0xf75   : > { %9004 = vmatprep.mubr.msk.bf16.mxu0 %vm11651_vm0, %v11650_v0  ;;  %8997 = vmatpush3.bf16.msra.mxu0 %v9739_v25 }
 0xf76   : > { %v4030_v32 = vpack.c.bf16 %v4022_v58, %v4022_v58  ;;  %8998 = vmatprep.subr.bf16.mxu0 %v11650_v0 }
 0xf78   : > { %8993 = vmatmul.mubr.msk.bf16.vlgmr.msra.gmra.mrb[44].mxu1 %vm2676_vm2, %v4030_v32 }
 0xf79   : > { %9012 = vmatprep.mubr.msk.bf16.mxu1 %vm11651_vm0, %v11650_v0  ;;  %8999 = vmatpush3.bf16.msra.mxu0 %v9740_v26  ;;  %v9744_v26 = vld [vmem:[#allocation35 + $0x8] sm:$0xff]  }
 0xf7a   : > { %9000 = vmatprep.subr.bf16.mxu0 %v11650_v0  ;;  %9009 = vmatpush3.bf16.msra.mxu1 %v9743_v12  ;;  %v9747_v12 = vld [vmem:[#allocation41 + $0x10] sm:$0xff]  }
 0xf7b   : > { %9010 = vmatprep.subr.bf16.mxu1 %v11650_v0 }
 0xf7d   : > { %9001 = vmatpush3.bf16.msra.mxu0 %v9741_v37  ;;  %v9745_v37 = vld [vmem:[#allocation41] sm:$0xff]  }
 0xf7e   : > { %9002 = vmatprep.subr.bf16.mxu0 %v11650_v0  ;;  %9011 = vmatpush3.bf16.msra.mxu1 %v9744_v26 }
 0xf7f   : > { %9016 = vmatprep.subr.bf16.mxu1 %v11650_v0 }
 0xf81   : > { %9003 = vmatpush3.bf16.msra.mxu0 %v9742_v34  ;;  %v9746_v34 = vld [vmem:[#allocation41 + $0x8] sm:$0xff]  }
 0xf82   : > { %9024 = vmatprep.subr.bf16.mxu0 %v11650_v0 }
0x102e   : > { %v4141_v36 = vpop.f32.mrb[28].mxu0 }
0x102f   : > { %v8952_v23 = vpop.f32.mrb[29].mxu0  ;;  %v4448_v40 = vsel %vm2269_vm1, %v4141_v36, 0.0  ;;  %v9748_v36 = vld [vmem:[#allocation41 + $0x18] sm:$0xff]  }
0x1030   : > { %v4184_v49 = vpop.f32.mrb[32].mxu1  ;;  %v4144_v57 = vpop.f32.mrb[30].mxu0  ;;  %v8570_v23 = vld [vmem:[#allocation34] ss:$0 sm:$0xff] }
0x1031   : > { %v4449_v41 = vsel %vm2269_vm1, %v4184_v49, 0.0  ;;  %v8958_v17 = vpop.f32.mrb[33].mxu1  ;;  %v8953_v51 = vpop.f32.mrb[31].mxu0 }
0x1032   : > { %v4450_v43 = vadd.f32 %v4449_v41, %v4448_v40  ;;  %v4187_v33 = vpop.f32.mrb[34].mxu1  ;;  %v9749_v17 = vld [vmem:[#allocation38] sm:$0xff]  }
0x1033   : > { %v8959_v59 = vpop.f32.mrb[35].mxu1  ;;  %v8584_v33 = vld [vmem:[#allocation43] ss:$0 sm:$0xff] }
0x1036   : > { %v4227_v61 = vpop.f32.mrb[32].mxu0 }
0x1037   : > { %v4451_v6 = vsel %vm2269_vm1, %v4227_v61, 0.0  ;;  %v8964_v56 = vpop.f32.mrb[33].mxu0  ;;  %v5174_v61 = vld [vmem:[#allocation47] sm:$0x1] }
0x1038   : > { %v4270_v52 = vpop.f32.mrb[36].mxu1  ;;  %v4452_v2 = vadd.f32 %v4451_v6, %v4450_v43  ;;  %v4230_v4 = vpop.f32.mrb[34].mxu0 }
0x1039   : > { %v4453_v53 = vsel %vm2269_vm1, %v4270_v52, 0.0  ;;  %v8970_v45 = vpop.f32.mrb[37].mxu1  ;;  %v8965_v27 = vpop.f32.mrb[35].mxu0  ;;  %v5183_v52 = vpack.i.b16 %v5174_v61, %v5174_v61 }
0x103a   : > { %v4273_v54 = vpop.f32.mrb[38].mxu1  ;;  %v4454_v62 = vadd.f32 %v4453_v53, %v4452_v2 }
0x103b   : > { %v8971_v63 = vpop.f32.mrb[39].mxu1  ;;  %v5188_v45 = vrot.slane %v5183_v52, %v12938_v21 }
0x103e   : > { %v4313_v7 = vpop.f32.mrb[36].mxu0 }
0x103f   : > { %v4455_v60 = vsel %vm2269_vm1, %v4313_v7, 0.0  ;;  %v8976_v10 = vpop.f32.mrb[37].mxu0 }
0x1040   : > { %v4356_v14 = vpop.f32.mrb[40].mxu1  ;;  %v4456_v3 = vadd.f32 %v4455_v60, %v4454_v62  ;;  %v4316_v18 = vpop.f32.mrb[38].mxu0  ;;  %v8576_v62 = vld [vmem:[#allocation37] ss:$0 sm:$0xff] }
0x1041   : > { %v4457_v13 = vsel %vm2269_vm1, %v4356_v14, 0.0  ;;  %v8982_v1 = vpop.f32.mrb[41].mxu1  ;;  %v8977_v11 = vpop.f32.mrb[39].mxu0  ;;  %v9751_v18 = vld [vmem:[#allocation44] sm:$0xff]  }
0x1042   : > { %v4359_v19 = vpop.f32.mrb[42].mxu1  ;;  %v4458_v35 = vadd.f32 %v4457_v13, %v4456_v3  ;;  %v9752_v1 = vld [vmem:[#allocation44 + $0x8] sm:$0xff]   ;;  %v5175_v11 = vld [vmem:[#allocation47 + $0x1] sm:$0x1] }
0x1043   : > { %v8983_v22 = vpop.f32.mrb[43].mxu1  ;;  %v9753_v19 = vld [vmem:[#allocation44 + $0x10] sm:$0xff]  }
0x1044   : > { %v9754_v22 = vld [vmem:[#allocation44 + $0x18] sm:$0xff]  }
0x1047   : > { %v4399_v24 = vpop.f32.mrb[40].mxu0 }
0x1048   : > { %v4459_v28 = vsel %vm2269_vm1, %v4399_v24, 0.0  ;;  %v8988_v30 = vpop.f32.mrb[41].mxu0 }
0x1049   : > { %v4460_v8 = vadd.f32 %v4459_v28, %v4458_v35  ;;  %v4402_v29 = vpop.f32.mrb[42].mxu0  ;;  %v5190_v35 = vpack.i.b16 %v5175_v11, %v5175_v11  ;;  %v2224_v28 = vld [vmem:[%s1905_s4] sm:$0xf] }
0x104a   : > { %v8989_v20 = vpop.f32.mrb[43].mxu0 }
0x104b   : > { %v4442_v16 = vpop.f32.mrb[44].mxu1  ;;  %v5195_v24 = vrot.slane %v5190_v35, %v12938_v21 }
0x104c   : > { %v4461_v31 = vsel %vm2269_vm1, %v4442_v16, 0.0  ;;  %v8994_v47 = vpop.f32.mrb[45].mxu1 }
0x104d   : > { %v4462_v55 = vadd.f32 %v4461_v31, %v4460_v8  ;;  %v4445_v58 = vpop.f32.mrb[46].mxu1  ;;  %v8580_v8 = vld [vmem:[#allocation40] ss:$0 sm:$0xff] }
0x104e   : > { %v8995_v32 = vpop.f32.mrb[47].mxu1 }
0x104f   : > { %v4463_v25 = vpack.c.bf16 %v4462_v55, %v4462_v55 }
0x1051   : > { %9005 = vmatmul.mubr.msk.bf16.vlgmr.msra.gmra.mrb[44].mxu0 %vm2269_vm1, %v4463_v25 }
0x1052   : > { %9032 = vmatprep.mubr.msk.bf16.mxu0 %vm11651_vm0, %v11650_v0  ;;  %9025 = vmatpush3.bf16.msra.mxu0 %v9745_v37 }
0x1053   : > { %9026 = vmatprep.subr.bf16.mxu0 %v11650_v0 }
0x1056   : > { %9027 = vmatpush3.bf16.msra.mxu0 %v9746_v34 }
0x1057   : > { %9028 = vmatprep.subr.bf16.mxu0 %v11650_v0 }
0x105a   : > { %9029 = vmatpush3.bf16.msra.mxu0 %v9747_v12  ;;  %v8590_v12 = vld [vmem:[#allocation46] ss:$0 sm:$0xff] }
0x105b   : > { %9030 = vmatprep.subr.bf16.mxu0 %v11650_v0 }
0x105e   : > { %9031 = vmatpush3.bf16.msra.mxu0 %v9748_v36 }
0x105f   : > { %9048 = vmatprep.subr.bf16.mxu0 %v11650_v0 }
0x1061   : > { %9033 = vmatmul.mubr.msk.bf16.vlgmr.msra.gmra.mrb[48].mxu0 %vm2269_vm1, %v13236_v15  ;;  %v9750_v15 = vld [vmem:[#allocation38 + $0x8] sm:$0xff]  }
0x1062   : > { %9050 = vmatprep.mubr.msk.bf16.mxu0 %vm11651_vm0, %v11650_v0 }
0x1124   : > { %v4540_v49 = vpop.f32.mrb[44].mxu0 }
0x1125   : > { %v4541_v40 = vadd.f32 %v8570_v23, %v4540_v49  ;;  %v9006_v57 = vpop.f32.mrb[45].mxu0 }
0x1126   : > { %v4543_v41 = vpop.f32.mrb[46].mxu0 }
0x1127   : > { %v4546_v43 = vpack.c.bf16 %v4541_v40, %v4541_v40  ;;  %v9007_v51 = vpop.f32.mrb[47].mxu0 }
0x1129   : > { %9013 = vmatmul.mubr.msk.bf16.vlgmr.msra.gmra.mrb[48].mxu1 %vm3424_vm3, %v4546_v43 }
0x112a   : > { %9017 = vmatpush3.bf16.msra.mxu1 %v9749_v17  ;;  %9020 = vmatprep.mubr.msk.bf16.mxu1 %vm11651_vm0, %v11650_v0 }
0x112b   : > { %9018 = vmatprep.subr.bf16.mxu1 %v11650_v0 }
0x112e   : > { %9019 = vmatpush3.bf16.msra.mxu1 %v9750_v15 }
0x112f   : > { %9036 = vmatprep.subr.bf16.mxu1 %v11650_v0 }
0x1134   : > { %v4754_v59 = vpop.f32.mrb[48].mxu0 }
0x1135   : > { %v4755_v6 = vadd.f32 %v8584_v33, %v4754_v59  ;;  %v9034_v56 = vpop.f32.mrb[49].mxu0 }
0x1136   : > { %v4757_v2 = vpop.f32.mrb[50].mxu0 }
0x1137   : > { %v4758_v4 = vadd.f32 %v8584_v33, %v4757_v2  ;;  %v9035_v53 = vpop.f32.mrb[51].mxu0  ;;  %4933 = vrot.lane.b32.xlu0 %v4755_v6, %s11652_s13 }
0x1139   : > { %v13410_v27 = vpack.c.bf16 %v4758_v4, %v4755_v6  ;;  %4935 = vrot.lane.b32.xlu1 %v4758_v4, %s11652_s13 }
0x113b   : > { %v5238_v54 = vmul.bf16 %v5188_v45, %v13410_v27  ;;  %v5239_v30 = vmul.bf16 %v5195_v24, %v13410_v27 }
0x113d   : > { %9049 = vmatpush3.bf16.msra.mxu0 %v5238_v54 }
0x113e   : > { %9060 = vmatprep.subr.bf16.mxu0 %v11650_v0 }
0x11a9   : > { %v4934_v56 = vpop.permute.xlu0 %4933 }
0x11ab   : > { %v4936_v41 = vpop.permute.xlu1 %4935 }
0x11fc   : > { %v4607_v63 = vpop.f32.mrb[48].mxu1 }
0x11fd   : > { %v4608_v7 = vadd.f32 %v8576_v62, %v4607_v63  ;;  %v9014_v60 = vpop.f32.mrb[49].mxu1 }
0x11fe   : > { %v4610_v10 = vpop.f32.mrb[50].mxu1 }
0x11ff   : > { %v4613_v14 = vmax.f32 %v4608_v7, 0.0  ;;  %v9015_v3 = vpop.f32.mrb[51].mxu1 }
0x1201   : > { %v4614_v13 = vpack.c.bf16 %v4613_v14, %v4613_v14 }
0x1203   : > { %9021 = vmatmul.mubr.msk.bf16.vlgmr.msra.gmra.mrb[52].mxu1 %vm3424_vm3, %v4614_v13 }
0x1204   : > { %9037 = vmatpush3.bf16.msra.mxu1 %v9751_v18  ;;  %9044 = vmatprep.mubr.msk.bf16.mxu1 %vm11651_vm0, %v11650_v0 }
0x1205   : > { %9038 = vmatprep.subr.bf16.mxu1 %v11650_v0 }
0x1208   : > { %9039 = vmatpush3.bf16.msra.mxu1 %v9752_v1 }
0x1209   : > { %9040 = vmatprep.subr.bf16.mxu1 %v11650_v0 }
0x120c   : > { %9041 = vmatpush3.bf16.msra.mxu1 %v9753_v19 }
0x120d   : > { %9042 = vmatprep.subr.bf16.mxu1 %v11650_v0 }
0x1210   : > { %9043 = vmatpush3.bf16.msra.mxu1 %v9754_v22 }
0x1211   : > { %9054 = vmatprep.subr.bf16.mxu1 %v11650_v0 }
0x1213   : > { %9045 = vmatmul.mubr.msk.bf16.vlgmr.msra.gmra.mrb[56].mxu1 %vm2269_vm1, %v2224_v28 }
0x1214   : > { %9055 = vmatpush3.bf16.msra.mxu1 %v5239_v30  ;;  %9056 = vmatprep.mubr.msk.bf16.mxu1 %vm11651_vm0, %v11650_v0 }
0x1215   : > { %9066 = vmatprep.subr.bf16.mxu1 %v11650_v0 }
0x12d6   : > { %v4675_v29 = vpop.f32.mrb[52].mxu1 }
0x12d7   : > { %v13430_v20 = vadd.f32 %v8580_v8, %v4675_v29  ;;  %v9022_v16 = vpop.f32.mrb[53].mxu1 }
0x12d8   : > { %v4678_v31 = vpop.f32.mrb[54].mxu1 }
0x12d9   : > { %v7766_v47 = vsel %vm3424_vm3, %v13430_v20, 0.0  ;;  %v9023_v55 = vpop.f32.mrb[55].mxu1 }
0x12da   : > { %v7767_v58 = vrot.slane %v7766_v47, 4 }
0x12dc   : > { %v7768_v32 = vadd.f32 %v7767_v58, %v7766_v47 }
0x12de   : > { %v7769_v25 = vrot.slane %v7768_v32, 2 }
0x12e0   : > { %v7770_v26 = vadd.f32 %v7769_v25, %v7768_v32 }
0x12e2   : > { %v7771_v37 = vrot.slane %v7770_v26, 1 }
0x12e4   : > { %v7772_v34 = vadd.f32 %v7771_v37, %v7770_v26 }
0x12e6   : > { %v4837_v36 = vpop.f32.mrb[56].mxu1  ;;  %7773 = vst.msk [vmem:[%s13274_s15 + $0x2] sm:$0x1] %vm7756_vm4, %v7772_v34 }
0x12e7   : > { %v4838_v23 = vadd.f32 %v8590_v12, %v4837_v36  ;;  %v9046_v49 = vpop.f32.mrb[57].mxu1 }
0x12e8   : > { %v4840_v40 = vpop.f32.mrb[58].mxu1 }
0x12e9   : > { %v9047_v57 = vpop.f32.mrb[59].mxu1  ;;  %4843 = vxpose.xlu1.b32.start.end [1/1] (short) (narrow) %v4838_v23, 8 }
0x1369   : > { %v4859_v17 = vpop.trf.xlu1 }
0x136a   : > { %v4913_v43 = vrot.slane %v4859_v17, %v12960_v42  ;;  %v4878_v51 = vrot.slane %v4859_v17, %v12938_v21  ;;  %v4927_v15 = vrot.slane %v4859_v17, %v12976_v50  ;;  %v4885_v33 = vrot.slane %v4859_v17, %v12955_v39 }
0x136b   : > { %v4892_v59 = vrot.slane %v4859_v17, %v12964_v44  ;;  %v4899_v61 = vrot.slane %v4859_v17, %v12972_v48  ;;  %v4906_v6 = vrot.slane %v4859_v17, %v12952_v38  ;;  %v4920_v52 = vrot.slane %v4859_v17, %v12968_v46 }
0x136c   : > { %4915 = vbcast.lane.b32.xlu1 %v4913_v43, 256  ;;  %4880 = vbcast.lane.b32.xlu0 %v4878_v51, 256 }
0x1370   : > { %4929 = vbcast.lane.b32.xlu1 %v4927_v15, 256  ;;  %4887 = vbcast.lane.b32.xlu0 %v4885_v33, 256 }
0x1374   : > { %4894 = vbcast.lane.b32.xlu0 %v4892_v59, 256 }
0x1378   : > { %4901 = vbcast.lane.b32.xlu0 %v4899_v61, 256 }
0x137c   : > { %4908 = vbcast.lane.b32.xlu0 %v4906_v6, 256 }
0x139a   : > { %4939 = vxpose.xlu0.b32.start [1/2] (short) (narrow) %v4934_v56, 8 }
0x139e   : > { %4940 = vxpose.xlu0.b32.end [2/2] (short) (narrow) %v4936_v41, 8 }
0x13c7   : > { %4922 = vbcast.lane.b32.xlu0 %v4920_v52, 256 }
0x13de   : > { %v4881_v2 = vpop.permute.xlu0 %4880  ;;  %v4916_v1 = vpop.permute.xlu1 %4915 }
0x13e2   : > { %v4888_v4 = vpop.permute.xlu0 %4887  ;;  %v4930_v55 = vpop.permute.xlu1 %4929 }
0x13e6   : > { %v4895_v53 = vpop.permute.xlu0 %4894 }
0x13ea   : > { %v4902_v45 = vpop.permute.xlu0 %4901 }
0x13ee   : > { %v4909_v54 = vpop.permute.xlu0 %4908 }
0x141a   : > { %v4955_v62 = vpop.trf.xlu0 }
0x141b   : > { %v4972_v63 = vcombine.high %v4955_v62, %v4955_v62  ;;  %v4979_v7 = vrot.slane %v4955_v62, %v12986_v5 }
0x141d   : > { %v4986_v60 = vrot.slane %v4972_v63, %v12986_v5  ;;  %v4987_v10 = vcombine.high %v4979_v7, %v4979_v7  ;;  %v4995_v14 = vrot.slane %v4979_v7, %v12986_v5 }
0x141f   : > { %v4988_v3 = vcombine.high %v4986_v60, %v4986_v60  ;;  %v5009_v18 = vrot.slane %v4987_v10, %v12986_v5  ;;  %v5017_v13 = vcombine.high %v4995_v14, %v4995_v14  ;;  %v5024_v11 = vrot.slane %v4995_v14, %v12938_v21 }
0x1420   : > { %v5002_v28 = vrot.slane %v4986_v60, %v12986_v5 }
0x1421   : > { %v5016_v19 = vrot.slane %v4988_v3, %v12986_v5  ;;  %v5019_v35 = vcombine.high %v5009_v18, %v5009_v18  ;;  %v5028_v22 = vrot.slane %v5009_v18, %v12938_v21  ;;  %v5032_v24 = vrot.slane %v5017_v13, %v12938_v21 }
0x1422   : > { %v5061_v30 = vadd.f32 %v5024_v11, %v4881_v2  ;;  %v5040_v58 = vrot.slane %v5002_v28, %v12938_v21  ;;  %v5018_v51 = vcombine.high %v5002_v28, %v5002_v28 }
0x1423   : > { %v5020_v8 = vcombine.high %v5016_v19, %v5016_v19  ;;  %v5036_v29 = vrot.slane %v5019_v35, %v12938_v21  ;;  %v5062_v16 = vadd.f32 %v5028_v22, %v4888_v4  ;;  %v5063_v31 = vadd.f32 %v5032_v24, %v4895_v53 }
0x1424   : > { %9919 = vtanh.f32 %v5061_v30  ;;  %v5044_v26 = vrot.slane %v5016_v19, %v12938_v21  ;;  %v5065_v37 = vadd.f32 %v5040_v58, %v4909_v54  ;;  %v5048_v59 = vrot.slane %v5018_v51, %v12938_v21 }
0x1425   : > { %v5052_v47 = vrot.slane %v5020_v8, %v12938_v21  ;;  %9921 = vtanh.f32 %v5062_v16  ;;  %v5064_v32 = vadd.f32 %v5036_v29, %v4902_v45 }
0x1426   : > { %9923 = vtanh.f32 %v5063_v31  ;;  %v5066_v12 = vadd.f32 %v5044_v26, %v4916_v1 }
0x1427   : > { %v5068_v25 = vadd.f32 %v5052_v47, %v4930_v55 }
0x1429   : > { %9925 = vtanh.f32 %v5068_v25 }
0x142a   : > { %9927 = vtanh.f32 %v5064_v32 }
0x142b   : > { %9929 = vtanh.f32 %v5065_v37 }
0x142c   : > { %9931 = vtanh.f32 %v5066_v12 }
0x142e   : > { %v9920_v34 = vpop.eup %9919 }
0x142f   : > { %v9922_v36 = vpop.eup %9921  ;;  %v5077_v23 = vsel %vm2676_vm2, %v9920_v34, -inf }
0x1430   : > { %v9924_v49 = vpop.eup %9923  ;;  %5078 = vmax.xlane.f32.xlu1 %v5077_v23  ;;  %v5080_v40 = vsel %vm2676_vm2, %v9922_v36, -inf }
0x1431   : > { %5081 = vmax.xlane.f32.xlu0 %v5080_v40  ;;  %v5083_v41 = vsel %vm2676_vm2, %v9924_v49, -inf }
0x1433   : > { %v9926_v57 = vpop.eup %9925 }
0x1434   : > { %v9928_v17 = vpop.eup %9927  ;;  %5084 = vmax.xlane.f32.xlu1 %v5083_v41  ;;  %v5098_v43 = vsel %vm2676_vm2, %v9926_v57, -inf }
0x1435   : > { %5099 = vmax.xlane.f32.xlu0 %v5098_v43  ;;  %v5086_v15 = vsel %vm2676_vm2, %v9928_v17, -inf  ;;  %v9930_v33 = vpop.eup %9929 }
0x1436   : > { %v5089_v56 = vsel %vm2676_vm2, %v9930_v33, -inf  ;;  %v9932_v52 = vpop.eup %9931 }
0x1437   : > { %v5092_v2 = vsel %vm2676_vm2, %v9932_v52, -inf }
0x1438   : > { %5087 = vmax.xlane.f32.xlu1 %v5086_v15 }
0x1439   : > { %v4923_v61 = vpop.permute.xlu0 %4922 }
0x143a   : > { %v5067_v6 = vadd.f32 %v5048_v59, %v4923_v61  ;;  %v5176_v59 = vld [vmem:[#allocation47 + $0x2] sm:$0x1]  ;;  %v5177_v61 = vld [vmem:[#allocation47 + $0x3] sm:$0x1] }
0x143c   : > { %9933 = vtanh.f32 %v5067_v6  ;;  %5090 = vmax.xlane.f32.xlu1 %v5089_v56  ;;  %v5197_v6 = vpack.i.b16 %v5176_v59, %v5176_v59 }
0x1440   : > { %5093 = vmax.xlane.f32.xlu1 %v5092_v2 }
0x1446   : > { %v9934_v4 = vpop.eup %9933 }
0x1447   : > { %v5095_v53 = vsel %vm2676_vm2, %v9934_v4, -inf }
0x1448   : > { %5096 = vmax.xlane.f32.xlu1 %v5095_v53 }
0x14bd   : > { %v5079_v45 = vpop.xlane.xlu1 %5078 }
0x14be   : > { %v5101_v54 = vsub.f32 %v9920_v34, %v5079_v45  ;;  %v5082_v62 = vpop.xlane.xlu0 %5081 }
0x14bf   : > { %v5102_v63 = vsub.f32 %v9922_v36, %v5082_v62 }
0x14c0   : > { %v5109_v7 = vmul.f32 1.442695, %v5101_v54 }
0x14c1   : > { %v5111_v60 = vmul.f32 1.442695, %v5102_v63  ;;  %v5085_v10 = vpop.xlane.xlu1 %5084  ;;  %v5178_v63 = vld [vmem:[#allocation47 + $0x4] sm:$0x1] }
0x14c2   : > { %9935 = vpow2.f32 %v5109_v7  ;;  %v5103_v14 = vsub.f32 %v9924_v49, %v5085_v10  ;;  %v5100_v11 = vpop.xlane.xlu0 %5099 }
0x14c3   : > { %9937 = vpow2.f32 %v5111_v60  ;;  %v5108_v24 = vsub.f32 %v9926_v57, %v5100_v11  ;;  %v5179_v60 = vld [vmem:[#allocation47 + $0x5] sm:$0x1] }
0x14c4   : > { %v5113_v3 = vmul.f32 1.442695, %v5103_v14 }
0x14c5   : > { %v5088_v18 = vpop.xlane.xlu1 %5087  ;;  %v5123_v55 = vmul.f32 1.442695, %v5108_v24 }
0x14c6   : > { %9939 = vpow2.f32 %v5113_v3  ;;  %v5104_v13 = vsub.f32 %v9928_v17, %v5088_v18 }
0x14c8   : > { %v5115_v1 = vmul.f32 1.442695, %v5104_v13  ;;  %v5211_v13 = vpack.i.b16 %v5178_v63, %v5178_v63 }
0x14c9   : > { %v5091_v19 = vpop.xlane.xlu1 %5090 }
0x14ca   : > { %9941 = vpow2.f32 %v5115_v1  ;;  %v5105_v35 = vsub.f32 %v9930_v33, %v5091_v19  ;;  %v5218_v19 = vpack.i.b16 %v5179_v60, %v5179_v60  ;;  %v5216_v24 = vrot.slane %v5211_v13, %v12938_v21 }
0x14cc   : > { %v9936_v22 = vpop.eup %9935  ;;  %v5117_v28 = vmul.f32 1.442695, %v5105_v35 }
0x14cd   : > { %v9938_v30 = vpop.eup %9937  ;;  %v5094_v8 = vpop.xlane.xlu1 %5093  ;;  %v5125_v29 = vsel %vm2676_vm2, %v9936_v22, 0.0 }
0x14ce   : > { %9943 = vpow2.f32 %v5117_v28  ;;  %v5106_v16 = vsub.f32 %v9932_v52, %v5094_v8  ;;  %5126 = vadd.xlane.f32.xlu1 %v5125_v29  ;;  %v5128_v31 = vsel %vm2676_vm2, %v9938_v30, 0.0  ;;  %v5204_v52 = vpack.i.b16 %v5177_v61, %v5177_v61  ;;  %v5180_v29 = vld [vmem:[#allocation47 + $0x6] sm:$0x1] }
0x14cf   : > { %5129 = vadd.xlane.f32.xlu0 %v5128_v31  ;;  %v5223_v8 = vrot.slane %v5218_v19, %v12938_v21 }
0x14d0   : > { %v9940_v47 = vpop.eup %9939  ;;  %v5119_v58 = vmul.f32 1.442695, %v5106_v16  ;;  %v5209_v62 = vrot.slane %v5204_v52, %v12938_v21  ;;  %v5181_v16 = vld [vmem:[#allocation47 + $0x7] sm:$0x1] }
0x14d1   : > { %v5131_v32 = vsel %vm2676_vm2, %v9940_v47, 0.0  ;;  %v9758_v52 = vld [vmem:[#allocation49 + $0x18] sm:$0xff]  }
0x14d2   : > { %9945 = vpow2.f32 %v5119_v58  ;;  %5132 = vadd.xlane.f32.xlu1 %v5131_v32  ;;  %v5241_v11 = vmul.bf16 %v5209_v62, %v13410_v27  ;;  %v5225_v32 = vpack.i.b16 %v5180_v29, %v5180_v29 }
0x14d3   : > { %9947 = vpow2.f32 %v5123_v55  ;;  %v5242_v55 = vmul.bf16 %v5216_v24, %v13410_v27 }
0x14d4   : > { %v9942_v25 = vpop.eup %9941 }
0x14d5   : > { %v5097_v26 = vpop.xlane.xlu1 %5096  ;;  %v5134_v37 = vsel %vm2676_vm2, %v9942_v25, 0.0 }
0x14d6   : > { %v5107_v34 = vsub.f32 %v9934_v4, %v5097_v26  ;;  %5135 = vadd.xlane.f32.xlu0 %v5134_v37  ;;  %v5202_v4 = vrot.slane %v5197_v6, %v12938_v21  ;;  %v5243_v37 = vmul.bf16 %v5223_v8, %v13410_v27 }
0x14d8   : > { %v13470_v12 = vpop.eup %9943  ;;  %v5121_v36 = vmul.f32 1.442695, %v5107_v34  ;;  %v5240_v3 = vmul.bf16 %v5202_v4, %v13410_v27 }
0x14d9   : > { %v5137_v23 = vsel %vm2676_vm2, %v13470_v12, 0.0 }
0x14da   : > { %9949 = vpow2.f32 %v5121_v36  ;;  %5138 = vadd.xlane.f32.xlu1 %v5137_v23  ;;  %v5230_v23 = vrot.slane %v5225_v32, %v12938_v21 }
0x14dc   : > { %v13474_v49 = vpop.eup %9945 }
0x14dd   : > { %v5140_v40 = vsel %vm2676_vm2, %v13474_v49, 0.0  ;;  %v13478_v57 = vpop.eup %9947 }
0x14de   : > { %5141 = vadd.xlane.f32.xlu0 %v5140_v40  ;;  %v5146_v41 = vsel %vm2676_vm2, %v13478_v57, 0.0 }
0x14e2   : > { %5147 = vadd.xlane.f32.xlu0 %v5146_v41 }
0x14e4   : > { %v13482_v17 = vpop.eup %9949 }
0x14e5   : > { %v5143_v43 = vsel %vm2676_vm2, %v13482_v17, 0.0 }
0x14e6   : > { %5144 = vadd.xlane.f32.xlu1 %v5143_v43 }
0x155b   : > { %v5127_v51 = vpop.xlane.xlu1 %5126 }
0x155c   : > { %9951 = vrcp.f32 %v5127_v51  ;;  %v5130_v15 = vpop.xlane.xlu0 %5129 }
0x155d   : > { %9953 = vrcp.f32 %v5130_v15 }
0x155f   : > { %v5133_v33 = vpop.xlane.xlu1 %5132 }
0x1560   : > { %9955 = vrcp.f32 %v5133_v33 }
0x1563   : > { %v5136_v56 = vpop.xlane.xlu0 %5135 }
0x1564   : > { %9957 = vrcp.f32 %v5136_v56  ;;  %v9756_v56 = vld [vmem:[#allocation49 + $0x8] sm:$0xff]  }
0x1566   : > { %v9952_v2 = vpop.eup %9951 }
0x1567   : > { %v9954_v53 = vpop.eup %9953  ;;  %v5157_v45 = vmul.f32 %v9952_v2, %v9936_v22  ;;  %v5139_v54 = vpop.xlane.xlu1 %5138  ;;  %v9761_v2 = vld [vmem:[#allocation52] sm:$0xff]  }
0x1568   : > { %v5158_v7 = vmul.f32 %v9954_v53, %v9938_v30  ;;  %9959 = vrcp.f32 %v5139_v54 }
0x1569   : > { %v5165_v10 = vpack.c.bf16 %v5157_v45, %v5157_v45 }
0x156a   : > { %v9956_v14 = vpop.eup %9955  ;;  %v5166_v18 = vpack.c.bf16 %v5158_v7, %v5158_v7 }
0x156b   : > { %v5142_v1 = vpop.xlane.xlu0 %5141  ;;  %9051 = vmatmul.mubr.msk.bf16.vlgmr.msra.gmra.mrb[52].mxu0 %vm2676_vm2, %v5165_v10  ;;  %v5159_v35 = vmul.f32 %v9956_v14, %v9940_v47 }
0x156c   : > { %9961 = vrcp.f32 %v5142_v1  ;;  %9061 = vmatpush3.bf16.msra.mxu0 %v5240_v3  ;;  %9057 = vmatmul.mubr.msk.bf16.vlgmr.msra.gmra.mrb[60].mxu1 %vm2676_vm2, %v5166_v18 }
0x156d   : > { %9067 = vmatpush3.bf16.msra.mxu1 %v5241_v11  ;;  %9062 = vmatprep.mubr.msk.bf16.mxu0 %vm11651_vm0, %v11650_v0  ;;  %v5167_v31 = vpack.c.bf16 %v5159_v35, %v5159_v35 }
0x156e   : > { %v9958_v22 = vpop.eup %9957  ;;  %9072 = vmatprep.subr.bf16.mxu0 %v11650_v0  ;;  %9068 = vmatprep.mubr.msk.bf16.mxu1 %vm11651_vm0, %v11650_v0 }
0x156f   : > { %v5160_v28 = vmul.f32 %v9958_v22, %v9942_v25  ;;  %v5148_v30 = vpop.xlane.xlu0 %5147  ;;  %9078 = vmatprep.subr.bf16.mxu1 %v11650_v0  ;;  %v5232_v25 = vpack.i.b16 %v5181_v16, %v5181_v16 }
0x1570   : > { %9963 = vrcp.f32 %v5148_v30 }
0x1571   : > { %v5168_v58 = vpack.c.bf16 %v5160_v28, %v5160_v28  ;;  %v5237_v41 = vrot.slane %v5232_v25, %v12938_v21 }
0x1572   : > { %v9960_v47 = vpop.eup %9959 }
0x1573   : > { %9063 = vmatmul.mubr.msk.bf16.vlgmr.msra.gmra.mrb[56].mxu0 %vm2676_vm2, %v5167_v31  ;;  %v5145_v26 = vpop.xlane.xlu1 %5144  ;;  %v5161_v34 = vmul.f32 %v9960_v47, %v13470_v12  ;;  %v5244_v12 = vmul.bf16 %v5230_v23, %v13410_v27  ;;  %v5245_v33 = vmul.bf16 %v5237_v41, %v13410_v27 }
0x1574   : > { %9073 = vmatpush3.bf16.msra.mxu0 %v5242_v55  ;;  %9965 = vrcp.f32 %v5145_v26  ;;  %9069 = vmatmul.mubr.msk.bf16.vlgmr.msra.gmra.mrb[64].mxu1 %vm2676_vm2, %v5168_v58 }
0x1575   : > { %9079 = vmatpush3.bf16.msra.mxu1 %v5243_v37  ;;  %9074 = vmatprep.mubr.msk.bf16.mxu0 %vm11651_vm0, %v11650_v0  ;;  %v5169_v43 = vpack.c.bf16 %v5161_v34, %v5161_v34 }
0x1576   : > { %v9962_v36 = vpop.eup %9961  ;;  %9084 = vmatprep.subr.bf16.mxu0 %v11650_v0  ;;  %9080 = vmatprep.mubr.msk.bf16.mxu1 %vm11651_vm0, %v11650_v0 }
0x1577   : > { %v5162_v40 = vmul.f32 %v9962_v36, %v13474_v49  ;;  %9090 = vmatprep.subr.bf16.mxu1 %v11650_v0 }
0x1579   : > { %v5170_v51 = vpack.c.bf16 %v5162_v40, %v5162_v40 }
0x157a   : > { %v9964_v15 = vpop.eup %9963 }
0x157b   : > { %9075 = vmatmul.mubr.msk.bf16.vlgmr.msra.gmra.mrb[60].mxu0 %vm2676_vm2, %v5169_v43  ;;  %v5164_v59 = vmul.f32 %v9964_v15, %v13478_v57  ;;  %v9755_v57 = vld [vmem:[#allocation49] sm:$0xff]  }
0x157c   : > { %9085 = vmatpush3.bf16.msra.mxu0 %v5244_v12  ;;  %9081 = vmatmul.mubr.msk.bf16.vlgmr.msra.gmra.mrb[68].mxu1 %vm2676_vm2, %v5170_v51 }
0x157d   : > { %9091 = vmatpush3.bf16.msra.mxu1 %v5245_v33  ;;  %9086 = vmatprep.mubr.msk.bf16.mxu0 %vm11651_vm0, %v11650_v0  ;;  %v5172_v6 = vpack.c.bf16 %v5164_v59, %v5164_v59 }
0x157e   : > { %v9966_v49 = vpop.eup %9965  ;;  %9092 = vmatprep.mubr.msk.bf16.mxu1 %vm11651_vm0, %v11650_v0  ;;  %9096 = vmatprep.subr.bf16.mxu0 %v11650_v0 }
0x157f   : > { %v5163_v61 = vmul.f32 %v9966_v49, %v13482_v17  ;;  %9108 = vmatprep.subr.bf16.mxu1 %v11650_v0  ;;  %v9757_v17 = vld [vmem:[#allocation49 + $0x10] sm:$0xff]  }
0x1581   : > { %v5171_v27 = vpack.c.bf16 %v5163_v61, %v5163_v61 }
0x1583   : > { %9087 = vmatmul.mubr.msk.bf16.vlgmr.msra.gmra.mrb[64].mxu0 %vm2676_vm2, %v5171_v27 }
0x1584   : > { %9093 = vmatmul.mubr.msk.bf16.vlgmr.msra.gmra.mrb[72].mxu1 %vm2676_vm2, %v5172_v6  ;;  %9104 = vmatprep.mubr.msk.bf16.mxu0 %vm11651_vm0, %v11650_v0 }
0x1585   : > { %9112 = vmatprep.mubr.msk.bf16.mxu1 %vm11651_vm0, %v11650_v0  ;;  %9097 = vmatpush3.bf16.msra.mxu0 %v9755_v57  ;;  %v9759_v57 = vld [vmem:[#allocation58] sm:$0xff]  }
0x1586   : > { %9098 = vmatprep.subr.bf16.mxu0 %v11650_v0  ;;  %9109 = vmatpush3.bf16.msra.mxu1 %v9761_v2  ;;  %v8604_v2 = vld [vmem:[#allocation50] ss:$0 sm:$0xff] }
0x1587   : > { %9110 = vmatprep.subr.bf16.mxu1 %v11650_v0 }
0x1589   : > { %9099 = vmatpush3.bf16.msra.mxu0 %v9756_v56 }
0x158a   : > { %9100 = vmatprep.subr.bf16.mxu0 %v11650_v0 }
0x158d   : > { %9101 = vmatpush3.bf16.msra.mxu0 %v9757_v17  ;;  %v9760_v17 = vld [vmem:[#allocation58 + $0x8] sm:$0xff]  }
0x158e   : > { %9102 = vmatprep.subr.bf16.mxu0 %v11650_v0 }
0x1591   : > { %9103 = vmatpush3.bf16.msra.mxu0 %v9758_v52  ;;  %v9762_v52 = vld [vmem:[#allocation52 + $0x8] sm:$0xff]  }
0x1592   : > { %9124 = vmatprep.subr.bf16.mxu0 %v11650_v0  ;;  %9111 = vmatpush3.bf16.msra.mxu1 %v9762_v52 }
0x1593   : > { %9116 = vmatprep.subr.bf16.mxu1 %v11650_v0 }
0x163e   : > { %v5283_v4 = vpop.f32.mrb[52].mxu0 }
0x163f   : > { %v9052_v53 = vpop.f32.mrb[53].mxu0  ;;  %v5326_v45 = vpop.f32.mrb[60].mxu1  ;;  %v5590_v54 = vsel %vm2269_vm1, %v5283_v4, 0.0 }
0x1640   : > { %v5286_v62 = vpop.f32.mrb[54].mxu0  ;;  %v5591_v63 = vsel %vm2269_vm1, %v5326_v45, 0.0  ;;  %v9058_v7 = vpop.f32.mrb[61].mxu1 }
0x1641   : > { %v5592_v60 = vadd.f32 %v5591_v63, %v5590_v54  ;;  %v9053_v10 = vpop.f32.mrb[55].mxu0  ;;  %v5329_v14 = vpop.f32.mrb[62].mxu1  ;;  %v9763_v62 = vld [vmem:[#allocation55] sm:$0xff]  }
0x1642   : > { %v9059_v3 = vpop.f32.mrb[63].mxu1  ;;  %v8618_v10 = vld [vmem:[#allocation59] ss:$0 sm:$0xff] }
0x1646   : > { %v5369_v18 = vpop.f32.mrb[56].mxu0 }
0x1647   : > { %v5593_v13 = vsel %vm2269_vm1, %v5369_v18, 0.0  ;;  %v9064_v1 = vpop.f32.mrb[57].mxu0  ;;  %v5412_v11 = vpop.f32.mrb[64].mxu1 }
0x1648   : > { %v5594_v19 = vadd.f32 %v5593_v13, %v5592_v60  ;;  %v5372_v35 = vpop.f32.mrb[58].mxu0  ;;  %v5595_v22 = vsel %vm2269_vm1, %v5412_v11, 0.0  ;;  %v9070_v24 = vpop.f32.mrb[65].mxu1  ;;  %v6289_v60 = vld [vmem:[#allocation64] sm:$0x1] }
0x1649   : > { %v9065_v28 = vpop.f32.mrb[59].mxu0  ;;  %v5415_v30 = vpop.f32.mrb[66].mxu1  ;;  %v6298_v14 = vpack.i.b16 %v6289_v60, %v6289_v60 }
0x164a   : > { %v5596_v8 = vadd.f32 %v5595_v22, %v5594_v19  ;;  %v9071_v29 = vpop.f32.mrb[67].mxu1  ;;  %v9764_v28 = vld [vmem:[#allocation55 + $0x8] sm:$0xff]   ;;  %v8610_v30 = vld [vmem:[#allocation53] ss:$0 sm:$0xff] }
0x164b   : > { %v6303_v35 = vrot.slane %v6298_v14, %v12938_v21 }
0x164e   : > { %v5455_v16 = vpop.f32.mrb[60].mxu0 }
0x164f   : > { %v5597_v31 = vsel %vm2269_vm1, %v5455_v16, 0.0  ;;  %v9076_v47 = vpop.f32.mrb[61].mxu0  ;;  %v5498_v55 = vpop.f32.mrb[68].mxu1 }
0x1650   : > { %v5598_v58 = vadd.f32 %v5597_v31, %v5596_v8  ;;  %v5458_v32 = vpop.f32.mrb[62].mxu0  ;;  %v5599_v26 = vsel %vm2269_vm1, %v5498_v55, 0.0  ;;  %v9082_v37 = vpop.f32.mrb[69].mxu1 }
0x1651   : > { %v9077_v25 = vpop.f32.mrb[63].mxu0  ;;  %v5501_v34 = vpop.f32.mrb[70].mxu1  ;;  %v9765_v32 = vld [vmem:[#allocation61] sm:$0xff]  }
0x1652   : > { %v5600_v36 = vadd.f32 %v5599_v26, %v5598_v58  ;;  %v9083_v23 = vpop.f32.mrb[71].mxu1  ;;  %v6290_v58 = vld [vmem:[#allocation64 + $0x1] sm:$0x1]  ;;  %v9766_v25 = vld [vmem:[#allocation61 + $0x8] sm:$0xff]  }
0x1653   : > { %v6305_v37 = vpack.i.b16 %v6290_v58, %v6290_v58 }
0x1655   : > { %v6310_v34 = vrot.slane %v6305_v37, %v12938_v21 }
0x1656   : > { %v5541_v40 = vpop.f32.mrb[64].mxu0 }
0x1657   : > { %v5601_v41 = vsel %vm2269_vm1, %v5541_v40, 0.0  ;;  %v9088_v43 = vpop.f32.mrb[65].mxu0  ;;  %v5584_v12 = vpop.f32.mrb[72].mxu1 }
0x1658   : > { %v5602_v51 = vadd.f32 %v5601_v41, %v5600_v36  ;;  %v5603_v15 = vsel %vm2269_vm1, %v5584_v12, 0.0  ;;  %v5544_v33 = vpop.f32.mrb[66].mxu0  ;;  %v9094_v49 = vpop.f32.mrb[73].mxu1  ;;  %v5824_v36 = vpack.c.bf16 %v13430_v20, %v13430_v20 }
0x1659   : > { %v9089_v59 = vpop.f32.mrb[67].mxu0  ;;  %v5587_v61 = vpop.f32.mrb[74].mxu1 }
0x165a   : > { %v5604_v27 = vadd.f32 %v5603_v15, %v5602_v51  ;;  %v9095_v6 = vpop.f32.mrb[75].mxu1  ;;  %v8622_v51 = vld [vmem:[#allocation62] ss:$0 sm:$0xff] }
0x165c   : > { %v5605_v56 = vpack.c.bf16 %v5604_v27, %v5604_v27 }
0x165e   : > { %9105 = vmatmul.mubr.msk.bf16.vlgmr.msra.gmra.mrb[68].mxu0 %vm2269_vm1, %v5605_v56 }
0x165f   : > { %9125 = vmatpush3.bf16.msra.mxu0 %v9759_v57  ;;  %9128 = vmatprep.mubr.msk.bf16.mxu0 %vm11651_vm0, %v11650_v0 }
0x1660   : > { %9126 = vmatprep.subr.bf16.mxu0 %v11650_v0 }
0x1663   : > { %9127 = vmatpush3.bf16.msra.mxu0 %v9760_v17 }
0x1664   : > { %9140 = vmatprep.subr.bf16.mxu0 %v11650_v0 }
0x1666   : > { %9129 = vmatmul.mubr.msk.bf16.vlgmr.msra.gmra.mrb[72].mxu0 %vm3424_vm3, %v13270_v9 }
0x1667   : > { %9142 = vmatprep.mubr.msk.bf16.mxu0 %vm11651_vm0, %v11650_v0 }
0x1731   : > { %v5682_v4 = vpop.f32.mrb[68].mxu0 }
0x1732   : > { %v5683_v53 = vadd.f32 %v8604_v2, %v5682_v4  ;;  %v9106_v45 = vpop.f32.mrb[69].mxu0 }
0x1733   : > { %v5685_v54 = vpop.f32.mrb[70].mxu0 }
0x1734   : > { %v5688_v63 = vpack.c.bf16 %v5683_v53, %v5683_v53  ;;  %v9107_v7 = vpop.f32.mrb[71].mxu0 }
0x1736   : > { %9113 = vmatmul.mubr.msk.bf16.vlgmr.msra.gmra.mrb[76].mxu1 %vm3424_vm3, %v5688_v63 }
0x1737   : > { %9117 = vmatpush3.bf16.msra.mxu1 %v9763_v62  ;;  %9120 = vmatprep.mubr.msk.bf16.mxu1 %vm11651_vm0, %v11650_v0 }
0x1738   : > { %9118 = vmatprep.subr.bf16.mxu1 %v11650_v0 }
0x1739   : > { %v5885_v3 = vpop.f32.mrb[72].mxu0 }
0x173a   : > { %v5886_v18 = vadd.f32 %v8618_v10, %v5885_v3  ;;  %v9130_v13 = vpop.f32.mrb[73].mxu0 }
0x173b   : > { %v5888_v1 = vpop.f32.mrb[74].mxu0  ;;  %9119 = vmatpush3.bf16.msra.mxu1 %v9764_v28 }
0x173c   : > { %v5889_v11 = vadd.f32 %v8618_v10, %v5888_v1  ;;  %6048 = vrot.lane.b32.xlu1 %v5886_v18, %s11654_s5  ;;  %v9131_v19 = vpop.f32.mrb[75].mxu0  ;;  %9132 = vmatprep.subr.bf16.mxu1 %v11650_v0 }
0x173e   : > { %v13561_v22 = vpack.c.bf16 %v5889_v11, %v5886_v18  ;;  %6050 = vrot.lane.b32.xlu0 %v5889_v11, %s11654_s5 }
0x1740   : > { %v6353_v24 = vmul.bf16 %v6303_v35, %v13561_v22  ;;  %v6354_v23 = vmul.bf16 %v6310_v34, %v13561_v22 }
0x1742   : > { %9141 = vmatpush3.bf16.msra.mxu0 %v6353_v24 }
0x1743   : > { %9152 = vmatprep.subr.bf16.mxu0 %v11650_v0 }
0x17ae   : > { %v6049_v61 = vpop.permute.xlu1 %6048 }
0x17b0   : > { %v6051_v53 = vpop.permute.xlu0 %6050 }
0x1809   : > { %v5749_v8 = vpop.f32.mrb[76].mxu1 }
0x180a   : > { %v5750_v29 = vadd.f32 %v8610_v30, %v5749_v8  ;;  %v9114_v16 = vpop.f32.mrb[77].mxu1 }
0x180b   : > { %v5752_v31 = vpop.f32.mrb[78].mxu1 }
0x180c   : > { %v5755_v47 = vmax.f32 %v5750_v29, 0.0  ;;  %v9115_v55 = vpop.f32.mrb[79].mxu1 }
0x180e   : > { %v5756_v26 = vpack.c.bf16 %v5755_v47, %v5755_v47 }
0x1810   : > { %9121 = vmatmul.mubr.msk.bf16.vlgmr.msra.gmra.mrb[80].mxu1 %vm3424_vm3, %v5756_v26 }
0x1811   : > { %9133 = vmatpush3.bf16.msra.mxu1 %v9765_v32  ;;  %9136 = vmatprep.mubr.msk.bf16.mxu1 %vm11651_vm0, %v11650_v0 }
0x1812   : > { %9134 = vmatprep.subr.bf16.mxu1 %v11650_v0 }
0x1815   : > { %9135 = vmatpush3.bf16.msra.mxu1 %v9766_v25 }
0x1816   : > { %9146 = vmatprep.subr.bf16.mxu1 %v11650_v0 }
0x1818   : > { %9137 = vmatmul.mubr.msk.bf16.vlgmr.msra.gmra.mrb[84].mxu1 %vm3424_vm3, %v5824_v36 }
0x1819   : > { %9147 = vmatpush3.bf16.msra.mxu1 %v6354_v23  ;;  %9148 = vmatprep.mubr.msk.bf16.mxu1 %vm11651_vm0, %v11650_v0 }
0x181a   : > { %9158 = vmatprep.subr.bf16.mxu1 %v11650_v0 }
0x18e3   : > { %v13580_v40 = vpop.f32.mrb[80].mxu1 }
0x18e4   : > { %v9122_v41 = vpop.f32.mrb[81].mxu1 }
0x18e5   : > { %v5820_v43 = vpop.f32.mrb[82].mxu1 }
0x18e6   : > { %v9123_v12 = vpop.f32.mrb[83].mxu1 }
0x18eb   : > { %v5952_v15 = vpop.f32.mrb[84].mxu1 }
0x18ec   : > { %v5953_v20 = vadd.f32 %v8622_v51, %v5952_v15  ;;  %v9138_v33 = vpop.f32.mrb[85].mxu1 }
0x18ed   : > { %v5955_v49 = vpop.f32.mrb[86].mxu1 }
0x18ee   : > { %v9139_v59 = vpop.f32.mrb[87].mxu1  ;;  %5958 = vxpose.xlu1.b32.start.end [1/1] (short) (narrow) %v5953_v20, 8 }
0x196e   : > { %v5974_v27 = vpop.trf.xlu1 }
0x196f   : > { %v6028_v6 = vrot.slane %v5974_v27, %v12960_v42  ;;  %v5993_v57 = vrot.slane %v5974_v27, %v12938_v21  ;;  %v6042_v56 = vrot.slane %v5974_v27, %v12976_v50  ;;  %v6000_v17 = vrot.slane %v5974_v27, %v12955_v39 }
0x1970   : > { %v6007_v52 = vrot.slane %v5974_v27, %v12964_v44  ;;  %v6014_v2 = vrot.slane %v5974_v27, %v12972_v48  ;;  %v6021_v4 = vrot.slane %v5974_v27, %v12952_v38  ;;  %v6035_v45 = vrot.slane %v5974_v27, %v12968_v46 }
0x1971   : > { %6030 = vbcast.lane.b32.xlu1 %v6028_v6, 256  ;;  %5995 = vbcast.lane.b32.xlu0 %v5993_v57, 256 }
0x1975   : > { %6044 = vbcast.lane.b32.xlu1 %v6042_v56, 256  ;;  %6002 = vbcast.lane.b32.xlu0 %v6000_v17, 256 }
0x1979   : > { %6009 = vbcast.lane.b32.xlu0 %v6007_v52, 256 }
0x197d   : > { %6016 = vbcast.lane.b32.xlu0 %v6014_v2, 256 }
0x1981   : > { %6023 = vbcast.lane.b32.xlu0 %v6021_v4, 256 }
0x199f   : > { %6054 = vxpose.xlu0.b32.start [1/2] (short) (narrow) %v6049_v61, 8 }
0x19a3   : > { %6055 = vxpose.xlu0.b32.end [2/2] (short) (narrow) %v6051_v53, 8 }
0x19cc   : > { %6037 = vbcast.lane.b32.xlu0 %v6035_v45, 256 }
0x19e3   : > { %v5996_v54 = vpop.permute.xlu0 %5995  ;;  %v6031_v34 = vpop.permute.xlu1 %6030 }
0x19e7   : > { %v6003_v62 = vpop.permute.xlu0 %6002  ;;  %v6045_v57 = vpop.permute.xlu1 %6044 }
0x19eb   : > { %v6010_v63 = vpop.permute.xlu0 %6009 }
0x19ef   : > { %v6017_v7 = vpop.permute.xlu0 %6016 }
0x19f3   : > { %v6024_v60 = vpop.permute.xlu0 %6023 }
0x1a1f   : > { %v6070_v10 = vpop.trf.xlu0 }
0x1a20   : > { %v6087_v14 = vcombine.high %v6070_v10, %v6070_v10  ;;  %v6094_v3 = vrot.slane %v6070_v10, %v12986_v5 }
0x1a22   : > { %v6102_v18 = vcombine.high %v6094_v3, %v6094_v3  ;;  %v6110_v13 = vrot.slane %v6094_v3, %v12986_v5  ;;  %v6101_v1 = vrot.slane %v6087_v14, %v12986_v5 }
0x1a24   : > { %v6124_v11 = vrot.slane %v6102_v18, %v12986_v5  ;;  %v6132_v19 = vcombine.high %v6110_v13, %v6110_v13  ;;  %v6139_v35 = vrot.slane %v6110_v13, %v12938_v21  ;;  %v6103_v8 = vcombine.high %v6101_v1, %v6101_v1 }
0x1a25   : > { %v6117_v29 = vrot.slane %v6101_v1, %v12986_v5 }
0x1a26   : > { %v6134_v24 = vcombine.high %v6124_v11, %v6124_v11  ;;  %v6143_v28 = vrot.slane %v6124_v11, %v12938_v21  ;;  %v6147_v30 = vrot.slane %v6132_v19, %v12938_v21  ;;  %v6176_v16 = vadd.f32 %v6139_v35, %v5996_v54 }
0x1a27   : > { %v6131_v58 = vrot.slane %v6103_v8, %v12986_v5  ;;  %v6155_v32 = vrot.slane %v6117_v29, %v12938_v21  ;;  %v6133_v49 = vcombine.high %v6117_v29, %v6117_v29 }
0x1a28   : > { %v6151_v31 = vrot.slane %v6134_v24, %v12938_v21  ;;  %v6177_v47 = vadd.f32 %v6143_v28, %v6003_v62  ;;  %v6178_v55 = vadd.f32 %v6147_v30, %v6010_v63  ;;  %9967 = vtanh.f32 %v6176_v16 }
0x1a29   : > { %v6159_v37 = vrot.slane %v6131_v58, %v12938_v21  ;;  %v6180_v25 = vadd.f32 %v6155_v32, %v6024_v60  ;;  %v6135_v15 = vcombine.high %v6131_v58, %v6131_v58  ;;  %v6163_v6 = vrot.slane %v6133_v49, %v12938_v21 }
0x1a2a   : > { %9969 = vtanh.f32 %v6177_v47  ;;  %v6179_v26 = vadd.f32 %v6151_v31, %v6017_v7 }
0x1a2b   : > { %9971 = vtanh.f32 %v6178_v55  ;;  %v6181_v23 = vadd.f32 %v6159_v37, %v6031_v34  ;;  %v6167_v59 = vrot.slane %v6135_v15, %v12938_v21 }
0x1a2c   : > { %9973 = vtanh.f32 %v6179_v26 }
0x1a2d   : > { %9975 = vtanh.f32 %v6180_v25  ;;  %v6183_v52 = vadd.f32 %v6167_v59, %v6045_v57 }
0x1a2e   : > { %9977 = vtanh.f32 %v6181_v23 }
0x1a32   : > { %v9968_v36 = vpop.eup %9967 }
0x1a33   : > { %v6192_v43 = vsel %vm2676_vm2, %v9968_v36, -inf }
0x1a34   : > { %v9970_v41 = vpop.eup %9969  ;;  %6193 = vmax.xlane.f32.xlu1 %v6192_v43 }
0x1a35   : > { %v9972_v12 = vpop.eup %9971  ;;  %v6195_v51 = vsel %vm2676_vm2, %v9970_v41, -inf }
0x1a36   : > { %6196 = vmax.xlane.f32.xlu0 %v6195_v51  ;;  %v6198_v20 = vsel %vm2676_vm2, %v9972_v12, -inf  ;;  %v9974_v33 = vpop.eup %9973 }
0x1a37   : > { %v6201_v61 = vsel %vm2676_vm2, %v9974_v33, -inf  ;;  %v9976_v27 = vpop.eup %9975 }
0x1a38   : > { %6199 = vmax.xlane.f32.xlu1 %v6198_v20  ;;  %v6204_v2 = vsel %vm2676_vm2, %v9976_v27, -inf  ;;  %v9978_v4 = vpop.eup %9977 }
0x1a39   : > { %v6207_v53 = vsel %vm2676_vm2, %v9978_v4, -inf }
0x1a3c   : > { %6202 = vmax.xlane.f32.xlu1 %v6201_v61 }
0x1a3e   : > { %v6038_v56 = vpop.permute.xlu0 %6037 }
0x1a3f   : > { %v6182_v17 = vadd.f32 %v6163_v6, %v6038_v56 }
0x1a40   : > { %6205 = vmax.xlane.f32.xlu1 %v6204_v2  ;;  %v6292_v2 = vld [vmem:[#allocation64 + $0x3] sm:$0x1] }
0x1a41   : > { %9979 = vtanh.f32 %v6182_v17 }
0x1a42   : > { %9981 = vtanh.f32 %v6183_v52  ;;  %v6291_v52 = vld [vmem:[#allocation64 + $0x2] sm:$0x1] }
0x1a44   : > { %6208 = vmax.xlane.f32.xlu1 %v6207_v53 }
0x1a4b   : > { %v9980_v45 = vpop.eup %9979 }
0x1a4c   : > { %v6210_v54 = vsel %vm2676_vm2, %v9980_v45, -inf  ;;  %v9982_v62 = vpop.eup %9981 }
0x1a4d   : > { %6211 = vmax.xlane.f32.xlu1 %v6210_v54  ;;  %v6213_v63 = vsel %vm2676_vm2, %v9982_v62, -inf }
0x1a51   : > { %6214 = vmax.xlane.f32.xlu1 %v6213_v63 }
0x1ac1   : > { %v6194_v7 = vpop.xlane.xlu1 %6193 }
0x1ac2   : > { %v6216_v60 = vsub.f32 %v9968_v36, %v6194_v7 }
0x1ac3   : > { %v6197_v10 = vpop.xlane.xlu0 %6196 }
0x1ac4   : > { %v6217_v14 = vsub.f32 %v9970_v41, %v6197_v10  ;;  %v6224_v3 = vmul.f32 1.442695, %v6216_v60 }
0x1ac5   : > { %v6200_v13 = vpop.xlane.xlu1 %6199 }
0x1ac6   : > { %v6226_v18 = vmul.f32 1.442695, %v6217_v14  ;;  %9983 = vpow2.f32 %v6224_v3  ;;  %v6218_v1 = vsub.f32 %v9972_v12, %v6200_v13  ;;  %v6293_v14 = vld [vmem:[#allocation64 + $0x4] sm:$0x1] }
0x1ac8   : > { %9985 = vpow2.f32 %v6226_v18  ;;  %v6228_v11 = vmul.f32 1.442695, %v6218_v1  ;;  %v6294_v18 = vld [vmem:[#allocation64 + $0x5] sm:$0x1] }
0x1ac9   : > { %v6203_v19 = vpop.xlane.xlu1 %6202 }
0x1aca   : > { %9987 = vpow2.f32 %v6228_v11  ;;  %v6219_v35 = vsub.f32 %v9974_v33, %v6203_v19 }
0x1acc   : > { %v6230_v24 = vmul.f32 1.442695, %v6219_v35  ;;  %v6326_v35 = vpack.i.b16 %v6293_v14, %v6293_v14 }
0x1acd   : > { %v6206_v28 = vpop.xlane.xlu1 %6205 }
0x1ace   : > { %9989 = vpow2.f32 %v6230_v24  ;;  %v6220_v30 = vsub.f32 %v9976_v27, %v6206_v28 }
0x1ad0   : > { %v9984_v8 = vpop.eup %9983  ;;  %v6232_v29 = vmul.f32 1.442695, %v6220_v30  ;;  %v6333_v30 = vpack.i.b16 %v6294_v18, %v6294_v18 }
0x1ad1   : > { %v6209_v31 = vpop.xlane.xlu1 %6208  ;;  %v6240_v47 = vsel %vm2676_vm2, %v9984_v8, 0.0 }
0x1ad2   : > { %v9986_v16 = vpop.eup %9985  ;;  %9991 = vpow2.f32 %v6232_v29  ;;  %v6221_v55 = vsub.f32 %v9978_v4, %v6209_v31  ;;  %6241 = vadd.xlane.f32.xlu0 %v6240_v47  ;;  %v6312_v4 = vpack.i.b16 %v6291_v52, %v6291_v52  ;;  %v6338_v47 = vrot.slane %v6333_v30, %v12938_v21 }
0x1ad3   : > { %v6243_v58 = vsel %vm2676_vm2, %v9986_v16, 0.0 }
0x1ad4   : > { %6244 = vadd.xlane.f32.xlu1 %v6243_v58  ;;  %v9988_v32 = vpop.eup %9987  ;;  %v6234_v26 = vmul.f32 1.442695, %v6221_v55  ;;  %v6295_v55 = vld [vmem:[#allocation64 + $0x6] sm:$0x1]  ;;  %v6296_v58 = vld [vmem:[#allocation64 + $0x7] sm:$0x1] }
0x1ad5   : > { %v6246_v37 = vsel %vm2676_vm2, %v9988_v32, 0.0 }
0x1ad6   : > { %9993 = vpow2.f32 %v6234_v26  ;;  %6247 = vadd.xlane.f32.xlu0 %v6246_v37 }
0x1ad8   : > { %v13615_v25 = vpop.eup %9989 }
0x1ad9   : > { %v6249_v36 = vsel %vm2676_vm2, %v13615_v25, 0.0 }
0x1ada   : > { %v6212_v34 = vpop.xlane.xlu1 %6211  ;;  %6250 = vadd.xlane.f32.xlu1 %v6249_v36  ;;  %v6340_v36 = vpack.i.b16 %v6295_v55, %v6295_v55 }
0x1adb   : > { %v6222_v23 = vsub.f32 %v9980_v45, %v6212_v34  ;;  %v6319_v45 = vpack.i.b16 %v6292_v2, %v6292_v2 }
0x1adc   : > { %v13619_v41 = vpop.eup %9991 }
0x1add   : > { %v6236_v43 = vmul.f32 1.442695, %v6222_v23  ;;  %v6252_v12 = vsel %vm2676_vm2, %v13619_v41, 0.0  ;;  %v6324_v10 = vrot.slane %v6319_v45, %v12938_v21  ;;  %v9768_v45 = vld [vmem:[#allocation68 + $0x8] sm:$0xff]  }
0x1ade   : > { %v6215_v51 = vpop.xlane.xlu1 %6214  ;;  %6253 = vadd.xlane.f32.xlu0 %v6252_v12  ;;  %v6347_v12 = vpack.i.b16 %v6296_v58, %v6296_v58 }
0x1adf   : > { %9995 = vpow2.f32 %v6236_v43  ;;  %v6223_v15 = vsub.f32 %v9982_v62, %v6215_v51  ;;  %v6317_v62 = vrot.slane %v6312_v4, %v12938_v21  ;;  %v6356_v28 = vmul.bf16 %v6324_v10, %v13561_v22  ;;  %v9767_v4 = vld [vmem:[#allocation68] sm:$0xff]  }
0x1ae0   : > { %v13623_v20 = vpop.eup %9993  ;;  %v6358_v43 = vmul.bf16 %v6338_v47, %v13561_v22 }
0x1ae1   : > { %v6238_v33 = vmul.f32 1.442695, %v6223_v15  ;;  %v6255_v49 = vsel %vm2676_vm2, %v13623_v20, 0.0  ;;  %v6355_v11 = vmul.bf16 %v6317_v62, %v13561_v22  ;;  %v6345_v15 = vrot.slane %v6340_v36, %v12938_v21 }
0x1ae2   : > { %6256 = vadd.xlane.f32.xlu1 %v6255_v49 }
0x1ae3   : > { %9997 = vpow2.f32 %v6238_v33 }
0x1ae9   : > { %v13627_v59 = vpop.eup %9995 }
0x1aea   : > { %v6258_v61 = vsel %vm2676_vm2, %v13627_v59, 0.0 }
0x1aeb   : > { %6259 = vadd.xlane.f32.xlu0 %v6258_v61  ;;  %v6352_v61 = vrot.slane %v6347_v12, %v12938_v21 }
0x1aed   : > { %v13631_v27 = vpop.eup %9997 }
0x1aee   : > { %v6261_v6 = vsel %vm2676_vm2, %v13631_v27, 0.0 }
0x1aef   : > { %6262 = vadd.xlane.f32.xlu1 %v6261_v6  ;;  %v6359_v6 = vmul.bf16 %v6345_v15, %v13561_v22 }
0x1b5f   : > { %v6242_v57 = vpop.xlane.xlu0 %6241 }
0x1b60   : > { %9999 = vrcp.f32 %v6242_v57 }
0x1b61   : > { %v6245_v56 = vpop.xlane.xlu1 %6244 }
0x1b62   : > { %10001 = vrcp.f32 %v6245_v56  ;;  %v6360_v56 = vmul.bf16 %v6352_v61, %v13561_v22 }
0x1b63   : > { %v6248_v17 = vpop.xlane.xlu0 %6247 }
0x1b64   : > { %10003 = vrcp.f32 %v6248_v17 }
0x1b67   : > { %v6251_v53 = vpop.xlane.xlu1 %6250 }
0x1b68   : > { %10005 = vrcp.f32 %v6251_v53 }
0x1b6a   : > { %v10000_v54 = vpop.eup %9999 }
0x1b6b   : > { %v6272_v7 = vmul.f32 %v10000_v54, %v9984_v8  ;;  %v6254_v60 = vpop.xlane.xlu0 %6253 }
0x1b6c   : > { %v10002_v63 = vpop.eup %10001  ;;  %10007 = vrcp.f32 %v6254_v60 }
0x1b6d   : > { %v6273_v3 = vmul.f32 %v10002_v63, %v9986_v16  ;;  %v6280_v13 = vpack.c.bf16 %v6272_v7, %v6272_v7  ;;  %v6331_v16 = vrot.slane %v6326_v35, %v12938_v21 }
0x1b6e   : > { %v10004_v1 = vpop.eup %10003 }
0x1b6f   : > { %v6281_v19 = vpack.c.bf16 %v6273_v3, %v6273_v3  ;;  %v6257_v24 = vpop.xlane.xlu1 %6256  ;;  %9143 = vmatmul.mubr.msk.bf16.vlgmr.msra.gmra.mrb[76].mxu0 %vm2676_vm2, %v6280_v13  ;;  %v6274_v8 = vmul.f32 %v10004_v1, %v9988_v32  ;;  %v6357_v37 = vmul.bf16 %v6331_v16, %v13561_v22 }
0x1b70   : > { %10009 = vrcp.f32 %v6257_v24  ;;  %9153 = vmatpush3.bf16.msra.mxu0 %v6355_v11  ;;  %9154 = vmatprep.mubr.msk.bf16.mxu0 %vm11651_vm0, %v11650_v0 }
0x1b71   : > { %9149 = vmatmul.mubr.msk.bf16.vlgmr.msra.gmra.mrb[88].mxu1 %vm2676_vm2, %v6281_v19  ;;  %9164 = vmatprep.subr.bf16.mxu0 %v11650_v0  ;;  %v6282_v32 = vpack.c.bf16 %v6274_v8, %v6274_v8 }
0x1b72   : > { %9159 = vmatpush3.bf16.msra.mxu1 %v6356_v28  ;;  %v10006_v29 = vpop.eup %10005  ;;  %9160 = vmatprep.mubr.msk.bf16.mxu1 %vm11651_vm0, %v11650_v0 }
0x1b73   : > { %v6275_v31 = vmul.f32 %v10006_v29, %v13615_v25  ;;  %9170 = vmatprep.subr.bf16.mxu1 %v11650_v0 }
0x1b75   : > { %v6283_v34 = vpack.c.bf16 %v6275_v31, %v6275_v31 }
0x1b76   : > { %v10008_v26 = vpop.eup %10007 }
0x1b77   : > { %9155 = vmatmul.mubr.msk.bf16.vlgmr.msra.gmra.mrb[80].mxu0 %vm2676_vm2, %v6282_v32  ;;  %v6276_v25 = vmul.f32 %v10008_v26, %v13619_v41 }
0x1b78   : > { %v6260_v23 = vpop.xlane.xlu0 %6259  ;;  %9165 = vmatpush3.bf16.msra.mxu0 %v6357_v37  ;;  %9166 = vmatprep.mubr.msk.bf16.mxu0 %vm11651_vm0, %v11650_v0 }
0x1b79   : > { %10011 = vrcp.f32 %v6260_v23  ;;  %9161 = vmatmul.mubr.msk.bf16.vlgmr.msra.gmra.mrb[92].mxu1 %vm2676_vm2, %v6283_v34  ;;  %9176 = vmatprep.subr.bf16.mxu0 %v11650_v0  ;;  %v6284_v41 = vpack.c.bf16 %v6276_v25, %v6276_v25 }
0x1b7a   : > { %9171 = vmatpush3.bf16.msra.mxu1 %v6358_v43  ;;  %v10010_v51 = vpop.eup %10009  ;;  %9172 = vmatprep.mubr.msk.bf16.mxu1 %vm11651_vm0, %v11650_v0 }
0x1b7b   : > { %v6277_v33 = vmul.f32 %v10010_v51, %v13623_v20  ;;  %9182 = vmatprep.subr.bf16.mxu1 %v11650_v0 }
0x1b7c   : > { %v6263_v49 = vpop.xlane.xlu1 %6262 }
0x1b7d   : > { %10013 = vrcp.f32 %v6263_v49  ;;  %v6285_v57 = vpack.c.bf16 %v6277_v33, %v6277_v33 }
0x1b7f   : > { %9167 = vmatmul.mubr.msk.bf16.vlgmr.msra.gmra.mrb[84].mxu0 %vm2676_vm2, %v6284_v41 }
0x1b80   : > { %9177 = vmatpush3.bf16.msra.mxu0 %v6359_v6  ;;  %9178 = vmatprep.mubr.msk.bf16.mxu0 %vm11651_vm0, %v11650_v0 }
0x1b81   : > { %9173 = vmatmul.mubr.msk.bf16.vlgmr.msra.gmra.mrb[96].mxu1 %vm2676_vm2, %v6285_v57  ;;  %9188 = vmatprep.subr.bf16.mxu0 %v11650_v0 }
0x1b82   : > { %9183 = vmatpush3.bf16.msra.mxu1 %v6360_v56  ;;  %9184 = vmatprep.mubr.msk.bf16.mxu1 %vm11651_vm0, %v11650_v0 }
0x1b83   : > { %v10012_v20 = vpop.eup %10011  ;;  %9196 = vmatprep.subr.bf16.mxu1 %v11650_v0 }
0x1b84   : > { %v6278_v17 = vmul.f32 %v10012_v20, %v13627_v59  ;;  %v9769_v59 = vld [vmem:[#allocation65] sm:$0xff]  }
0x1b86   : > { %v6286_v52 = vpack.c.bf16 %v6278_v17, %v6278_v17 }
0x1b87   : > { %v10014_v2 = vpop.eup %10013 }
0x1b88   : > { %v6279_v22 = vmul.f32 %v10014_v2, %v13631_v27  ;;  %9179 = vmatmul.mubr.msk.bf16.vlgmr.msra.gmra.mrb[88].mxu0 %vm2676_vm2, %v6286_v52  ;;  %v9770_v27 = vld [vmem:[#allocation65 + $0x8] sm:$0xff]  }
0x1b89   : > { %9192 = vmatprep.mubr.msk.bf16.mxu0 %vm11651_vm0, %v11650_v0  ;;  %9189 = vmatpush3.bf16.msra.mxu0 %v9769_v59  ;;  %v8614_v59 = vld [vmem:[#allocation56] ss:$0 sm:$0xff] }
0x1b8a   : > { %v6287_v53 = vpack.c.bf16 %v6279_v22, %v6279_v22  ;;  %9190 = vmatprep.subr.bf16.mxu0 %v11650_v0  ;;  %v9771_v22 = vld [vmem:[#allocation71] sm:$0xff]  }
0x1b8c   : > { %9185 = vmatmul.mubr.msk.bf16.vlgmr.msra.gmra.mrb[100].mxu1 %vm2676_vm2, %v6287_v53  ;;  %v7249_v53 = vld [vmem:[#allocation74] sm:$0x1] }
0x1b8d   : > { %9197 = vmatpush3.bf16.msra.mxu1 %v9767_v4  ;;  %9200 = vmatprep.mubr.msk.bf16.mxu1 %vm11651_vm0, %v11650_v0 }
0x1b8e   : > { %9198 = vmatprep.subr.bf16.mxu1 %v11650_v0  ;;  %9191 = vmatpush3.bf16.msra.mxu0 %v9770_v27  ;;  %v8638_v27 = vld [vmem:[#allocation70] ss:$0 sm:$0xff] }
0x1b8f   : > { %9204 = vmatprep.subr.bf16.mxu0 %v11650_v0 }
0x1b91   : > { %9199 = vmatpush3.bf16.msra.mxu1 %v9768_v45  ;;  %v7250_v45 = vld [vmem:[#allocation74 + $0x1] sm:$0x1] }
0x1b92   : > { %9212 = vmatprep.subr.bf16.mxu1 %v11650_v0 }
0x1b94   : > { %9201 = vmatmul.mubr.msk.bf16.vlgmr.msra.gmra.mrb[104].mxu1 %vm3424_vm3, %v13270_v9 }
0x1b95   : > { %9214 = vmatprep.mubr.msk.bf16.mxu1 %vm11651_vm0, %v11650_v0 }
0x1c42   : > { %v6398_v54 = vpop.f32.mrb[76].mxu0 }
0x1c43   : > { %v9144_v62 = vpop.f32.mrb[77].mxu0  ;;  %v6705_v7 = vsel %vm3424_vm3, %v6398_v54, 0.0  ;;  %v9772_v54 = vld [vmem:[#allocation71 + $0x8] sm:$0xff]  }
0x1c44   : > { %v6441_v63 = vpop.f32.mrb[88].mxu1  ;;  %v6401_v60 = vpop.f32.mrb[78].mxu0  ;;  %v7258_v62 = vpack.i.b16 %v7249_v53, %v7249_v53 }
0x1c45   : > { %v6706_v10 = vsel %vm3424_vm3, %v6441_v63, 0.0  ;;  %v9150_v9 = vpop.f32.mrb[89].mxu1  ;;  %v9145_v3 = vpop.f32.mrb[79].mxu0  ;;  %v7265_v63 = vpack.i.b16 %v7250_v45, %v7250_v45 }
0x1c46   : > { %v6707_v14 = vadd.f32 %v6706_v10, %v6705_v7  ;;  %v6444_v18 = vpop.f32.mrb[90].mxu1  ;;  %v5818_v7 = vadd.f32 %v8614_v59, %v13580_v40 }
0x1c47   : > { %v9151_v13 = vpop.f32.mrb[91].mxu1 }
0x1c48   : > { %v7263_v13 = vrot.slane %v7258_v62, %v12938_v21 }
0x1c4a   : > { %v6484_v1 = vpop.f32.mrb[80].mxu0 }
0x1c4b   : > { %v6708_v11 = vsel %vm3424_vm3, %v6484_v1, 0.0  ;;  %v9156_v19 = vpop.f32.mrb[81].mxu0  ;;  %v7270_v1 = vrot.slane %v7265_v63, %v12938_v21 }
0x1c4c   : > { %v6527_v35 = vpop.f32.mrb[92].mxu1  ;;  %v6709_v24 = vadd.f32 %v6708_v11, %v6707_v14  ;;  %v6487_v28 = vpop.f32.mrb[82].mxu0  ;;  %v6787_v11 = vpack.c.bf16 %v5818_v7, %v5818_v7 }
0x1c4d   : > { %v6710_v30 = vsel %vm3424_vm3, %v6527_v35, 0.0  ;;  %v9162_v8 = vpop.f32.mrb[93].mxu1  ;;  %v9157_v29 = vpop.f32.mrb[83].mxu0 }
0x1c4e   : > { %v6530_v16 = vpop.f32.mrb[94].mxu1  ;;  %v6711_v31 = vadd.f32 %v6710_v30, %v6709_v24  ;;  %v8634_v24 = vld [vmem:[#allocation67] ss:$0 sm:$0xff] }
0x1c4f   : > { %v9163_v47 = vpop.f32.mrb[95].mxu1 }
0x1c52   : > { %v6570_v55 = vpop.f32.mrb[84].mxu0 }
0x1c53   : > { %v6712_v58 = vsel %vm3424_vm3, %v6570_v55, 0.0  ;;  %v9168_v32 = vpop.f32.mrb[85].mxu0 }
0x1c54   : > { %v6613_v26 = vpop.f32.mrb[96].mxu1  ;;  %v6713_v37 = vadd.f32 %v6712_v58, %v6711_v31  ;;  %v6573_v34 = vpop.f32.mrb[86].mxu0  ;;  %v8642_v58 = vld [vmem:[#allocation73] ss:$0 sm:$0xff] }
0x1c55   : > { %v6714_v36 = vsel %vm3424_vm3, %v6613_v26, 0.0  ;;  %v9174_v23 = vpop.f32.mrb[97].mxu1  ;;  %v9169_v43 = vpop.f32.mrb[87].mxu0 }
0x1c56   : > { %v6616_v12 = vpop.f32.mrb[98].mxu1  ;;  %v6715_v25 = vadd.f32 %v6714_v36, %v6713_v37 }
0x1c57   : > { %v9175_v51 = vpop.f32.mrb[99].mxu1 }
0x1c5b   : > { %v6656_v15 = vpop.f32.mrb[88].mxu0 }
0x1c5c   : > { %v6716_v33 = vsel %vm3424_vm3, %v6656_v15, 0.0  ;;  %v9180_v49 = vpop.f32.mrb[89].mxu0 }
0x1c5d   : > { %v6717_v61 = vadd.f32 %v6716_v33, %v6715_v25  ;;  %v6659_v41 = vpop.f32.mrb[90].mxu0 }
0x1c5e   : > { %v9181_v6 = vpop.f32.mrb[91].mxu0 }
0x1c5f   : > { %v6699_v57 = vpop.f32.mrb[100].mxu1 }
0x1c60   : > { %v6718_v56 = vsel %vm3424_vm3, %v6699_v57, 0.0  ;;  %v9186_v20 = vpop.f32.mrb[101].mxu1 }
0x1c61   : > { %v6719_v17 = vadd.f32 %v6718_v56, %v6717_v61  ;;  %v6702_v52 = vpop.f32.mrb[102].mxu1 }
0x1c62   : > { %v9187_v2 = vpop.f32.mrb[103].mxu1 }
0x1c63   : > { %v6720_v4 = vpack.c.bf16 %v6719_v17, %v6719_v17 }
0x1c65   : > { %9193 = vmatmul.mubr.msk.bf16.vlgmr.msra.gmra.mrb[92].mxu0 %vm3424_vm3, %v6720_v4 }
0x1c66   : > { %9205 = vmatpush3.bf16.msra.mxu0 %v9771_v22  ;;  %9208 = vmatprep.mubr.msk.bf16.mxu0 %vm11651_vm0, %v11650_v0 }
0x1c67   : > { %v6845_v60 = vpop.f32.mrb[104].mxu1  ;;  %9206 = vmatprep.subr.bf16.mxu0 %v11650_v0 }
0x1c68   : > { %v6846_v10 = vadd.f32 %v8638_v27, %v6845_v60  ;;  %v9202_v9 = vpop.f32.mrb[105].mxu1 }
0x1c69   : > { %v6848_v14 = vpop.f32.mrb[106].mxu1 }
0x1c6a   : > { %v6849_v3 = vadd.f32 %v8638_v27, %v6848_v14  ;;  %9207 = vmatpush3.bf16.msra.mxu0 %v9772_v54  ;;  %7008 = vrot.lane.b32.xlu0 %v6846_v10, %s11654_s5  ;;  %v9203_v18 = vpop.f32.mrb[107].mxu1 }
0x1c6b   : > { %9218 = vmatprep.subr.bf16.mxu0 %v11650_v0 }
0x1c6c   : > { %v13707_v19 = vpack.c.bf16 %v6849_v3, %v6846_v10  ;;  %7010 = vrot.lane.b32.xlu1 %v6849_v3, %s11654_s5 }
0x1c6d   : > { %9209 = vmatmul.mubr.msk.bf16.vlgmr.msra.gmra.mrb[96].mxu0 %vm3424_vm3, %v6787_v11 }
0x1c6e   : > { %v7313_v40 = vmul.bf16 %v7263_v13, %v13707_v19  ;;  %v7314_v35 = vmul.bf16 %v7270_v1, %v13707_v19  ;;  %9220 = vmatprep.mubr.msk.bf16.mxu0 %vm11651_vm0, %v11650_v0 }
0x1c70   : > { %9213 = vmatpush3.bf16.msra.mxu1 %v7313_v40  ;;  %9219 = vmatpush3.bf16.msra.mxu0 %v7314_v35 }
0x1c71   : > { %9224 = vmatprep.subr.bf16.mxu1 %v11650_v0  ;;  %9230 = vmatprep.subr.bf16.mxu0 %v11650_v0 }
0x1cde   : > { %v7011_v51 = vpop.permute.xlu1 %7010 }
0x1d38   : > { %v6781_v28 = vpop.f32.mrb[92].mxu0 }
0x1d39   : > { %v6782_v30 = vadd.f32 %v8634_v24, %v6781_v28  ;;  %v9194_v8 = vpop.f32.mrb[93].mxu0 }
0x1d3a   : > { %v6784_v29 = vpop.f32.mrb[94].mxu0 }
0x1d3b   : > { %v7758_v16 = vsel %vm3424_vm3, %v6782_v30, 0.0  ;;  %v9195_v31 = vpop.f32.mrb[95].mxu0 }
0x1d3c   : > { %v7759_v47 = vrot.slane %v7758_v16, 4 }
0x1d3e   : > { %v7760_v55 = vadd.f32 %v7759_v47, %v7758_v16 }
0x1d40   : > { %v7761_v32 = vrot.slane %v7760_v55, 2  ;;  %v6912_v26 = vpop.f32.mrb[96].mxu0 }
0x1d41   : > { %v6913_v37 = vadd.f32 %v8642_v58, %v6912_v26  ;;  %v9210_v34 = vpop.f32.mrb[97].mxu0 }
0x1d42   : > { %v7762_v36 = vadd.f32 %v7761_v32, %v7760_v55  ;;  %v6915_v23 = vpop.f32.mrb[98].mxu0 }
0x1d43   : > { %6918 = vxpose.xlu1.b32.start.end [1/1] (short) (narrow) %v6913_v37, 8  ;;  %v9211_v43 = vpop.f32.mrb[99].mxu0 }
0x1d44   : > { %v7763_v12 = vrot.slane %v7762_v36, 1 }
0x1d46   : > { %v7764_v25 = vadd.f32 %v7763_v12, %v7762_v36 }
0x1d48   : > { %7765 = vst.msk [vmem:[%s13274_s15 + $0x1] sm:$0x1] %vm7756_vm4, %v7764_v25 }
0x1dc3   : > { %v6934_v15 = vpop.trf.xlu1 }
0x1dc4   : > { %v6988_v33 = vrot.slane %v6934_v15, %v12960_v42  ;;  %v6953_v49 = vrot.slane %v6934_v15, %v12938_v21  ;;  %v7002_v61 = vrot.slane %v6934_v15, %v12976_v50  ;;  %v6960_v41 = vrot.slane %v6934_v15, %v12955_v39  ;;  %v7009_v42 = vpop.permute.xlu0 %7008 }
0x1dc5   : > { %v6967_v6 = vrot.slane %v6934_v15, %v12964_v44  ;;  %v6974_v57 = vrot.slane %v6934_v15, %v12972_v48  ;;  %v6981_v56 = vrot.slane %v6934_v15, %v12952_v38  ;;  %v6995_v20 = vrot.slane %v6934_v15, %v12968_v46 }
0x1dc6   : > { %6990 = vbcast.lane.b32.xlu1 %v6988_v33, 256  ;;  %6955 = vbcast.lane.b32.xlu0 %v6953_v49, 256 }
0x1dca   : > { %7004 = vbcast.lane.b32.xlu1 %v7002_v61, 256  ;;  %6962 = vbcast.lane.b32.xlu0 %v6960_v41, 256 }
0x1dce   : > { %6969 = vbcast.lane.b32.xlu0 %v6967_v6, 256 }
0x1dd2   : > { %6976 = vbcast.lane.b32.xlu0 %v6974_v57, 256 }
0x1dd6   : > { %6983 = vbcast.lane.b32.xlu0 %v6981_v56, 256 }
0x1df4   : > { %7014 = vxpose.xlu0.b32.start [1/2] (short) (narrow) %v7009_v42, 8 }
0x1df8   : > { %7015 = vxpose.xlu0.b32.end [2/2] (short) (narrow) %v7011_v51, 8 }
0x1e21   : > { %6997 = vbcast.lane.b32.xlu0 %v6995_v20, 256 }
0x1e38   : > { %v6956_v50 = vpop.permute.xlu0 %6955  ;;  %v6991_v46 = vpop.permute.xlu1 %6990 }
0x1e3c   : > { %v6963_v17 = vpop.permute.xlu0 %6962  ;;  %v7005_v40 = vpop.permute.xlu1 %7004 }
0x1e40   : > { %v6970_v39 = vpop.permute.xlu0 %6969 }
0x1e44   : > { %v6977_v52 = vpop.permute.xlu0 %6976 }
0x1e48   : > { %v6984_v2 = vpop.permute.xlu0 %6983 }
0x1e74   : > { %v7030_v22 = vpop.trf.xlu0 }
0x1e75   : > { %v7047_v44 = vcombine.high %v7030_v22, %v7030_v22  ;;  %v7054_v4 = vrot.slane %v7030_v22, %v12986_v5 }
0x1e77   : > { %v7061_v48 = vrot.slane %v7047_v44, %v12986_v5  ;;  %v7062_v53 = vcombine.high %v7054_v4, %v7054_v4  ;;  %v7070_v38 = vrot.slane %v7054_v4, %v12986_v5 }
0x1e79   : > { %v7063_v45 = vcombine.high %v7061_v48, %v7061_v48  ;;  %v7084_v59 = vrot.slane %v7062_v53, %v12986_v5  ;;  %v7092_v27 = vcombine.high %v7070_v38, %v7070_v38  ;;  %v7099_v54 = vrot.slane %v7070_v38, %v12938_v21 }
0x1e7a   : > { %v7077_v10 = vrot.slane %v7061_v48, %v12986_v5 }
0x1e7b   : > { %v7091_v62 = vrot.slane %v7063_v45, %v12986_v5  ;;  %v7094_v63 = vcombine.high %v7084_v59, %v7084_v59  ;;  %v7103_v7 = vrot.slane %v7084_v59, %v12938_v21  ;;  %v7107_v60 = vrot.slane %v7092_v27, %v12938_v21 }
0x1e7c   : > { %v7136_v9 = vadd.f32 %v7099_v54, %v6956_v50  ;;  %v7115_v35 = vrot.slane %v7077_v10, %v12938_v21  ;;  %v7093_v26 = vcombine.high %v7077_v10, %v7077_v10 }
0x1e7d   : > { %v7095_v14 = vcombine.high %v7091_v62, %v7091_v62  ;;  %v7111_v3 = vrot.slane %v7094_v63, %v12938_v21  ;;  %v7137_v18 = vadd.f32 %v7103_v7, %v6963_v17  ;;  %v7138_v13 = vadd.f32 %v7107_v60, %v6970_v39 }
0x1e7e   : > { %10015 = vtanh.f32 %v7136_v9  ;;  %v7119_v28 = vrot.slane %v7091_v62, %v12938_v21  ;;  %v7140_v5 = vadd.f32 %v7115_v35, %v6984_v2  ;;  %v7123_v23 = vrot.slane %v7093_v26, %v12938_v21 }
0x1e7f   : > { %v7127_v1 = vrot.slane %v7095_v14, %v12938_v21  ;;  %v7139_v11 = vadd.f32 %v7111_v3, %v6977_v52  ;;  %10017 = vtanh.f32 %v7137_v18 }
0x1e80   : > { %10019 = vtanh.f32 %v7138_v13  ;;  %v7141_v8 = vadd.f32 %v7119_v28, %v6991_v46 }
0x1e81   : > { %v7143_v24 = vadd.f32 %v7127_v1, %v7005_v40  ;;  %10021 = vtanh.f32 %v7139_v11 }
0x1e83   : > { %10023 = vtanh.f32 %v7143_v24 }
0x1e84   : > { %10025 = vtanh.f32 %v7140_v5 }
0x1e85   : > { %10027 = vtanh.f32 %v7141_v8 }
0x1e88   : > { %v10016_v30 = vpop.eup %10015 }
0x1e89   : > { %v10018_v29 = vpop.eup %10017  ;;  %v7152_v16 = vsel %vm2676_vm2, %v10016_v30, -inf }
0x1e8a   : > { %v10020_v31 = vpop.eup %10019  ;;  %7153 = vmax.xlane.f32.xlu1 %v7152_v16  ;;  %v7155_v47 = vsel %vm2676_vm2, %v10018_v29, -inf  ;;  %v7251_v16 = vld [vmem:[#allocation74 + $0x2] sm:$0x1] }
0x1e8b   : > { %7156 = vmax.xlane.f32.xlu0 %v7155_v47  ;;  %v10022_v55 = vpop.eup %10021  ;;  %v7158_v58 = vsel %vm2676_vm2, %v10020_v31, -inf  ;;  %v7272_v47 = vpack.i.b16 %v7251_v16, %v7251_v16 }
0x1e8c   : > { %v7161_v34 = vsel %vm2676_vm2, %v10022_v55, -inf }
0x1e8d   : > { %v10024_v32 = vpop.eup %10023  ;;  %v7277_v26 = vrot.slane %v7272_v47, %v12938_v21 }
0x1e8e   : > { %7159 = vmax.xlane.f32.xlu1 %v7158_v58  ;;  %v7173_v37 = vsel %vm2676_vm2, %v10024_v32, -inf  ;;  %v10026_v36 = vpop.eup %10025 }
0x1e8f   : > { %7174 = vmax.xlane.f32.xlu0 %v7173_v37  ;;  %v7164_v25 = vsel %vm2676_vm2, %v10026_v36, -inf  ;;  %v10028_v51 = vpop.eup %10027 }
0x1e90   : > { %v7167_v15 = vsel %vm2676_vm2, %v10028_v51, -inf }
0x1e92   : > { %7162 = vmax.xlane.f32.xlu1 %v7161_v34 }
0x1e93   : > { %v6998_v43 = vpop.permute.xlu0 %6997 }
0x1e94   : > { %v7142_v12 = vadd.f32 %v7123_v23, %v6998_v43  ;;  %v7253_v43 = vld [vmem:[#allocation74 + $0x4] sm:$0x1] }
0x1e96   : > { %10029 = vtanh.f32 %v7142_v12  ;;  %7165 = vmax.xlane.f32.xlu1 %v7164_v25  ;;  %v7254_v25 = vld [vmem:[#allocation74 + $0x5] sm:$0x1] }
0x1e9a   : > { %7168 = vmax.xlane.f32.xlu1 %v7167_v15 }
0x1ea0   : > { %v10030_v33 = vpop.eup %10029 }
0x1ea1   : > { %v7170_v49 = vsel %vm2676_vm2, %v10030_v33, -inf }
0x1ea2   : > { %7171 = vmax.xlane.f32.xlu1 %v7170_v49 }
0x1f17   : > { %v7154_v61 = vpop.xlane.xlu1 %7153 }
0x1f18   : > { %v7176_v41 = vsub.f32 %v10016_v30, %v7154_v61  ;;  %v7157_v6 = vpop.xlane.xlu0 %7156  ;;  %v7286_v61 = vpack.i.b16 %v7253_v43, %v7253_v43 }
0x1f19   : > { %v7177_v57 = vsub.f32 %v10018_v29, %v7157_v6 }
0x1f1a   : > { %v7184_v56 = vmul.f32 1.442695, %v7176_v41 }
0x1f1b   : > { %v7186_v42 = vmul.f32 1.442695, %v7177_v57  ;;  %v7160_v20 = vpop.xlane.xlu1 %7159  ;;  %v7293_v57 = vpack.i.b16 %v7254_v25, %v7254_v25 }
0x1f1c   : > { %10031 = vpow2.f32 %v7184_v56  ;;  %v7178_v50 = vsub.f32 %v10020_v31, %v7160_v20  ;;  %v7175_v22 = vpop.xlane.xlu0 %7174  ;;  %v7252_v31 = vld [vmem:[#allocation74 + $0x3] sm:$0x1]  ;;  %v7291_v20 = vrot.slane %v7286_v61, %v12938_v21 }
0x1f1d   : > { %10033 = vpow2.f32 %v7186_v42  ;;  %v7183_v53 = vsub.f32 %v10024_v32, %v7175_v22  ;;  %v7279_v58 = vpack.i.b16 %v7252_v31, %v7252_v31 }
0x1f1e   : > { %v7188_v17 = vmul.f32 1.442695, %v7178_v50 }
0x1f1f   : > { %v7163_v39 = vpop.xlane.xlu1 %7162  ;;  %v7198_v63 = vmul.f32 1.442695, %v7183_v53  ;;  %v7284_v23 = vrot.slane %v7279_v58, %v12938_v21 }
0x1f20   : > { %10035 = vpow2.f32 %v7188_v17  ;;  %v7179_v52 = vsub.f32 %v10022_v55, %v7163_v39  ;;  %v7298_v39 = vrot.slane %v7293_v57, %v12938_v21 }
0x1f21   : > { %v7316_v6 = vmul.bf16 %v7284_v23, %v13707_v19 }
0x1f22   : > { %v7190_v2 = vmul.f32 1.442695, %v7179_v52  ;;  %v7255_v52 = vld [vmem:[#allocation74 + $0x6] sm:$0x1] }
0x1f23   : > { %v7166_v44 = vpop.xlane.xlu1 %7165  ;;  %v7300_v53 = vpack.i.b16 %v7255_v52, %v7255_v52 }
0x1f24   : > { %10037 = vpow2.f32 %v7190_v2  ;;  %v7180_v4 = vsub.f32 %v10026_v36, %v7166_v44  ;;  %v7256_v2 = vld [vmem:[#allocation74 + $0x7] sm:$0x1] }
0x1f26   : > { %v10032_v48 = vpop.eup %10031  ;;  %v7192_v38 = vmul.f32 1.442695, %v7180_v4  ;;  %v7317_v4 = vmul.bf16 %v7291_v20, %v13707_v19 }
0x1f27   : > { %v10034_v45 = vpop.eup %10033  ;;  %v7169_v59 = vpop.xlane.xlu1 %7168  ;;  %v7200_v27 = vsel %vm2676_vm2, %v10032_v48, 0.0 }
0x1f28   : > { %10039 = vpow2.f32 %v7192_v38  ;;  %v7181_v46 = vsub.f32 %v10028_v51, %v7169_v59  ;;  %7201 = vadd.xlane.f32.xlu1 %v7200_v27  ;;  %v7203_v54 = vsel %vm2676_vm2, %v10034_v45, 0.0  ;;  %v7307_v59 = vpack.i.b16 %v7256_v2, %v7256_v2 }
0x1f29   : > { %7204 = vadd.xlane.f32.xlu0 %v7203_v54  ;;  %v7305_v54 = vrot.slane %v7300_v53, %v12938_v21 }
0x1f2a   : > { %v10036_v62 = vpop.eup %10035  ;;  %v7194_v7 = vmul.f32 1.442695, %v7181_v46 }
0x1f2b   : > { %v7206_v60 = vsel %vm2676_vm2, %v10036_v62, 0.0 }
0x1f2c   : > { %10041 = vpow2.f32 %v7194_v7  ;;  %7207 = vadd.xlane.f32.xlu1 %v7206_v60  ;;  %v7319_v60 = vmul.bf16 %v7305_v54, %v13707_v19 }
0x1f2d   : > { %10043 = vpow2.f32 %v7198_v63  ;;  %v7312_v63 = vrot.slane %v7307_v59, %v12938_v21 }
0x1f2e   : > { %v10038_v10 = vpop.eup %10037 }
0x1f2f   : > { %v7172_v9 = vpop.xlane.xlu1 %7171  ;;  %v7209_v14 = vsel %vm2676_vm2, %v10038_v10, 0.0 }
0x1f30   : > { %v7182_v3 = vsub.f32 %v10030_v33, %v7172_v9  ;;  %7210 = vadd.xlane.f32.xlu0 %v7209_v14  ;;  %v7315_v33 = vmul.bf16 %v7277_v26, %v13707_v19  ;;  %v7320_v14 = vmul.bf16 %v7312_v63, %v13707_v19 }
0x1f32   : > { %v13754_v18 = vpop.eup %10039  ;;  %v7196_v13 = vmul.f32 1.442695, %v7182_v3 }
0x1f33   : > { %v7212_v1 = vsel %vm2676_vm2, %v13754_v18, 0.0 }
0x1f34   : > { %10045 = vpow2.f32 %v7196_v13  ;;  %7213 = vadd.xlane.f32.xlu1 %v7212_v1 }
0x1f36   : > { %v13758_v11 = vpop.eup %10041 }
0x1f37   : > { %v7215_v40 = vsel %vm2676_vm2, %v13758_v11, 0.0  ;;  %v13762_v35 = vpop.eup %10043 }
0x1f38   : > { %7216 = vadd.xlane.f32.xlu0 %v7215_v40  ;;  %v7221_v24 = vsel %vm2676_vm2, %v13762_v35, 0.0 }
0x1f3c   : > { %7222 = vadd.xlane.f32.xlu0 %v7221_v24 }
0x1f3e   : > { %v13766_v28 = vpop.eup %10045 }
0x1f3f   : > { %v7218_v5 = vsel %vm2676_vm2, %v13766_v28, 0.0 }
0x1f40   : > { %7219 = vadd.xlane.f32.xlu1 %v7218_v5 }
0x1fb5   : > { %v7202_v30 = vpop.xlane.xlu1 %7201 }
0x1fb6   : > { %10047 = vrcp.f32 %v7202_v30  ;;  %v7205_v8 = vpop.xlane.xlu0 %7204 }
0x1fb7   : > { %10049 = vrcp.f32 %v7205_v8 }
0x1fb9   : > { %v7208_v29 = vpop.xlane.xlu1 %7207 }
0x1fba   : > { %10051 = vrcp.f32 %v7208_v29 }
0x1fbd   : > { %v7211_v55 = vpop.xlane.xlu0 %7210 }
0x1fbe   : > { %10053 = vrcp.f32 %v7211_v55 }
0x1fc0   : > { %v10048_v32 = vpop.eup %10047 }
0x1fc1   : > { %v10050_v37 = vpop.eup %10049  ;;  %v7232_v34 = vmul.f32 %v10048_v32, %v10032_v48  ;;  %v7214_v36 = vpop.xlane.xlu1 %7213 }
0x1fc2   : > { %v7233_v12 = vmul.f32 %v10050_v37, %v10034_v45  ;;  %10055 = vrcp.f32 %v7214_v36  ;;  %v7318_v45 = vmul.bf16 %v7298_v39, %v13707_v19  ;;  %v9773_v19 = vld [vmem:[#allocation76] sm:$0xff]  }
0x1fc3   : > { %v7240_v51 = vpack.c.bf16 %v7232_v34, %v7232_v34 }
0x1fc4   : > { %v10052_v15 = vpop.eup %10051  ;;  %v7241_v49 = vpack.c.bf16 %v7233_v12, %v7233_v12 }
0x1fc5   : > { %9215 = vmatmul.mubr.msk.bf16.vlgmr.msra.gmra.mrb[108].mxu1 %vm2676_vm2, %v7240_v51  ;;  %v7217_v41 = vpop.xlane.xlu0 %7216  ;;  %v7234_v56 = vmul.f32 %v10052_v15, %v10036_v62 }
0x1fc6   : > { %9225 = vmatpush3.bf16.msra.mxu1 %v7315_v33  ;;  %10057 = vrcp.f32 %v7217_v41  ;;  %9221 = vmatmul.mubr.msk.bf16.vlgmr.msra.gmra.mrb[100].mxu0 %vm2676_vm2, %v7241_v49 }
0x1fc7   : > { %9231 = vmatpush3.bf16.msra.mxu0 %v7316_v6  ;;  %9226 = vmatprep.mubr.msk.bf16.mxu1 %vm11651_vm0, %v11650_v0  ;;  %v7242_v22 = vpack.c.bf16 %v7234_v56, %v7234_v56 }
0x1fc8   : > { %v10054_v42 = vpop.eup %10053  ;;  %9236 = vmatprep.subr.bf16.mxu1 %v11650_v0  ;;  %9232 = vmatprep.mubr.msk.bf16.mxu0 %vm11651_vm0, %v11650_v0 }
0x1fc9   : > { %v7235_v50 = vmul.f32 %v10054_v42, %v10038_v10  ;;  %v7223_v17 = vpop.xlane.xlu0 %7222  ;;  %9242 = vmatprep.subr.bf16.mxu0 %v11650_v0 }
0x1fca   : > { %10059 = vrcp.f32 %v7223_v17 }
0x1fcb   : > { %v7243_v48 = vpack.c.bf16 %v7235_v50, %v7235_v50 }
0x1fcc   : > { %v10056_v44 = vpop.eup %10055 }
0x1fcd   : > { %9227 = vmatmul.mubr.msk.bf16.vlgmr.msra.gmra.mrb[112].mxu1 %vm2676_vm2, %v7242_v22  ;;  %v7220_v38 = vpop.xlane.xlu1 %7219  ;;  %v7236_v27 = vmul.f32 %v10056_v44, %v13754_v18 }
0x1fce   : > { %9237 = vmatpush3.bf16.msra.mxu1 %v7317_v4  ;;  %10061 = vrcp.f32 %v7220_v38  ;;  %9233 = vmatmul.mubr.msk.bf16.vlgmr.msra.gmra.mrb[104].mxu0 %vm2676_vm2, %v7243_v48 }
0x1fcf   : > { %9243 = vmatpush3.bf16.msra.mxu0 %v7318_v45  ;;  %9238 = vmatprep.mubr.msk.bf16.mxu1 %vm11651_vm0, %v11650_v0  ;;  %v7244_v7 = vpack.c.bf16 %v7236_v27, %v7236_v27 }
0x1fd0   : > { %v10058_v46 = vpop.eup %10057  ;;  %9248 = vmatprep.subr.bf16.mxu1 %v11650_v0  ;;  %9244 = vmatprep.mubr.msk.bf16.mxu0 %vm11651_vm0, %v11650_v0 }
0x1fd1   : > { %v7237_v62 = vmul.f32 %v10058_v46, %v13758_v11  ;;  %9254 = vmatprep.subr.bf16.mxu0 %v11650_v0  ;;  %v9774_v11 = vld [vmem:[#allocation76 + $0x8] sm:$0xff]   ;;  %v8654_v46 = vld [vmem:[#allocation77] ss:$0 sm:$0xff] }
0x1fd3   : > { %v7245_v10 = vpack.c.bf16 %v7237_v62, %v7237_v62 }
0x1fd4   : > { %v10060_v9 = vpop.eup %10059 }
0x1fd5   : > { %9239 = vmatmul.mubr.msk.bf16.vlgmr.msra.gmra.mrb[116].mxu1 %vm2676_vm2, %v7244_v7  ;;  %v7239_v18 = vmul.f32 %v10060_v9, %v13762_v35 }
0x1fd6   : > { %9249 = vmatpush3.bf16.msra.mxu1 %v7319_v60  ;;  %9245 = vmatmul.mubr.msk.bf16.vlgmr.msra.gmra.mrb[108].mxu0 %vm2676_vm2, %v7245_v10 }
0x1fd7   : > { %9255 = vmatpush3.bf16.msra.mxu0 %v7320_v14  ;;  %9250 = vmatprep.mubr.msk.bf16.mxu1 %vm11651_vm0, %v11650_v0  ;;  %v7247_v1 = vpack.c.bf16 %v7239_v18, %v7239_v18 }
0x1fd8   : > { %v10062_v3 = vpop.eup %10061  ;;  %9256 = vmatprep.mubr.msk.bf16.mxu0 %vm11651_vm0, %v11650_v0  ;;  %9260 = vmatprep.subr.bf16.mxu1 %v11650_v0 }
0x1fd9   : > { %v7238_v21 = vmul.f32 %v10062_v3, %v13766_v28 }
0x1fdb   : > { %v7246_v13 = vpack.c.bf16 %v7238_v21, %v7238_v21 }
0x1fdd   : > { %9251 = vmatmul.mubr.msk.bf16.vlgmr.msra.gmra.mrb[120].mxu1 %vm2676_vm2, %v7246_v13 }
0x1fde   : > { %9257 = vmatmul.mubr.msk.bf16.vlgmr.msra.gmra.mrb[112].mxu0 %vm2676_vm2, %v7247_v1  ;;  %9264 = vmatprep.mubr.msk.bf16.mxu1 %vm11651_vm0, %v11650_v0 }
0x1fdf   : > { %9261 = vmatpush3.bf16.msra.mxu1 %v9773_v19 }
0x1fe0   : > { %9262 = vmatprep.subr.bf16.mxu1 %v11650_v0 }
0x1fe3   : > { %9263 = vmatpush3.bf16.msra.mxu1 %v9774_v11 }
0x2098   : > { %v7358_v40 = vpop.f32.mrb[108].mxu1 }
0x2099   : > { %v9216_v35 = vpop.f32.mrb[109].mxu1  ;;  %v7401_v24 = vpop.f32.mrb[100].mxu0  ;;  %v7665_v28 = vsel %vm3424_vm3, %v7358_v40, 0.0 }
0x209a   : > { %v7361_v5 = vpop.f32.mrb[110].mxu1  ;;  %v7666_v30 = vsel %vm3424_vm3, %v7401_v24, 0.0  ;;  %v9222_v8 = vpop.f32.mrb[101].mxu0 }
0x209b   : > { %v7667_v29 = vadd.f32 %v7666_v30, %v7665_v28  ;;  %v9217_v16 = vpop.f32.mrb[111].mxu1  ;;  %v7404_v31 = vpop.f32.mrb[102].mxu0 }
0x209c   : > { %v9223_v47 = vpop.f32.mrb[103].mxu0 }
0x20a0   : > { %v7444_v55 = vpop.f32.mrb[112].mxu1 }
0x20a1   : > { %v7668_v58 = vsel %vm3424_vm3, %v7444_v55, 0.0  ;;  %v9228_v32 = vpop.f32.mrb[113].mxu1  ;;  %v7487_v0 = vpop.f32.mrb[104].mxu0 }
0x20a2   : > { %v7669_v26 = vadd.f32 %v7668_v58, %v7667_v29  ;;  %v7447_v37 = vpop.f32.mrb[114].mxu1  ;;  %v7670_v34 = vsel %vm3424_vm3, %v7487_v0, 0.0  ;;  %v9234_v36 = vpop.f32.mrb[105].mxu0 }
0x20a3   : > { %v9229_v23 = vpop.f32.mrb[115].mxu1  ;;  %v7490_v43 = vpop.f32.mrb[106].mxu0 }
0x20a4   : > { %v7671_v12 = vadd.f32 %v7670_v34, %v7669_v26  ;;  %v9235_v25 = vpop.f32.mrb[107].mxu0 }
0x20a8   : > { %v7530_v51 = vpop.f32.mrb[116].mxu1 }
0x20a9   : > { %v7672_v15 = vsel %vm3424_vm3, %v7530_v51, 0.0  ;;  %v9240_v33 = vpop.f32.mrb[117].mxu1  ;;  %v7573_v49 = vpop.f32.mrb[108].mxu0 }
0x20aa   : > { %v7673_v61 = vadd.f32 %v7672_v15, %v7671_v12  ;;  %v7533_v41 = vpop.f32.mrb[118].mxu1  ;;  %v7674_v6 = vsel %vm3424_vm3, %v7573_v49, 0.0  ;;  %v9246_v57 = vpop.f32.mrb[109].mxu0 }
0x20ab   : > { %v9241_v56 = vpop.f32.mrb[119].mxu1  ;;  %v7576_v42 = vpop.f32.mrb[110].mxu0 }
0x20ac   : > { %v7675_v20 = vadd.f32 %v7674_v6, %v7673_v61  ;;  %v9247_v50 = vpop.f32.mrb[111].mxu0 }
0x20b0   : > { %v7616_v17 = vpop.f32.mrb[120].mxu1 }
0x20b1   : > { %v7676_v39 = vsel %vm3424_vm3, %v7616_v17, 0.0  ;;  %v9252_v52 = vpop.f32.mrb[121].mxu1  ;;  %v7659_v2 = vpop.f32.mrb[112].mxu0 }
0x20b2   : > { %v7677_v22 = vadd.f32 %v7676_v39, %v7675_v20  ;;  %v7678_v44 = vsel %vm3424_vm3, %v7659_v2, 0.0  ;;  %v7619_v4 = vpop.f32.mrb[122].mxu1  ;;  %v9258_v48 = vpop.f32.mrb[113].mxu0 }
0x20b3   : > { %v9253_v53 = vpop.f32.mrb[123].mxu1  ;;  %v7662_v38 = vpop.f32.mrb[114].mxu0 }
0x20b4   : > { %v7679_v45 = vadd.f32 %v7678_v44, %v7677_v22  ;;  %v9259_v59 = vpop.f32.mrb[115].mxu0 }
0x20b6   : > { %v7680_v27 = vpack.c.bf16 %v7679_v45, %v7679_v45 }
0x20b8   : > { %9265 = vmatmul.mubr.msk.bf16.vlgmr.msra.gmra.mrb[124].mxu1 %vm3424_vm3, %v7680_v27 }
0x218b   : > { %v7741_v54 = vpop.f32.mrb[124].mxu1 }
0x218c   : > { %v7742_v62 = vadd.f32 %v8654_v46, %v7741_v54  ;;  %v9266_v63 = vpop.f32.mrb[125].mxu1 }
0x218d   : > { %v7744_v7 = vpop.f32.mrb[126].mxu1 }
0x218e   : > { %v7774_v60 = vsel %vm3424_vm3, %v7742_v62, 0.0  ;;  %v9267_v10 = vpop.f32.mrb[127].mxu1 }
0x218f   : > { %v7775_v9 = vrot.slane %v7774_v60, 4 }
0x2191   : > { %v7776_v14 = vadd.f32 %v7775_v9, %v7774_v60 }
0x2193   : > { %v7777_v3 = vrot.slane %v7776_v14, 2 }
0x2195   : > { %v7778_v18 = vadd.f32 %v7777_v3, %v7776_v14 }
0x2197   : > { %v7779_v21 = vrot.slane %v7778_v18, 1 }
0x2199   : > { %v7780_v13 = vadd.f32 %v7779_v21, %v7778_v18 }
0x219b   : > { %7781 = vst.msk [vmem:[%s13274_s15 + $0x3] sm:$0x1] %vm7756_vm4, %v7780_v13 }
0x219c   : > { %11389 = shalt.err (!%p11386_p11)
}
0x219d   : > { %s11390_s0 = scalar_lea.hbm %s13827_s9, 64  ;;  %s11394_s3 = scalar_lea.hbm %s14126_s11, 128 }
0x219e   : > { %p11391_p12 = scmp.ne.s32.totalorder %s13827_s9, %s11390_s0  ;;  %p11395_p2 = scmp.lt.u32.totalorder %s13827_s9, %s14126_s11 }
0x219f   : > { %p11396_p4 = scmp.lt.u32.totalorder %s11394_s3, %s11390_s0  ;;  %p11398_p8 = scmp.lt.u32.totalorder %s11390_s0, %s13827_s9 }
0x21a0   : > { %p11392_p13 = pnand %p11391_p12, %p14128_p9 }
0x21a1   : > { %p11397_p3 = por %p11396_p4, %p11395_p2 }
0x21a2   : > { %p11393_p1 = pneg %p11392_p13 }
0x21a3   : > { %p11399_p0 = por %p11398_p8, %p11397_p3 }
0x21a5   : > { %p11400_p7 = pnand %p11399_p0, %p11393_p1 }
0x21a7   : > { %11403 = shalt.err (!%p11400_p7)
}
0x21a8   : > { %9462 = dma.vmem_to_hbm [thread:$0]  (%p14128_p9), %s13829_s10, 64, %s13827_s9, %s7783_s14  }
0x21a9 PF: > { %s14129_s8 = sld [smem:[#allocation150_spill]]  ;;  %s14130_s7 = sld [smem:[#allocation156_spill]] }
0x21aa   : > { %p14132_p6 = scmp.ge.s32.totalorder %s11542_s18, 2 }
0x21af   : > { %s7808_s4 = sand.u32 1, %s14129_s8   ;;  %p14131_p5 = scmp.ne.s32.totalorder %s14130_s7, 0 }
0x21b0   : > { %s7809_s13 = scalar_lea.sflag [#allocation4], %s7808_s4 }
0x21b1   : > { %p9475_p10 = pnand %p14132_p6, %p14131_p5 }
0x21b3   : > { %11525 = dma.done.wait (!%p9475_p10), %s7809_s13, 64  }
0x21b4   : > { %11527 = vsyncadd (!%p9475_p10), %s7809_s13, 4294967232  ;;  %s14133_s18 = sld [smem:[#allocation152_spill]]  ;;  %s14134_s0 = sld [smem:[#allocation151_spill]] }
0x21b5   : > { %s14135_s5 = sld [smem:[#allocation153_spill]]  ;;  %s14136_s15 = smov %s11538_s16 }
0x21ba   : > { %p141_p11 = scmp.ge.s32.totalorder %s14133_s18, 4  }
0x21bb   : > { %s14137_s16 = smov %s14135_s5 }
0x21bc   :  { %143 = sbr.rel (!%p141_p11) target bundleno = 133 (0x85), region = 527 }
0x21c3   :  { %7814 = vsyncpa [#allocation3], 1 }
0x21c4   :  { %7816 = vsyncpa [#allocation3 + $0x1], 1 }
0x21c5   :  { %7817 = vsyncpa [#allocation6], 1 }
0x21c6   :  { %7819 = vsyncpa [#allocation6 + $0x1], 1 }
0x21c7   :  { %7820 = vsyncpa [#allocation9], 1 }
0x21c8   :  { %7821 = vsyncpa [#allocation12], 1 }
0x21c9   :  { %7822 = vsyncpa [#allocation15], 1 }
0x21ca   :  { %7823 = vsyncpa [#allocation18], 1 }
0x21cb   :  { %7824 = vsyncpa [#allocation21], 1 }
0x21cc   :  { %7825 = vsyncpa [#allocation24], 1 }
0x21cd   :  { %7826 = vsyncpa [#allocation27], 1 }
0x21ce   :  { %7827 = vsyncpa [#allocation30], 1 }
0x21cf   :  { %7828 = vsyncpa [#allocation33], 1 }
0x21d0   :  { %7829 = vsyncpa [#allocation36], 1 }
0x21d1   :  { %7830 = vsyncpa [#allocation39], 1 }
0x21d2   :  { %7831 = vsyncpa [#allocation42], 1 }
0x21d3   :  { %7832 = vsyncpa [#allocation45], 1 }
0x21d4   :  { %7833 = vsyncpa [#allocation48], 1 }
0x21d5   :  { %7834 = vsyncpa [#allocation51], 1 }
0x21d6   :  { %7835 = vsyncpa [#allocation54], 1 }
0x21d7   :  { %7836 = vsyncpa [#allocation57], 1 }
0x21d8   :  { %7837 = vsyncpa [#allocation60], 1 }
0x21d9   :  { %7838 = vsyncpa [#allocation63], 1 }
0x21da   :  { %7839 = vsyncpa [#allocation66], 1 }
0x21db   :  { %7840 = vsyncpa [#allocation69], 1 }
0x21dc   :  { %7841 = vsyncpa [#allocation72], 1 }
0x21dd   :  { %7842 = vsyncpa [#allocation75], 1 }
0x21de   :  { %7843 = vsyncpa [#allocation78], 1 }
0x21df   :  { %7844 = vsyncpa [#allocation4], 1 }
0x21e0   :  { %7846 = vsyncpa [#allocation4 + $0x1], 1 }

</bundles_post_ra>
